<compile_context>
chip_gen: v5e
topology: v5e:2x2
jax: 0.10.0
libtpu: 0.0.40
codegen_flags: <defaults>
</compile_context>

<pallas_src>
import math

import jax
import jax.numpy as jnp
from jax import lax
from jax.experimental import pallas as pl
from jax.experimental.pallas import tpu as pltpu

_VMEM = pl.BlockSpec(memory_space=pltpu.MemorySpace.VMEM)


# ---------------------------------------------------------------------------
# Fused multi-layer GRU encoder (torch.nn.GRU, batch_first, h0 = 0).
# ---------------------------------------------------------------------------
def _gru_stack_kernel(x_ref, wih_ref, whh_ref, b_ref, hT_ref, seq_ref):
    """Fused multi-layer GRU (gate order r, z, n; zero initial hidden state).

    x_ref   : (T*Bp, D)     flattened time-major input (row block t = step t)
    wih_ref : (L, 3, D, D)  transposed per-gate input-to-hidden weights
    whh_ref : (L, 3, D, D)  transposed per-gate hidden-to-hidden weights
    b_ref   : (L, 4, 1, D)  [b_ir+b_hr, b_iz+b_hz, b_in, b_hn]
    hT_ref  : (L, Bp, D)    output: final hidden state of every layer
    seq_ref : (T*Bp, D)     VMEM scratch holding a layer's output sequence
    """
    TB, D = x_ref.shape
    L, Bp, _ = hT_ref.shape
    T = TB // Bp
    f32 = jnp.float32

    x2d = x_ref[...]                               # layer-0 input
    for layer in range(L):                         # all layers in one call
        w_ir = wih_ref[layer, 0, :, :]
        w_iz = wih_ref[layer, 1, :, :]
        w_in = wih_ref[layer, 2, :, :]
        w_hr = whh_ref[layer, 0, :, :]
        w_hz = whh_ref[layer, 1, :, :]
        w_hn = whh_ref[layer, 2, :, :]
        b_r = b_ref[layer, 0, :, :]
        b_z = b_ref[layer, 1, :, :]
        b_n = b_ref[layer, 2, :, :]
        b_hn = b_ref[layer, 3, :, :]

        # Hoisted input projection: one (T*Bp, D) @ (D, D) matmul per gate for
        # the whole sequence; only the h-dependent matmuls stay in the loop.
        gr = jnp.dot(x2d, w_ir, preferred_element_type=f32) + b_r
        gz = jnp.dot(x2d, w_iz, preferred_element_type=f32) + b_z
        gn = jnp.dot(x2d, w_in, preferred_element_type=f32) + b_n

        keep_seq = (layer + 1) < L     # last layer's sequence is never used
        h = jnp.zeros((Bp, D), f32)
        for t in range(T):             # static, fully unrolled time loop
            lo = t * Bp
            hr = jnp.dot(h, w_hr, preferred_element_type=f32)
            hz = jnp.dot(h, w_hz, preferred_element_type=f32)
            hn = jnp.dot(h, w_hn, preferred_element_type=f32)
            r = jax.nn.sigmoid(gr[lo:lo + Bp, :] + hr)
            z = jax.nn.sigmoid(gz[lo:lo + Bp, :] + hz)
            n = jnp.tanh(gn[lo:lo + Bp, :] + r * (hn + b_hn))
            h = n + z * (h - n)        # == (1 - z) * n + z * h
            if keep_seq:
                seq_ref[lo:lo + Bp, :] = h
        hT_ref[layer, :, :] = h
        if keep_seq:
            x2d = seq_ref[...]         # next layer's input sequence


def _pack_gru_params(layer_params):
    """Repack torch-shaped (w_ih, w_hh, b_ih, b_hh) into the kernel layout."""
    D = layer_params[0][1].shape[1]
    wih, whh, bias = [], [], []
    for (w_ih, w_hh, b_ih, b_hh) in layer_params:
        wih.append(jnp.stack([w_ih[g * D:(g + 1) * D, :].T for g in range(3)]))
        whh.append(jnp.stack([w_hh[g * D:(g + 1) * D, :].T for g in range(3)]))
        bias.append(jnp.stack([
            (b_ih[0 * D:1 * D] + b_hh[0 * D:1 * D]).reshape(1, D),
            (b_ih[1 * D:2 * D] + b_hh[1 * D:2 * D]).reshape(1, D),
            b_ih[2 * D:3 * D].reshape(1, D),
            b_hh[2 * D:3 * D].reshape(1, D),
        ]))
    return jnp.stack(wih), jnp.stack(whh), jnp.stack(bias)


def gru_encoder(x_btd, layer_params):
    """Encoder.forward: multi-layer GRU, returns hn.transpose(0,1) -> (B, L, D)."""
    B, T, D = x_btd.shape
    L = len(layer_params)
    wih, whh, bias = _pack_gru_params(layer_params)
    Bp = max(8, ((B + 7) // 8) * 8)                     # full sublane group
    x = jnp.transpose(x_btd, (1, 0, 2)).astype(jnp.float32)   # (T, B, D)
    if Bp != B:
        x = jnp.pad(x, ((0, 0), (0, Bp - B), (0, 0)))
    x = x.reshape(T * Bp, D)
    hT = pl.pallas_call(
        _gru_stack_kernel,
        out_shape=jax.ShapeDtypeStruct((L, Bp, D), jnp.float32),
        in_specs=[_VMEM, _VMEM, _VMEM, _VMEM],
        out_specs=_VMEM,
        scratch_shapes=[pltpu.VMEM((T * Bp, D), jnp.float32)],
    )(x, wih, whh, bias)
    return jnp.transpose(hT[:, :B, :], (1, 0, 2))       # (B, L, D)


# ---------------------------------------------------------------------------
# Fuser: Linear(cat(x1, broadcast(x2)))  ==  x1 @ W1 + x2 @ W2 + b
# ---------------------------------------------------------------------------
def _fuser_kernel(x1_ref, x2_ref, w1_ref, w2_ref, b_ref, o_ref):
    o_ref[...] = (
        jnp.dot(x1_ref[...], w1_ref[...], preferred_element_type=jnp.float32)
        + jnp.dot(x2_ref[...], w2_ref[...], preferred_element_type=jnp.float32)
        + b_ref[...])


def fuser_apply(x1, x2, w, b):
    d1, d2 = x1.shape[-1], x2.shape[-1]
    shp = x2.shape[:1] + (1,) * (x1.ndim - x2.ndim) + x2.shape[1:]
    x2b = jnp.broadcast_to(x2.reshape(shp), x1.shape[:-1] + (d2,))
    lead = x1.shape[:-1]
    M = math.prod(lead)
    do = w.shape[0]
    out = pl.pallas_call(
        _fuser_kernel,
        out_shape=jax.ShapeDtypeStruct((M, do), jnp.float32),
        in_specs=[_VMEM] * 5,
        out_specs=_VMEM,
    )(x1.reshape(M, d1), x2b.reshape(M, d2),
      w[:, :d1].T, w[:, d1:].T, b.reshape(1, do))
    return out.reshape(lead + (do,))


# ---------------------------------------------------------------------------
# MLP (image encoder): x + LayerNorm(Linear(relu(x)))
# ---------------------------------------------------------------------------
def _mlp_kernel(x_ref, w_ref, b_ref, g_ref, beta_ref, o_ref):
    x = x_ref[...]
    d = jnp.dot(jnp.maximum(x, 0.0), w_ref[...],
                preferred_element_type=jnp.float32) + b_ref[...]
    mu = jnp.mean(d, axis=-1, keepdims=True)
    c = d - mu
    var = jnp.mean(c * c, axis=-1, keepdims=True)
    ln = c * lax.rsqrt(var + 1e-5) * g_ref[...] + beta_ref[...]
    o_ref[...] = x + ln


def mlp_apply(x, w, b, gamma, beta):
    lead = x.shape[:-1]
    dm = x.shape[-1]
    M = math.prod(lead)
    out = pl.pallas_call(
        _mlp_kernel,
        out_shape=jax.ShapeDtypeStruct((M, dm), jnp.float32),
        in_specs=[_VMEM] * 5,
        out_specs=_VMEM,
    )(x.reshape(M, dm), w.T, b.reshape(1, dm),
      gamma.reshape(1, dm), beta.reshape(1, dm))
    return out.reshape(lead + (dm,))


# ---------------------------------------------------------------------------
# MultiChoice.forward (Pallas-backed)
# ---------------------------------------------------------------------------
def multichoice_forward(params, que, answers, features, text_feature_names):
    emb = params['emb']
    q = emb[que]                                        # (B, Tq, D)
    t = emb[answers]                                    # (B, C, Ta, D)
    q = gru_encoder(q, params['question_encoder'])      # (B, L, D)
    for name in sorted(features.keys()):
        feat = features[name]
        if name in text_feature_names:
            feat = emb[feat]
        if name == 'images':
            feat = mlp_apply(feat, *params['feature_encoders'][name])
        else:
            feat = gru_encoder(feat, params['feature_encoders'][name])
        feat = feat.mean(axis=1)
        q = fuser_apply(q, feat, *params['feature_fusers'][name])
    q = q.mean(axis=1)                                  # (B, D)
    o = fuser_apply(t, q, *params['answer_fuser'])      # (B, C, Ta, D)
    return o.mean(axis=-1).mean(axis=-1)                # (B, num_choice)


# ---------------------------------------------------------------------------
# Pure-JAX reference (mirrors torch semantics exactly) — for checking.
# ---------------------------------------------------------------------------
def _gru_encoder_ref(x_btd, layer_params):
    x = jnp.transpose(x_btd, (1, 0, 2))
    D = x.shape[-1]
    B = x.shape[1]
    h_finals = []
    for (w_ih, w_hh, b_ih, b_hh) in layer_params:
        def step(h, x_t, w_ih=w_ih, w_hh=w_hh, b_ih=b_ih, b_hh=b_hh):
            gi = x_t @ w_ih.T + b_ih
            gh = h @ w_hh.T + b_hh
            r = jax.nn.sigmoid(gi[:, :D] + gh[:, :D])
            z = jax.nn.sigmoid(gi[:, D:2 * D] + gh[:, D:2 * D])
            n = jnp.tanh(gi[:, 2 * D:] + r * gh[:, 2 * D:])
            h_new = (1.0 - z) * n + z * h
            return h_new, h_new
        hT, out = lax.scan(step, jnp.zeros((B, D), jnp.float32), x)
        x = out
        h_finals.append(hT)
    return jnp.transpose(jnp.stack(h_finals, axis=0), (1, 0, 2))


def _fuser_ref(x1, x2, w, b):
    d2 = x2.shape[-1]
    shp = x2.shape[:1] + (1,) * (x1.ndim - x2.ndim) + x2.shape[1:]
    x2b = jnp.broadcast_to(x2.reshape(shp), x1.shape[:-1] + (d2,))
    return jnp.concatenate([x1, x2b], axis=-1) @ w.T + b


def _mlp_ref(x, w, b, gamma, beta):
    d = jnp.maximum(x, 0.0) @ w.T + b
    mu = d.mean(axis=-1, keepdims=True)
    var = ((d - mu) ** 2).mean(axis=-1, keepdims=True)
    ln = (d - mu) / jnp.sqrt(var + 1e-5) * gamma + beta
    return x + ln


def multichoice_forward_ref(params, que, answers, features, text_feature_names):
    emb = params['emb']
    q = emb[que]
    t = emb[answers]
    q = _gru_encoder_ref(q, params['question_encoder'])
    for name in sorted(features.keys()):
        feat = features[name]
        if name in text_feature_names:
            feat = emb[feat]
        if name == 'images':
            feat = _mlp_ref(feat, *params['feature_encoders'][name])
        else:
            feat = _gru_encoder_ref(feat, params['feature_encoders'][name])
        feat = feat.mean(axis=1)
        q = _fuser_ref(q, feat, *params['feature_fusers'][name])
    q = q.mean(axis=1)
    o = _fuser_ref(t, q, *params['answer_fuser'])
    return o.mean(axis=-1).mean(axis=-1)


# ---------------------------------------------------------------------------
# Parameter init (torch-default-like shapes / ranges).
# ---------------------------------------------------------------------------
def _linear_params(key, out_dim, in_dim):
    k1, k2 = jax.random.split(key)
    bound = 1.0 / math.sqrt(in_dim)
    w = jax.random.uniform(k1, (out_dim, in_dim), jnp.float32, -bound, bound)
    b = jax.random.uniform(k2, (out_dim,), jnp.float32, -bound, bound)
    return w, b


def _gru_params(key, n_dim, layers):
    D = n_dim
    bound = 1.0 / math.sqrt(D)
    out = []
    for _ in range(layers):
        key, k1, k2, k3, k4 = jax.random.split(key, 5)
        out.append((
            jax.random.uniform(k1, (3 * D, D), jnp.float32, -bound, bound),
            jax.random.uniform(k2, (3 * D, D), jnp.float32, -bound, bound),
            jax.random.uniform(k3, (3 * D,), jnp.float32, -bound, bound),
            jax.random.uniform(k4, (3 * D,), jnp.float32, -bound, bound)))
    return out


def _mlp_params(key, n_dim):
    w, b = _linear_params(key, n_dim, n_dim)
    return w, b, jnp.ones((n_dim,), jnp.float32), jnp.zeros((n_dim,), jnp.float32)


def init_multichoice_params(key, vocab_size, n_dim, image_dim, layers):
    ks = jax.random.split(key, 7)
    return {
        'emb': jax.random.normal(ks[0], (vocab_size, n_dim), jnp.float32),
        'question_encoder': _gru_params(ks[1], n_dim, layers),
        'answer_fuser': _linear_params(ks[2], n_dim, 2 * n_dim),
        'feature_encoders': {
            'images': _mlp_params(ks[3], image_dim),
            'subtitle': _gru_params(ks[4], n_dim, layers),
        },
        'feature_fusers': {
            'images': _linear_params(ks[5], n_dim, n_dim + image_dim),
            'subtitle': _linear_params(ks[6], n_dim, 2 * n_dim),
        },
    }


if __name__ == "__main__":
    B, D, L = 2, 32, 2            # batch, n_dim, GRU layers
    V, C = 50, 5                  # vocab size, num_choice
    Tq, Ta, Ts = 8, 6, 7          # question / answer / subtitle lengths
    image_dim, n_img = 64, 3
    text_feature_names = ('subtitle',)

    key = jax.random.PRNGKey(0)
    kp, kq, ka, ks_, ki = jax.random.split(key, 5)
    params = init_multichoice_params(kp, V, D, image_dim, L)
    que = jax.random.randint(kq, (B, Tq), 0, V)
    answers = jax.random.randint(ka, (B, C, Ta), 0, V)
    subtitle = jax.random.randint(ks_, (B, Ts), 0, V)
    images = jax.random.normal(ki, (B, n_img, image_dim), jnp.float32)
    features = {'images': images, 'subtitle': subtitle}

    fwd = jax.jit(lambda p, q, a, f: multichoice_forward(p, q, a, f,
                                                         text_feature_names))
    out = jax.block_until_ready(fwd(params, que, answers, features))

    ref = multichoice_forward_ref(params, que, answers, features,
                                  text_feature_names)
    assert out.shape == (B, C), out.shape
    max_err = float(jnp.max(jnp.abs(out - ref)))
    assert jnp.allclose(out, ref, atol=1e-3, rtol=1e-3), \
        f"mismatch vs reference, max |err| = {max_err}"
    print("KERNEL_OK")
</pallas_src>

<mosaic_0001>
module attributes {stable_mosaic.version = 11 : i64} {
  func.func @_mlp_kernel(%arg0: memref<6x64xf32, #tpu.memory_space<vmem>>, %arg1: memref<64x64xf32, #tpu.memory_space<vmem>>, %arg2: memref<1x64xf32, #tpu.memory_space<vmem>>, %arg3: memref<1x64xf32, #tpu.memory_space<vmem>>, %arg4: memref<1x64xf32, #tpu.memory_space<vmem>>, %arg5: memref<6x64xf32, #tpu.memory_space<vmem>>) attributes {dimension_semantics = [], scalar_prefetch = 0 : i64, scratch_operands = 0 : i64, tpu.core_type = #tpu.core_type<tc>} {
    %c0 = arith.constant 0 : index
    %c0_0 = arith.constant 0 : index
    %0 = vector.load %arg0[%c0, %c0_0] : memref<6x64xf32, #tpu.memory_space<vmem>>, vector<6x64xf32>
    %cst = arith.constant 0.000000e+00 : f32
    %1 = vector.broadcast %cst : f32 to vector<6x64xf32>
    %2 = arith.maximumf %0, %1 : vector<6x64xf32>
    %c0_1 = arith.constant 0 : index
    %c0_2 = arith.constant 0 : index
    %3 = vector.load %arg1[%c0_1, %c0_2] : memref<64x64xf32, #tpu.memory_space<vmem>>, vector<64x64xf32>
    %cst_3 = arith.constant dense<0.000000e+00> : vector<6x64xf32>
    %4 = tpu.matmul %2, %3, %cst_3 {dimension_numbers = #tpu.dot_dimension_numbers<[1], [0], [0], [1], [0, 0, 1, 1], [], []>} : vector<6x64xf32>, vector<64x64xf32>, vector<6x64xf32> -> vector<6x64xf32>
    %c0_4 = arith.constant 0 : index
    %c0_5 = arith.constant 0 : index
    %5 = vector.load %arg2[%c0_4, %c0_5] : memref<1x64xf32, #tpu.memory_space<vmem>>, vector<1x64xf32>
    %6 = vector.broadcast %5 : vector<1x64xf32> to vector<6x64xf32>
    %7 = arith.addf %4, %6 : vector<6x64xf32>
    %cst_6 = arith.constant dense<0.000000e+00> : vector<6xf32>
    %8 = vector.multi_reduction <add>, %7, %cst_6 [1] : vector<6x64xf32> to vector<6xf32>
    %9 = vector.shape_cast %8 : vector<6xf32> to vector<6x1xf32>
    %cst_7 = arith.constant 6.400000e+01 : f32
    %10 = vector.broadcast %cst_7 : f32 to vector<6x1xf32>
    %11 = arith.divf %9, %10 : vector<6x1xf32>
    %12 = vector.broadcast %11 : vector<6x1xf32> to vector<6x64xf32>
    %13 = arith.subf %7, %12 : vector<6x64xf32>
    %14 = arith.mulf %13, %13 : vector<6x64xf32>
    %cst_8 = arith.constant dense<0.000000e+00> : vector<6xf32>
    %15 = vector.multi_reduction <add>, %14, %cst_8 [1] : vector<6x64xf32> to vector<6xf32>
    %16 = vector.shape_cast %15 : vector<6xf32> to vector<6x1xf32>
    %cst_9 = arith.constant 6.400000e+01 : f32
    %17 = vector.broadcast %cst_9 : f32 to vector<6x1xf32>
    %18 = arith.divf %16, %17 : vector<6x1xf32>
    %cst_10 = arith.constant 9.99999974E-6 : f32
    %19 = vector.broadcast %cst_10 : f32 to vector<6x1xf32>
    %20 = arith.addf %18, %19 : vector<6x1xf32>
    %21 = math.rsqrt %20 : vector<6x1xf32>
    %22 = vector.broadcast %21 : vector<6x1xf32> to vector<6x64xf32>
    %23 = arith.mulf %13, %22 : vector<6x64xf32>
    %c0_11 = arith.constant 0 : index
    %c0_12 = arith.constant 0 : index
    %24 = vector.load %arg3[%c0_11, %c0_12] : memref<1x64xf32, #tpu.memory_space<vmem>>, vector<1x64xf32>
    %25 = vector.broadcast %24 : vector<1x64xf32> to vector<6x64xf32>
    %26 = arith.mulf %23, %25 : vector<6x64xf32>
    %c0_13 = arith.constant 0 : index
    %c0_14 = arith.constant 0 : index
    %27 = vector.load %arg4[%c0_13, %c0_14] : memref<1x64xf32, #tpu.memory_space<vmem>>, vector<1x64xf32>
    %28 = vector.broadcast %27 : vector<1x64xf32> to vector<6x64xf32>
    %29 = arith.addf %26, %28 : vector<6x64xf32>
    %30 = arith.addf %0, %29 : vector<6x64xf32>
    %c0_15 = arith.constant 0 : index
    %c0_16 = arith.constant 0 : index
    %31 = vector.load %arg5[%c0_15, %c0_16] : memref<6x64xf32, #tpu.memory_space<vmem>>, vector<6x64xf32>
    tpu.vector_store %arg5[%c0_15, %c0_16], %30 {strides = array<i32>} : memref<6x64xf32, #tpu.memory_space<vmem>>, vector<6x64xf32>,
    return
  }
}

module attributes {stable_mosaic.version = 11 : i64} {
  func.func @_gru_stack_kernel(%arg0: memref<64x32xf32, #tpu.memory_space<vmem>>, %arg1: memref<2x3x32x32xf32, #tpu.memory_space<vmem>>, %arg2: memref<2x3x32x32xf32, #tpu.memory_space<vmem>>, %arg3: memref<2x4x1x32xf32, #tpu.memory_space<vmem>>, %arg4: memref<2x8x32xf32, #tpu.memory_space<vmem>>, %arg5: memref<64x32xf32, #tpu.memory_space<vmem>>) attributes {dimension_semantics = [], scalar_prefetch = 0 : i64, scratch_operands = 1 : i64, tpu.core_type = #tpu.core_type<tc>} {
    %c0 = arith.constant 0 : index
    %c0_0 = arith.constant 0 : index
    %0 = vector.load %arg0[%c0, %c0_0] : memref<64x32xf32, #tpu.memory_space<vmem>>, vector<64x32xf32>
    %c0_1 = arith.constant 0 : index
    %c0_2 = arith.constant 0 : index
    %c0_3 = arith.constant 0 : index
    %c0_4 = arith.constant 0 : index
    %1 = vector.load %arg1[%c0_1, %c0_2, %c0_3, %c0_4] : memref<2x3x32x32xf32, #tpu.memory_space<vmem>>, vector<1x1x32x32xf32>
    %2 = vector.shape_cast %1 : vector<1x1x32x32xf32> to vector<32x32xf32>
    %c0_5 = arith.constant 0 : index
    %c1 = arith.constant 1 : index
    %c0_6 = arith.constant 0 : index
    %c0_7 = arith.constant 0 : index
    %3 = vector.load %arg1[%c0_5, %c1, %c0_6, %c0_7] : memref<2x3x32x32xf32, #tpu.memory_space<vmem>>, vector<1x1x32x32xf32>
    %4 = vector.shape_cast %3 : vector<1x1x32x32xf32> to vector<32x32xf32>
    %c0_8 = arith.constant 0 : index
    %c2 = arith.constant 2 : index
    %c0_9 = arith.constant 0 : index
    %c0_10 = arith.constant 0 : index
    %5 = vector.load %arg1[%c0_8, %c2, %c0_9, %c0_10] : memref<2x3x32x32xf32, #tpu.memory_space<vmem>>, vector<1x1x32x32xf32>
    %6 = vector.shape_cast %5 : vector<1x1x32x32xf32> to vector<32x32xf32>
    %c0_11 = arith.constant 0 : index
    %c0_12 = arith.constant 0 : index
    %c0_13 = arith.constant 0 : index
    %c0_14 = arith.constant 0 : index
    %7 = vector.load %arg2[%c0_11, %c0_12, %c0_13, %c0_14] : memref<2x3x32x32xf32, #tpu.memory_space<vmem>>, vector<1x1x32x32xf32>
    %8 = vector.shape_cast %7 : vector<1x1x32x32xf32> to vector<32x32xf32>
    %c0_15 = arith.constant 0 : index
    %c1_16 = arith.constant 1 : index
    %c0_17 = arith.constant 0 : index
    %c0_18 = arith.constant 0 : index
    %9 = vector.load %arg2[%c0_15, %c1_16, %c0_17, %c0_18] : memref<2x3x32x32xf32, #tpu.memory_space<vmem>>, vector<1x1x32x32xf32>
    %10 = vector.shape_cast %9 : vector<1x1x32x32xf32> to vector<32x32xf32>
    %c0_19 = arith.constant 0 : index
    %c2_20 = arith.constant 2 : index
    %c0_21 = arith.constant 0 : index
    %c0_22 = arith.constant 0 : index
    %11 = vector.load %arg2[%c0_19, %c2_20, %c0_21, %c0_22] : memref<2x3x32x32xf32, #tpu.memory_space<vmem>>, vector<1x1x32x32xf32>
    %12 = vector.shape_cast %11 : vector<1x1x32x32xf32> to vector<32x32xf32>
    %c0_23 = arith.constant 0 : index
    %c0_24 = arith.constant 0 : index
    %c0_25 = arith.constant 0 : index
    %c0_26 = arith.constant 0 : index
    %13 = vector.load %arg3[%c0_23, %c0_24, %c0_25, %c0_26] : memref<2x4x1x32xf32, #tpu.memory_space<vmem>>, vector<1x1x1x32xf32>
    %14 = vector.shape_cast %13 : vector<1x1x1x32xf32> to vector<1x32xf32>
    %c0_27 = arith.constant 0 : index
    %c1_28 = arith.constant 1 : index
    %c0_29 = arith.constant 0 : index
    %c0_30 = arith.constant 0 : index
    %15 = vector.load %arg3[%c0_27, %c1_28, %c0_29, %c0_30] : memref<2x4x1x32xf32, #tpu.memory_space<vmem>>, vector<1x1x1x32xf32>
    %16 = vector.shape_cast %15 : vector<1x1x1x32xf32> to vector<1x32xf32>
    %c0_31 = arith.constant 0 : index
    %c2_32 = arith.constant 2 : index
    %c0_33 = arith.constant 0 : index
    %c0_34 = arith.constant 0 : index
    %17 = vector.load %arg3[%c0_31, %c2_32, %c0_33, %c0_34] : memref<2x4x1x32xf32, #tpu.memory_space<vmem>>, vector<1x1x1x32xf32>
    %18 = vector.shape_cast %17 : vector<1x1x1x32xf32> to vector<1x32xf32>
    %c0_35 = arith.constant 0 : index
    %c3 = arith.constant 3 : index
    %c0_36 = arith.constant 0 : index
    %c0_37 = arith.constant 0 : index
    %19 = vector.load %arg3[%c0_35, %c3, %c0_36, %c0_37] : memref<2x4x1x32xf32, #tpu.memory_space<vmem>>, vector<1x1x1x32xf32>
    %20 = vector.shape_cast %19 : vector<1x1x1x32xf32> to vector<1x32xf32>
    %cst = arith.constant dense<0.000000e+00> : vector<64x32xf32>
    %21 = tpu.matmul %0, %2, %cst {dimension_numbers = #tpu.dot_dimension_numbers<[1], [0], [0], [1], [0, 0, 1, 1], [], []>} : vector<64x32xf32>, vector<32x32xf32>, vector<64x32xf32> -> vector<64x32xf32>
    %22 = vector.broadcast %14 : vector<1x32xf32> to vector<64x32xf32>
    %23 = arith.addf %21, %22 : vector<64x32xf32>
    %cst_38 = arith.constant dense<0.000000e+00> : vector<64x32xf32>
    %24 = tpu.matmul %0, %4, %cst_38 {dimension_numbers = #tpu.dot_dimension_numbers<[1], [0], [0], [1], [0, 0, 1, 1], [], []>} : vector<64x32xf32>, vector<32x32xf32>, vector<64x32xf32> -> vector<64x32xf32>
    %25 = vector.broadcast %16 : vector<1x32xf32> to vector<64x32xf32>
    %26 = arith.addf %24, %25 : vector<64x32xf32>
    %cst_39 = arith.constant dense<0.000000e+00> : vector<64x32xf32>
    %27 = tpu.matmul %0, %6, %cst_39 {dimension_numbers = #tpu.dot_dimension_numbers<[1], [0], [0], [1], [0, 0, 1, 1], [], []>} : vector<64x32xf32>, vector<32x32xf32>, vector<64x32xf32> -> vector<64x32xf32>
    %28 = vector.broadcast %18 : vector<1x32xf32> to vector<64x32xf32>
    %29 = arith.addf %27, %28 : vector<64x32xf32>
    %cst_40 = arith.constant 0.000000e+00 : f32
    %30 = vector.broadcast %cst_40 : f32 to vector<8x32xf32>
    %cst_41 = arith.constant dense<0.000000e+00> : vector<8x32xf32>
    %31 = tpu.matmul %30, %8, %cst_41 {dimension_numbers = #tpu.dot_dimension_numbers<[1], [0], [0], [1], [0, 0, 1, 1], [], []>} : vector<8x32xf32>, vector<32x32xf32>, vector<8x32xf32> -> vector<8x32xf32>
    %cst_42 = arith.constant dense<0.000000e+00> : vector<8x32xf32>
    %32 = tpu.matmul %30, %10, %cst_42 {dimension_numbers = #tpu.dot_dimension_numbers<[1], [0], [0], [1], [0, 0, 1, 1], [], []>} : vector<8x32xf32>, vector<32x32xf32>, vector<8x32xf32> -> vector<8x32xf32>
    %cst_43 = arith.constant dense<0.000000e+00> : vector<8x32xf32>
    %33 = tpu.matmul %30, %12, %cst_43 {dimension_numbers = #tpu.dot_dimension_numbers<[1], [0], [0], [1], [0, 0, 1, 1], [], []>} : vector<8x32xf32>, vector<32x32xf32>, vector<8x32xf32> -> vector<8x32xf32>
    %34 = vector.extract_strided_slice %23 {offsets = [0, 0], sizes = [8, 32], strides = [1, 1]} : vector<64x32xf32> to vector<8x32xf32>
    %35 = arith.addf %34, %31 : vector<8x32xf32>
    %36 = arith.negf %35 : vector<8x32xf32>
    %37 = math.exp %36 : vector<8x32xf32>
    %cst_44 = arith.constant 1.000000e+00 : f32
    %38 = vector.broadcast %cst_44 : f32 to vector<8x32xf32>
    %39 = arith.addf %38, %37 : vector<8x32xf32>
    %40 = arith.divf %38, %39 : vector<8x32xf32>
    %41 = vector.extract_strided_slice %26 {offsets = [0, 0], sizes = [8, 32], strides = [1, 1]} : vector<64x32xf32> to vector<8x32xf32>
    %42 = arith.addf %41, %32 : vector<8x32xf32>
    %43 = arith.negf %42 : vector<8x32xf32>
    %44 = math.exp %43 : vector<8x32xf32>
    %cst_45 = arith.constant 1.000000e+00 : f32
    %45 = vector.broadcast %cst_45 : f32 to vector<8x32xf32>
    %46 = arith.addf %45, %44 : vector<8x32xf32>
    %47 = arith.divf %45, %46 : vector<8x32xf32>
    %48 = vector.extract_strided_slice %29 {offsets = [0, 0], sizes = [8, 32], strides = [1, 1]} : vector<64x32xf32> to vector<8x32xf32>
    %49 = vector.broadcast %20 : vector<1x32xf32> to vector<8x32xf32>
    %50 = arith.addf %33, %49 : vector<8x32xf32>
    %51 = arith.mulf %40, %50 : vector<8x32xf32>
    %52 = arith.addf %48, %51 : vector<8x32xf32>
    %53 = math.tanh %52 : vector<8x32xf32>
    %54 = arith.subf %30, %53 : vector<8x32xf32>
    %55 = arith.mulf %47, %54 : vector<8x32xf32>
    %56 = arith.addf %53, %55 : vector<8x32xf32>
    %c0_46 = arith.constant 0 : index
    %c0_47 = arith.constant 0 : index
    %57 = vector.load %arg5[%c0_46, %c0_47] : memref<64x32xf32, #tpu.memory_space<vmem>>, vector<8x32xf32>
    tpu.vector_store %arg5[%c0_46, %c0_47], %56 {strides = array<i32>} : memref<64x32xf32, #tpu.memory_space<vmem>>, vector<8x32xf32>,
    %cst_48 = arith.constant dense<0.000000e+00> : vector<8x32xf32>
    %58 = tpu.matmul %56, %8, %cst_48 {dimension_numbers = #tpu.dot_dimension_numbers<[1], [0], [0], [1], [0, 0, 1, 1], [], []>} : vector<8x32xf32>, vector<32x32xf32>, vector<8x32xf32> -> vector<8x32xf32>
    %cst_49 = arith.constant dense<0.000000e+00> : vector<8x32xf32>
    %59 = tpu.matmul %56, %10, %cst_49 {dimension_numbers = #tpu.dot_dimension_numbers<[1], [0], [0], [1], [0, 0, 1, 1], [], []>} : vector<8x32xf32>, vector<32x32xf32>, vector<8x32xf32> -> vector<8x32xf32>
    %cst_50 = arith.constant dense<0.000000e+00> : vector<8x32xf32>
    %60 = tpu.matmul %56, %12, %cst_50 {dimension_numbers = #tpu.dot_dimension_numbers<[1], [0], [0], [1], [0, 0, 1, 1], [], []>} : vector<8x32xf32>, vector<32x32xf32>, vector<8x32xf32> -> vector<8x32xf32>
    %61 = vector.extract_strided_slice %23 {offsets = [8, 0], sizes = [8, 32], strides = [1, 1]} : vector<64x32xf32> to vector<8x32xf32>
    %62 = arith.addf %61, %58 : vector<8x32xf32>
    %63 = arith.negf %62 : vector<8x32xf32>
    %64 = math.exp %63 : vector<8x32xf32>
    %cst_51 = arith.constant 1.000000e+00 : f32
    %65 = vector.broadcast %cst_51 : f32 to vector<8x32xf32>
    %66 = arith.addf %65, %64 : vector<8x32xf32>
    %67 = arith.divf %65, %66 : vector<8x32xf32>
    %68 = vector.extract_strided_slice %26 {offsets = [8, 0], sizes = [8, 32], strides = [1, 1]} : vector<64x32xf32> to vector<8x32xf32>
    %69 = arith.addf %68, %59 : vector<8x32xf32>
    %70 = arith.negf %69 : vector<8x32xf32>
    %71 = math.exp %70 : vector<8x32xf32>
    %cst_52 = arith.constant 1.000000e+00 : f32
    %72 = vector.broadcast %cst_52 : f32 to vector<8x32xf32>
    %73 = arith.addf %72, %71 : vector<8x32xf32>
    %74 = arith.divf %72, %73 : vector<8x32xf32>
    %75 = vector.extract_strided_slice %29 {offsets = [8, 0], sizes = [8, 32], strides = [1, 1]} : vector<64x32xf32> to vector<8x32xf32>
    %76 = vector.broadcast %20 : vector<1x32xf32> to vector<8x32xf32>
    %77 = arith.addf %60, %76 : vector<8x32xf32>
    %78 = arith.mulf %67, %77 : vector<8x32xf32>
    %79 = arith.addf %75, %78 : vector<8x32xf32>
    %80 = math.tanh %79 : vector<8x32xf32>
    %81 = arith.subf %56, %80 : vector<8x32xf32>
    %82 = arith.mulf %74, %81 : vector<8x32xf32>
    %83 = arith.addf %80, %82 : vector<8x32xf32>
    %c8 = arith.constant 8 : index
    %c0_53 = arith.constant 0 : index
    %84 = vector.load %arg5[%c8, %c0_53] : memref<64x32xf32, #tpu.memory_space<vmem>>, vector<8x32xf32>
    tpu.vector_store %arg5[%c8, %c0_53], %83 {strides = array<i32>} : memref<64x32xf32, #tpu.memory_space<vmem>>, vector<8x32xf32>,
    %cst_54 = arith.constant dense<0.000000e+00> : vector<8x32xf32>
    %85 = tpu.matmul %83, %8, %cst_54 {dimension_numbers = #tpu.dot_dimension_numbers<[1], [0], [0], [1], [0, 0, 1, 1], [], []>} : vector<8x32xf32>, vector<32x32xf32>, vector<8x32xf32> -> vector<8x32xf32>
    %cst_55 = arith.constant dense<0.000000e+00> : vector<8x32xf32>
    %86 = tpu.matmul %83, %10, %cst_55 {dimension_numbers = #tpu.dot_dimension_numbers<[1], [0], [0], [1], [0, 0, 1, 1], [], []>} : vector<8x32xf32>, vector<32x32xf32>, vector<8x32xf32> -> vector<8x32xf32>
    %cst_56 = arith.constant dense<0.000000e+00> : vector<8x32xf32>
    %87 = tpu.matmul %83, %12, %cst_56 {dimension_numbers = #tpu.dot_dimension_numbers<[1], [0], [0], [1], [0, 0, 1, 1], [], []>} : vector<8x32xf32>, vector<32x32xf32>, vector<8x32xf32> -> vector<8x32xf32>
    %88 = vector.extract_strided_slice %23 {offsets = [16, 0], sizes = [8, 32], strides = [1, 1]} : vector<64x32xf32> to vector<8x32xf32>
    %89 = arith.addf %88, %85 : vector<8x32xf32>
    %90 = arith.negf %89 : vector<8x32xf32>
    %91 = math.exp %90 : vector<8x32xf32>
    %cst_57 = arith.constant 1.000000e+00 : f32
    %92 = vector.broadcast %cst_57 : f32 to vector<8x32xf32>
    %93 = arith.addf %92, %91 : vector<8x32xf32>
    %94 = arith.divf %92, %93 : vector<8x32xf32>
    %95 = vector.extract_strided_slice %26 {offsets = [16, 0], sizes = [8, 32], strides = [1, 1]} : vector<64x32xf32> to vector<8x32xf32>
    %96 = arith.addf %95, %86 : vector<8x32xf32>
    %97 = arith.negf %96 : vector<8x32xf32>
    %98 = math.exp %97 : vector<8x32xf32>
    %cst_58 = arith.constant 1.000000e+00 : f32
    %99 = vector.broadcast %cst_58 : f32 to vector<8x32xf32>
    %100 = arith.addf %99, %98 : vector<8x32xf32>
    %101 = arith.divf %99, %100 : vector<8x32xf32>
    %102 = vector.extract_strided_slice %29 {offsets = [16, 0], sizes = [8, 32], strides = [1, 1]} : vector<64x32xf32> to vector<8x32xf32>
    %103 = vector.broadcast %20 : vector<1x32xf32> to vector<8x32xf32>
    %104 = arith.addf %87, %103 : vector<8x32xf32>
    %105 = arith.mulf %94, %104 : vector<8x32xf32>
    %106 = arith.addf %102, %105 : vector<8x32xf32>
    %107 = math.tanh %106 : vector<8x32xf32>
    %108 = arith.subf %83, %107 : vector<8x32xf32>
    %109 = arith.mulf %101, %108 : vector<8x32xf32>
    %110 = arith.addf %107, %109 : vector<8x32xf32>
    %c16 = arith.constant 16 : index
    %c0_59 = arith.constant 0 : index
    %111 = vector.load %arg5[%c16, %c0_59] : memref<64x32xf32, #tpu.memory_space<vmem>>, vector<8x32xf32>
    tpu.vector_store %arg5[%c16, %c0_59], %110 {strides = array<i32>} : memref<64x32xf32, #tpu.memory_space<vmem>>, vector<8x32xf32>,
    %cst_60 = arith.constant dense<0.000000e+00> : vector<8x32xf32>
    %112 = tpu.matmul %110, %8, %cst_60 {dimension_numbers = #tpu.dot_dimension_numbers<[1], [0], [0], [1], [0, 0, 1, 1], [], []>} : vector<8x32xf32>, vector<32x32xf32>, vector<8x32xf32> -> vector<8x32xf32>
    %cst_61 = arith.constant dense<0.000000e+00> : vector<8x32xf32>
    %113 = tpu.matmul %110, %10, %cst_61 {dimension_numbers = #tpu.dot_dimension_numbers<[1], [0], [0], [1], [0, 0, 1, 1], [], []>} : vector<8x32xf32>, vector<32x32xf32>, vector<8x32xf32> -> vector<8x32xf32>
    %cst_62 = arith.constant dense<0.000000e+00> : vector<8x32xf32>
    %114 = tpu.matmul %110, %12, %cst_62 {dimension_numbers = #tpu.dot_dimension_numbers<[1], [0], [0], [1], [0, 0, 1, 1], [], []>} : vector<8x32xf32>, vector<32x32xf32>, vector<8x32xf32> -> vector<8x32xf32>
    %115 = vector.extract_strided_slice %23 {offsets = [24, 0], sizes = [8, 32], strides = [1, 1]} : vector<64x32xf32> to vector<8x32xf32>
    %116 = arith.addf %115, %112 : vector<8x32xf32>
    %117 = arith.negf %116 : vector<8x32xf32>
    %118 = math.exp %117 : vector<8x32xf32>
    %cst_63 = arith.constant 1.000000e+00 : f32
    %119 = vector.broadcast %cst_63 : f32 to vector<8x32xf32>
    %120 = arith.addf %119, %118 : vector<8x32xf32>
    %121 = arith.divf %119, %120 : vector<8x32xf32>
    %122 = vector.extract_strided_slice %26 {offsets = [24, 0], sizes = [8, 32], strides = [1, 1]} : vector<64x32xf32> to vector<8x32xf32>
    %123 = arith.addf %122, %113 : vector<8x32xf32>
    %124 = arith.negf %123 : vector<8x32xf32>
    %125 = math.exp %124 : vector<8x32xf32>
    %cst_64 = arith.constant 1.000000e+00 : f32
    %126 = vector.broadcast %cst_64 : f32 to vector<8x32xf32>
    %127 = arith.addf %126, %125 : vector<8x32xf32>
    %128 = arith.divf %126, %127 : vector<8x32xf32>
    %129 = vector.extract_strided_slice %29 {offsets = [24, 0], sizes = [8, 32], strides = [1, 1]} : vector<64x32xf32> to vector<8x32xf32>
    %130 = vector.broadcast %20 : vector<1x32xf32> to vector<8x32xf32>
    %131 = arith.addf %114, %130 : vector<8x32xf32>
    %132 = arith.mulf %121, %131 : vector<8x32xf32>
    %133 = arith.addf %129, %132 : vector<8x32xf32>
    %134 = math.tanh %133 : vector<8x32xf32>
    %135 = arith.subf %110, %134 : vector<8x32xf32>
    %136 = arith.mulf %128, %135 : vector<8x32xf32>
    %137 = arith.addf %134, %136 : vector<8x32xf32>
    %c24 = arith.constant 24 : index
    %c0_65 = arith.constant 0 : index
    %138 = vector.load %arg5[%c24, %c0_65] : memref<64x32xf32, #tpu.memory_space<vmem>>, vector<8x32xf32>
    tpu.vector_store %arg5[%c24, %c0_65], %137 {strides = array<i32>} : memref<64x32xf32, #tpu.memory_space<vmem>>, vector<8x32xf32>,
    %cst_66 = arith.constant dense<0.000000e+00> : vector<8x32xf32>
    %139 = tpu.matmul %137, %8, %cst_66 {dimension_numbers = #tpu.dot_dimension_numbers<[1], [0], [0], [1], [0, 0, 1, 1], [], []>} : vector<8x32xf32>, vector<32x32xf32>, vector<8x32xf32> -> vector<8x32xf32>
    %cst_67 = arith.constant dense<0.000000e+00> : vector<8x32xf32>
    %140 = tpu.matmul %137, %10, %cst_67 {dimension_numbers = #tpu.dot_dimension_numbers<[1], [0], [0], [1], [0, 0, 1, 1], [], []>} : vector<8x32xf32>, vector<32x32xf32>, vector<8x32xf32> -> vector<8x32xf32>
    %cst_68 = arith.constant dense<0.000000e+00> : vector<8x32xf32>
    %141 = tpu.matmul %137, %12, %cst_68 {dimension_numbers = #tpu.dot_dimension_numbers<[1], [0], [0], [1], [0, 0, 1, 1], [], []>} : vector<8x32xf32>, vector<32x32xf32>, vector<8x32xf32> -> vector<8x32xf32>
    %142 = vector.extract_strided_slice %23 {offsets = [32, 0], sizes = [8, 32], strides = [1, 1]} : vector<64x32xf32> to vector<8x32xf32>
    %143 = arith.addf %142, %139 : vector<8x32xf32>
    %144 = arith.negf %143 : vector<8x32xf32>
    %145 = math.exp %144 : vector<8x32xf32>
    %cst_69 = arith.constant 1.000000e+00 : f32
    %146 = vector.broadcast %cst_69 : f32 to vector<8x32xf32>
    %147 = arith.addf %146, %145 : vector<8x32xf32>
    %148 = arith.divf %146, %147 : vector<8x32xf32>
    %149 = vector.extract_strided_slice %26 {offsets = [32, 0], sizes = [8, 32], strides = [1, 1]} : vector<64x32xf32> to vector<8x32xf32>
    %150 = arith.addf %149, %140 : vector<8x32xf32>
    %151 = arith.negf %150 : vector<8x32xf32>
    %152 = math.exp %151 : vector<8x32xf32>
    %cst_70 = arith.constant 1.000000e+00 : f32
    %153 = vector.broadcast %cst_70 : f32 to vector<8x32xf32>
    %154 = arith.addf %153, %152 : vector<8x32xf32>
    %155 = arith.divf %153, %154 : vector<8x32xf32>
    %156 = vector.extract_strided_slice %29 {offsets = [32, 0], sizes = [8, 32], strides = [1, 1]} : vector<64x32xf32> to vector<8x32xf32>
    %157 = vector.broadcast %20 : vector<1x32xf32> to vector<8x32xf32>
    %158 = arith.addf %141, %157 : vector<8x32xf32>
    %159 = arith.mulf %148, %158 : vector<8x32xf32>
    %160 = arith.addf %156, %159 : vector<8x32xf32>
    %161 = math.tanh %160 : vector<8x32xf32>
    %162 = arith.subf %137, %161 : vector<8x32xf32>
    %163 = arith.mulf %155, %162 : vector<8x32xf32>
    %164 = arith.addf %161, %163 : vector<8x32xf32>
    %c32 = arith.constant 32 : index
    %c0_71 = arith.constant 0 : index
    %165 = vector.load %arg5[%c32, %c0_71] : memref<64x32xf32, #tpu.memory_space<vmem>>, vector<8x32xf32>
    tpu.vector_store %arg5[%c32, %c0_71], %164 {strides = array<i32>} : memref<64x32xf32, #tpu.memory_space<vmem>>, vector<8x32xf32>,
    %cst_72 = arith.constant dense<0.000000e+00> : vector<8x32xf32>
    %166 = tpu.matmul %164, %8, %cst_72 {dimension_numbers = #tpu.dot_dimension_numbers<[1], [0], [0], [1], [0, 0, 1, 1], [], []>} : vector<8x32xf32>, vector<32x32xf32>, vector<8x32xf32> -> vector<8x32xf32>
    %cst_73 = arith.constant dense<0.000000e+00> : vector<8x32xf32>
    %167 = tpu.matmul %164, %10, %cst_73 {dimension_numbers = #tpu.dot_dimension_numbers<[1], [0], [0], [1], [0, 0, 1, 1], [], []>} : vector<8x32xf32>, vector<32x32xf32>, vector<8x32xf32> -> vector<8x32xf32>
    %cst_74 = arith.constant dense<0.000000e+00> : vector<8x32xf32>
    %168 = tpu.matmul %164, %12, %cst_74 {dimension_numbers = #tpu.dot_dimension_numbers<[1], [0], [0], [1], [0, 0, 1, 1], [], []>} : vector<8x32xf32>, vector<32x32xf32>, vector<8x32xf32> -> vector<8x32xf32>
    %169 = vector.extract_strided_slice %23 {offsets = [40, 0], sizes = [8, 32], strides = [1, 1]} : vector<64x32xf32> to vector<8x32xf32>
    %170 = arith.addf %169, %166 : vector<8x32xf32>
    %171 = arith.negf %170 : vector<8x32xf32>
    %172 = math.exp %171 : vector<8x32xf32>
    %cst_75 = arith.constant 1.000000e+00 : f32
    %173 = vector.broadcast %cst_75 : f32 to vector<8x32xf32>
    %174 = arith.addf %173, %172 : vector<8x32xf32>
    %175 = arith.divf %173, %174 : vector<8x32xf32>
    %176 = vector.extract_strided_slice %26 {offsets = [40, 0], sizes = [8, 32], strides = [1, 1]} : vector<64x32xf32> to vector<8x32xf32>
    %177 = arith.addf %176, %167 : vector<8x32xf32>
    %178 = arith.negf %177 : vector<8x32xf32>
    %179 = math.exp %178 : vector<8x32xf32>
    %cst_76 = arith.constant 1.000000e+00 : f32
    %180 = vector.broadcast %cst_76 : f32 to vector<8x32xf32>
    %181 = arith.addf %180, %179 : vector<8x32xf32>
    %182 = arith.divf %180, %181 : vector<8x32xf32>
    %183 = vector.extract_strided_slice %29 {offsets = [40, 0], sizes = [8, 32], strides = [1, 1]} : vector<64x32xf32> to vector<8x32xf32>
    %184 = vector.broadcast %20 : vector<1x32xf32> to vector<8x32xf32>
    %185 = arith.addf %168, %184 : vector<8x32xf32>
    %186 = arith.mulf %175, %185 : vector<8x32xf32>
    %187 = arith.addf %183, %186 : vector<8x32xf32>
    %188 = math.tanh %187 : vector<8x32xf32>
    %189 = arith.subf %164, %188 : vector<8x32xf32>
    %190 = arith.mulf %182, %189 : vector<8x32xf32>
    %191 = arith.addf %188, %190 : vector<8x32xf32>
    %c40 = arith.constant 40 : index
    %c0_77 = arith.constant 0 : index
    %192 = vector.load %arg5[%c40, %c0_77] : memref<64x32xf32, #tpu.memory_space<vmem>>, vector<8x32xf32>
    tpu.vector_store %arg5[%c40, %c0_77], %191 {strides = array<i32>} : memref<64x32xf32, #tpu.memory_space<vmem>>, vector<8x32xf32>,
    %cst_78 = arith.constant dense<0.000000e+00> : vector<8x32xf32>
    %193 = tpu.matmul %191, %8, %cst_78 {dimension_numbers = #tpu.dot_dimension_numbers<[1], [0], [0], [1], [0, 0, 1, 1], [], []>} : vector<8x32xf32>, vector<32x32xf32>, vector<8x32xf32> -> vector<8x32xf32>
    %cst_79 = arith.constant dense<0.000000e+00> : vector<8x32xf32>
    %194 = tpu.matmul %191, %10, %cst_79 {dimension_numbers = #tpu.dot_dimension_numbers<[1], [0], [0], [1], [0, 0, 1, 1], [], []>} : vector<8x32xf32>, vector<32x32xf32>, vector<8x32xf32> -> vector<8x32xf32>
    %cst_80 = arith.constant dense<0.000000e+00> : vector<8x32xf32>
    %195 = tpu.matmul %191, %12, %cst_80 {dimension_numbers = #tpu.dot_dimension_numbers<[1], [0], [0], [1], [0, 0, 1, 1], [], []>} : vector<8x32xf32>, vector<32x32xf32>, vector<8x32xf32> -> vector<8x32xf32>
    %196 = vector.extract_strided_slice %23 {offsets = [48, 0], sizes = [8, 32], strides = [1, 1]} : vector<64x32xf32> to vector<8x32xf32>
    %197 = arith.addf %196, %193 : vector<8x32xf32>
    %198 = arith.negf %197 : vector<8x32xf32>
    %199 = math.exp %198 : vector<8x32xf32>
    %cst_81 = arith.constant 1.000000e+00 : f32
    %200 = vector.broadcast %cst_81 : f32 to vector<8x32xf32>
    %201 = arith.addf %200, %199 : vector<8x32xf32>
    %202 = arith.divf %200, %201 : vector<8x32xf32>
    %203 = vector.extract_strided_slice %26 {offsets = [48, 0], sizes = [8, 32], strides = [1, 1]} : vector<64x32xf32> to vector<8x32xf32>
    %204 = arith.addf %203, %194 : vector<8x32xf32>
    %205 = arith.negf %204 : vector<8x32xf32>
    %206 = math.exp %205 : vector<8x32xf32>
    %cst_82 = arith.constant 1.000000e+00 : f32
    %207 = vector.broadcast %cst_82 : f32 to vector<8x32xf32>
    %208 = arith.addf %207, %206 : vector<8x32xf32>
    %209 = arith.divf %207, %208 : vector<8x32xf32>
    %210 = vector.extract_strided_slice %29 {offsets = [48, 0], sizes = [8, 32], strides = [1, 1]} : vector<64x32xf32> to vector<8x32xf32>
    %211 = vector.broadcast %20 : vector<1x32xf32> to vector<8x32xf32>
    %212 = arith.addf %195, %211 : vector<8x32xf32>
    %213 = arith.mulf %202, %212 : vector<8x32xf32>
    %214 = arith.addf %210, %213 : vector<8x32xf32>
    %215 = math.tanh %214 : vector<8x32xf32>
    %216 = arith.subf %191, %215 : vector<8x32xf32>
    %217 = arith.mulf %209, %216 : vector<8x32xf32>
    %218 = arith.addf %215, %217 : vector<8x32xf32>
    %c48 = arith.constant 48 : index
    %c0_83 = arith.constant 0 : index
    %219 = vector.load %arg5[%c48, %c0_83] : memref<64x32xf32, #tpu.memory_space<vmem>>, vector<8x32xf32>
    tpu.vector_store %arg5[%c48, %c0_83], %218 {strides = array<i32>} : memref<64x32xf32, #tpu.memory_space<vmem>>, vector<8x32xf32>,
    %cst_84 = arith.constant dense<0.000000e+00> : vector<8x32xf32>
    %220 = tpu.matmul %218, %8, %cst_84 {dimension_numbers = #tpu.dot_dimension_numbers<[1], [0], [0], [1], [0, 0, 1, 1], [], []>} : vector<8x32xf32>, vector<32x32xf32>, vector<8x32xf32> -> vector<8x32xf32>
    %cst_85 = arith.constant dense<0.000000e+00> : vector<8x32xf32>
    %221 = tpu.matmul %218, %10, %cst_85 {dimension_numbers = #tpu.dot_dimension_numbers<[1], [0], [0], [1], [0, 0, 1, 1], [], []>} : vector<8x32xf32>, vector<32x32xf32>, vector<8x32xf32> -> vector<8x32xf32>
    %cst_86 = arith.constant dense<0.000000e+00> : vector<8x32xf32>
    %222 = tpu.matmul %218, %12, %cst_86 {dimension_numbers = #tpu.dot_dimension_numbers<[1], [0], [0], [1], [0, 0, 1, 1], [], []>} : vector<8x32xf32>, vector<32x32xf32>, vector<8x32xf32> -> vector<8x32xf32>
    %223 = vector.extract_strided_slice %23 {offsets = [56, 0], sizes = [8, 32], strides = [1, 1]} : vector<64x32xf32> to vector<8x32xf32>
    %224 = arith.addf %223, %220 : vector<8x32xf32>
    %225 = arith.negf %224 : vector<8x32xf32>
    %226 = math.exp %225 : vector<8x32xf32>
    %cst_87 = arith.constant 1.000000e+00 : f32
    %227 = vector.broadcast %cst_87 : f32 to vector<8x32xf32>
    %228 = arith.addf %227, %226 : vector<8x32xf32>
    %229 = arith.divf %227, %228 : vector<8x32xf32>
    %230 = vector.extract_strided_slice %26 {offsets = [56, 0], sizes = [8, 32], strides = [1, 1]} : vector<64x32xf32> to vector<8x32xf32>
    %231 = arith.addf %230, %221 : vector<8x32xf32>
    %232 = arith.negf %231 : vector<8x32xf32>
    %233 = math.exp %232 : vector<8x32xf32>
    %cst_88 = arith.constant 1.000000e+00 : f32
    %234 = vector.broadcast %cst_88 : f32 to vector<8x32xf32>
    %235 = arith.addf %234, %233 : vector<8x32xf32>
    %236 = arith.divf %234, %235 : vector<8x32xf32>
    %237 = vector.extract_strided_slice %29 {offsets = [56, 0], sizes = [8, 32], strides = [1, 1]} : vector<64x32xf32> to vector<8x32xf32>
    %238 = vector.broadcast %20 : vector<1x32xf32> to vector<8x32xf32>
    %239 = arith.addf %222, %238 : vector<8x32xf32>
    %240 = arith.mulf %229, %239 : vector<8x32xf32>
    %241 = arith.addf %237, %240 : vector<8x32xf32>
    %242 = math.tanh %241 : vector<8x32xf32>
    %243 = arith.subf %218, %242 : vector<8x32xf32>
    %244 = arith.mulf %236, %243 : vector<8x32xf32>
    %245 = arith.addf %242, %244 : vector<8x32xf32>
    %c56 = arith.constant 56 : index
    %c0_89 = arith.constant 0 : index
    %246 = vector.load %arg5[%c56, %c0_89] : memref<64x32xf32, #tpu.memory_space<vmem>>, vector<8x32xf32>
    tpu.vector_store %arg5[%c56, %c0_89], %245 {strides = array<i32>} : memref<64x32xf32, #tpu.memory_space<vmem>>, vector<8x32xf32>,
    %c0_90 = arith.constant 0 : index
    %c0_91 = arith.constant 0 : index
    %c0_92 = arith.constant 0 : index
    %247 = vector.load %arg4[%c0_90, %c0_91, %c0_92] : memref<2x8x32xf32, #tpu.memory_space<vmem>>, vector<1x8x32xf32>
    %248 = vector.shape_cast %247 : vector<1x8x32xf32> to vector<8x32xf32>
    %249 = vector.shape_cast %245 : vector<8x32xf32> to vector<1x8x32xf32>
    tpu.vector_store %arg4[%c0_90, %c0_91, %c0_92], %249 {strides = array<i32>} : memref<2x8x32xf32, #tpu.memory_space<vmem>>, vector<1x8x32xf32>,
    %c0_93 = arith.constant 0 : index
    %c0_94 = arith.constant 0 : index
    %250 = vector.load %arg5[%c0_93, %c0_94] : memref<64x32xf32, #tpu.memory_space<vmem>>, vector<64x32xf32>
    %c1_95 = arith.constant 1 : index
    %c0_96 = arith.constant 0 : index
    %c0_97 = arith.constant 0 : index
    %c0_98 = arith.constant 0 : index
    %251 = vector.load %arg1[%c1_95, %c0_96, %c0_97, %c0_98] : memref<2x3x32x32xf32, #tpu.memory_space<vmem>>, vector<1x1x32x32xf32>
    %252 = vector.shape_cast %251 : vector<1x1x32x32xf32> to vector<32x32xf32>
    %c1_99 = arith.constant 1 : index
    %c1_100 = arith.constant 1 : index
    %c0_101 = arith.constant 0 : index
    %c0_102 = arith.constant 0 : index
    %253 = vector.load %arg1[%c1_99, %c1_100, %c0_101, %c0_102] : memref<2x3x32x32xf32, #tpu.memory_space<vmem>>, vector<1x1x32x32xf32>
    %254 = vector.shape_cast %253 : vector<1x1x32x32xf32> to vector<32x32xf32>
    %c1_103 = arith.constant 1 : index
    %c2_104 = arith.constant 2 : index
    %c0_105 = arith.constant 0 : index
    %c0_106 = arith.constant 0 : index
    %255 = vector.load %arg1[%c1_103, %c2_104, %c0_105, %c0_106] : memref<2x3x32x32xf32, #tpu.memory_space<vmem>>, vector<1x1x32x32xf32>
    %256 = vector.shape_cast %255 : vector<1x1x32x32xf32> to vector<32x32xf32>
    %c1_107 = arith.constant 1 : index
    %c0_108 = arith.constant 0 : index
    %c0_109 = arith.constant 0 : index
    %c0_110 = arith.constant 0 : index
    %257 = vector.load %arg2[%c1_107, %c0_108, %c0_109, %c0_110] : memref<2x3x32x32xf32, #tpu.memory_space<vmem>>, vector<1x1x32x32xf32>
    %258 = vector.shape_cast %257 : vector<1x1x32x32xf32> to vector<32x32xf32>
    %c1_111 = arith.constant 1 : index
    %c1_112 = arith.constant 1 : index
    %c0_113 = arith.constant 0 : index
    %c0_114 = arith.constant 0 : index
    %259 = vector.load %arg2[%c1_111, %c1_112, %c0_113, %c0_114] : memref<2x3x32x32xf32, #tpu.memory_space<vmem>>, vector<1x1x32x32xf32>
    %260 = vector.shape_cast %259 : vector<1x1x32x32xf32> to vector<32x32xf32>
    %c1_115 = arith.constant 1 : index
    %c2_116 = arith.constant 2 : index
    %c0_117 = arith.constant 0 : index
    %c0_118 = arith.constant 0 : index
    %261 = vector.load %arg2[%c1_115, %c2_116, %c0_117, %c0_118] : memref<2x3x32x32xf32, #tpu.memory_space<vmem>>, vector<1x1x32x32xf32>
    %262 = vector.shape_cast %261 : vector<1x1x32x32xf32> to vector<32x32xf32>
    %c1_119 = arith.constant 1 : index
    %c0_120 = arith.constant 0 : index
    %c0_121 = arith.constant 0 : index
    %c0_122 = arith.constant 0 : index
    %263 = vector.load %arg3[%c1_119, %c0_120, %c0_121, %c0_122] : memref<2x4x1x32xf32, #tpu.memory_space<vmem>>, vector<1x1x1x32xf32>
    %264 = vector.shape_cast %263 : vector<1x1x1x32xf32> to vector<1x32xf32>
    %c1_123 = arith.constant 1 : index
    %c1_124 = arith.constant 1 : index
    %c0_125 = arith.constant 0 : index
    %c0_126 = arith.constant 0 : index
    %265 = vector.load %arg3[%c1_123, %c1_124, %c0_125, %c0_126] : memref<2x4x1x32xf32, #tpu.memory_space<vmem>>, vector<1x1x1x32xf32>
    %266 = vector.shape_cast %265 : vector<1x1x1x32xf32> to vector<1x32xf32>
    %c1_127 = arith.constant 1 : index
    %c2_128 = arith.constant 2 : index
    %c0_129 = arith.constant 0 : index
    %c0_130 = arith.constant 0 : index
    %267 = vector.load %arg3[%c1_127, %c2_128, %c0_129, %c0_130] : memref<2x4x1x32xf32, #tpu.memory_space<vmem>>, vector<1x1x1x32xf32>
    %268 = vector.shape_cast %267 : vector<1x1x1x32xf32> to vector<1x32xf32>
    %c1_131 = arith.constant 1 : index
    %c3_132 = arith.constant 3 : index
    %c0_133 = arith.constant 0 : index
    %c0_134 = arith.constant 0 : index
    %269 = vector.load %arg3[%c1_131, %c3_132, %c0_133, %c0_134] : memref<2x4x1x32xf32, #tpu.memory_space<vmem>>, vector<1x1x1x32xf32>
    %270 = vector.shape_cast %269 : vector<1x1x1x32xf32> to vector<1x32xf32>
    %cst_135 = arith.constant dense<0.000000e+00> : vector<64x32xf32>
    %271 = tpu.matmul %250, %252, %cst_135 {dimension_numbers = #tpu.dot_dimension_numbers<[1], [0], [0], [1], [0, 0, 1, 1], [], []>} : vector<64x32xf32>, vector<32x32xf32>, vector<64x32xf32> -> vector<64x32xf32>
    %272 = vector.broadcast %264 : vector<1x32xf32> to vector<64x32xf32>
    %273 = arith.addf %271, %272 : vector<64x32xf32>
    %cst_136 = arith.constant dense<0.000000e+00> : vector<64x32xf32>
    %274 = tpu.matmul %250, %254, %cst_136 {dimension_numbers = #tpu.dot_dimension_numbers<[1], [0], [0], [1], [0, 0, 1, 1], [], []>} : vector<64x32xf32>, vector<32x32xf32>, vector<64x32xf32> -> vector<64x32xf32>
    %275 = vector.broadcast %266 : vector<1x32xf32> to vector<64x32xf32>
    %276 = arith.addf %274, %275 : vector<64x32xf32>
    %cst_137 = arith.constant dense<0.000000e+00> : vector<64x32xf32>
    %277 = tpu.matmul %250, %256, %cst_137 {dimension_numbers = #tpu.dot_dimension_numbers<[1], [0], [0], [1], [0, 0, 1, 1], [], []>} : vector<64x32xf32>, vector<32x32xf32>, vector<64x32xf32> -> vector<64x32xf32>
    %278 = vector.broadcast %268 : vector<1x32xf32> to vector<64x32xf32>
    %279 = arith.addf %277, %278 : vector<64x32xf32>
    %cst_138 = arith.constant 0.000000e+00 : f32
    %280 = vector.broadcast %cst_138 : f32 to vector<8x32xf32>
    %cst_139 = arith.constant dense<0.000000e+00> : vector<8x32xf32>
    %281 = tpu.matmul %280, %258, %cst_139 {dimension_numbers = #tpu.dot_dimension_numbers<[1], [0], [0], [1], [0, 0, 1, 1], [], []>} : vector<8x32xf32>, vector<32x32xf32>, vector<8x32xf32> -> vector<8x32xf32>
    %cst_140 = arith.constant dense<0.000000e+00> : vector<8x32xf32>
    %282 = tpu.matmul %280, %260, %cst_140 {dimension_numbers = #tpu.dot_dimension_numbers<[1], [0], [0], [1], [0, 0, 1, 1], [], []>} : vector<8x32xf32>, vector<32x32xf32>, vector<8x32xf32> -> vector<8x32xf32>
    %cst_141 = arith.constant dense<0.000000e+00> : vector<8x32xf32>
    %283 = tpu.matmul %280, %262, %cst_141 {dimension_numbers = #tpu.dot_dimension_numbers<[1], [0], [0], [1], [0, 0, 1, 1], [], []>} : vector<8x32xf32>, vector<32x32xf32>, vector<8x32xf32> -> vector<8x32xf32>
    %284 = vector.extract_strided_slice %273 {offsets = [0, 0], sizes = [8, 32], strides = [1, 1]} : vector<64x32xf32> to vector<8x32xf32>
    %285 = arith.addf %284, %281 : vector<8x32xf32>
    %286 = arith.negf %285 : vector<8x32xf32>
    %287 = math.exp %286 : vector<8x32xf32>
    %cst_142 = arith.constant 1.000000e+00 : f32
    %288 = vector.broadcast %cst_142 : f32 to vector<8x32xf32>
    %289 = arith.addf %288, %287 : vector<8x32xf32>
    %290 = arith.divf %288, %289 : vector<8x32xf32>
    %291 = vector.extract_strided_slice %276 {offsets = [0, 0], sizes = [8, 32], strides = [1, 1]} : vector<64x32xf32> to vector<8x32xf32>
    %292 = arith.addf %291, %282 : vector<8x32xf32>
    %293 = arith.negf %292 : vector<8x32xf32>
    %294 = math.exp %293 : vector<8x32xf32>
    %cst_143 = arith.constant 1.000000e+00 : f32
    %295 = vector.broadcast %cst_143 : f32 to vector<8x32xf32>
    %296 = arith.addf %295, %294 : vector<8x32xf32>
    %297 = arith.divf %295, %296 : vector<8x32xf32>
    %298 = vector.extract_strided_slice %279 {offsets = [0, 0], sizes = [8, 32], strides = [1, 1]} : vector<64x32xf32> to vector<8x32xf32>
    %299 = vector.broadcast %270 : vector<1x32xf32> to vector<8x32xf32>
    %300 = arith.addf %283, %299 : vector<8x32xf32>
    %301 = arith.mulf %290, %300 : vector<8x32xf32>
    %302 = arith.addf %298, %301 : vector<8x32xf32>
    %303 = math.tanh %302 : vector<8x32xf32>
    %304 = arith.subf %280, %303 : vector<8x32xf32>
    %305 = arith.mulf %297, %304 : vector<8x32xf32>
    %306 = arith.addf %303, %305 : vector<8x32xf32>
    %cst_144 = arith.constant dense<0.000000e+00> : vector<8x32xf32>
    %307 = tpu.matmul %306, %258, %cst_144 {dimension_numbers = #tpu.dot_dimension_numbers<[1], [0], [0], [1], [0, 0, 1, 1], [], []>} : vector<8x32xf32>, vector<32x32xf32>, vector<8x32xf32> -> vector<8x32xf32>
    %cst_145 = arith.constant dense<0.000000e+00> : vector<8x32xf32>
    %308 = tpu.matmul %306, %260, %cst_145 {dimension_numbers = #tpu.dot_dimension_numbers<[1], [0], [0], [1], [0, 0, 1, 1], [], []>} : vector<8x32xf32>, vector<32x32xf32>, vector<8x32xf32> -> vector<8x32xf32>
    %cst_146 = arith.constant dense<0.000000e+00> : vector<8x32xf32>
    %309 = tpu.matmul %306, %262, %cst_146 {dimension_numbers = #tpu.dot_dimension_numbers<[1], [0], [0], [1], [0, 0, 1, 1], [], []>} : vector<8x32xf32>, vector<32x32xf32>, vector<8x32xf32> -> vector<8x32xf32>
    %310 = vector.extract_strided_slice %273 {offsets = [8, 0], sizes = [8, 32], strides = [1, 1]} : vector<64x32xf32> to vector<8x32xf32>
    %311 = arith.addf %310, %307 : vector<8x32xf32>
    %312 = arith.negf %311 : vector<8x32xf32>
    %313 = math.exp %312 : vector<8x32xf32>
    %cst_147 = arith.constant 1.000000e+00 : f32
    %314 = vector.broadcast %cst_147 : f32 to vector<8x32xf32>
    %315 = arith.addf %314, %313 : vector<8x32xf32>
    %316 = arith.divf %314, %315 : vector<8x32xf32>
    %317 = vector.extract_strided_slice %276 {offsets = [8, 0], sizes = [8, 32], strides = [1, 1]} : vector<64x32xf32> to vector<8x32xf32>
    %318 = arith.addf %317, %308 : vector<8x32xf32>
    %319 = arith.negf %318 : vector<8x32xf32>
    %320 = math.exp %319 : vector<8x32xf32>
    %cst_148 = arith.constant 1.000000e+00 : f32
    %321 = vector.broadcast %cst_148 : f32 to vector<8x32xf32>
    %322 = arith.addf %321, %320 : vector<8x32xf32>
    %323 = arith.divf %321, %322 : vector<8x32xf32>
    %324 = vector.extract_strided_slice %279 {offsets = [8, 0], sizes = [8, 32], strides = [1, 1]} : vector<64x32xf32> to vector<8x32xf32>
    %325 = vector.broadcast %270 : vector<1x32xf32> to vector<8x32xf32>
    %326 = arith.addf %309, %325 : vector<8x32xf32>
    %327 = arith.mulf %316, %326 : vector<8x32xf32>
    %328 = arith.addf %324, %327 : vector<8x32xf32>
    %329 = math.tanh %328 : vector<8x32xf32>
    %330 = arith.subf %306, %329 : vector<8x32xf32>
    %331 = arith.mulf %323, %330 : vector<8x32xf32>
    %332 = arith.addf %329, %331 : vector<8x32xf32>
    %cst_149 = arith.constant dense<0.000000e+00> : vector<8x32xf32>
    %333 = tpu.matmul %332, %258, %cst_149 {dimension_numbers = #tpu.dot_dimension_numbers<[1], [0], [0], [1], [0, 0, 1, 1], [], []>} : vector<8x32xf32>, vector<32x32xf32>, vector<8x32xf32> -> vector<8x32xf32>
    %cst_150 = arith.constant dense<0.000000e+00> : vector<8x32xf32>
    %334 = tpu.matmul %332, %260, %cst_150 {dimension_numbers = #tpu.dot_dimension_numbers<[1], [0], [0], [1], [0, 0, 1, 1], [], []>} : vector<8x32xf32>, vector<32x32xf32>, vector<8x32xf32> -> vector<8x32xf32>
    %cst_151 = arith.constant dense<0.000000e+00> : vector<8x32xf32>
    %335 = tpu.matmul %332, %262, %cst_151 {dimension_numbers = #tpu.dot_dimension_numbers<[1], [0], [0], [1], [0, 0, 1, 1], [], []>} : vector<8x32xf32>, vector<32x32xf32>, vector<8x32xf32> -> vector<8x32xf32>
    %336 = vector.extract_strided_slice %273 {offsets = [16, 0], sizes = [8, 32], strides = [1, 1]} : vector<64x32xf32> to vector<8x32xf32>
    %337 = arith.addf %336, %333 : vector<8x32xf32>
    %338 = arith.negf %337 : vector<8x32xf32>
    %339 = math.exp %338 : vector<8x32xf32>
    %cst_152 = arith.constant 1.000000e+00 : f32
    %340 = vector.broadcast %cst_152 : f32 to vector<8x32xf32>
    %341 = arith.addf %340, %339 : vector<8x32xf32>
    %342 = arith.divf %340, %341 : vector<8x32xf32>
    %343 = vector.extract_strided_slice %276 {offsets = [16, 0], sizes = [8, 32], strides = [1, 1]} : vector<64x32xf32> to vector<8x32xf32>
    %344 = arith.addf %343, %334 : vector<8x32xf32>
    %345 = arith.negf %344 : vector<8x32xf32>
    %346 = math.exp %345 : vector<8x32xf32>
    %cst_153 = arith.constant 1.000000e+00 : f32
    %347 = vector.broadcast %cst_153 : f32 to vector<8x32xf32>
    %348 = arith.addf %347, %346 : vector<8x32xf32>
    %349 = arith.divf %347, %348 : vector<8x32xf32>
    %350 = vector.extract_strided_slice %279 {offsets = [16, 0], sizes = [8, 32], strides = [1, 1]} : vector<64x32xf32> to vector<8x32xf32>
    %351 = vector.broadcast %270 : vector<1x32xf32> to vector<8x32xf32>
    %352 = arith.addf %335, %351 : vector<8x32xf32>
    %353 = arith.mulf %342, %352 : vector<8x32xf32>
    %354 = arith.addf %350, %353 : vector<8x32xf32>
    %355 = math.tanh %354 : vector<8x32xf32>
    %356 = arith.subf %332, %355 : vector<8x32xf32>
    %357 = arith.mulf %349, %356 : vector<8x32xf32>
    %358 = arith.addf %355, %357 : vector<8x32xf32>
    %cst_154 = arith.constant dense<0.000000e+00> : vector<8x32xf32>
    %359 = tpu.matmul %358, %258, %cst_154 {dimension_numbers = #tpu.dot_dimension_numbers<[1], [0], [0], [1], [0, 0, 1, 1], [], []>} : vector<8x32xf32>, vector<32x32xf32>, vector<8x32xf32> -> vector<8x32xf32>
    %cst_155 = arith.constant dense<0.000000e+00> : vector<8x32xf32>
    %360 = tpu.matmul %358, %260, %cst_155 {dimension_numbers = #tpu.dot_dimension_numbers<[1], [0], [0], [1], [0, 0, 1, 1], [], []>} : vector<8x32xf32>, vector<32x32xf32>, vector<8x32xf32> -> vector<8x32xf32>
    %cst_156 = arith.constant dense<0.000000e+00> : vector<8x32xf32>
    %361 = tpu.matmul %358, %262, %cst_156 {dimension_numbers = #tpu.dot_dimension_numbers<[1], [0], [0], [1], [0, 0, 1, 1], [], []>} : vector<8x32xf32>, vector<32x32xf32>, vector<8x32xf32> -> vector<8x32xf32>
    %362 = vector.extract_strided_slice %273 {offsets = [24, 0], sizes = [8, 32], strides = [1, 1]} : vector<64x32xf32> to vector<8x32xf32>
    %363 = arith.addf %362, %359 : vector<8x32xf32>
    %364 = arith.negf %363 : vector<8x32xf32>
    %365 = math.exp %364 : vector<8x32xf32>
    %cst_157 = arith.constant 1.000000e+00 : f32
    %366 = vector.broadcast %cst_157 : f32 to vector<8x32xf32>
    %367 = arith.addf %366, %365 : vector<8x32xf32>
    %368 = arith.divf %366, %367 : vector<8x32xf32>
    %369 = vector.extract_strided_slice %276 {offsets = [24, 0], sizes = [8, 32], strides = [1, 1]} : vector<64x32xf32> to vector<8x32xf32>
    %370 = arith.addf %369, %360 : vector<8x32xf32>
    %371 = arith.negf %370 : vector<8x32xf32>
    %372 = math.exp %371 : vector<8x32xf32>
    %cst_158 = arith.constant 1.000000e+00 : f32
    %373 = vector.broadcast %cst_158 : f32 to vector<8x32xf32>
    %374 = arith.addf %373, %372 : vector<8x32xf32>
    %375 = arith.divf %373, %374 : vector<8x32xf32>
    %376 = vector.extract_strided_slice %279 {offsets = [24, 0], sizes = [8, 32], strides = [1, 1]} : vector<64x32xf32> to vector<8x32xf32>
    %377 = vector.broadcast %270 : vector<1x32xf32> to vector<8x32xf32>
    %378 = arith.addf %361, %377 : vector<8x32xf32>
    %379 = arith.mulf %368, %378 : vector<8x32xf32>
    %380 = arith.addf %376, %379 : vector<8x32xf32>
    %381 = math.tanh %380 : vector<8x32xf32>
    %382 = arith.subf %358, %381 : vector<8x32xf32>
    %383 = arith.mulf %375, %382 : vector<8x32xf32>
    %384 = arith.addf %381, %383 : vector<8x32xf32>
    %cst_159 = arith.constant dense<0.000000e+00> : vector<8x32xf32>
    %385 = tpu.matmul %384, %258, %cst_159 {dimension_numbers = #tpu.dot_dimension_numbers<[1], [0], [0], [1], [0, 0, 1, 1], [], []>} : vector<8x32xf32>, vector<32x32xf32>, vector<8x32xf32> -> vector<8x32xf32>
    %cst_160 = arith.constant dense<0.000000e+00> : vector<8x32xf32>
    %386 = tpu.matmul %384, %260, %cst_160 {dimension_numbers = #tpu.dot_dimension_numbers<[1], [0], [0], [1], [0, 0, 1, 1], [], []>} : vector<8x32xf32>, vector<32x32xf32>, vector<8x32xf32> -> vector<8x32xf32>
    %cst_161 = arith.constant dense<0.000000e+00> : vector<8x32xf32>
    %387 = tpu.matmul %384, %262, %cst_161 {dimension_numbers = #tpu.dot_dimension_numbers<[1], [0], [0], [1], [0, 0, 1, 1], [], []>} : vector<8x32xf32>, vector<32x32xf32>, vector<8x32xf32> -> vector<8x32xf32>
    %388 = vector.extract_strided_slice %273 {offsets = [32, 0], sizes = [8, 32], strides = [1, 1]} : vector<64x32xf32> to vector<8x32xf32>
    %389 = arith.addf %388, %385 : vector<8x32xf32>
    %390 = arith.negf %389 : vector<8x32xf32>
    %391 = math.exp %390 : vector<8x32xf32>
    %cst_162 = arith.constant 1.000000e+00 : f32
    %392 = vector.broadcast %cst_162 : f32 to vector<8x32xf32>
    %393 = arith.addf %392, %391 : vector<8x32xf32>
    %394 = arith.divf %392, %393 : vector<8x32xf32>
    %395 = vector.extract_strided_slice %276 {offsets = [32, 0], sizes = [8, 32], strides = [1, 1]} : vector<64x32xf32> to vector<8x32xf32>
    %396 = arith.addf %395, %386 : vector<8x32xf32>
    %397 = arith.negf %396 : vector<8x32xf32>
    %398 = math.exp %397 : vector<8x32xf32>
    %cst_163 = arith.constant 1.000000e+00 : f32
    %399 = vector.broadcast %cst_163 : f32 to vector<8x32xf32>
    %400 = arith.addf %399, %398 : vector<8x32xf32>
    %401 = arith.divf %399, %400 : vector<8x32xf32>
    %402 = vector.extract_strided_slice %279 {offsets = [32, 0], sizes = [8, 32], strides = [1, 1]} : vector<64x32xf32> to vector<8x32xf32>
    %403 = vector.broadcast %270 : vector<1x32xf32> to vector<8x32xf32>
    %404 = arith.addf %387, %403 : vector<8x32xf32>
    %405 = arith.mulf %394, %404 : vector<8x32xf32>
    %406 = arith.addf %402, %405 : vector<8x32xf32>
    %407 = math.tanh %406 : vector<8x32xf32>
    %408 = arith.subf %384, %407 : vector<8x32xf32>
    %409 = arith.mulf %401, %408 : vector<8x32xf32>
    %410 = arith.addf %407, %409 : vector<8x32xf32>
    %cst_164 = arith.constant dense<0.000000e+00> : vector<8x32xf32>
    %411 = tpu.matmul %410, %258, %cst_164 {dimension_numbers = #tpu.dot_dimension_numbers<[1], [0], [0], [1], [0, 0, 1, 1], [], []>} : vector<8x32xf32>, vector<32x32xf32>, vector<8x32xf32> -> vector<8x32xf32>
    %cst_165 = arith.constant dense<0.000000e+00> : vector<8x32xf32>
    %412 = tpu.matmul %410, %260, %cst_165 {dimension_numbers = #tpu.dot_dimension_numbers<[1], [0], [0], [1], [0, 0, 1, 1], [], []>} : vector<8x32xf32>, vector<32x32xf32>, vector<8x32xf32> -> vector<8x32xf32>
    %cst_166 = arith.constant dense<0.000000e+00> : vector<8x32xf32>
    %413 = tpu.matmul %410, %262, %cst_166 {dimension_numbers = #tpu.dot_dimension_numbers<[1], [0], [0], [1], [0, 0, 1, 1], [], []>} : vector<8x32xf32>, vector<32x32xf32>, vector<8x32xf32> -> vector<8x32xf32>
    %414 = vector.extract_strided_slice %273 {offsets = [40, 0], sizes = [8, 32], strides = [1, 1]} : vector<64x32xf32> to vector<8x32xf32>
    %415 = arith.addf %414, %411 : vector<8x32xf32>
    %416 = arith.negf %415 : vector<8x32xf32>
    %417 = math.exp %416 : vector<8x32xf32>
    %cst_167 = arith.constant 1.000000e+00 : f32
    %418 = vector.broadcast %cst_167 : f32 to vector<8x32xf32>
    %419 = arith.addf %418, %417 : vector<8x32xf32>
    %420 = arith.divf %418, %419 : vector<8x32xf32>
    %421 = vector.extract_strided_slice %276 {offsets = [40, 0], sizes = [8, 32], strides = [1, 1]} : vector<64x32xf32> to vector<8x32xf32>
    %422 = arith.addf %421, %412 : vector<8x32xf32>
    %423 = arith.negf %422 : vector<8x32xf32>
    %424 = math.exp %423 : vector<8x32xf32>
    %cst_168 = arith.constant 1.000000e+00 : f32
    %425 = vector.broadcast %cst_168 : f32 to vector<8x32xf32>
    %426 = arith.addf %425, %424 : vector<8x32xf32>
    %427 = arith.divf %425, %426 : vector<8x32xf32>
    %428 = vector.extract_strided_slice %279 {offsets = [40, 0], sizes = [8, 32], strides = [1, 1]} : vector<64x32xf32> to vector<8x32xf32>
    %429 = vector.broadcast %270 : vector<1x32xf32> to vector<8x32xf32>
    %430 = arith.addf %413, %429 : vector<8x32xf32>
    %431 = arith.mulf %420, %430 : vector<8x32xf32>
    %432 = arith.addf %428, %431 : vector<8x32xf32>
    %433 = math.tanh %432 : vector<8x32xf32>
    %434 = arith.subf %410, %433 : vector<8x32xf32>
    %435 = arith.mulf %427, %434 : vector<8x32xf32>
    %436 = arith.addf %433, %435 : vector<8x32xf32>
    %cst_169 = arith.constant dense<0.000000e+00> : vector<8x32xf32>
    %437 = tpu.matmul %436, %258, %cst_169 {dimension_numbers = #tpu.dot_dimension_numbers<[1], [0], [0], [1], [0, 0, 1, 1], [], []>} : vector<8x32xf32>, vector<32x32xf32>, vector<8x32xf32> -> vector<8x32xf32>
    %cst_170 = arith.constant dense<0.000000e+00> : vector<8x32xf32>
    %438 = tpu.matmul %436, %260, %cst_170 {dimension_numbers = #tpu.dot_dimension_numbers<[1], [0], [0], [1], [0, 0, 1, 1], [], []>} : vector<8x32xf32>, vector<32x32xf32>, vector<8x32xf32> -> vector<8x32xf32>
    %cst_171 = arith.constant dense<0.000000e+00> : vector<8x32xf32>
    %439 = tpu.matmul %436, %262, %cst_171 {dimension_numbers = #tpu.dot_dimension_numbers<[1], [0], [0], [1], [0, 0, 1, 1], [], []>} : vector<8x32xf32>, vector<32x32xf32>, vector<8x32xf32> -> vector<8x32xf32>
    %440 = vector.extract_strided_slice %273 {offsets = [48, 0], sizes = [8, 32], strides = [1, 1]} : vector<64x32xf32> to vector<8x32xf32>
    %441 = arith.addf %440, %437 : vector<8x32xf32>
    %442 = arith.negf %441 : vector<8x32xf32>
    %443 = math.exp %442 : vector<8x32xf32>
    %cst_172 = arith.constant 1.000000e+00 : f32
    %444 = vector.broadcast %cst_172 : f32 to vector<8x32xf32>
    %445 = arith.addf %444, %443 : vector<8x32xf32>
    %446 = arith.divf %444, %445 : vector<8x32xf32>
    %447 = vector.extract_strided_slice %276 {offsets = [48, 0], sizes = [8, 32], strides = [1, 1]} : vector<64x32xf32> to vector<8x32xf32>
    %448 = arith.addf %447, %438 : vector<8x32xf32>
    %449 = arith.negf %448 : vector<8x32xf32>
    %450 = math.exp %449 : vector<8x32xf32>
    %cst_173 = arith.constant 1.000000e+00 : f32
    %451 = vector.broadcast %cst_173 : f32 to vector<8x32xf32>
    %452 = arith.addf %451, %450 : vector<8x32xf32>
    %453 = arith.divf %451, %452 : vector<8x32xf32>
    %454 = vector.extract_strided_slice %279 {offsets = [48, 0], sizes = [8, 32], strides = [1, 1]} : vector<64x32xf32> to vector<8x32xf32>
    %455 = vector.broadcast %270 : vector<1x32xf32> to vector<8x32xf32>
    %456 = arith.addf %439, %455 : vector<8x32xf32>
    %457 = arith.mulf %446, %456 : vector<8x32xf32>
    %458 = arith.addf %454, %457 : vector<8x32xf32>
    %459 = math.tanh %458 : vector<8x32xf32>
    %460 = arith.subf %436, %459 : vector<8x32xf32>
    %461 = arith.mulf %453, %460 : vector<8x32xf32>
    %462 = arith.addf %459, %461 : vector<8x32xf32>
    %cst_174 = arith.constant dense<0.000000e+00> : vector<8x32xf32>
    %463 = tpu.matmul %462, %258, %cst_174 {dimension_numbers = #tpu.dot_dimension_numbers<[1], [0], [0], [1], [0, 0, 1, 1], [], []>} : vector<8x32xf32>, vector<32x32xf32>, vector<8x32xf32> -> vector<8x32xf32>
    %cst_175 = arith.constant dense<0.000000e+00> : vector<8x32xf32>
    %464 = tpu.matmul %462, %260, %cst_175 {dimension_numbers = #tpu.dot_dimension_numbers<[1], [0], [0], [1], [0, 0, 1, 1], [], []>} : vector<8x32xf32>, vector<32x32xf32>, vector<8x32xf32> -> vector<8x32xf32>
    %cst_176 = arith.constant dense<0.000000e+00> : vector<8x32xf32>
    %465 = tpu.matmul %462, %262, %cst_176 {dimension_numbers = #tpu.dot_dimension_numbers<[1], [0], [0], [1], [0, 0, 1, 1], [], []>} : vector<8x32xf32>, vector<32x32xf32>, vector<8x32xf32> -> vector<8x32xf32>
    %466 = vector.extract_strided_slice %273 {offsets = [56, 0], sizes = [8, 32], strides = [1, 1]} : vector<64x32xf32> to vector<8x32xf32>
    %467 = arith.addf %466, %463 : vector<8x32xf32>
    %468 = arith.negf %467 : vector<8x32xf32>
    %469 = math.exp %468 : vector<8x32xf32>
    %cst_177 = arith.constant 1.000000e+00 : f32
    %470 = vector.broadcast %cst_177 : f32 to vector<8x32xf32>
    %471 = arith.addf %470, %469 : vector<8x32xf32>
    %472 = arith.divf %470, %471 : vector<8x32xf32>
    %473 = vector.extract_strided_slice %276 {offsets = [56, 0], sizes = [8, 32], strides = [1, 1]} : vector<64x32xf32> to vector<8x32xf32>
    %474 = arith.addf %473, %464 : vector<8x32xf32>
    %475 = arith.negf %474 : vector<8x32xf32>
    %476 = math.exp %475 : vector<8x32xf32>
    %cst_178 = arith.constant 1.000000e+00 : f32
    %477 = vector.broadcast %cst_178 : f32 to vector<8x32xf32>
    %478 = arith.addf %477, %476 : vector<8x32xf32>
    %479 = arith.divf %477, %478 : vector<8x32xf32>
    %480 = vector.extract_strided_slice %279 {offsets = [56, 0], sizes = [8, 32], strides = [1, 1]} : vector<64x32xf32> to vector<8x32xf32>
    %481 = vector.broadcast %270 : vector<1x32xf32> to vector<8x32xf32>
    %482 = arith.addf %465, %481 : vector<8x32xf32>
    %483 = arith.mulf %472, %482 : vector<8x32xf32>
    %484 = arith.addf %480, %483 : vector<8x32xf32>
    %485 = math.tanh %484 : vector<8x32xf32>
    %486 = arith.subf %462, %485 : vector<8x32xf32>
    %487 = arith.mulf %479, %486 : vector<8x32xf32>
    %488 = arith.addf %485, %487 : vector<8x32xf32>
    %c1_179 = arith.constant 1 : index
    %c0_180 = arith.constant 0 : index
    %c0_181 = arith.constant 0 : index
    %489 = vector.load %arg4[%c1_179, %c0_180, %c0_181] : memref<2x8x32xf32, #tpu.memory_space<vmem>>, vector<1x8x32xf32>
    %490 = vector.shape_cast %489 : vector<1x8x32xf32> to vector<8x32xf32>
    %491 = vector.shape_cast %488 : vector<8x32xf32> to vector<1x8x32xf32>
    tpu.vector_store %arg4[%c1_179, %c0_180, %c0_181], %491 {strides = array<i32>} : memref<2x8x32xf32, #tpu.memory_space<vmem>>, vector<1x8x32xf32>,
    return
  }
}

module attributes {stable_mosaic.version = 11 : i64} {
  func.func @_fuser_kernel(%arg0: memref<4x32xf32, #tpu.memory_space<vmem>>, %arg1: memref<4x64xf32, #tpu.memory_space<vmem>>, %arg2: memref<32x32xf32, #tpu.memory_space<vmem>>, %arg3: memref<64x32xf32, #tpu.memory_space<vmem>>, %arg4: memref<1x32xf32, #tpu.memory_space<vmem>>, %arg5: memref<4x32xf32, #tpu.memory_space<vmem>>) attributes {dimension_semantics = [], scalar_prefetch = 0 : i64, scratch_operands = 0 : i64, tpu.core_type = #tpu.core_type<tc>} {
    %c0 = arith.constant 0 : index
    %c0_0 = arith.constant 0 : index
    %0 = vector.load %arg0[%c0, %c0_0] : memref<4x32xf32, #tpu.memory_space<vmem>>, vector<4x32xf32>
    %c0_1 = arith.constant 0 : index
    %c0_2 = arith.constant 0 : index
    %1 = vector.load %arg2[%c0_1, %c0_2] : memref<32x32xf32, #tpu.memory_space<vmem>>, vector<32x32xf32>
    %cst = arith.constant dense<0.000000e+00> : vector<4x32xf32>
    %2 = tpu.matmul %0, %1, %cst {dimension_numbers = #tpu.dot_dimension_numbers<[1], [0], [0], [1], [0, 0, 1, 1], [], []>} : vector<4x32xf32>, vector<32x32xf32>, vector<4x32xf32> -> vector<4x32xf32>
    %c0_3 = arith.constant 0 : index
    %c0_4 = arith.constant 0 : index
    %3 = vector.load %arg1[%c0_3, %c0_4] : memref<4x64xf32, #tpu.memory_space<vmem>>, vector<4x64xf32>
    %c0_5 = arith.constant 0 : index
    %c0_6 = arith.constant 0 : index
    %4 = vector.load %arg3[%c0_5, %c0_6] : memref<64x32xf32, #tpu.memory_space<vmem>>, vector<64x32xf32>
    %cst_7 = arith.constant dense<0.000000e+00> : vector<4x32xf32>
    %5 = tpu.matmul %3, %4, %cst_7 {dimension_numbers = #tpu.dot_dimension_numbers<[1], [0], [0], [1], [0, 0, 1, 1], [], []>} : vector<4x64xf32>, vector<64x32xf32>, vector<4x32xf32> -> vector<4x32xf32>
    %6 = arith.addf %2, %5 : vector<4x32xf32>
    %c0_8 = arith.constant 0 : index
    %c0_9 = arith.constant 0 : index
    %7 = vector.load %arg4[%c0_8, %c0_9] : memref<1x32xf32, #tpu.memory_space<vmem>>, vector<1x32xf32>
    %8 = vector.broadcast %7 : vector<1x32xf32> to vector<4x32xf32>
    %9 = arith.addf %6, %8 : vector<4x32xf32>
    %c0_10 = arith.constant 0 : index
    %c0_11 = arith.constant 0 : index
    %10 = vector.load %arg5[%c0_10, %c0_11] : memref<4x32xf32, #tpu.memory_space<vmem>>, vector<4x32xf32>
    tpu.vector_store %arg5[%c0_10, %c0_11], %9 {strides = array<i32>} : memref<4x32xf32, #tpu.memory_space<vmem>>, vector<4x32xf32>,
    return
  }
}

module attributes {stable_mosaic.version = 11 : i64} {
  func.func @_gru_stack_kernel(%arg0: memref<56x32xf32, #tpu.memory_space<vmem>>, %arg1: memref<2x3x32x32xf32, #tpu.memory_space<vmem>>, %arg2: memref<2x3x32x32xf32, #tpu.memory_space<vmem>>, %arg3: memref<2x4x1x32xf32, #tpu.memory_space<vmem>>, %arg4: memref<2x8x32xf32, #tpu.memory_space<vmem>>, %arg5: memref<56x32xf32, #tpu.memory_space<vmem>>) attributes {dimension_semantics = [], scalar_prefetch = 0 : i64, scratch_operands = 1 : i64, tpu.core_type = #tpu.core_type<tc>} {
    %c0 = arith.constant 0 : index
    %c0_0 = arith.constant 0 : index
    %0 = vector.load %arg0[%c0, %c0_0] : memref<56x32xf32, #tpu.memory_space<vmem>>, vector<56x32xf32>
    %c0_1 = arith.constant 0 : index
    %c0_2 = arith.constant 0 : index
    %c0_3 = arith.constant 0 : index
    %c0_4 = arith.constant 0 : index
    %1 = vector.load %arg1[%c0_1, %c0_2, %c0_3, %c0_4] : memref<2x3x32x32xf32, #tpu.memory_space<vmem>>, vector<1x1x32x32xf32>
    %2 = vector.shape_cast %1 : vector<1x1x32x32xf32> to vector<32x32xf32>
    %c0_5 = arith.constant 0 : index
    %c1 = arith.constant 1 : index
    %c0_6 = arith.constant 0 : index
    %c0_7 = arith.constant 0 : index
    %3 = vector.load %arg1[%c0_5, %c1, %c0_6, %c0_7] : memref<2x3x32x32xf32, #tpu.memory_space<vmem>>, vector<1x1x32x32xf32>
    %4 = vector.shape_cast %3 : vector<1x1x32x32xf32> to vector<32x32xf32>
    %c0_8 = arith.constant 0 : index
    %c2 = arith.constant 2 : index
    %c0_9 = arith.constant 0 : index
    %c0_10 = arith.constant 0 : index
    %5 = vector.load %arg1[%c0_8, %c2, %c0_9, %c0_10] : memref<2x3x32x32xf32, #tpu.memory_space<vmem>>, vector<1x1x32x32xf32>
    %6 = vector.shape_cast %5 : vector<1x1x32x32xf32> to vector<32x32xf32>
    %c0_11 = arith.constant 0 : index
    %c0_12 = arith.constant 0 : index
    %c0_13 = arith.constant 0 : index
    %c0_14 = arith.constant 0 : index
    %7 = vector.load %arg2[%c0_11, %c0_12, %c0_13, %c0_14] : memref<2x3x32x32xf32, #tpu.memory_space<vmem>>, vector<1x1x32x32xf32>
    %8 = vector.shape_cast %7 : vector<1x1x32x32xf32> to vector<32x32xf32>
    %c0_15 = arith.constant 0 : index
    %c1_16 = arith.constant 1 : index
    %c0_17 = arith.constant 0 : index
    %c0_18 = arith.constant 0 : index
    %9 = vector.load %arg2[%c0_15, %c1_16, %c0_17, %c0_18] : memref<2x3x32x32xf32, #tpu.memory_space<vmem>>, vector<1x1x32x32xf32>
    %10 = vector.shape_cast %9 : vector<1x1x32x32xf32> to vector<32x32xf32>
    %c0_19 = arith.constant 0 : index
    %c2_20 = arith.constant 2 : index
    %c0_21 = arith.constant 0 : index
    %c0_22 = arith.constant 0 : index
    %11 = vector.load %arg2[%c0_19, %c2_20, %c0_21, %c0_22] : memref<2x3x32x32xf32, #tpu.memory_space<vmem>>, vector<1x1x32x32xf32>
    %12 = vector.shape_cast %11 : vector<1x1x32x32xf32> to vector<32x32xf32>
    %c0_23 = arith.constant 0 : index
    %c0_24 = arith.constant 0 : index
    %c0_25 = arith.constant 0 : index
    %c0_26 = arith.constant 0 : index
    %13 = vector.load %arg3[%c0_23, %c0_24, %c0_25, %c0_26] : memref<2x4x1x32xf32, #tpu.memory_space<vmem>>, vector<1x1x1x32xf32>
    %14 = vector.shape_cast %13 : vector<1x1x1x32xf32> to vector<1x32xf32>
    %c0_27 = arith.constant 0 : index
    %c1_28 = arith.constant 1 : index
    %c0_29 = arith.constant 0 : index
    %c0_30 = arith.constant 0 : index
    %15 = vector.load %arg3[%c0_27, %c1_28, %c0_29, %c0_30] : memref<2x4x1x32xf32, #tpu.memory_space<vmem>>, vector<1x1x1x32xf32>
    %16 = vector.shape_cast %15 : vector<1x1x1x32xf32> to vector<1x32xf32>
    %c0_31 = arith.constant 0 : index
    %c2_32 = arith.constant 2 : index
    %c0_33 = arith.constant 0 : index
    %c0_34 = arith.constant 0 : index
    %17 = vector.load %arg3[%c0_31, %c2_32, %c0_33, %c0_34] : memref<2x4x1x32xf32, #tpu.memory_space<vmem>>, vector<1x1x1x32xf32>
    %18 = vector.shape_cast %17 : vector<1x1x1x32xf32> to vector<1x32xf32>
    %c0_35 = arith.constant 0 : index
    %c3 = arith.constant 3 : index
    %c0_36 = arith.constant 0 : index
    %c0_37 = arith.constant 0 : index
    %19 = vector.load %arg3[%c0_35, %c3, %c0_36, %c0_37] : memref<2x4x1x32xf32, #tpu.memory_space<vmem>>, vector<1x1x1x32xf32>
    %20 = vector.shape_cast %19 : vector<1x1x1x32xf32> to vector<1x32xf32>
    %cst = arith.constant dense<0.000000e+00> : vector<56x32xf32>
    %21 = tpu.matmul %0, %2, %cst {dimension_numbers = #tpu.dot_dimension_numbers<[1], [0], [0], [1], [0, 0, 1, 1], [], []>} : vector<56x32xf32>, vector<32x32xf32>, vector<56x32xf32> -> vector<56x32xf32>
    %22 = vector.broadcast %14 : vector<1x32xf32> to vector<56x32xf32>
    %23 = arith.addf %21, %22 : vector<56x32xf32>
    %cst_38 = arith.constant dense<0.000000e+00> : vector<56x32xf32>
    %24 = tpu.matmul %0, %4, %cst_38 {dimension_numbers = #tpu.dot_dimension_numbers<[1], [0], [0], [1], [0, 0, 1, 1], [], []>} : vector<56x32xf32>, vector<32x32xf32>, vector<56x32xf32> -> vector<56x32xf32>
    %25 = vector.broadcast %16 : vector<1x32xf32> to vector<56x32xf32>
    %26 = arith.addf %24, %25 : vector<56x32xf32>
    %cst_39 = arith.constant dense<0.000000e+00> : vector<56x32xf32>
    %27 = tpu.matmul %0, %6, %cst_39 {dimension_numbers = #tpu.dot_dimension_numbers<[1], [0], [0], [1], [0, 0, 1, 1], [], []>} : vector<56x32xf32>, vector<32x32xf32>, vector<56x32xf32> -> vector<56x32xf32>
    %28 = vector.broadcast %18 : vector<1x32xf32> to vector<56x32xf32>
    %29 = arith.addf %27, %28 : vector<56x32xf32>
    %cst_40 = arith.constant 0.000000e+00 : f32
    %30 = vector.broadcast %cst_40 : f32 to vector<8x32xf32>
    %cst_41 = arith.constant dense<0.000000e+00> : vector<8x32xf32>
    %31 = tpu.matmul %30, %8, %cst_41 {dimension_numbers = #tpu.dot_dimension_numbers<[1], [0], [0], [1], [0, 0, 1, 1], [], []>} : vector<8x32xf32>, vector<32x32xf32>, vector<8x32xf32> -> vector<8x32xf32>
    %cst_42 = arith.constant dense<0.000000e+00> : vector<8x32xf32>
    %32 = tpu.matmul %30, %10, %cst_42 {dimension_numbers = #tpu.dot_dimension_numbers<[1], [0], [0], [1], [0, 0, 1, 1], [], []>} : vector<8x32xf32>, vector<32x32xf32>, vector<8x32xf32> -> vector<8x32xf32>
    %cst_43 = arith.constant dense<0.000000e+00> : vector<8x32xf32>
    %33 = tpu.matmul %30, %12, %cst_43 {dimension_numbers = #tpu.dot_dimension_numbers<[1], [0], [0], [1], [0, 0, 1, 1], [], []>} : vector<8x32xf32>, vector<32x32xf32>, vector<8x32xf32> -> vector<8x32xf32>
    %34 = vector.extract_strided_slice %23 {offsets = [0, 0], sizes = [8, 32], strides = [1, 1]} : vector<56x32xf32> to vector<8x32xf32>
    %35 = arith.addf %34, %31 : vector<8x32xf32>
    %36 = arith.negf %35 : vector<8x32xf32>
    %37 = math.exp %36 : vector<8x32xf32>
    %cst_44 = arith.constant 1.000000e+00 : f32
    %38 = vector.broadcast %cst_44 : f32 to vector<8x32xf32>
    %39 = arith.addf %38, %37 : vector<8x32xf32>
    %40 = arith.divf %38, %39 : vector<8x32xf32>
    %41 = vector.extract_strided_slice %26 {offsets = [0, 0], sizes = [8, 32], strides = [1, 1]} : vector<56x32xf32> to vector<8x32xf32>
    %42 = arith.addf %41, %32 : vector<8x32xf32>
    %43 = arith.negf %42 : vector<8x32xf32>
    %44 = math.exp %43 : vector<8x32xf32>
    %cst_45 = arith.constant 1.000000e+00 : f32
    %45 = vector.broadcast %cst_45 : f32 to vector<8x32xf32>
    %46 = arith.addf %45, %44 : vector<8x32xf32>
    %47 = arith.divf %45, %46 : vector<8x32xf32>
    %48 = vector.extract_strided_slice %29 {offsets = [0, 0], sizes = [8, 32], strides = [1, 1]} : vector<56x32xf32> to vector<8x32xf32>
    %49 = vector.broadcast %20 : vector<1x32xf32> to vector<8x32xf32>
    %50 = arith.addf %33, %49 : vector<8x32xf32>
    %51 = arith.mulf %40, %50 : vector<8x32xf32>
    %52 = arith.addf %48, %51 : vector<8x32xf32>
    %53 = math.tanh %52 : vector<8x32xf32>
    %54 = arith.subf %30, %53 : vector<8x32xf32>
    %55 = arith.mulf %47, %54 : vector<8x32xf32>
    %56 = arith.addf %53, %55 : vector<8x32xf32>
    %c0_46 = arith.constant 0 : index
    %c0_47 = arith.constant 0 : index
    %57 = vector.load %arg5[%c0_46, %c0_47] : memref<56x32xf32, #tpu.memory_space<vmem>>, vector<8x32xf32>
    tpu.vector_store %arg5[%c0_46, %c0_47], %56 {strides = array<i32>} : memref<56x32xf32, #tpu.memory_space<vmem>>, vector<8x32xf32>,
    %cst_48 = arith.constant dense<0.000000e+00> : vector<8x32xf32>
    %58 = tpu.matmul %56, %8, %cst_48 {dimension_numbers = #tpu.dot_dimension_numbers<[1], [0], [0], [1], [0, 0, 1, 1], [], []>} : vector<8x32xf32>, vector<32x32xf32>, vector<8x32xf32> -> vector<8x32xf32>
    %cst_49 = arith.constant dense<0.000000e+00> : vector<8x32xf32>
    %59 = tpu.matmul %56, %10, %cst_49 {dimension_numbers = #tpu.dot_dimension_numbers<[1], [0], [0], [1], [0, 0, 1, 1], [], []>} : vector<8x32xf32>, vector<32x32xf32>, vector<8x32xf32> -> vector<8x32xf32>
    %cst_50 = arith.constant dense<0.000000e+00> : vector<8x32xf32>
    %60 = tpu.matmul %56, %12, %cst_50 {dimension_numbers = #tpu.dot_dimension_numbers<[1], [0], [0], [1], [0, 0, 1, 1], [], []>} : vector<8x32xf32>, vector<32x32xf32>, vector<8x32xf32> -> vector<8x32xf32>
    %61 = vector.extract_strided_slice %23 {offsets = [8, 0], sizes = [8, 32], strides = [1, 1]} : vector<56x32xf32> to vector<8x32xf32>
    %62 = arith.addf %61, %58 : vector<8x32xf32>
    %63 = arith.negf %62 : vector<8x32xf32>
    %64 = math.exp %63 : vector<8x32xf32>
    %cst_51 = arith.constant 1.000000e+00 : f32
    %65 = vector.broadcast %cst_51 : f32 to vector<8x32xf32>
    %66 = arith.addf %65, %64 : vector<8x32xf32>
    %67 = arith.divf %65, %66 : vector<8x32xf32>
    %68 = vector.extract_strided_slice %26 {offsets = [8, 0], sizes = [8, 32], strides = [1, 1]} : vector<56x32xf32> to vector<8x32xf32>
    %69 = arith.addf %68, %59 : vector<8x32xf32>
    %70 = arith.negf %69 : vector<8x32xf32>
    %71 = math.exp %70 : vector<8x32xf32>
    %cst_52 = arith.constant 1.000000e+00 : f32
    %72 = vector.broadcast %cst_52 : f32 to vector<8x32xf32>
    %73 = arith.addf %72, %71 : vector<8x32xf32>
    %74 = arith.divf %72, %73 : vector<8x32xf32>
    %75 = vector.extract_strided_slice %29 {offsets = [8, 0], sizes = [8, 32], strides = [1, 1]} : vector<56x32xf32> to vector<8x32xf32>
    %76 = vector.broadcast %20 : vector<1x32xf32> to vector<8x32xf32>
    %77 = arith.addf %60, %76 : vector<8x32xf32>
    %78 = arith.mulf %67, %77 : vector<8x32xf32>
    %79 = arith.addf %75, %78 : vector<8x32xf32>
    %80 = math.tanh %79 : vector<8x32xf32>
    %81 = arith.subf %56, %80 : vector<8x32xf32>
    %82 = arith.mulf %74, %81 : vector<8x32xf32>
    %83 = arith.addf %80, %82 : vector<8x32xf32>
    %c8 = arith.constant 8 : index
    %c0_53 = arith.constant 0 : index
    %84 = vector.load %arg5[%c8, %c0_53] : memref<56x32xf32, #tpu.memory_space<vmem>>, vector<8x32xf32>
    tpu.vector_store %arg5[%c8, %c0_53], %83 {strides = array<i32>} : memref<56x32xf32, #tpu.memory_space<vmem>>, vector<8x32xf32>,
    %cst_54 = arith.constant dense<0.000000e+00> : vector<8x32xf32>
    %85 = tpu.matmul %83, %8, %cst_54 {dimension_numbers = #tpu.dot_dimension_numbers<[1], [0], [0], [1], [0, 0, 1, 1], [], []>} : vector<8x32xf32>, vector<32x32xf32>, vector<8x32xf32> -> vector<8x32xf32>
    %cst_55 = arith.constant dense<0.000000e+00> : vector<8x32xf32>
    %86 = tpu.matmul %83, %10, %cst_55 {dimension_numbers = #tpu.dot_dimension_numbers<[1], [0], [0], [1], [0, 0, 1, 1], [], []>} : vector<8x32xf32>, vector<32x32xf32>, vector<8x32xf32> -> vector<8x32xf32>
    %cst_56 = arith.constant dense<0.000000e+00> : vector<8x32xf32>
    %87 = tpu.matmul %83, %12, %cst_56 {dimension_numbers = #tpu.dot_dimension_numbers<[1], [0], [0], [1], [0, 0, 1, 1], [], []>} : vector<8x32xf32>, vector<32x32xf32>, vector<8x32xf32> -> vector<8x32xf32>
    %88 = vector.extract_strided_slice %23 {offsets = [16, 0], sizes = [8, 32], strides = [1, 1]} : vector<56x32xf32> to vector<8x32xf32>
    %89 = arith.addf %88, %85 : vector<8x32xf32>
    %90 = arith.negf %89 : vector<8x32xf32>
    %91 = math.exp %90 : vector<8x32xf32>
    %cst_57 = arith.constant 1.000000e+00 : f32
    %92 = vector.broadcast %cst_57 : f32 to vector<8x32xf32>
    %93 = arith.addf %92, %91 : vector<8x32xf32>
    %94 = arith.divf %92, %93 : vector<8x32xf32>
    %95 = vector.extract_strided_slice %26 {offsets = [16, 0], sizes = [8, 32], strides = [1, 1]} : vector<56x32xf32> to vector<8x32xf32>
    %96 = arith.addf %95, %86 : vector<8x32xf32>
    %97 = arith.negf %96 : vector<8x32xf32>
    %98 = math.exp %97 : vector<8x32xf32>
    %cst_58 = arith.constant 1.000000e+00 : f32
    %99 = vector.broadcast %cst_58 : f32 to vector<8x32xf32>
    %100 = arith.addf %99, %98 : vector<8x32xf32>
    %101 = arith.divf %99, %100 : vector<8x32xf32>
    %102 = vector.extract_strided_slice %29 {offsets = [16, 0], sizes = [8, 32], strides = [1, 1]} : vector<56x32xf32> to vector<8x32xf32>
    %103 = vector.broadcast %20 : vector<1x32xf32> to vector<8x32xf32>
    %104 = arith.addf %87, %103 : vector<8x32xf32>
    %105 = arith.mulf %94, %104 : vector<8x32xf32>
    %106 = arith.addf %102, %105 : vector<8x32xf32>
    %107 = math.tanh %106 : vector<8x32xf32>
    %108 = arith.subf %83, %107 : vector<8x32xf32>
    %109 = arith.mulf %101, %108 : vector<8x32xf32>
    %110 = arith.addf %107, %109 : vector<8x32xf32>
    %c16 = arith.constant 16 : index
    %c0_59 = arith.constant 0 : index
    %111 = vector.load %arg5[%c16, %c0_59] : memref<56x32xf32, #tpu.memory_space<vmem>>, vector<8x32xf32>
    tpu.vector_store %arg5[%c16, %c0_59], %110 {strides = array<i32>} : memref<56x32xf32, #tpu.memory_space<vmem>>, vector<8x32xf32>,
    %cst_60 = arith.constant dense<0.000000e+00> : vector<8x32xf32>
    %112 = tpu.matmul %110, %8, %cst_60 {dimension_numbers = #tpu.dot_dimension_numbers<[1], [0], [0], [1], [0, 0, 1, 1], [], []>} : vector<8x32xf32>, vector<32x32xf32>, vector<8x32xf32> -> vector<8x32xf32>
    %cst_61 = arith.constant dense<0.000000e+00> : vector<8x32xf32>
    %113 = tpu.matmul %110, %10, %cst_61 {dimension_numbers = #tpu.dot_dimension_numbers<[1], [0], [0], [1], [0, 0, 1, 1], [], []>} : vector<8x32xf32>, vector<32x32xf32>, vector<8x32xf32> -> vector<8x32xf32>
    %cst_62 = arith.constant dense<0.000000e+00> : vector<8x32xf32>
    %114 = tpu.matmul %110, %12, %cst_62 {dimension_numbers = #tpu.dot_dimension_numbers<[1], [0], [0], [1], [0, 0, 1, 1], [], []>} : vector<8x32xf32>, vector<32x32xf32>, vector<8x32xf32> -> vector<8x32xf32>
    %115 = vector.extract_strided_slice %23 {offsets = [24, 0], sizes = [8, 32], strides = [1, 1]} : vector<56x32xf32> to vector<8x32xf32>
    %116 = arith.addf %115, %112 : vector<8x32xf32>
    %117 = arith.negf %116 : vector<8x32xf32>
    %118 = math.exp %117 : vector<8x32xf32>
    %cst_63 = arith.constant 1.000000e+00 : f32
    %119 = vector.broadcast %cst_63 : f32 to vector<8x32xf32>
    %120 = arith.addf %119, %118 : vector<8x32xf32>
    %121 = arith.divf %119, %120 : vector<8x32xf32>
    %122 = vector.extract_strided_slice %26 {offsets = [24, 0], sizes = [8, 32], strides = [1, 1]} : vector<56x32xf32> to vector<8x32xf32>
    %123 = arith.addf %122, %113 : vector<8x32xf32>
    %124 = arith.negf %123 : vector<8x32xf32>
    %125 = math.exp %124 : vector<8x32xf32>
    %cst_64 = arith.constant 1.000000e+00 : f32
    %126 = vector.broadcast %cst_64 : f32 to vector<8x32xf32>
    %127 = arith.addf %126, %125 : vector<8x32xf32>
    %128 = arith.divf %126, %127 : vector<8x32xf32>
    %129 = vector.extract_strided_slice %29 {offsets = [24, 0], sizes = [8, 32], strides = [1, 1]} : vector<56x32xf32> to vector<8x32xf32>
    %130 = vector.broadcast %20 : vector<1x32xf32> to vector<8x32xf32>
    %131 = arith.addf %114, %130 : vector<8x32xf32>
    %132 = arith.mulf %121, %131 : vector<8x32xf32>
    %133 = arith.addf %129, %132 : vector<8x32xf32>
    %134 = math.tanh %133 : vector<8x32xf32>
    %135 = arith.subf %110, %134 : vector<8x32xf32>
    %136 = arith.mulf %128, %135 : vector<8x32xf32>
    %137 = arith.addf %134, %136 : vector<8x32xf32>
    %c24 = arith.constant 24 : index
    %c0_65 = arith.constant 0 : index
    %138 = vector.load %arg5[%c24, %c0_65] : memref<56x32xf32, #tpu.memory_space<vmem>>, vector<8x32xf32>
    tpu.vector_store %arg5[%c24, %c0_65], %137 {strides = array<i32>} : memref<56x32xf32, #tpu.memory_space<vmem>>, vector<8x32xf32>,
    %cst_66 = arith.constant dense<0.000000e+00> : vector<8x32xf32>
    %139 = tpu.matmul %137, %8, %cst_66 {dimension_numbers = #tpu.dot_dimension_numbers<[1], [0], [0], [1], [0, 0, 1, 1], [], []>} : vector<8x32xf32>, vector<32x32xf32>, vector<8x32xf32> -> vector<8x32xf32>
    %cst_67 = arith.constant dense<0.000000e+00> : vector<8x32xf32>
    %140 = tpu.matmul %137, %10, %cst_67 {dimension_numbers = #tpu.dot_dimension_numbers<[1], [0], [0], [1], [0, 0, 1, 1], [], []>} : vector<8x32xf32>, vector<32x32xf32>, vector<8x32xf32> -> vector<8x32xf32>
    %cst_68 = arith.constant dense<0.000000e+00> : vector<8x32xf32>
    %141 = tpu.matmul %137, %12, %cst_68 {dimension_numbers = #tpu.dot_dimension_numbers<[1], [0], [0], [1], [0, 0, 1, 1], [], []>} : vector<8x32xf32>, vector<32x32xf32>, vector<8x32xf32> -> vector<8x32xf32>
    %142 = vector.extract_strided_slice %23 {offsets = [32, 0], sizes = [8, 32], strides = [1, 1]} : vector<56x32xf32> to vector<8x32xf32>
    %143 = arith.addf %142, %139 : vector<8x32xf32>
    %144 = arith.negf %143 : vector<8x32xf32>
    %145 = math.exp %144 : vector<8x32xf32>
    %cst_69 = arith.constant 1.000000e+00 : f32
    %146 = vector.broadcast %cst_69 : f32 to vector<8x32xf32>
    %147 = arith.addf %146, %145 : vector<8x32xf32>
    %148 = arith.divf %146, %147 : vector<8x32xf32>
    %149 = vector.extract_strided_slice %26 {offsets = [32, 0], sizes = [8, 32], strides = [1, 1]} : vector<56x32xf32> to vector<8x32xf32>
    %150 = arith.addf %149, %140 : vector<8x32xf32>
    %151 = arith.negf %150 : vector<8x32xf32>
    %152 = math.exp %151 : vector<8x32xf32>
    %cst_70 = arith.constant 1.000000e+00 : f32
    %153 = vector.broadcast %cst_70 : f32 to vector<8x32xf32>
    %154 = arith.addf %153, %152 : vector<8x32xf32>
    %155 = arith.divf %153, %154 : vector<8x32xf32>
    %156 = vector.extract_strided_slice %29 {offsets = [32, 0], sizes = [8, 32], strides = [1, 1]} : vector<56x32xf32> to vector<8x32xf32>
    %157 = vector.broadcast %20 : vector<1x32xf32> to vector<8x32xf32>
    %158 = arith.addf %141, %157 : vector<8x32xf32>
    %159 = arith.mulf %148, %158 : vector<8x32xf32>
    %160 = arith.addf %156, %159 : vector<8x32xf32>
    %161 = math.tanh %160 : vector<8x32xf32>
    %162 = arith.subf %137, %161 : vector<8x32xf32>
    %163 = arith.mulf %155, %162 : vector<8x32xf32>
    %164 = arith.addf %161, %163 : vector<8x32xf32>
    %c32 = arith.constant 32 : index
    %c0_71 = arith.constant 0 : index
    %165 = vector.load %arg5[%c32, %c0_71] : memref<56x32xf32, #tpu.memory_space<vmem>>, vector<8x32xf32>
    tpu.vector_store %arg5[%c32, %c0_71], %164 {strides = array<i32>} : memref<56x32xf32, #tpu.memory_space<vmem>>, vector<8x32xf32>,
    %cst_72 = arith.constant dense<0.000000e+00> : vector<8x32xf32>
    %166 = tpu.matmul %164, %8, %cst_72 {dimension_numbers = #tpu.dot_dimension_numbers<[1], [0], [0], [1], [0, 0, 1, 1], [], []>} : vector<8x32xf32>, vector<32x32xf32>, vector<8x32xf32> -> vector<8x32xf32>
    %cst_73 = arith.constant dense<0.000000e+00> : vector<8x32xf32>
    %167 = tpu.matmul %164, %10, %cst_73 {dimension_numbers = #tpu.dot_dimension_numbers<[1], [0], [0], [1], [0, 0, 1, 1], [], []>} : vector<8x32xf32>, vector<32x32xf32>, vector<8x32xf32> -> vector<8x32xf32>
    %cst_74 = arith.constant dense<0.000000e+00> : vector<8x32xf32>
    %168 = tpu.matmul %164, %12, %cst_74 {dimension_numbers = #tpu.dot_dimension_numbers<[1], [0], [0], [1], [0, 0, 1, 1], [], []>} : vector<8x32xf32>, vector<32x32xf32>, vector<8x32xf32> -> vector<8x32xf32>
    %169 = vector.extract_strided_slice %23 {offsets = [40, 0], sizes = [8, 32], strides = [1, 1]} : vector<56x32xf32> to vector<8x32xf32>
    %170 = arith.addf %169, %166 : vector<8x32xf32>
    %171 = arith.negf %170 : vector<8x32xf32>
    %172 = math.exp %171 : vector<8x32xf32>
    %cst_75 = arith.constant 1.000000e+00 : f32
    %173 = vector.broadcast %cst_75 : f32 to vector<8x32xf32>
    %174 = arith.addf %173, %172 : vector<8x32xf32>
    %175 = arith.divf %173, %174 : vector<8x32xf32>
    %176 = vector.extract_strided_slice %26 {offsets = [40, 0], sizes = [8, 32], strides = [1, 1]} : vector<56x32xf32> to vector<8x32xf32>
    %177 = arith.addf %176, %167 : vector<8x32xf32>
    %178 = arith.negf %177 : vector<8x32xf32>
    %179 = math.exp %178 : vector<8x32xf32>
    %cst_76 = arith.constant 1.000000e+00 : f32
    %180 = vector.broadcast %cst_76 : f32 to vector<8x32xf32>
    %181 = arith.addf %180, %179 : vector<8x32xf32>
    %182 = arith.divf %180, %181 : vector<8x32xf32>
    %183 = vector.extract_strided_slice %29 {offsets = [40, 0], sizes = [8, 32], strides = [1, 1]} : vector<56x32xf32> to vector<8x32xf32>
    %184 = vector.broadcast %20 : vector<1x32xf32> to vector<8x32xf32>
    %185 = arith.addf %168, %184 : vector<8x32xf32>
    %186 = arith.mulf %175, %185 : vector<8x32xf32>
    %187 = arith.addf %183, %186 : vector<8x32xf32>
    %188 = math.tanh %187 : vector<8x32xf32>
    %189 = arith.subf %164, %188 : vector<8x32xf32>
    %190 = arith.mulf %182, %189 : vector<8x32xf32>
    %191 = arith.addf %188, %190 : vector<8x32xf32>
    %c40 = arith.constant 40 : index
    %c0_77 = arith.constant 0 : index
    %192 = vector.load %arg5[%c40, %c0_77] : memref<56x32xf32, #tpu.memory_space<vmem>>, vector<8x32xf32>
    tpu.vector_store %arg5[%c40, %c0_77], %191 {strides = array<i32>} : memref<56x32xf32, #tpu.memory_space<vmem>>, vector<8x32xf32>,
    %cst_78 = arith.constant dense<0.000000e+00> : vector<8x32xf32>
    %193 = tpu.matmul %191, %8, %cst_78 {dimension_numbers = #tpu.dot_dimension_numbers<[1], [0], [0], [1], [0, 0, 1, 1], [], []>} : vector<8x32xf32>, vector<32x32xf32>, vector<8x32xf32> -> vector<8x32xf32>
    %cst_79 = arith.constant dense<0.000000e+00> : vector<8x32xf32>
    %194 = tpu.matmul %191, %10, %cst_79 {dimension_numbers = #tpu.dot_dimension_numbers<[1], [0], [0], [1], [0, 0, 1, 1], [], []>} : vector<8x32xf32>, vector<32x32xf32>, vector<8x32xf32> -> vector<8x32xf32>
    %cst_80 = arith.constant dense<0.000000e+00> : vector<8x32xf32>
    %195 = tpu.matmul %191, %12, %cst_80 {dimension_numbers = #tpu.dot_dimension_numbers<[1], [0], [0], [1], [0, 0, 1, 1], [], []>} : vector<8x32xf32>, vector<32x32xf32>, vector<8x32xf32> -> vector<8x32xf32>
    %196 = vector.extract_strided_slice %23 {offsets = [48, 0], sizes = [8, 32], strides = [1, 1]} : vector<56x32xf32> to vector<8x32xf32>
    %197 = arith.addf %196, %193 : vector<8x32xf32>
    %198 = arith.negf %197 : vector<8x32xf32>
    %199 = math.exp %198 : vector<8x32xf32>
    %cst_81 = arith.constant 1.000000e+00 : f32
    %200 = vector.broadcast %cst_81 : f32 to vector<8x32xf32>
    %201 = arith.addf %200, %199 : vector<8x32xf32>
    %202 = arith.divf %200, %201 : vector<8x32xf32>
    %203 = vector.extract_strided_slice %26 {offsets = [48, 0], sizes = [8, 32], strides = [1, 1]} : vector<56x32xf32> to vector<8x32xf32>
    %204 = arith.addf %203, %194 : vector<8x32xf32>
    %205 = arith.negf %204 : vector<8x32xf32>
    %206 = math.exp %205 : vector<8x32xf32>
    %cst_82 = arith.constant 1.000000e+00 : f32
    %207 = vector.broadcast %cst_82 : f32 to vector<8x32xf32>
    %208 = arith.addf %207, %206 : vector<8x32xf32>
    %209 = arith.divf %207, %208 : vector<8x32xf32>
    %210 = vector.extract_strided_slice %29 {offsets = [48, 0], sizes = [8, 32], strides = [1, 1]} : vector<56x32xf32> to vector<8x32xf32>
    %211 = vector.broadcast %20 : vector<1x32xf32> to vector<8x32xf32>
    %212 = arith.addf %195, %211 : vector<8x32xf32>
    %213 = arith.mulf %202, %212 : vector<8x32xf32>
    %214 = arith.addf %210, %213 : vector<8x32xf32>
    %215 = math.tanh %214 : vector<8x32xf32>
    %216 = arith.subf %191, %215 : vector<8x32xf32>
    %217 = arith.mulf %209, %216 : vector<8x32xf32>
    %218 = arith.addf %215, %217 : vector<8x32xf32>
    %c48 = arith.constant 48 : index
    %c0_83 = arith.constant 0 : index
    %219 = vector.load %arg5[%c48, %c0_83] : memref<56x32xf32, #tpu.memory_space<vmem>>, vector<8x32xf32>
    tpu.vector_store %arg5[%c48, %c0_83], %218 {strides = array<i32>} : memref<56x32xf32, #tpu.memory_space<vmem>>, vector<8x32xf32>,
    %c0_84 = arith.constant 0 : index
    %c0_85 = arith.constant 0 : index
    %c0_86 = arith.constant 0 : index
    %220 = vector.load %arg4[%c0_84, %c0_85, %c0_86] : memref<2x8x32xf32, #tpu.memory_space<vmem>>, vector<1x8x32xf32>
    %221 = vector.shape_cast %220 : vector<1x8x32xf32> to vector<8x32xf32>
    %222 = vector.shape_cast %218 : vector<8x32xf32> to vector<1x8x32xf32>
    tpu.vector_store %arg4[%c0_84, %c0_85, %c0_86], %222 {strides = array<i32>} : memref<2x8x32xf32, #tpu.memory_space<vmem>>, vector<1x8x32xf32>,
    %c0_87 = arith.constant 0 : index
    %c0_88 = arith.constant 0 : index
    %223 = vector.load %arg5[%c0_87, %c0_88] : memref<56x32xf32, #tpu.memory_space<vmem>>, vector<56x32xf32>
    %c1_89 = arith.constant 1 : index
    %c0_90 = arith.constant 0 : index
    %c0_91 = arith.constant 0 : index
    %c0_92 = arith.constant 0 : index
    %224 = vector.load %arg1[%c1_89, %c0_90, %c0_91, %c0_92] : memref<2x3x32x32xf32, #tpu.memory_space<vmem>>, vector<1x1x32x32xf32>
    %225 = vector.shape_cast %224 : vector<1x1x32x32xf32> to vector<32x32xf32>
    %c1_93 = arith.constant 1 : index
    %c1_94 = arith.constant 1 : index
    %c0_95 = arith.constant 0 : index
    %c0_96 = arith.constant 0 : index
    %226 = vector.load %arg1[%c1_93, %c1_94, %c0_95, %c0_96] : memref<2x3x32x32xf32, #tpu.memory_space<vmem>>, vector<1x1x32x32xf32>
    %227 = vector.shape_cast %226 : vector<1x1x32x32xf32> to vector<32x32xf32>
    %c1_97 = arith.constant 1 : index
    %c2_98 = arith.constant 2 : index
    %c0_99 = arith.constant 0 : index
    %c0_100 = arith.constant 0 : index
    %228 = vector.load %arg1[%c1_97, %c2_98, %c0_99, %c0_100] : memref<2x3x32x32xf32, #tpu.memory_space<vmem>>, vector<1x1x32x32xf32>
    %229 = vector.shape_cast %228 : vector<1x1x32x32xf32> to vector<32x32xf32>
    %c1_101 = arith.constant 1 : index
    %c0_102 = arith.constant 0 : index
    %c0_103 = arith.constant 0 : index
    %c0_104 = arith.constant 0 : index
    %230 = vector.load %arg2[%c1_101, %c0_102, %c0_103, %c0_104] : memref<2x3x32x32xf32, #tpu.memory_space<vmem>>, vector<1x1x32x32xf32>
    %231 = vector.shape_cast %230 : vector<1x1x32x32xf32> to vector<32x32xf32>
    %c1_105 = arith.constant 1 : index
    %c1_106 = arith.constant 1 : index
    %c0_107 = arith.constant 0 : index
    %c0_108 = arith.constant 0 : index
    %232 = vector.load %arg2[%c1_105, %c1_106, %c0_107, %c0_108] : memref<2x3x32x32xf32, #tpu.memory_space<vmem>>, vector<1x1x32x32xf32>
    %233 = vector.shape_cast %232 : vector<1x1x32x32xf32> to vector<32x32xf32>
    %c1_109 = arith.constant 1 : index
    %c2_110 = arith.constant 2 : index
    %c0_111 = arith.constant 0 : index
    %c0_112 = arith.constant 0 : index
    %234 = vector.load %arg2[%c1_109, %c2_110, %c0_111, %c0_112] : memref<2x3x32x32xf32, #tpu.memory_space<vmem>>, vector<1x1x32x32xf32>
    %235 = vector.shape_cast %234 : vector<1x1x32x32xf32> to vector<32x32xf32>
    %c1_113 = arith.constant 1 : index
    %c0_114 = arith.constant 0 : index
    %c0_115 = arith.constant 0 : index
    %c0_116 = arith.constant 0 : index
    %236 = vector.load %arg3[%c1_113, %c0_114, %c0_115, %c0_116] : memref<2x4x1x32xf32, #tpu.memory_space<vmem>>, vector<1x1x1x32xf32>
    %237 = vector.shape_cast %236 : vector<1x1x1x32xf32> to vector<1x32xf32>
    %c1_117 = arith.constant 1 : index
    %c1_118 = arith.constant 1 : index
    %c0_119 = arith.constant 0 : index
    %c0_120 = arith.constant 0 : index
    %238 = vector.load %arg3[%c1_117, %c1_118, %c0_119, %c0_120] : memref<2x4x1x32xf32, #tpu.memory_space<vmem>>, vector<1x1x1x32xf32>
    %239 = vector.shape_cast %238 : vector<1x1x1x32xf32> to vector<1x32xf32>
    %c1_121 = arith.constant 1 : index
    %c2_122 = arith.constant 2 : index
    %c0_123 = arith.constant 0 : index
    %c0_124 = arith.constant 0 : index
    %240 = vector.load %arg3[%c1_121, %c2_122, %c0_123, %c0_124] : memref<2x4x1x32xf32, #tpu.memory_space<vmem>>, vector<1x1x1x32xf32>
    %241 = vector.shape_cast %240 : vector<1x1x1x32xf32> to vector<1x32xf32>
    %c1_125 = arith.constant 1 : index
    %c3_126 = arith.constant 3 : index
    %c0_127 = arith.constant 0 : index
    %c0_128 = arith.constant 0 : index
    %242 = vector.load %arg3[%c1_125, %c3_126, %c0_127, %c0_128] : memref<2x4x1x32xf32, #tpu.memory_space<vmem>>, vector<1x1x1x32xf32>
    %243 = vector.shape_cast %242 : vector<1x1x1x32xf32> to vector<1x32xf32>
    %cst_129 = arith.constant dense<0.000000e+00> : vector<56x32xf32>
    %244 = tpu.matmul %223, %225, %cst_129 {dimension_numbers = #tpu.dot_dimension_numbers<[1], [0], [0], [1], [0, 0, 1, 1], [], []>} : vector<56x32xf32>, vector<32x32xf32>, vector<56x32xf32> -> vector<56x32xf32>
    %245 = vector.broadcast %237 : vector<1x32xf32> to vector<56x32xf32>
    %246 = arith.addf %244, %245 : vector<56x32xf32>
    %cst_130 = arith.constant dense<0.000000e+00> : vector<56x32xf32>
    %247 = tpu.matmul %223, %227, %cst_130 {dimension_numbers = #tpu.dot_dimension_numbers<[1], [0], [0], [1], [0, 0, 1, 1], [], []>} : vector<56x32xf32>, vector<32x32xf32>, vector<56x32xf32> -> vector<56x32xf32>
    %248 = vector.broadcast %239 : vector<1x32xf32> to vector<56x32xf32>
    %249 = arith.addf %247, %248 : vector<56x32xf32>
    %cst_131 = arith.constant dense<0.000000e+00> : vector<56x32xf32>
    %250 = tpu.matmul %223, %229, %cst_131 {dimension_numbers = #tpu.dot_dimension_numbers<[1], [0], [0], [1], [0, 0, 1, 1], [], []>} : vector<56x32xf32>, vector<32x32xf32>, vector<56x32xf32> -> vector<56x32xf32>
    %251 = vector.broadcast %241 : vector<1x32xf32> to vector<56x32xf32>
    %252 = arith.addf %250, %251 : vector<56x32xf32>
    %cst_132 = arith.constant 0.000000e+00 : f32
    %253 = vector.broadcast %cst_132 : f32 to vector<8x32xf32>
    %cst_133 = arith.constant dense<0.000000e+00> : vector<8x32xf32>
    %254 = tpu.matmul %253, %231, %cst_133 {dimension_numbers = #tpu.dot_dimension_numbers<[1], [0], [0], [1], [0, 0, 1, 1], [], []>} : vector<8x32xf32>, vector<32x32xf32>, vector<8x32xf32> -> vector<8x32xf32>
    %cst_134 = arith.constant dense<0.000000e+00> : vector<8x32xf32>
    %255 = tpu.matmul %253, %233, %cst_134 {dimension_numbers = #tpu.dot_dimension_numbers<[1], [0], [0], [1], [0, 0, 1, 1], [], []>} : vector<8x32xf32>, vector<32x32xf32>, vector<8x32xf32> -> vector<8x32xf32>
    %cst_135 = arith.constant dense<0.000000e+00> : vector<8x32xf32>
    %256 = tpu.matmul %253, %235, %cst_135 {dimension_numbers = #tpu.dot_dimension_numbers<[1], [0], [0], [1], [0, 0, 1, 1], [], []>} : vector<8x32xf32>, vector<32x32xf32>, vector<8x32xf32> -> vector<8x32xf32>
    %257 = vector.extract_strided_slice %246 {offsets = [0, 0], sizes = [8, 32], strides = [1, 1]} : vector<56x32xf32> to vector<8x32xf32>
    %258 = arith.addf %257, %254 : vector<8x32xf32>
    %259 = arith.negf %258 : vector<8x32xf32>
    %260 = math.exp %259 : vector<8x32xf32>
    %cst_136 = arith.constant 1.000000e+00 : f32
    %261 = vector.broadcast %cst_136 : f32 to vector<8x32xf32>
    %262 = arith.addf %261, %260 : vector<8x32xf32>
    %263 = arith.divf %261, %262 : vector<8x32xf32>
    %264 = vector.extract_strided_slice %249 {offsets = [0, 0], sizes = [8, 32], strides = [1, 1]} : vector<56x32xf32> to vector<8x32xf32>
    %265 = arith.addf %264, %255 : vector<8x32xf32>
    %266 = arith.negf %265 : vector<8x32xf32>
    %267 = math.exp %266 : vector<8x32xf32>
    %cst_137 = arith.constant 1.000000e+00 : f32
    %268 = vector.broadcast %cst_137 : f32 to vector<8x32xf32>
    %269 = arith.addf %268, %267 : vector<8x32xf32>
    %270 = arith.divf %268, %269 : vector<8x32xf32>
    %271 = vector.extract_strided_slice %252 {offsets = [0, 0], sizes = [8, 32], strides = [1, 1]} : vector<56x32xf32> to vector<8x32xf32>
    %272 = vector.broadcast %243 : vector<1x32xf32> to vector<8x32xf32>
    %273 = arith.addf %256, %272 : vector<8x32xf32>
    %274 = arith.mulf %263, %273 : vector<8x32xf32>
    %275 = arith.addf %271, %274 : vector<8x32xf32>
    %276 = math.tanh %275 : vector<8x32xf32>
    %277 = arith.subf %253, %276 : vector<8x32xf32>
    %278 = arith.mulf %270, %277 : vector<8x32xf32>
    %279 = arith.addf %276, %278 : vector<8x32xf32>
    %cst_138 = arith.constant dense<0.000000e+00> : vector<8x32xf32>
    %280 = tpu.matmul %279, %231, %cst_138 {dimension_numbers = #tpu.dot_dimension_numbers<[1], [0], [0], [1], [0, 0, 1, 1], [], []>} : vector<8x32xf32>, vector<32x32xf32>, vector<8x32xf32> -> vector<8x32xf32>
    %cst_139 = arith.constant dense<0.000000e+00> : vector<8x32xf32>
    %281 = tpu.matmul %279, %233, %cst_139 {dimension_numbers = #tpu.dot_dimension_numbers<[1], [0], [0], [1], [0, 0, 1, 1], [], []>} : vector<8x32xf32>, vector<32x32xf32>, vector<8x32xf32> -> vector<8x32xf32>
    %cst_140 = arith.constant dense<0.000000e+00> : vector<8x32xf32>
    %282 = tpu.matmul %279, %235, %cst_140 {dimension_numbers = #tpu.dot_dimension_numbers<[1], [0], [0], [1], [0, 0, 1, 1], [], []>} : vector<8x32xf32>, vector<32x32xf32>, vector<8x32xf32> -> vector<8x32xf32>
    %283 = vector.extract_strided_slice %246 {offsets = [8, 0], sizes = [8, 32], strides = [1, 1]} : vector<56x32xf32> to vector<8x32xf32>
    %284 = arith.addf %283, %280 : vector<8x32xf32>
    %285 = arith.negf %284 : vector<8x32xf32>
    %286 = math.exp %285 : vector<8x32xf32>
    %cst_141 = arith.constant 1.000000e+00 : f32
    %287 = vector.broadcast %cst_141 : f32 to vector<8x32xf32>
    %288 = arith.addf %287, %286 : vector<8x32xf32>
    %289 = arith.divf %287, %288 : vector<8x32xf32>
    %290 = vector.extract_strided_slice %249 {offsets = [8, 0], sizes = [8, 32], strides = [1, 1]} : vector<56x32xf32> to vector<8x32xf32>
    %291 = arith.addf %290, %281 : vector<8x32xf32>
    %292 = arith.negf %291 : vector<8x32xf32>
    %293 = math.exp %292 : vector<8x32xf32>
    %cst_142 = arith.constant 1.000000e+00 : f32
    %294 = vector.broadcast %cst_142 : f32 to vector<8x32xf32>
    %295 = arith.addf %294, %293 : vector<8x32xf32>
    %296 = arith.divf %294, %295 : vector<8x32xf32>
    %297 = vector.extract_strided_slice %252 {offsets = [8, 0], sizes = [8, 32], strides = [1, 1]} : vector<56x32xf32> to vector<8x32xf32>
    %298 = vector.broadcast %243 : vector<1x32xf32> to vector<8x32xf32>
    %299 = arith.addf %282, %298 : vector<8x32xf32>
    %300 = arith.mulf %289, %299 : vector<8x32xf32>
    %301 = arith.addf %297, %300 : vector<8x32xf32>
    %302 = math.tanh %301 : vector<8x32xf32>
    %303 = arith.subf %279, %302 : vector<8x32xf32>
    %304 = arith.mulf %296, %303 : vector<8x32xf32>
    %305 = arith.addf %302, %304 : vector<8x32xf32>
    %cst_143 = arith.constant dense<0.000000e+00> : vector<8x32xf32>
    %306 = tpu.matmul %305, %231, %cst_143 {dimension_numbers = #tpu.dot_dimension_numbers<[1], [0], [0], [1], [0, 0, 1, 1], [], []>} : vector<8x32xf32>, vector<32x32xf32>, vector<8x32xf32> -> vector<8x32xf32>
    %cst_144 = arith.constant dense<0.000000e+00> : vector<8x32xf32>
    %307 = tpu.matmul %305, %233, %cst_144 {dimension_numbers = #tpu.dot_dimension_numbers<[1], [0], [0], [1], [0, 0, 1, 1], [], []>} : vector<8x32xf32>, vector<32x32xf32>, vector<8x32xf32> -> vector<8x32xf32>
    %cst_145 = arith.constant dense<0.000000e+00> : vector<8x32xf32>
    %308 = tpu.matmul %305, %235, %cst_145 {dimension_numbers = #tpu.dot_dimension_numbers<[1], [0], [0], [1], [0, 0, 1, 1], [], []>} : vector<8x32xf32>, vector<32x32xf32>, vector<8x32xf32> -> vector<8x32xf32>
    %309 = vector.extract_strided_slice %246 {offsets = [16, 0], sizes = [8, 32], strides = [1, 1]} : vector<56x32xf32> to vector<8x32xf32>
    %310 = arith.addf %309, %306 : vector<8x32xf32>
    %311 = arith.negf %310 : vector<8x32xf32>
    %312 = math.exp %311 : vector<8x32xf32>
    %cst_146 = arith.constant 1.000000e+00 : f32
    %313 = vector.broadcast %cst_146 : f32 to vector<8x32xf32>
    %314 = arith.addf %313, %312 : vector<8x32xf32>
    %315 = arith.divf %313, %314 : vector<8x32xf32>
    %316 = vector.extract_strided_slice %249 {offsets = [16, 0], sizes = [8, 32], strides = [1, 1]} : vector<56x32xf32> to vector<8x32xf32>
    %317 = arith.addf %316, %307 : vector<8x32xf32>
    %318 = arith.negf %317 : vector<8x32xf32>
    %319 = math.exp %318 : vector<8x32xf32>
    %cst_147 = arith.constant 1.000000e+00 : f32
    %320 = vector.broadcast %cst_147 : f32 to vector<8x32xf32>
    %321 = arith.addf %320, %319 : vector<8x32xf32>
    %322 = arith.divf %320, %321 : vector<8x32xf32>
    %323 = vector.extract_strided_slice %252 {offsets = [16, 0], sizes = [8, 32], strides = [1, 1]} : vector<56x32xf32> to vector<8x32xf32>
    %324 = vector.broadcast %243 : vector<1x32xf32> to vector<8x32xf32>
    %325 = arith.addf %308, %324 : vector<8x32xf32>
    %326 = arith.mulf %315, %325 : vector<8x32xf32>
    %327 = arith.addf %323, %326 : vector<8x32xf32>
    %328 = math.tanh %327 : vector<8x32xf32>
    %329 = arith.subf %305, %328 : vector<8x32xf32>
    %330 = arith.mulf %322, %329 : vector<8x32xf32>
    %331 = arith.addf %328, %330 : vector<8x32xf32>
    %cst_148 = arith.constant dense<0.000000e+00> : vector<8x32xf32>
    %332 = tpu.matmul %331, %231, %cst_148 {dimension_numbers = #tpu.dot_dimension_numbers<[1], [0], [0], [1], [0, 0, 1, 1], [], []>} : vector<8x32xf32>, vector<32x32xf32>, vector<8x32xf32> -> vector<8x32xf32>
    %cst_149 = arith.constant dense<0.000000e+00> : vector<8x32xf32>
    %333 = tpu.matmul %331, %233, %cst_149 {dimension_numbers = #tpu.dot_dimension_numbers<[1], [0], [0], [1], [0, 0, 1, 1], [], []>} : vector<8x32xf32>, vector<32x32xf32>, vector<8x32xf32> -> vector<8x32xf32>
    %cst_150 = arith.constant dense<0.000000e+00> : vector<8x32xf32>
    %334 = tpu.matmul %331, %235, %cst_150 {dimension_numbers = #tpu.dot_dimension_numbers<[1], [0], [0], [1], [0, 0, 1, 1], [], []>} : vector<8x32xf32>, vector<32x32xf32>, vector<8x32xf32> -> vector<8x32xf32>
    %335 = vector.extract_strided_slice %246 {offsets = [24, 0], sizes = [8, 32], strides = [1, 1]} : vector<56x32xf32> to vector<8x32xf32>
    %336 = arith.addf %335, %332 : vector<8x32xf32>
    %337 = arith.negf %336 : vector<8x32xf32>
    %338 = math.exp %337 : vector<8x32xf32>
    %cst_151 = arith.constant 1.000000e+00 : f32
    %339 = vector.broadcast %cst_151 : f32 to vector<8x32xf32>
    %340 = arith.addf %339, %338 : vector<8x32xf32>
    %341 = arith.divf %339, %340 : vector<8x32xf32>
    %342 = vector.extract_strided_slice %249 {offsets = [24, 0], sizes = [8, 32], strides = [1, 1]} : vector<56x32xf32> to vector<8x32xf32>
    %343 = arith.addf %342, %333 : vector<8x32xf32>
    %344 = arith.negf %343 : vector<8x32xf32>
    %345 = math.exp %344 : vector<8x32xf32>
    %cst_152 = arith.constant 1.000000e+00 : f32
    %346 = vector.broadcast %cst_152 : f32 to vector<8x32xf32>
    %347 = arith.addf %346, %345 : vector<8x32xf32>
    %348 = arith.divf %346, %347 : vector<8x32xf32>
    %349 = vector.extract_strided_slice %252 {offsets = [24, 0], sizes = [8, 32], strides = [1, 1]} : vector<56x32xf32> to vector<8x32xf32>
    %350 = vector.broadcast %243 : vector<1x32xf32> to vector<8x32xf32>
    %351 = arith.addf %334, %350 : vector<8x32xf32>
    %352 = arith.mulf %341, %351 : vector<8x32xf32>
    %353 = arith.addf %349, %352 : vector<8x32xf32>
    %354 = math.tanh %353 : vector<8x32xf32>
    %355 = arith.subf %331, %354 : vector<8x32xf32>
    %356 = arith.mulf %348, %355 : vector<8x32xf32>
    %357 = arith.addf %354, %356 : vector<8x32xf32>
    %cst_153 = arith.constant dense<0.000000e+00> : vector<8x32xf32>
    %358 = tpu.matmul %357, %231, %cst_153 {dimension_numbers = #tpu.dot_dimension_numbers<[1], [0], [0], [1], [0, 0, 1, 1], [], []>} : vector<8x32xf32>, vector<32x32xf32>, vector<8x32xf32> -> vector<8x32xf32>
    %cst_154 = arith.constant dense<0.000000e+00> : vector<8x32xf32>
    %359 = tpu.matmul %357, %233, %cst_154 {dimension_numbers = #tpu.dot_dimension_numbers<[1], [0], [0], [1], [0, 0, 1, 1], [], []>} : vector<8x32xf32>, vector<32x32xf32>, vector<8x32xf32> -> vector<8x32xf32>
    %cst_155 = arith.constant dense<0.000000e+00> : vector<8x32xf32>
    %360 = tpu.matmul %357, %235, %cst_155 {dimension_numbers = #tpu.dot_dimension_numbers<[1], [0], [0], [1], [0, 0, 1, 1], [], []>} : vector<8x32xf32>, vector<32x32xf32>, vector<8x32xf32> -> vector<8x32xf32>
    %361 = vector.extract_strided_slice %246 {offsets = [32, 0], sizes = [8, 32], strides = [1, 1]} : vector<56x32xf32> to vector<8x32xf32>
    %362 = arith.addf %361, %358 : vector<8x32xf32>
    %363 = arith.negf %362 : vector<8x32xf32>
    %364 = math.exp %363 : vector<8x32xf32>
    %cst_156 = arith.constant 1.000000e+00 : f32
    %365 = vector.broadcast %cst_156 : f32 to vector<8x32xf32>
    %366 = arith.addf %365, %364 : vector<8x32xf32>
    %367 = arith.divf %365, %366 : vector<8x32xf32>
    %368 = vector.extract_strided_slice %249 {offsets = [32, 0], sizes = [8, 32], strides = [1, 1]} : vector<56x32xf32> to vector<8x32xf32>
    %369 = arith.addf %368, %359 : vector<8x32xf32>
    %370 = arith.negf %369 : vector<8x32xf32>
    %371 = math.exp %370 : vector<8x32xf32>
    %cst_157 = arith.constant 1.000000e+00 : f32
    %372 = vector.broadcast %cst_157 : f32 to vector<8x32xf32>
    %373 = arith.addf %372, %371 : vector<8x32xf32>
    %374 = arith.divf %372, %373 : vector<8x32xf32>
    %375 = vector.extract_strided_slice %252 {offsets = [32, 0], sizes = [8, 32], strides = [1, 1]} : vector<56x32xf32> to vector<8x32xf32>
    %376 = vector.broadcast %243 : vector<1x32xf32> to vector<8x32xf32>
    %377 = arith.addf %360, %376 : vector<8x32xf32>
    %378 = arith.mulf %367, %377 : vector<8x32xf32>
    %379 = arith.addf %375, %378 : vector<8x32xf32>
    %380 = math.tanh %379 : vector<8x32xf32>
    %381 = arith.subf %357, %380 : vector<8x32xf32>
    %382 = arith.mulf %374, %381 : vector<8x32xf32>
    %383 = arith.addf %380, %382 : vector<8x32xf32>
    %cst_158 = arith.constant dense<0.000000e+00> : vector<8x32xf32>
    %384 = tpu.matmul %383, %231, %cst_158 {dimension_numbers = #tpu.dot_dimension_numbers<[1], [0], [0], [1], [0, 0, 1, 1], [], []>} : vector<8x32xf32>, vector<32x32xf32>, vector<8x32xf32> -> vector<8x32xf32>
    %cst_159 = arith.constant dense<0.000000e+00> : vector<8x32xf32>
    %385 = tpu.matmul %383, %233, %cst_159 {dimension_numbers = #tpu.dot_dimension_numbers<[1], [0], [0], [1], [0, 0, 1, 1], [], []>} : vector<8x32xf32>, vector<32x32xf32>, vector<8x32xf32> -> vector<8x32xf32>
    %cst_160 = arith.constant dense<0.000000e+00> : vector<8x32xf32>
    %386 = tpu.matmul %383, %235, %cst_160 {dimension_numbers = #tpu.dot_dimension_numbers<[1], [0], [0], [1], [0, 0, 1, 1], [], []>} : vector<8x32xf32>, vector<32x32xf32>, vector<8x32xf32> -> vector<8x32xf32>
    %387 = vector.extract_strided_slice %246 {offsets = [40, 0], sizes = [8, 32], strides = [1, 1]} : vector<56x32xf32> to vector<8x32xf32>
    %388 = arith.addf %387, %384 : vector<8x32xf32>
    %389 = arith.negf %388 : vector<8x32xf32>
    %390 = math.exp %389 : vector<8x32xf32>
    %cst_161 = arith.constant 1.000000e+00 : f32
    %391 = vector.broadcast %cst_161 : f32 to vector<8x32xf32>
    %392 = arith.addf %391, %390 : vector<8x32xf32>
    %393 = arith.divf %391, %392 : vector<8x32xf32>
    %394 = vector.extract_strided_slice %249 {offsets = [40, 0], sizes = [8, 32], strides = [1, 1]} : vector<56x32xf32> to vector<8x32xf32>
    %395 = arith.addf %394, %385 : vector<8x32xf32>
    %396 = arith.negf %395 : vector<8x32xf32>
    %397 = math.exp %396 : vector<8x32xf32>
    %cst_162 = arith.constant 1.000000e+00 : f32
    %398 = vector.broadcast %cst_162 : f32 to vector<8x32xf32>
    %399 = arith.addf %398, %397 : vector<8x32xf32>
    %400 = arith.divf %398, %399 : vector<8x32xf32>
    %401 = vector.extract_strided_slice %252 {offsets = [40, 0], sizes = [8, 32], strides = [1, 1]} : vector<56x32xf32> to vector<8x32xf32>
    %402 = vector.broadcast %243 : vector<1x32xf32> to vector<8x32xf32>
    %403 = arith.addf %386, %402 : vector<8x32xf32>
    %404 = arith.mulf %393, %403 : vector<8x32xf32>
    %405 = arith.addf %401, %404 : vector<8x32xf32>
    %406 = math.tanh %405 : vector<8x32xf32>
    %407 = arith.subf %383, %406 : vector<8x32xf32>
    %408 = arith.mulf %400, %407 : vector<8x32xf32>
    %409 = arith.addf %406, %408 : vector<8x32xf32>
    %cst_163 = arith.constant dense<0.000000e+00> : vector<8x32xf32>
    %410 = tpu.matmul %409, %231, %cst_163 {dimension_numbers = #tpu.dot_dimension_numbers<[1], [0], [0], [1], [0, 0, 1, 1], [], []>} : vector<8x32xf32>, vector<32x32xf32>, vector<8x32xf32> -> vector<8x32xf32>
    %cst_164 = arith.constant dense<0.000000e+00> : vector<8x32xf32>
    %411 = tpu.matmul %409, %233, %cst_164 {dimension_numbers = #tpu.dot_dimension_numbers<[1], [0], [0], [1], [0, 0, 1, 1], [], []>} : vector<8x32xf32>, vector<32x32xf32>, vector<8x32xf32> -> vector<8x32xf32>
    %cst_165 = arith.constant dense<0.000000e+00> : vector<8x32xf32>
    %412 = tpu.matmul %409, %235, %cst_165 {dimension_numbers = #tpu.dot_dimension_numbers<[1], [0], [0], [1], [0, 0, 1, 1], [], []>} : vector<8x32xf32>, vector<32x32xf32>, vector<8x32xf32> -> vector<8x32xf32>
    %413 = vector.extract_strided_slice %246 {offsets = [48, 0], sizes = [8, 32], strides = [1, 1]} : vector<56x32xf32> to vector<8x32xf32>
    %414 = arith.addf %413, %410 : vector<8x32xf32>
    %415 = arith.negf %414 : vector<8x32xf32>
    %416 = math.exp %415 : vector<8x32xf32>
    %cst_166 = arith.constant 1.000000e+00 : f32
    %417 = vector.broadcast %cst_166 : f32 to vector<8x32xf32>
    %418 = arith.addf %417, %416 : vector<8x32xf32>
    %419 = arith.divf %417, %418 : vector<8x32xf32>
    %420 = vector.extract_strided_slice %249 {offsets = [48, 0], sizes = [8, 32], strides = [1, 1]} : vector<56x32xf32> to vector<8x32xf32>
    %421 = arith.addf %420, %411 : vector<8x32xf32>
    %422 = arith.negf %421 : vector<8x32xf32>
    %423 = math.exp %422 : vector<8x32xf32>
    %cst_167 = arith.constant 1.000000e+00 : f32
    %424 = vector.broadcast %cst_167 : f32 to vector<8x32xf32>
    %425 = arith.addf %424, %423 : vector<8x32xf32>
    %426 = arith.divf %424, %425 : vector<8x32xf32>
    %427 = vector.extract_strided_slice %252 {offsets = [48, 0], sizes = [8, 32], strides = [1, 1]} : vector<56x32xf32> to vector<8x32xf32>
    %428 = vector.broadcast %243 : vector<1x32xf32> to vector<8x32xf32>
    %429 = arith.addf %412, %428 : vector<8x32xf32>
    %430 = arith.mulf %419, %429 : vector<8x32xf32>
    %431 = arith.addf %427, %430 : vector<8x32xf32>
    %432 = math.tanh %431 : vector<8x32xf32>
    %433 = arith.subf %409, %432 : vector<8x32xf32>
    %434 = arith.mulf %426, %433 : vector<8x32xf32>
    %435 = arith.addf %432, %434 : vector<8x32xf32>
    %c1_168 = arith.constant 1 : index
    %c0_169 = arith.constant 0 : index
    %c0_170 = arith.constant 0 : index
    %436 = vector.load %arg4[%c1_168, %c0_169, %c0_170] : memref<2x8x32xf32, #tpu.memory_space<vmem>>, vector<1x8x32xf32>
    %437 = vector.shape_cast %436 : vector<1x8x32xf32> to vector<8x32xf32>
    %438 = vector.shape_cast %435 : vector<8x32xf32> to vector<1x8x32xf32>
    tpu.vector_store %arg4[%c1_168, %c0_169, %c0_170], %438 {strides = array<i32>} : memref<2x8x32xf32, #tpu.memory_space<vmem>>, vector<1x8x32xf32>,
    return
  }
}

module attributes {stable_mosaic.version = 11 : i64} {
  func.func @_fuser_kernel(%arg0: memref<4x32xf32, #tpu.memory_space<vmem>>, %arg1: memref<4x32xf32, #tpu.memory_space<vmem>>, %arg2: memref<32x32xf32, #tpu.memory_space<vmem>>, %arg3: memref<32x32xf32, #tpu.memory_space<vmem>>, %arg4: memref<1x32xf32, #tpu.memory_space<vmem>>, %arg5: memref<4x32xf32, #tpu.memory_space<vmem>>) attributes {dimension_semantics = [], scalar_prefetch = 0 : i64, scratch_operands = 0 : i64, tpu.core_type = #tpu.core_type<tc>} {
    %c0 = arith.constant 0 : index
    %c0_0 = arith.constant 0 : index
    %0 = vector.load %arg0[%c0, %c0_0] : memref<4x32xf32, #tpu.memory_space<vmem>>, vector<4x32xf32>
    %c0_1 = arith.constant 0 : index
    %c0_2 = arith.constant 0 : index
    %1 = vector.load %arg2[%c0_1, %c0_2] : memref<32x32xf32, #tpu.memory_space<vmem>>, vector<32x32xf32>
    %cst = arith.constant dense<0.000000e+00> : vector<4x32xf32>
    %2 = tpu.matmul %0, %1, %cst {dimension_numbers = #tpu.dot_dimension_numbers<[1], [0], [0], [1], [0, 0, 1, 1], [], []>} : vector<4x32xf32>, vector<32x32xf32>, vector<4x32xf32> -> vector<4x32xf32>
    %c0_3 = arith.constant 0 : index
    %c0_4 = arith.constant 0 : index
    %3 = vector.load %arg1[%c0_3, %c0_4] : memref<4x32xf32, #tpu.memory_space<vmem>>, vector<4x32xf32>
    %c0_5 = arith.constant 0 : index
    %c0_6 = arith.constant 0 : index
    %4 = vector.load %arg3[%c0_5, %c0_6] : memref<32x32xf32, #tpu.memory_space<vmem>>, vector<32x32xf32>
    %cst_7 = arith.constant dense<0.000000e+00> : vector<4x32xf32>
    %5 = tpu.matmul %3, %4, %cst_7 {dimension_numbers = #tpu.dot_dimension_numbers<[1], [0], [0], [1], [0, 0, 1, 1], [], []>} : vector<4x32xf32>, vector<32x32xf32>, vector<4x32xf32> -> vector<4x32xf32>
    %6 = arith.addf %2, %5 : vector<4x32xf32>
    %c0_8 = arith.constant 0 : index
    %c0_9 = arith.constant 0 : index
    %7 = vector.load %arg4[%c0_8, %c0_9] : memref<1x32xf32, #tpu.memory_space<vmem>>, vector<1x32xf32>
    %8 = vector.broadcast %7 : vector<1x32xf32> to vector<4x32xf32>
    %9 = arith.addf %6, %8 : vector<4x32xf32>
    %c0_10 = arith.constant 0 : index
    %c0_11 = arith.constant 0 : index
    %10 = vector.load %arg5[%c0_10, %c0_11] : memref<4x32xf32, #tpu.memory_space<vmem>>, vector<4x32xf32>
    tpu.vector_store %arg5[%c0_10, %c0_11], %9 {strides = array<i32>} : memref<4x32xf32, #tpu.memory_space<vmem>>, vector<4x32xf32>,
    return
  }
}

module attributes {stable_mosaic.version = 11 : i64} {
  func.func @_fuser_kernel(%arg0: memref<60x32xf32, #tpu.memory_space<vmem>>, %arg1: memref<60x32xf32, #tpu.memory_space<vmem>>, %arg2: memref<32x32xf32, #tpu.memory_space<vmem>>, %arg3: memref<32x32xf32, #tpu.memory_space<vmem>>, %arg4: memref<1x32xf32, #tpu.memory_space<vmem>>, %arg5: memref<60x32xf32, #tpu.memory_space<vmem>>) attributes {dimension_semantics = [], scalar_prefetch = 0 : i64, scratch_operands = 0 : i64, tpu.core_type = #tpu.core_type<tc>} {
    %c0 = arith.constant 0 : index
    %c0_0 = arith.constant 0 : index
    %0 = vector.load %arg0[%c0, %c0_0] : memref<60x32xf32, #tpu.memory_space<vmem>>, vector<60x32xf32>
    %c0_1 = arith.constant 0 : index
    %c0_2 = arith.constant 0 : index
    %1 = vector.load %arg2[%c0_1, %c0_2] : memref<32x32xf32, #tpu.memory_space<vmem>>, vector<32x32xf32>
    %cst = arith.constant dense<0.000000e+00> : vector<60x32xf32>
    %2 = tpu.matmul %0, %1, %cst {dimension_numbers = #tpu.dot_dimension_numbers<[1], [0], [0], [1], [0, 0, 1, 1], [], []>} : vector<60x32xf32>, vector<32x32xf32>, vector<60x32xf32> -> vector<60x32xf32>
    %c0_3 = arith.constant 0 : index
    %c0_4 = arith.constant 0 : index
    %3 = vector.load %arg1[%c0_3, %c0_4] : memref<60x32xf32, #tpu.memory_space<vmem>>, vector<60x32xf32>
    %c0_5 = arith.constant 0 : index
    %c0_6 = arith.constant 0 : index
    %4 = vector.load %arg3[%c0_5, %c0_6] : memref<32x32xf32, #tpu.memory_space<vmem>>, vector<32x32xf32>
    %cst_7 = arith.constant dense<0.000000e+00> : vector<60x32xf32>
    %5 = tpu.matmul %3, %4, %cst_7 {dimension_numbers = #tpu.dot_dimension_numbers<[1], [0], [0], [1], [0, 0, 1, 1], [], []>} : vector<60x32xf32>, vector<32x32xf32>, vector<60x32xf32> -> vector<60x32xf32>
    %6 = arith.addf %2, %5 : vector<60x32xf32>
    %c0_8 = arith.constant 0 : index
    %c0_9 = arith.constant 0 : index
    %7 = vector.load %arg4[%c0_8, %c0_9] : memref<1x32xf32, #tpu.memory_space<vmem>>, vector<1x32xf32>
    %8 = vector.broadcast %7 : vector<1x32xf32> to vector<60x32xf32>
    %9 = arith.addf %6, %8 : vector<60x32xf32>
    %c0_10 = arith.constant 0 : index
    %c0_11 = arith.constant 0 : index
    %10 = vector.load %arg5[%c0_10, %c0_11] : memref<60x32xf32, #tpu.memory_space<vmem>>, vector<60x32xf32>
    tpu.vector_store %arg5[%c0_10, %c0_11], %9 {strides = array<i32>} : memref<60x32xf32, #tpu.memory_space<vmem>>, vector<60x32xf32>,
    return
  }
}

</mosaic_0001>

<bundles_post_ra>
// kernel: _lambda_.7
= control target key start
LH: loop header
LB: loop body
LE: loop exit
PB: predicated region body
PF: predicated region fallthrough
CT: control target
= control target key end

     0   :  { %vm34_vm0 = vcmask 523264   ;;  %vm58_vm1 = vcmask 521216   ;;  %v113_v14 = vmov 64.0   ;;  %s186_s1 = inlined_call_operand.vmem [shape: f32[64,64], index: 1, kind: input, shape index: {}]   ;;  %s187_s2 = inlined_call_operand.vmem [shape: f32[1,64], index: 2, kind: input, shape index: {}]   ;;  %s188_s0 = inlined_call_operand.vmem [shape: f32[6,64], index: 0, kind: input, shape index: {}]   ;;  %s189_s3 = inlined_call_operand.vmem [shape: f32[1,64], index: 3, kind: input, shape index: {}]   ;;  %s190_s4 = inlined_call_operand.vmem [shape: f32[1,64], index: 4, kind: input, shape index: {}]   ;;  %s191_s5 = inlined_call_operand.vmem [shape: f32[6,64], index: 5, kind: output, shape index: {}]  }
   0x1   :  { %v29_v0 = vld [vmem:[%s186_s1 + $0x38] sm:$0xff]  ;;  %v28_v1 = vld [vmem:[%s186_s1 + $0x30] sm:$0xff]  ;;  %v27_v2 = vld [vmem:[%s186_s1 + $0x28] sm:$0xff]  ;;  %109 = vrcp.f32 %v113_v14 }
   0x2   :  { %46 = vmatpush.msra.mxu0 %v29_v0  ;;  %v26_v3 = vld [vmem:[%s186_s1 + $0x20] sm:$0xff]  ;;  %v25_v4 = vld [vmem:[%s186_s1 + $0x18] sm:$0xff]  ;;  %v24_v5 = vld [vmem:[%s186_s1 + $0x10] sm:$0xff] }
   0x3   :  { %v20_v6 = vld [vmem:[%s188_s0] sm:$0x3f]  ;;  %v23_v7 = vld [vmem:[%s186_s1 + $0x8] sm:$0xff] }
   0x4   :  { %47 = vmatpush.msra.mxu0 %v28_v1  ;;  %v22_v8 = vld [vmem:[%s186_s1] sm:$0xff]  ;;  %v21_v9 = vmax.f32 %v20_v6, 0.0 }
   0x5   :  { %v106_v10 = vld [vmem:[%s187_s2] ss:$0 sm:$0xff] }
   0x6   :  { %48 = vmatpush.msra.mxu0 %v27_v2  ;;  %v107_v35 = vld [vmem:[%s189_s3] ss:$0 sm:$0xff] }
   0x7   :  { %v110_v15 = vpop.eup %109  ;;  %v108_v37 = vld [vmem:[%s190_s4] ss:$0 sm:$0xff] }
   0x8   :  { %49 = vmatpush.msra.mxu0 %v26_v3  ;;  %v63_v16 = vmul.f32 64.0, %v110_v15  ;;  %vm67_vm2 = vweird.f32 %v110_v15 }
   0xa   :  { %50 = vmatpush.msra.mxu0 %v25_v4  ;;  %v64_v17 = vsub.f32 1.0, %v63_v16 }
   0xc   :  { %51 = vmatpush.msra.mxu0 %v24_v5  ;;  %v65_v18 = vmul.f32 %v110_v15, %v64_v17 }
   0xe   :  { %52 = vmatpush.msra.mxu0 %v23_v7  ;;  %v66_v19 = vadd.f32 %v110_v15, %v65_v18 }
  0x10   :  { %53 = vmatpush.msra.mxu0 %v22_v8  ;;  %v68_v20 = vsel %vm67_vm2, %v110_v15, %v66_v19 }
  0x11   :  { %104 = vmatmul.msk.f32.vlgmr.msra.gmra.mxu0 %vm34_vm0, %v21_v9 }
  0x8e   :  { %v55_v11 = vpop.f32.mrf.mxu0 }
  0x8f   :  { %v56_v12 = vadd.f32 %v106_v10, %v55_v11 }
  0x91   :  { %v59_v13 = vsel %vm58_vm1, %v56_v12, 0.0 }
  0x92   :  { %60 = vadd.xlane.f32.xlu0 %v59_v13 }
 0x105   :  { %v61_v21 = vpop.xlane.xlu0 %60 }
 0x106   :  { %v69_v22 = vmul.f32 %v68_v20, %v61_v21 }
 0x108   :  { %v70_v23 = vsub.f32 %v56_v12, %v69_v22 }
 0x10a   :  { %v71_v24 = vmul.f32 %v70_v23, %v70_v23 }
 0x10c   :  { %v72_v25 = vsel %vm58_vm1, %v71_v24, 0.0 }
 0x10d   :  { %73 = vadd.xlane.f32.xlu0 %v72_v25 }
 0x180   :  { %v74_v26 = vpop.xlane.xlu0 %73 }
 0x181   :  { %v75_v27 = vmul.f32 %v74_v26, %v68_v20 }
 0x183   :  { %v76_v28 = vadd.f32 1e-05, %v75_v27 }
 0x185   :  { %111 = vrsqrt.f32 %v76_v28  ;;  %vm83_vm4 = vweird.f32 %v76_v28 }
 0x18b   :  { %v112_v29 = vpop.eup %111 }
 0x18c   :  { %v78_v30 = vmul.f32 %v112_v29, %v76_v28  ;;  %vm84_vm3 = vweird.f32 %v112_v29 }
 0x18d   :  { %vm85_vm5 = vmor %vm83_vm4, %vm84_vm3 }
 0x18e   :  { %v79_v31 = vmul.f32 %v112_v29, %v78_v30 }
 0x190   :  { %v80_v32 = vmul.f32 0.5, %v79_v31 }
 0x192   :  { %v81_v33 = vsub.f32 1.5, %v80_v32 }
 0x194   :  { %v82_v34 = vmul.f32 %v112_v29, %v81_v33 }
 0x196   :  { %v86_v36 = vsel %vm85_vm5, %v112_v29, %v82_v34 }
 0x197   :  { %v87_v38 = vmul.f32 %v86_v36, %v70_v23 }
 0x199   :  { %v92_v39 = vmul.f32 %v107_v35, %v87_v38 }
 0x19b   :  { %v97_v40 = vadd.f32 %v108_v37, %v92_v39 }
 0x19d   :  { %v98_v41 = vadd.f32 %v97_v40, %v20_v6 }
 0x19f   :  { %99 = vst.msk [vmem:[%s191_s5] sm:$0x3f] %vm58_vm1, %v98_v41 }

// kernel: _lambda_.8
= control target key start
LH: loop header
LB: loop body
LE: loop exit
PB: predicated region body
PF: predicated region fallthrough
CT: control target
= control target key end

     0   :  { %vm58_vm0 = vcmask 261120   ;;  %vm34_vm1 = vcmask 523264   ;;  %vm87_vm2 = vcmask 257024   ;;  %s174_s3 = inlined_call_operand.vmem [shape: f32[64,32], index: 3, kind: input, shape index: {}]   ;;  %s175_s2 = inlined_call_operand.vmem [shape: f32[32,32], index: 2, kind: input, shape index: {}]   ;;  %s176_s0 = inlined_call_operand.vmem [shape: f32[4,32], index: 0, kind: input, shape index: {}]   ;;  %s177_s1 = inlined_call_operand.vmem [shape: f32[4,64], index: 1, kind: input, shape index: {}]   ;;  %s178_s4 = inlined_call_operand.vmem [shape: f32[1,32], index: 4, kind: input, shape index: {}]   ;;  %s179_s5 = inlined_call_operand.vmem [shape: f32[4,32], index: 5, kind: output, shape index: {}]  }
   0x1   :  { %v33_v0 = vld [vmem:[%s174_s3 + $0x38] sm:$0xff]  ;;  %v32_v1 = vld [vmem:[%s174_s3 + $0x30] sm:$0xff]  ;;  %v31_v3 = vld [vmem:[%s174_s3 + $0x28] sm:$0xff] }
   0x2   :  { %46 = vmatpush.msra.mxu0 %v33_v0  ;;  %v24_v2 = vld [vmem:[%s175_s2 + $0x18] sm:$0xff]  ;;  %v23_v4 = vld [vmem:[%s175_s2 + $0x10] sm:$0xff]  ;;  %v22_v5 = vld [vmem:[%s175_s2 + $0x8] sm:$0xff] }
   0x3   :  { %74 = vmatpush.msra.mxu1 %v24_v2  ;;  %v30_v6 = vld [vmem:[%s174_s3 + $0x20] sm:$0xff]  ;;  %v29_v8 = vld [vmem:[%s174_s3 + $0x18] sm:$0xff]  ;;  %v28_v10 = vld [vmem:[%s174_s3 + $0x10] sm:$0xff] }
   0x4   :  { %47 = vmatpush.msra.mxu0 %v32_v1  ;;  %v21_v7 = vld [vmem:[%s175_s2] sm:$0xff]  ;;  %v27_v11 = vld [vmem:[%s174_s3 + $0x8] sm:$0xff] }
   0x5   :  { %75 = vmatpush.msra.mxu1 %v23_v4  ;;  %v20_v9 = vld [vmem:[%s176_s0] sm:$0xf] }
   0x6   :  { %48 = vmatpush.msra.mxu0 %v31_v3  ;;  %v26_v12 = vld [vmem:[%s174_s3] sm:$0xff] }
   0x7   :  { %76 = vmatpush.msra.mxu1 %v22_v5  ;;  %v25_v13 = vld [vmem:[%s177_s1] sm:$0xf] }
   0x8   :  { %49 = vmatpush.msra.mxu0 %v30_v6  ;;  %v95_v15 = vld [vmem:[%s178_s4] ss:$0 sm:$0xff] }
   0x9   :  { %77 = vmatpush.msra.mxu1 %v21_v7 }
   0xa   :  { %50 = vmatpush.msra.mxu0 %v29_v8  ;;  %94 = vmatmul.msk.f32.vlgmr.msra.gmra.mxu1 %vm58_vm0, %v20_v9 }
   0xc   :  { %51 = vmatpush.msra.mxu0 %v28_v10 }
   0xe   :  { %52 = vmatpush.msra.mxu0 %v27_v11 }
  0x10   :  { %53 = vmatpush.msra.mxu0 %v26_v12 }
  0x11   :  { %93 = vmatmul.msk.f32.vlgmr.msra.gmra.mxu0 %vm34_vm1, %v25_v13 }
  0x87   :  { %v79_v14 = vpop.f32.mrf.mxu1 }
  0x8e   :  { %v55_v16 = vpop.f32.mrf.mxu0 }
  0x8f   :  { %v80_v17 = vadd.f32 %v79_v14, %v55_v16 }
  0x91   :  { %v86_v18 = vadd.f32 %v95_v15, %v80_v17 }
  0x93   :  { %88 = vst.msk [vmem:[%s179_s5] sm:$0xf] %vm87_vm2, %v86_v18 }

// kernel: _lambda_.10
= control target key start
LH: loop header
LB: loop body
LE: loop exit
PB: predicated region body
PF: predicated region fallthrough
CT: control target
= control target key end

     0   :  { %vm30_vm0 = vcmask 261120   ;;  %vm82_vm1 = vcmask 257024   ;;  %s157_s3 = inlined_call_operand.vmem [shape: f32[32,32], index: 3, kind: input, shape index: {}]   ;;  %s158_s2 = inlined_call_operand.vmem [shape: f32[32,32], index: 2, kind: input, shape index: {}]   ;;  %s159_s1 = inlined_call_operand.vmem [shape: f32[4,32], index: 1, kind: input, shape index: {}]   ;;  %s160_s0 = inlined_call_operand.vmem [shape: f32[4,32], index: 0, kind: input, shape index: {}]   ;;  %s161_s4 = inlined_call_operand.vmem [shape: f32[1,32], index: 4, kind: input, shape index: {}]   ;;  %s162_s5 = inlined_call_operand.vmem [shape: f32[4,32], index: 5, kind: output, shape index: {}]  }
   0x1   :  { %v29_v0 = vld [vmem:[%s157_s3 + $0x18] sm:$0xff]  ;;  %v28_v2 = vld [vmem:[%s157_s3 + $0x10] sm:$0xff]  ;;  %v27_v4 = vld [vmem:[%s157_s3 + $0x8] sm:$0xff] }
   0x2   :  { %v24_v1 = vld [vmem:[%s158_s2 + $0x18] sm:$0xff]  ;;  %46 = vmatpush.msra.mxu0 %v29_v0  ;;  %v23_v3 = vld [vmem:[%s158_s2 + $0x10] sm:$0xff]  ;;  %v22_v5 = vld [vmem:[%s158_s2 + $0x8] sm:$0xff] }
   0x3   :  { %69 = vmatpush.msra.mxu1 %v24_v1  ;;  %v26_v6 = vld [vmem:[%s157_s3] sm:$0xff] }
   0x4   :  { %47 = vmatpush.msra.mxu0 %v28_v2  ;;  %v21_v7 = vld [vmem:[%s158_s2] sm:$0xff] }
   0x5   :  { %70 = vmatpush.msra.mxu1 %v23_v3  ;;  %v25_v8 = vld [vmem:[%s159_s1] sm:$0xf] }
   0x6   :  { %48 = vmatpush.msra.mxu0 %v27_v4  ;;  %v20_v9 = vld [vmem:[%s160_s0] sm:$0xf] }
   0x7   :  { %71 = vmatpush.msra.mxu1 %v22_v5  ;;  %v90_v10 = vld [vmem:[%s161_s4] ss:$0 sm:$0xff] }
   0x8   :  { %49 = vmatpush.msra.mxu0 %v26_v6 }
   0x9   :  { %72 = vmatpush.msra.mxu1 %v21_v7  ;;  %88 = vmatmul.msk.f32.vlgmr.msra.gmra.mxu0 %vm30_vm0, %v25_v8 }
   0xa   :  { %89 = vmatmul.msk.f32.vlgmr.msra.gmra.mxu1 %vm30_vm0, %v20_v9 }
  0x86   :  { %v51_v11 = vpop.f32.mrf.mxu0 }
  0x87   :  { %v74_v12 = vpop.f32.mrf.mxu1 }
  0x88   :  { %v75_v13 = vadd.f32 %v74_v12, %v51_v11 }
  0x8a   :  { %v81_v14 = vadd.f32 %v90_v10, %v75_v13 }
  0x8c   :  { %83 = vst.msk [vmem:[%s162_s5] sm:$0xf] %vm82_vm1, %v81_v14 }

// kernel: _lambda_.6
= control target key start
LH: loop header
LB: loop body
LE: loop exit
PB: predicated region body
PF: predicated region fallthrough
CT: control target
= control target key end

     0   :  { %vm63_vm0 = vcmask 261120   ;;  %v2526_v16 = vmov 0.0   ;;  %s3369_s2 = inlined_call_operand.vmem [shape: f32[2,3,32,32], index: 2, kind: input, shape index: {}]   ;;  %s3370_s1 = inlined_call_operand.vmem [shape: f32[2,3,32,32], index: 1, kind: input, shape index: {}]   ;;  %s3371_s0 = inlined_call_operand.vmem [shape: f32[64,32], index: 0, kind: input, shape index: {}]   ;;  %s3372_s3 = inlined_call_operand.vmem [shape: f32[2,4,1,32], index: 3, kind: input, shape index: {}]   ;;  %s3373_s4 = inlined_call_operand.vmem [shape: f32[2,8,32], index: 4, kind: output, shape index: {}]  }
   0x1   :  { %v2555_v0 = vld [vmem:[%s3369_s2 + $0x18] sm:$0xff]  ;;  %v2560_v1 = vld [vmem:[%s3369_s2 + $0x10] sm:$0xff]  ;;  %v2572_v4 = vld [vmem:[%s3369_s2 + $0x8] sm:$0xff] }
   0x2   :  { %v28_v2 = vld [vmem:[%s3370_s1 + $0x18] sm:$0xff]  ;;  %232 = vmatpush.msra.mxu3 %v2555_v0  ;;  %v27_v3 = vld [vmem:[%s3370_s1 + $0x10] sm:$0xff]  ;;  %v26_v5 = vld [vmem:[%s3370_s1 + $0x8] sm:$0xff] }
   0x3   :  { %100 = vmatpush.msra.mxu0 %v28_v2  ;;  %v2184_v6 = vld [vmem:[%s3370_s1 + $0x38] sm:$0xff]  ;;  %v2584_v7 = vld [vmem:[%s3369_s2] sm:$0xff]  ;;  %v2183_v9 = vld [vmem:[%s3370_s1 + $0x30] sm:$0xff] }
   0x4   :  { %233 = vmatpush.msra.mxu3 %v2560_v1  ;;  %v25_v8 = vld [vmem:[%s3370_s1] sm:$0xff]  ;;  %144 = vmatpush.msra.mxu1 %v2184_v6  ;;  %v2599_v11 = vld [vmem:[%s3369_s2 + $0x38] sm:$0xff]  ;;  %v2182_v12 = vld [vmem:[%s3370_s1 + $0x28] sm:$0xff] }
   0x5   :  { %101 = vmatpush.msra.mxu0 %v27_v3  ;;  %v17_v10 = vld [vmem:[%s3371_s0] sm:$0xff]  ;;  %v2608_v13 = vld [vmem:[%s3369_s2 + $0x30] sm:$0xff]  ;;  %v2188_v15 = vld [vmem:[%s3370_s1 + $0x58] sm:$0xff] }
   0x6   :  { %234 = vmatpush.msra.mxu3 %v2572_v4  ;;  %145 = vmatpush.msra.mxu1 %v2183_v9  ;;  %v2181_v14 = vld [vmem:[%s3370_s1 + $0x20] sm:$0xff]  ;;  %v2621_v17 = vld [vmem:[%s3369_s2 + $0x28] sm:$0xff]  ;;  %v2626_v18 = vld [vmem:[%s3369_s2 + $0x58] sm:$0xff] }
   0x7   :  { %102 = vmatpush.msra.mxu0 %v26_v5  ;;  %v2187_v19 = vld [vmem:[%s3370_s1 + $0x50] sm:$0xff]  ;;  %188 = vmatpush.msra.mxu2 %v2188_v15  ;;  %v2186_v20 = vld [vmem:[%s3370_s1 + $0x48] sm:$0xff]  ;;  %v2640_v21 = vld [vmem:[%s3369_s2 + $0x20] sm:$0xff] }
   0x8   :  { %235 = vmatpush.msra.mxu3 %v2584_v7  ;;  %146 = vmatpush.msra.mxu1 %v2182_v12  ;;  %v2646_v22 = vld [vmem:[%s3369_s2 + $0x50] sm:$0xff]  ;;  %v2185_v23 = vld [vmem:[%s3370_s1 + $0x40] sm:$0xff]  ;;  %v2656_v24 = vld [vmem:[%s3369_s2 + $0x48] sm:$0xff] }
   0x9   :  { %103 = vmatpush.msra.mxu0 %v25_v8  ;;  %236 = vmatmul.f32.vlgmr.msra.gmra.mxu3 %v2526_v16  ;;  %v2666_v25 = vld [vmem:[%s3369_s2 + $0x40] sm:$0xff]  ;;  %v18_v40 = vld [vmem:[%s3371_s0 + $0x8] sm:$0xff] }
   0xa   :  { %2200 = vmatmul.msk.f32.vlgmr.msra.gmra.mxu0 %vm63_vm0, %v17_v10  ;;  %252 = vmatpush.msrb.mxu3 %v2599_v11  ;;  %v2704_v26 = vld [vmem:[%s3372_s3] ss:$0 sm:$0xff]  ;;  %v2710_v31 = vld [vmem:[%s3372_s3 + $0x1] ss:$0 sm:$0xff]  ;;  %v2722_v46 = vld [vmem:[%s3372_s3 + $0x3] ss:$0 sm:$0xff] }
   0xb   :  { %535 = vmatpush.msrb.mxu0 %v2626_v18  ;;  %147 = vmatpush.msra.mxu1 %v2181_v14  ;;  %v2727_v51 = vld [vmem:[%s3372_s3 + $0x2] ss:$0 sm:$0xff] }
   0xc   :  { %253 = vmatpush.msrb.mxu3 %v2608_v13  ;;  %2208 = vmatmul.msk.f32.vlgmr.msra.gmra.mxu1 %vm63_vm0, %v17_v10 }
   0xd   :  { %189 = vmatpush.msra.mxu2 %v2187_v19  ;;  %536 = vmatpush.msrb.mxu0 %v2646_v22 }
   0xe   :  { %254 = vmatpush.msrb.mxu3 %v2621_v17  ;;  %565 = vmatpush.msrb.mxu1 %v2555_v0 }
   0xf   :  { %190 = vmatpush.msra.mxu2 %v2186_v20  ;;  %537 = vmatpush.msrb.mxu0 %v2656_v24  ;;  %v19_v20 = vld [vmem:[%s3371_s0 + $0x10] sm:$0xff] }
  0x10   :  { %255 = vmatpush.msrb.mxu3 %v2640_v21  ;;  %566 = vmatpush.msrb.mxu1 %v2560_v1 }
  0x11   :  { %256 = vmatmul.f32.vlgmr.msrb.gmra.mxu3 %v2526_v16  ;;  %191 = vmatpush.msra.mxu2 %v2185_v23  ;;  %v20_v23 = vld [vmem:[%s3371_s0 + $0x18] sm:$0xff] }
  0x12   :  { %315 = vmatpush.msra.mxu3 %v2626_v18  ;;  %2216 = vmatmul.msk.f32.vlgmr.msra.gmra.mxu2 %vm63_vm0, %v17_v10 }
  0x13   :  { %538 = vmatpush.msrb.mxu0 %v2666_v25  ;;  %585 = vmatpush.msrb.mxu2 %v2599_v11 }
  0x14   :  { %316 = vmatpush.msra.mxu3 %v2646_v22  ;;  %567 = vmatpush.msrb.mxu1 %v2572_v4 }
  0x15   :  { %586 = vmatpush.msrb.mxu2 %v2608_v13  ;;  %675 = vmatpush.msra.mxu0 %v2555_v0 }
  0x16   :  { %317 = vmatpush.msra.mxu3 %v2656_v24  ;;  %568 = vmatpush.msrb.mxu1 %v2584_v7 }
  0x17   :  { %587 = vmatpush.msrb.mxu2 %v2621_v17  ;;  %676 = vmatpush.msra.mxu0 %v2560_v1 }
  0x18   :  { %318 = vmatpush.msra.mxu3 %v2666_v25  ;;  %695 = vmatpush.msra.mxu1 %v2599_v11 }
  0x19   :  { %319 = vmatmul.f32.vlgmr.msra.gmra.mxu3 %v2526_v16  ;;  %588 = vmatpush.msrb.mxu2 %v2640_v21 }
  0x1a   :  { %345 = vmatpush.msrb.mxu3 %v2555_v0  ;;  %677 = vmatpush.msra.mxu0 %v2572_v4 }
  0x1b   :  { %755 = vmatpush.msra.mxu2 %v2626_v18  ;;  %696 = vmatpush.msra.mxu1 %v2608_v13 }
  0x1c   :  { %346 = vmatpush.msrb.mxu3 %v2560_v1  ;;  %678 = vmatpush.msra.mxu0 %v2584_v7 }
  0x1d   :  { %756 = vmatpush.msra.mxu2 %v2646_v22  ;;  %697 = vmatpush.msra.mxu1 %v2621_v17 }
  0x1e   :  { %347 = vmatpush.msrb.mxu3 %v2572_v4  ;;  %2201 = vmatmul.msk.f32.gmra.mxu0 %vm63_vm0, %v18_v40 }
  0x1f   :  { %757 = vmatpush.msra.mxu2 %v2656_v24  ;;  %698 = vmatpush.msra.mxu1 %v2640_v21 }
  0x20   :  { %348 = vmatpush.msrb.mxu3 %v2584_v7  ;;  %2209 = vmatmul.msk.f32.gmra.mxu1 %vm63_vm0, %v18_v40 }
  0x21   :  { %758 = vmatpush.msra.mxu2 %v2666_v25 }
  0x22   :  { %365 = vmatpush.msra.mxu3 %v2599_v11  ;;  %2217 = vmatmul.msk.f32.gmra.mxu2 %vm63_vm0, %v18_v40 }
  0x24   :  { %366 = vmatpush.msra.mxu3 %v2608_v13 }
  0x26   :  { %367 = vmatpush.msra.mxu3 %v2621_v17  ;;  %2202 = vmatmul.msk.f32.gmra.mxu0 %vm63_vm0, %v19_v20 }
  0x28   :  { %368 = vmatpush.msra.mxu3 %v2640_v21  ;;  %2210 = vmatmul.msk.f32.gmra.mxu1 %vm63_vm0, %v19_v20 }
  0x2a   :  { %2218 = vmatmul.msk.f32.gmra.mxu2 %vm63_vm0, %v19_v20 }
  0x2e   :  { %2203 = vmatmul.msk.f32.gmra.mxu0 %vm63_vm0, %v20_v23 }
  0x30   :  { %2211 = vmatmul.msk.f32.gmra.mxu1 %vm63_vm0, %v20_v23 }
  0x32   :  { %2219 = vmatmul.msk.f32.gmra.mxu2 %vm63_vm0, %v20_v23 }
  0x87   :  { %v105_v27 = vpop.f32.mrf.mxu0 }
  0x88   :  { %v106_v28 = vadd.f32 %v2704_v26, %v105_v27  ;;  %v21_v27 = vld [vmem:[%s3371_s0 + $0x20] sm:$0xff] }
  0x89   :  { %v149_v32 = vpop.f32.mrf.mxu1  ;;  %2204 = vmatmul.msk.f32.gmra.mxu0 %vm63_vm0, %v21_v27  ;;  %2212 = vmatmul.msk.f32.gmra.mxu1 %vm63_vm0, %v21_v27 }
  0x8a   :  { %v150_v34 = vadd.f32 %v2710_v31, %v149_v32  ;;  %2220 = vmatmul.msk.f32.gmra.mxu2 %vm63_vm0, %v21_v27  ;;  %v23_v32 = vld [vmem:[%s3371_s0 + $0x30] sm:$0xff] }
  0x8c   :  { %v237_v29 = vpop.f32.mrf.mxu3 }
  0x8d   :  { %v260_v30 = vadd.f32 %v237_v29, %v106_v28  ;;  %v22_v28 = vld [vmem:[%s3371_s0 + $0x28] sm:$0xff] }
  0x8f   :  { %v2224_v33 = vmul.f32 -1.442695, %v260_v30 }
  0x91   :  { %2360 = vpow2.f32 %v2224_v33  ;;  %2205 = vmatmul.msk.f32.gmra.mxu0 %vm63_vm0, %v22_v28  ;;  %2213 = vmatmul.msk.f32.gmra.mxu1 %vm63_vm0, %v22_v28 }
  0x92   :  { %2221 = vmatmul.msk.f32.gmra.mxu2 %vm63_vm0, %v22_v28 }
  0x94   :  { %v257_v35 = vpop.f32.mrf.mxu3 }
  0x95   :  { %v280_v36 = vadd.f32 %v257_v35, %v150_v34  ;;  %v193_v52 = vpop.f32.mrf.mxu2 }
  0x96   :  { %v194_v59 = vadd.f32 %v2727_v51, %v193_v52 }
  0x97   :  { %v2361_v37 = vpop.eup %2360  ;;  %v2225_v38 = vmul.f32 -1.442695, %v280_v36 }
  0x98   :  { %v264_v39 = vadd.f32 1.0, %v2361_v37 }
  0x99   :  { %2362 = vpow2.f32 %v2225_v38  ;;  %2206 = vmatmul.msk.f32.gmra.mxu0 %vm63_vm0, %v23_v32  ;;  %2214 = vmatmul.msk.f32.gmra.mxu1 %vm63_vm0, %v23_v32  ;;  %v24_v38 = vld [vmem:[%s3371_s0 + $0x38] sm:$0xff] }
  0x9a   :  { %2364 = vrcp.f32 %v264_v39  ;;  %v276_v47 = vand.u32 2147483648, %v264_v39  ;;  %v274_v50 = vand.u32 2147483647, %v264_v39  ;;  %vm270_vm2 = vweird.f32 %v264_v39  ;;  %2222 = vmatmul.msk.f32.gmra.mxu2 %vm63_vm0, %v23_v32 }
  0x9b   :  { %v108_v29 = vpop.f32.mrf.mxu0 }
  0x9c   :  { %v320_v48 = vpop.f32.mrf.mxu3  ;;  %v277_v56 = vor.u32 1.1754944e-38, %v276_v47  ;;  %vm275_vm4 = vcmp.eq.f32.partialorder %v274_v50, 8.507059e+37  ;;  %v109_v30 = vadd.f32 %v2704_v26, %v108_v29 }
  0x9d   :  { %v321_v54 = vadd.f32 %v2722_v46, %v320_v48  ;;  %v152_v35 = vpop.f32.mrf.mxu1 }
  0x9e   :  { %v153_v37 = vadd.f32 %v2710_v31, %v152_v35 }
  0x9f   :  { %v2363_v41 = vpop.eup %2362 }
  0xa0   :  { %v2365_v42 = vpop.eup %2364  ;;  %v284_v43 = vadd.f32 1.0, %v2363_v41 }
  0xa1   :  { %v266_v44 = vmul.f32 %v2365_v42, %v264_v39  ;;  %vm271_vm1 = vweird.f32 %v2365_v42  ;;  %2207 = vmatmul.msk.f32.gmra.mxu0 %vm63_vm0, %v24_v38  ;;  %2215 = vmatmul.msk.f32.gmra.mxu1 %vm63_vm0, %v24_v38 }
  0xa2   :  { %2366 = vrcp.f32 %v284_v43  ;;  %vm272_vm3 = vmor %vm270_vm2, %vm271_vm1  ;;  %v296_v5 = vand.u32 2147483648, %v284_v43  ;;  %vm290_vm6 = vweird.f32 %v284_v43  ;;  %v294_v6 = vand.u32 2147483647, %v284_v43  ;;  %2223 = vmatmul.msk.f32.gmra.mxu2 %vm63_vm0, %v24_v38 }
  0xa3   :  { %v267_v45 = vsub.f32 1.0, %v266_v44 }
  0xa4   :  { %v297_v10 = vor.u32 1.1754944e-38, %v296_v5  ;;  %vm295_vm8 = vcmp.eq.f32.partialorder %v294_v6, 8.507059e+37 }
  0xa5   :  { %v268_v49 = vmul.f32 %v2365_v42, %v267_v45 }
  0xa7   :  { %v269_v53 = vadd.f32 %v2365_v42, %v268_v49 }
  0xa8   :  { %v2367_v55 = vpop.eup %2366 }
  0xa9   :  { %v286_v57 = vmul.f32 %v2367_v55, %v284_v43  ;;  %v273_v58 = vsel %vm272_vm3, %v2365_v42, %v269_v53  ;;  %vm291_vm5 = vweird.f32 %v2367_v55 }
  0xaa   :  { %v278_v60 = vsel %vm275_vm4, %v277_v56, %v273_v58  ;;  %vm292_vm7 = vmor %vm290_vm6, %vm291_vm5 }
  0xab   :  { %v287_v61 = vsub.f32 1.0, %v286_v57  ;;  %v323_v62 = vmul.f32 %v321_v54, %v278_v60  ;;  %v196_v54 = vpop.f32.mrf.mxu2 }
  0xad   :  { %v288_v63 = vmul.f32 %v2367_v55, %v287_v61  ;;  %v324_v2 = vadd.f32 %v323_v62, %v194_v59  ;;  %v197_v59 = vadd.f32 %v2727_v51, %v196_v54 }
  0xaf   :  { %2368 = vtanh.f32 %v324_v2  ;;  %v289_v3 = vadd.f32 %v2367_v55, %v288_v63 }
  0xb1   :  { %v293_v8 = vsel %vm292_vm7, %v2367_v55, %v289_v3 }
  0xb2   :  { %v298_v14 = vsel %vm295_vm8, %v297_v10, %v293_v8 }
  0xb5   :  { %v2369_v9 = vpop.eup %2368 }
  0xb6   :  { %v326_v12 = vsub.f32 0.0, %v2369_v9 }
  0xb8   :  { %v327_v15 = vmul.f32 %v326_v12, %v298_v14 }
  0xba   :  { %v2731_v19 = vadd.f32 %v2369_v9, %v327_v15 }
  0xbc   :  { %329 = vst.msk [vmem:[#allocation2] sm:$0xff] %vm63_vm0, %v2731_v19  ;;  %2226 = vmatmul.msk.f32.vlgmr.msrb.gmra.mxu3 %vm63_vm0, %v2731_v19 }
  0xbd   :  { %425 = vmatpush.msrb.mxu3 %v2626_v18 }
  0xbf   :  { %426 = vmatpush.msrb.mxu3 %v2646_v22 }
  0xc1   :  { %427 = vmatpush.msrb.mxu3 %v2656_v24 }
  0xc3   :  { %428 = vmatpush.msrb.mxu3 %v2666_v25 }
  0xc4   :  { %2227 = vmatmul.msk.f32.vlgmr.msra.gmra.mxu3 %vm63_vm0, %v2731_v19 }
  0xc5   :  { %455 = vmatpush.msra.mxu3 %v2555_v0 }
  0xc7   :  { %456 = vmatpush.msra.mxu3 %v2560_v1 }
  0xc9   :  { %457 = vmatpush.msra.mxu3 %v2572_v4 }
  0xcb   :  { %458 = vmatpush.msra.mxu3 %v2584_v7 }
  0xcc   :  { %2230 = vmatmul.msk.f32.vlgmr.msrb.gmra.mxu3 %vm63_vm0, %v2731_v19 }
  0xcd   :  { %475 = vmatpush.msrb.mxu3 %v2599_v11 }
  0xcf   :  { %476 = vmatpush.msrb.mxu3 %v2608_v13 }
  0xd1   :  { %477 = vmatpush.msrb.mxu3 %v2621_v17 }
  0xd3   :  { %478 = vmatpush.msrb.mxu3 %v2640_v21 }
 0x13f   :  { %v350_v33 = vpop.f32.mrf.mxu3 }
 0x140   :  { %v373_v34 = vadd.f32 %v350_v33, %v109_v30 }
 0x142   :  { %v2228_v36 = vmul.f32 -1.442695, %v373_v34 }
 0x144   :  { %2370 = vpow2.f32 %v2228_v36  ;;  %v155_v36 = vpop.f32.mrf.mxu1 }
 0x147   :  { %v370_v39 = vpop.f32.mrf.mxu3 }
 0x148   :  { %v393_v40 = vadd.f32 %v370_v39, %v153_v37  ;;  %v156_v39 = vadd.f32 %v2710_v31, %v155_v36 }
 0x14a   :  { %v2371_v41 = vpop.eup %2370  ;;  %v2229_v42 = vmul.f32 -1.442695, %v393_v40 }
 0x14b   :  { %v377_v43 = vadd.f32 1.0, %v2371_v41 }
 0x14c   :  { %2372 = vpow2.f32 %v2229_v42 }
 0x14d   :  { %2374 = vrcp.f32 %v377_v43  ;;  %v389_v50 = vand.u32 2147483648, %v377_v43  ;;  %v387_v53 = vand.u32 2147483647, %v377_v43  ;;  %vm383_vm10 = vweird.f32 %v377_v43 }
 0x14f   :  { %v430_v55 = vpop.f32.mrf.mxu3  ;;  %v390_v58 = vor.u32 1.1754944e-38, %v389_v50  ;;  %vm388_vm12 = vcmp.eq.f32.partialorder %v387_v53, 8.507059e+37 }
 0x150   :  { %v431_v62 = vadd.f32 %v2722_v46, %v430_v55 }
 0x152   :  { %v2373_v44 = vpop.eup %2372 }
 0x153   :  { %v2375_v45 = vpop.eup %2374  ;;  %v397_v47 = vadd.f32 1.0, %v2373_v44 }
 0x154   :  { %v379_v48 = vmul.f32 %v2375_v45, %v377_v43  ;;  %vm384_vm9 = vweird.f32 %v2375_v45 }
 0x155   :  { %2376 = vrcp.f32 %v397_v47  ;;  %vm385_vm11 = vmor %vm383_vm10, %vm384_vm9  ;;  %v409_v9 = vand.u32 2147483648, %v397_v47  ;;  %vm403_vm14 = vweird.f32 %v397_v47  ;;  %v407_v10 = vand.u32 2147483647, %v397_v47 }
 0x156   :  { %v380_v49 = vsub.f32 1.0, %v379_v48 }
 0x157   :  { %v410_v15 = vor.u32 1.1754944e-38, %v409_v9  ;;  %vm408_vm1 = vcmp.eq.f32.partialorder %v407_v10, 8.507059e+37 }
 0x158   :  { %v381_v52 = vmul.f32 %v2375_v45, %v380_v49 }
 0x15a   :  { %v382_v56 = vadd.f32 %v2375_v45, %v381_v52 }
 0x15b   :  { %v2377_v57 = vpop.eup %2376 }
 0x15c   :  { %v399_v60 = vmul.f32 %v2377_v57, %v397_v47  ;;  %v386_v61 = vsel %vm385_vm11, %v2375_v45, %v382_v56  ;;  %vm404_vm13 = vweird.f32 %v2377_v57 }
 0x15d   :  { %v391_v63 = vsel %vm388_vm12, %v390_v58, %v386_v61  ;;  %vm405_vm15 = vmor %vm403_vm14, %vm404_vm13 }
 0x15e   :  { %v400_v2 = vsub.f32 1.0, %v399_v60  ;;  %v433_v3 = vmul.f32 %v431_v62, %v391_v63 }
 0x160   :  { %v401_v5 = vmul.f32 %v2377_v57, %v400_v2  ;;  %v434_v6 = vadd.f32 %v433_v3, %v197_v59 }
 0x162   :  { %2378 = vtanh.f32 %v434_v6  ;;  %v402_v8 = vadd.f32 %v2377_v57, %v401_v5 }
 0x164   :  { %v406_v12 = vsel %vm405_vm15, %v2377_v57, %v402_v8  ;;  %v199_v57 = vpop.f32.mrf.mxu2 }
 0x165   :  { %v411_v23 = vsel %vm408_vm1, %v410_v15, %v406_v12  ;;  %v200_v63 = vadd.f32 %v2727_v51, %v199_v57 }
 0x168   :  { %v2379_v14 = vpop.eup %2378 }
 0x169   :  { %v436_v20 = vsub.f32 %v2731_v19, %v2379_v14  ;;  %v111_v19 = vpop.f32.mrf.mxu0 }
 0x16a   :  { %v112_v33 = vadd.f32 %v2704_v26, %v111_v19 }
 0x16b   :  { %v437_v27 = vmul.f32 %v436_v20, %v411_v23 }
 0x16d   :  { %v2794_v28 = vadd.f32 %v2379_v14, %v437_v27 }
 0x16f   :  { %439 = vst.msk [vmem:[#allocation2 + $0x8] sm:$0xff] %vm63_vm0, %v2794_v28  ;;  %2231 = vmatmul.msk.f32.vlgmr.msra.gmra.mxu3 %vm63_vm0, %v2794_v28  ;;  %2235 = vmatmul.msk.f32.vlgmr.msrb.gmra.mxu0 %vm63_vm0, %v2794_v28 }
 0x170   :  { %645 = vmatpush.msra.mxu3 %v2626_v18  ;;  %805 = vmatpush.msrb.mxu0 %v2599_v11 }
 0x171   :  { %v2816_v29 = vpop.f32.mrf.mxu0 }
 0x172   :  { %646 = vmatpush.msra.mxu3 %v2646_v22  ;;  %806 = vmatpush.msrb.mxu0 %v2608_v13 }
 0x174   :  { %647 = vmatpush.msra.mxu3 %v2656_v24  ;;  %807 = vmatpush.msrb.mxu0 %v2621_v17 }
 0x176   :  { %648 = vmatpush.msra.mxu3 %v2666_v25  ;;  %808 = vmatpush.msrb.mxu0 %v2640_v21 }
 0x177   :  { %2232 = vmatmul.msk.f32.vlgmr.msrb.gmra.mxu3 %vm63_vm0, %v2794_v28 }
 0x178   :  { %785 = vmatpush.msrb.mxu3 %v2555_v0 }
 0x179   :  { %v2818_v30 = vpop.f32.mrf.mxu0 }
 0x17a   :  { %786 = vmatpush.msrb.mxu3 %v2560_v1 }
 0x17c   :  { %787 = vmatpush.msrb.mxu3 %v2572_v4 }
 0x17e   :  { %788 = vmatpush.msrb.mxu3 %v2584_v7 }
 0x181   :  { %v2820_v32 = vpop.f32.mrf.mxu0 }
 0x189   :  { %v2823_v38 = vpop.f32.mrf.mxu0 }
 0x191   :  { %v2826_v45 = vpop.f32.mrf.mxu0 }
 0x1ec   :  { %v540_v54 = vpop.f32.mrf.mxu0 }
 0x1ed   :  { %v541_v60 = vadd.f32 %v2722_v46, %v540_v54 }
 0x1f2   :  { %v460_v34 = vpop.f32.mrf.mxu3 }
 0x1f3   :  { %v483_v35 = vadd.f32 %v460_v34, %v112_v33 }
 0x1f5   :  { %v2233_v37 = vmul.f32 -1.442695, %v483_v35  ;;  %v202_v35 = vpop.f32.mrf.mxu2 }
 0x1f7   :  { %2380 = vpow2.f32 %v2233_v37 }
 0x1fa   :  { %v480_v40 = vpop.f32.mrf.mxu3 }
 0x1fb   :  { %v503_v41 = vadd.f32 %v480_v40, %v156_v39 }
 0x1fd   :  { %v2381_v42 = vpop.eup %2380  ;;  %v2234_v43 = vmul.f32 -1.442695, %v503_v41  ;;  %v2855_v37 = vpop.f32.mrf.mxu2 }
 0x1fe   :  { %v487_v44 = vadd.f32 1.0, %v2381_v42 }
 0x1ff   :  { %2382 = vpow2.f32 %v2234_v43 }
 0x200   :  { %2384 = vrcp.f32 %v487_v44  ;;  %v499_v53 = vand.u32 2147483648, %v487_v44  ;;  %v497_v56 = vand.u32 2147483647, %v487_v44  ;;  %vm493_vm3 = vweird.f32 %v487_v44 }
 0x202   :  { %v500_v61 = vor.u32 1.1754944e-38, %v499_v53  ;;  %vm498_vm5 = vcmp.eq.f32.partialorder %v497_v56, 8.507059e+37 }
 0x205   :  { %v2383_v47 = vpop.eup %2382  ;;  %v2859_v40 = vpop.f32.mrf.mxu2 }
 0x206   :  { %v2385_v48 = vpop.eup %2384  ;;  %v507_v49 = vadd.f32 1.0, %v2383_v47  ;;  %v115_v47 = vadd.f32 %v2704_v26, %v2816_v29 }
 0x207   :  { %v489_v50 = vmul.f32 %v2385_v48, %v487_v44  ;;  %vm494_vm2 = vweird.f32 %v2385_v48 }
 0x208   :  { %2386 = vrcp.f32 %v507_v49  ;;  %vm495_vm4 = vmor %vm493_vm3, %vm494_vm2  ;;  %v519_v12 = vand.u32 2147483648, %v507_v49  ;;  %vm513_vm7 = vweird.f32 %v507_v49  ;;  %v517_v14 = vand.u32 2147483647, %v507_v49 }
 0x209   :  { %v490_v52 = vsub.f32 1.0, %v489_v50 }
 0x20a   :  { %v520_v23 = vor.u32 1.1754944e-38, %v519_v12  ;;  %vm518_vm9 = vcmp.eq.f32.partialorder %v517_v14, 8.507059e+37 }
 0x20b   :  { %v491_v55 = vmul.f32 %v2385_v48, %v490_v52 }
 0x20d   :  { %v492_v58 = vadd.f32 %v2385_v48, %v491_v55  ;;  %v2863_v42 = vpop.f32.mrf.mxu2 }
 0x20e   :  { %v2387_v59 = vpop.eup %2386 }
 0x20f   :  { %v509_v62 = vmul.f32 %v2387_v59, %v507_v49  ;;  %v496_v2 = vsel %vm495_vm4, %v2385_v48, %v492_v58  ;;  %vm514_vm6 = vweird.f32 %v2387_v59 }
 0x210   :  { %v501_v3 = vsel %vm498_vm5, %v500_v61, %v496_v2  ;;  %vm515_vm8 = vmor %vm513_vm7, %vm514_vm6 }
 0x211   :  { %v510_v5 = vsub.f32 1.0, %v509_v62  ;;  %v543_v6 = vmul.f32 %v541_v60, %v501_v3 }
 0x213   :  { %v511_v8 = vmul.f32 %v2387_v59, %v510_v5  ;;  %v544_v9 = vadd.f32 %v543_v6, %v200_v63 }
 0x215   :  { %2388 = vtanh.f32 %v544_v9  ;;  %v512_v10 = vadd.f32 %v2387_v59, %v511_v8  ;;  %v2867_v44 = vpop.f32.mrf.mxu2 }
 0x217   :  { %v516_v15 = vsel %vm515_vm8, %v2387_v59, %v512_v10 }
 0x218   :  { %v521_v19 = vsel %vm518_vm9, %v520_v23, %v516_v15 }
 0x21b   :  { %v2389_v20 = vpop.eup %2388 }
 0x21c   :  { %v546_v27 = vsub.f32 %v2794_v28, %v2389_v20  ;;  %v158_v28 = vpop.f32.mrf.mxu1 }
 0x21d   :  { %v159_v52 = vadd.f32 %v2710_v31, %v158_v28 }
 0x21e   :  { %v547_v33 = vmul.f32 %v546_v27, %v521_v19 }
 0x220   :  { %v2831_v34 = vadd.f32 %v2389_v20, %v547_v33  ;;  %v203_v20 = vadd.f32 %v2727_v51, %v202_v35 }
 0x222   :  { %549 = vst.msk [vmem:[#allocation2 + $0x10] sm:$0xff] %vm63_vm0, %v2831_v34  ;;  %2236 = vmatmul.msk.f32.vlgmr.msrb.gmra.mxu1 %vm63_vm0, %v2831_v34  ;;  %2237 = vmatmul.msk.f32.vlgmr.msrb.gmra.mxu2 %vm63_vm0, %v2831_v34 }
 0x223   :  { %2240 = vmatmul.msk.f32.vlgmr.msra.gmra.mxu3 %vm63_vm0, %v2831_v34  ;;  %865 = vmatpush.msrb.mxu1 %v2626_v18 }
 0x224   :  { %895 = vmatpush.msrb.mxu2 %v2555_v0  ;;  %915 = vmatpush.msra.mxu3 %v2599_v11  ;;  %v2853_v36 = vpop.f32.mrf.mxu1 }
 0x225   :  { %866 = vmatpush.msrb.mxu1 %v2646_v22 }
 0x226   :  { %896 = vmatpush.msrb.mxu2 %v2560_v1  ;;  %916 = vmatpush.msra.mxu3 %v2608_v13 }
 0x227   :  { %867 = vmatpush.msrb.mxu1 %v2656_v24 }
 0x228   :  { %897 = vmatpush.msrb.mxu2 %v2572_v4  ;;  %917 = vmatpush.msra.mxu3 %v2621_v17 }
 0x229   :  { %868 = vmatpush.msrb.mxu1 %v2666_v25 }
 0x22a   :  { %898 = vmatpush.msrb.mxu2 %v2584_v7  ;;  %918 = vmatpush.msra.mxu3 %v2640_v21 }
 0x22c   :  { %v2857_v39 = vpop.f32.mrf.mxu1 }
 0x234   :  { %v2861_v41 = vpop.f32.mrf.mxu1 }
 0x23c   :  { %v2865_v43 = vpop.f32.mrf.mxu1 }
 0x29f   :  { %v570_v48 = vpop.f32.mrf.mxu1 }
 0x2a0   :  { %v593_v49 = vadd.f32 %v570_v48, %v115_v47 }
 0x2a2   :  { %v2238_v50 = vmul.f32 -1.442695, %v593_v49 }
 0x2a4   :  { %2390 = vpow2.f32 %v2238_v50 }
 0x2a5   :  { %v590_v53 = vpop.f32.mrf.mxu2 }
 0x2a6   :  { %v613_v54 = vadd.f32 %v590_v53, %v159_v52  ;;  %v650_v5 = vpop.f32.mrf.mxu3 }
 0x2a7   :  { %v651_v14 = vadd.f32 %v2722_v46, %v650_v5 }
 0x2a8   :  { %v2239_v55 = vmul.f32 -1.442695, %v613_v54 }
 0x2aa   :  { %v2391_v56 = vpop.eup %2390  ;;  %2392 = vpow2.f32 %v2239_v55 }
 0x2ab   :  { %v597_v57 = vadd.f32 1.0, %v2391_v56 }
 0x2ad   :  { %2394 = vrcp.f32 %v597_v57  ;;  %v609_v29 = vand.u32 2147483648, %v597_v57  ;;  %v607_v2 = vand.u32 2147483647, %v597_v57  ;;  %vm603_vm11 = vweird.f32 %v597_v57 }
 0x2af   :  { %v610_v9 = vor.u32 1.1754944e-38, %v609_v29  ;;  %vm608_vm13 = vcmp.eq.f32.partialorder %v607_v2, 8.507059e+37 }
 0x2b0   :  { %v2393_v58 = vpop.eup %2392 }
 0x2b1   :  { %v617_v59 = vadd.f32 1.0, %v2393_v58 }
 0x2b3   :  { %v2395_v60 = vpop.eup %2394  ;;  %2396 = vrcp.f32 %v617_v59  ;;  %v629_v28 = vand.u32 2147483648, %v617_v59  ;;  %vm623_vm15 = vweird.f32 %v617_v59  ;;  %v627_v47 = vand.u32 2147483647, %v617_v59 }
 0x2b4   :  { %v599_v61 = vmul.f32 %v2395_v60, %v597_v57  ;;  %vm604_vm10 = vweird.f32 %v2395_v60 }
 0x2b5   :  { %vm605_vm12 = vmor %vm603_vm11, %vm604_vm10  ;;  %v630_v50 = vor.u32 1.1754944e-38, %v629_v28  ;;  %vm628_vm2 = vcmp.eq.f32.partialorder %v627_v47, 8.507059e+37 }
 0x2b6   :  { %v600_v62 = vsub.f32 1.0, %v599_v61 }
 0x2b8   :  { %v601_v63 = vmul.f32 %v2395_v60, %v600_v62 }
 0x2b9   :  { %v2397_v3 = vpop.eup %2396 }
 0x2ba   :  { %v619_v6 = vmul.f32 %v2397_v3, %v617_v59  ;;  %v602_v8 = vadd.f32 %v2395_v60, %v601_v63  ;;  %vm624_vm14 = vweird.f32 %v2397_v3 }
 0x2bb   :  { %vm625_vm1 = vmor %vm623_vm15, %vm624_vm14 }
 0x2bc   :  { %v620_v10 = vsub.f32 1.0, %v619_v6  ;;  %v606_v12 = vsel %vm605_vm12, %v2395_v60, %v602_v8 }
 0x2bd   :  { %v611_v15 = vsel %vm608_vm13, %v610_v9, %v606_v12 }
 0x2be   :  { %v653_v23 = vmul.f32 %v651_v14, %v611_v15  ;;  %v621_v27 = vmul.f32 %v2397_v3, %v620_v10  ;;  %v206_v10 = vadd.f32 %v2727_v51, %v2855_v37  ;;  %v165_v37 = vadd.f32 %v2710_v31, %v2857_v39  ;;  %v2263_v39 = vld [vmem:[%s3370_s1 + $0x70] sm:$0xff] }
 0x2c0   :  { %v654_v19 = vadd.f32 %v653_v23, %v203_v20  ;;  %v622_v33 = vadd.f32 %v2397_v3, %v621_v27 }
 0x2c2   :  { %2398 = vtanh.f32 %v654_v19  ;;  %v626_v48 = vsel %vm625_vm1, %v2397_v3, %v622_v33 }
 0x2c3   :  { %v631_v53 = vsel %vm628_vm2, %v630_v50, %v626_v48 }
 0x2c8   :  { %v2399_v49 = vpop.eup %2398 }
 0x2c9   :  { %v656_v52 = vsub.f32 %v2831_v34, %v2399_v49 }
 0x2cb   :  { %v657_v54 = vmul.f32 %v656_v52, %v631_v53 }
 0x2cd   :  { %v2875_v55 = vadd.f32 %v2399_v49, %v657_v54 }
 0x2cf   :  { %659 = vst.msk [vmem:[#allocation2 + $0x18] sm:$0xff] %vm63_vm0, %v2875_v55  ;;  %2241 = vmatmul.msk.f32.vlgmr.msra.gmra.mxu0 %vm63_vm0, %v2875_v55  ;;  %2242 = vmatmul.msk.f32.vlgmr.msra.gmra.mxu1 %vm63_vm0, %v2875_v55 }
 0x2d0   :  { %2245 = vmatmul.msk.f32.vlgmr.msra.gmra.mxu2 %vm63_vm0, %v2875_v55  ;;  %975 = vmatpush.msra.mxu0 %v2626_v18 }
 0x2d1   :  { %1005 = vmatpush.msra.mxu1 %v2555_v0  ;;  %1025 = vmatpush.msra.mxu2 %v2599_v11  ;;  %v118_v0 = vadd.f32 %v2704_v26, %v2818_v30 }
 0x2d2   :  { %976 = vmatpush.msra.mxu0 %v2646_v22 }
 0x2d3   :  { %1006 = vmatpush.msra.mxu1 %v2560_v1  ;;  %1026 = vmatpush.msra.mxu2 %v2608_v13  ;;  %v162_v1 = vadd.f32 %v2710_v31, %v2853_v36 }
 0x2d4   :  { %977 = vmatpush.msra.mxu0 %v2656_v24 }
 0x2d5   :  { %1007 = vmatpush.msra.mxu1 %v2572_v4  ;;  %1027 = vmatpush.msra.mxu2 %v2621_v17 }
 0x2d6   :  { %978 = vmatpush.msra.mxu0 %v2666_v25 }
 0x2d7   :  { %1008 = vmatpush.msra.mxu1 %v2584_v7  ;;  %1028 = vmatpush.msra.mxu2 %v2640_v21 }
 0x34c   :  { %v680_v11 = vpop.f32.mrf.mxu0  ;;  %v700_v13 = vpop.f32.mrf.mxu1 }
 0x34d   :  { %v703_v34 = vadd.f32 %v680_v11, %v118_v0  ;;  %v723_v35 = vadd.f32 %v700_v13, %v162_v1 }
 0x34f   :  { %v2243_v56 = vmul.f32 -1.442695, %v703_v34  ;;  %v2244_v4 = vmul.f32 -1.442695, %v723_v35 }
 0x351   :  { %2400 = vpow2.f32 %v2243_v56 }
 0x352   :  { %2402 = vpow2.f32 %v2244_v4  ;;  %v2261_v4 = vld [vmem:[%s3370_s1 + $0x60] sm:$0xff] }
 0x353   :  { %v760_v63 = vpop.f32.mrf.mxu2 }
 0x354   :  { %v761_v8 = vadd.f32 %v2722_v46, %v760_v63  ;;  %v209_v63 = vadd.f32 %v2727_v51, %v2859_v40  ;;  %v2949_v40 = vld [vmem:[#allocation2] sm:$0xff] }
 0x357   :  { %v2401_v17 = vpop.eup %2400 }
 0x358   :  { %v2403_v57 = vpop.eup %2402  ;;  %v707_v58 = vadd.f32 1.0, %v2401_v17 }
 0x359   :  { %v727_v7 = vadd.f32 1.0, %v2403_v57 }
 0x35a   :  { %2404 = vrcp.f32 %v707_v58  ;;  %v719_v36 = vand.u32 2147483648, %v707_v58  ;;  %v717_v29 = vand.u32 2147483647, %v707_v58  ;;  %vm713_vm4 = vweird.f32 %v707_v58 }
 0x35b   :  { %2406 = vrcp.f32 %v727_v7  ;;  %v739_v23 = vand.u32 2147483648, %v727_v7  ;;  %vm733_vm8 = vweird.f32 %v727_v7  ;;  %v737_v27 = vand.u32 2147483647, %v727_v7 }
 0x35c   :  { %v720_v5 = vor.u32 1.1754944e-38, %v719_v36  ;;  %vm718_vm6 = vcmp.eq.f32.partialorder %v717_v29, 8.507059e+37 }
 0x35d   :  { %v740_v28 = vor.u32 1.1754944e-38, %v739_v23  ;;  %vm738_vm10 = vcmp.eq.f32.partialorder %v737_v27, 8.507059e+37 }
 0x360   :  { %v2405_v21 = vpop.eup %2404 }
 0x361   :  { %v2407_v59 = vpop.eup %2406  ;;  %v709_v30 = vmul.f32 %v2405_v21, %v707_v58  ;;  %vm714_vm3 = vweird.f32 %v2405_v21 }
 0x362   :  { %v729_v61 = vmul.f32 %v2407_v59, %v727_v7  ;;  %vm715_vm5 = vmor %vm713_vm4, %vm714_vm3  ;;  %vm734_vm7 = vweird.f32 %v2407_v59 }
 0x363   :  { %v710_v60 = vsub.f32 1.0, %v709_v30  ;;  %vm735_vm9 = vmor %vm733_vm8, %vm734_vm7 }
 0x364   :  { %v730_v3 = vsub.f32 1.0, %v729_v61 }
 0x365   :  { %v711_v62 = vmul.f32 %v2405_v21, %v710_v60 }
 0x366   :  { %v731_v14 = vmul.f32 %v2407_v59, %v730_v3 }
 0x367   :  { %v712_v2 = vadd.f32 %v2405_v21, %v711_v62 }
 0x368   :  { %v732_v20 = vadd.f32 %v2407_v59, %v731_v14 }
 0x369   :  { %v716_v6 = vsel %vm715_vm5, %v2405_v21, %v712_v2 }
 0x36a   :  { %v721_v9 = vsel %vm718_vm6, %v720_v5, %v716_v6  ;;  %v736_v19 = vsel %vm735_vm9, %v2407_v59, %v732_v20 }
 0x36b   :  { %v763_v12 = vmul.f32 %v761_v8, %v721_v9  ;;  %v741_v48 = vsel %vm738_vm10, %v740_v28, %v736_v19  ;;  %v2953_v19 = vld [vmem:[#allocation2 + $0x8] sm:$0xff]  ;;  %v2961_v28 = vld [vmem:[#allocation2 + $0x18] sm:$0xff] }
 0x36d   :  { %v764_v15 = vadd.f32 %v763_v12, %v206_v10 }
 0x36f   :  { %2408 = vtanh.f32 %v764_v15 }
 0x375   :  { %v2409_v33 = vpop.eup %2408 }
 0x376   :  { %v766_v47 = vsub.f32 %v2875_v55, %v2409_v33  ;;  %v121_v55 = vadd.f32 %v2704_v26, %v2820_v32  ;;  %v2262_v32 = vld [vmem:[%s3370_s1 + $0x68] sm:$0xff] }
 0x378   :  { %v767_v49 = vmul.f32 %v766_v47, %v741_v48 }
 0x37a   :  { %v2905_v50 = vadd.f32 %v2409_v33, %v767_v49  ;;  %v2957_v33 = vld [vmem:[#allocation2 + $0x10] sm:$0xff]  ;;  %v124_v49 = vadd.f32 %v2704_v26, %v2823_v38  ;;  %v2980_v26 = vld [vmem:[%s3369_s2 + $0x78] sm:$0xff] }
 0x37b   :  { %v2272_v38 = vld [vmem:[%s3370_s1 + $0xb8] sm:$0xff] }
 0x37c   :  { %769 = vst.msk [vmem:[#allocation2 + $0x20] sm:$0xff] %vm63_vm0, %v2905_v50  ;;  %2246 = vmatmul.msk.f32.vlgmr.msrb.gmra.mxu3 %vm63_vm0, %v2905_v50  ;;  %2247 = vmatmul.msk.f32.vlgmr.msrb.gmra.mxu0 %vm63_vm0, %v2905_v50 }
 0x37d   :  { %2250 = vmatmul.msk.f32.vlgmr.msrb.gmra.mxu1 %vm63_vm0, %v2905_v50  ;;  %1085 = vmatpush.msrb.mxu3 %v2626_v18 }
 0x37f   :  { %1086 = vmatpush.msrb.mxu3 %v2646_v22 }
 0x381   :  { %1087 = vmatpush.msrb.mxu3 %v2656_v24 }
 0x383   :  { %1088 = vmatpush.msrb.mxu3 %v2666_v25  ;;  %v2264_v25 = vld [vmem:[%s3370_s1 + $0x78] sm:$0xff]  ;;  %v2965_v47 = vld [vmem:[#allocation2 + $0x20] sm:$0xff] }
 0x384   :  { %1186 = vmatpush.msrb.mxu0 %v2264_v25  ;;  %v3003_v25 = vld [vmem:[%s3369_s2 + $0x68] sm:$0xff] }
 0x386   :  { %1187 = vmatpush.msrb.mxu0 %v2263_v39  ;;  %v2266_v39 = vld [vmem:[%s3370_s1 + $0x88] sm:$0xff] }
 0x388   :  { %1188 = vmatpush.msrb.mxu0 %v2262_v32 }
 0x38a   :  { %1189 = vmatpush.msrb.mxu0 %v2261_v4  ;;  %v3015_v4 = vld [vmem:[%s3369_s2 + $0x60] sm:$0xff] }
 0x3f9   :  { %v810_v52 = vpop.f32.mrf.mxu0 }
 0x3fa   :  { %v833_v53 = vadd.f32 %v810_v52, %v165_v37  ;;  %v870_v59 = vpop.f32.mrf.mxu1 }
 0x3fb   :  { %v871_v36 = vadd.f32 %v2722_v46, %v870_v59 }
 0x3fc   :  { %v2249_v54 = vmul.f32 -1.442695, %v833_v53 }
 0x3fe   :  { %2410 = vpow2.f32 %v2249_v54 }
 0x3ff   :  { %v790_v0 = vpop.f32.mrf.mxu3 }
 0x400   :  { %v813_v1 = vadd.f32 %v790_v0, %v121_v55 }
 0x402   :  { %v2248_v11 = vmul.f32 -1.442695, %v813_v1 }
 0x404   :  { %2412 = vpow2.f32 %v2248_v11  ;;  %v2411_v18 = vpop.eup %2410 }
 0x405   :  { %v837_v13 = vadd.f32 1.0, %v2411_v18 }
 0x407   :  { %v849_v8 = vand.u32 2147483648, %v837_v13  ;;  %vm843_vm1 = vweird.f32 %v837_v13  ;;  %v847_v9 = vand.u32 2147483647, %v837_v13 }
 0x409   :  { %v850_v14 = vor.u32 1.1754944e-38, %v849_v8  ;;  %vm848_vm3 = vcmp.eq.f32.partialorder %v847_v9, 8.507059e+37 }
 0x40a   :  { %v2413_v22 = vpop.eup %2412 }
 0x40b   :  { %v817_v24 = vadd.f32 1.0, %v2413_v22 }
 0x40d   :  { %2414 = vrcp.f32 %v817_v24  ;;  %v829_v58 = vand.u32 2147483648, %v817_v24  ;;  %v827_v21 = vand.u32 2147483647, %v817_v24  ;;  %vm823_vm12 = vweird.f32 %v817_v24 }
 0x40e   :  { %2416 = vrcp.f32 %v837_v13 }
 0x40f   :  { %v830_v61 = vor.u32 1.1754944e-38, %v829_v58  ;;  %vm828_vm14 = vcmp.eq.f32.partialorder %v827_v21, 8.507059e+37 }
 0x413   :  { %v2415_v34 = vpop.eup %2414 }
 0x414   :  { %v2417_v35 = vpop.eup %2416  ;;  %v819_v56 = vmul.f32 %v2415_v34, %v817_v24  ;;  %vm824_vm11 = vweird.f32 %v2415_v34  ;;  %v2271_v24 = vld [vmem:[%s3370_s1 + $0xb0] sm:$0xff] }
 0x415   :  { %v839_v57 = vmul.f32 %v2417_v35, %v837_v13  ;;  %vm825_vm13 = vmor %vm823_vm12, %vm824_vm11  ;;  %vm844_vm15 = vweird.f32 %v2417_v35  ;;  %v2267_v13 = vld [vmem:[%s3370_s1 + $0x90] sm:$0xff] }
 0x416   :  { %v820_v17 = vsub.f32 1.0, %v819_v56  ;;  %vm845_vm2 = vmor %vm843_vm1, %vm844_vm15 }
 0x417   :  { %v840_v60 = vsub.f32 1.0, %v839_v57  ;;  %v2269_v57 = vld [vmem:[%s3370_s1 + $0xa0] sm:$0xff] }
 0x418   :  { %v821_v7 = vmul.f32 %v2415_v34, %v820_v17  ;;  %v2265_v17 = vld [vmem:[%s3370_s1 + $0x80] sm:$0xff] }
 0x419   :  { %v841_v3 = vmul.f32 %v2417_v35, %v840_v60 }
 0x41a   :  { %v822_v30 = vadd.f32 %v2415_v34, %v821_v7 }
 0x41b   :  { %v842_v6 = vadd.f32 %v2417_v35, %v841_v3  ;;  %v212_v3 = vadd.f32 %v2727_v51, %v2863_v42 }
 0x41c   :  { %v826_v62 = vsel %vm825_vm13, %v2415_v34, %v822_v30  ;;  %v2270_v34 = vld [vmem:[%s3370_s1 + $0xa8] sm:$0xff] }
 0x41d   :  { %v831_v29 = vsel %vm828_vm14, %v830_v61, %v826_v62  ;;  %v846_v10 = vsel %vm845_vm2, %v2417_v35, %v842_v6 }
 0x41e   :  { %v873_v2 = vmul.f32 %v871_v36, %v831_v29  ;;  %v851_v20 = vsel %vm848_vm3, %v850_v14, %v846_v10 }
 0x420   :  { %v874_v5 = vadd.f32 %v873_v2, %v209_v63 }
 0x422   :  { %2418 = vtanh.f32 %v874_v5 }
 0x428   :  { %v2419_v12 = vpop.eup %2418 }
 0x429   :  { %v876_v15 = vsub.f32 %v2905_v50, %v2419_v12  ;;  %v168_v50 = vadd.f32 %v2710_v31, %v2861_v41  ;;  %v2268_v31 = vld [vmem:[%s3370_s1 + $0x98] sm:$0xff]  ;;  %v2992_v41 = vld [vmem:[%s3369_s2 + $0x70] sm:$0xff] }
 0x42a   :  { %1230 = vmatpush.msrb.mxu1 %v2268_v31  ;;  %v3160_v31 = vld [vmem:[%s3372_s3 + $0x4] ss:$0 sm:$0xff] }
 0x42b   :  { %v877_v23 = vmul.f32 %v876_v15, %v851_v20 }
 0x42c   :  { %1231 = vmatpush.msrb.mxu1 %v2267_v13 }
 0x42d   :  { %v2939_v27 = vadd.f32 %v2419_v12, %v877_v23  ;;  %v3038_v23 = vld [vmem:[%s3369_s2 + $0xb0] sm:$0xff] }
 0x42e   :  { %1232 = vmatpush.msrb.mxu1 %v2266_v39 }
 0x42f   :  { %879 = vst.msk [vmem:[#allocation2 + $0x28] sm:$0xff] %vm63_vm0, %v2939_v27  ;;  %2251 = vmatmul.msk.f32.vlgmr.msrb.gmra.mxu2 %vm63_vm0, %v2939_v27  ;;  %2252 = vmatmul.msk.f32.vlgmr.msra.gmra.mxu3 %vm63_vm0, %v2939_v27 }
 0x430   :  { %2255 = vmatmul.msk.f32.vlgmr.msra.gmra.mxu0 %vm63_vm0, %v2939_v27  ;;  %1315 = vmatpush.msra.mxu3 %v2980_v26 }
 0x431   :  { %1274 = vmatpush.msrb.mxu2 %v2272_v38  ;;  %1233 = vmatpush.msrb.mxu1 %v2265_v17 }
 0x432   :  { %1316 = vmatpush.msra.mxu3 %v2992_v41 }
 0x433   :  { %1275 = vmatpush.msrb.mxu2 %v2271_v24 }
 0x434   :  { %1317 = vmatpush.msra.mxu3 %v3003_v25 }
 0x435   :  { %1276 = vmatpush.msrb.mxu2 %v2270_v34 }
 0x436   :  { %v2969_v48 = vld [vmem:[#allocation2 + $0x28] sm:$0xff]  ;;  %1318 = vmatpush.msra.mxu3 %v3015_v4 }
 0x437   :  { %1277 = vmatpush.msrb.mxu2 %v2269_v57 }
 0x438   :  { %2289 = vmatmul.msk.f32.vlgmr.msrb.gmra.mxu0 %vm63_vm0, %v2949_v40 }
 0x440   :  { %2290 = vmatmul.msk.f32.gmra.mxu0 %vm63_vm0, %v2953_v19 }
 0x448   :  { %2291 = vmatmul.msk.f32.gmra.mxu0 %vm63_vm0, %v2957_v33 }
 0x450   :  { %2292 = vmatmul.msk.f32.gmra.mxu0 %vm63_vm0, %v2961_v28 }
 0x458   :  { %2293 = vmatmul.msk.f32.gmra.mxu0 %vm63_vm0, %v2965_v47 }
 0x460   :  { %2294 = vmatmul.msk.f32.gmra.mxu0 %vm63_vm0, %v2969_v48 }
 0x4ad   :  { %v980_v60 = vpop.f32.mrf.mxu0 }
 0x4ae   :  { %v981_v29 = vadd.f32 %v2722_v46, %v980_v60  ;;  %v3031_v46 = vld [vmem:[%s3369_s2 + $0xb8] sm:$0xff] }
 0x4af   :  { %1616 = vmatpush.msra.mxu0 %v3031_v46 }
 0x4b1   :  { %1617 = vmatpush.msra.mxu0 %v3038_v23 }
 0x4b2   :  { %v900_v37 = vpop.f32.mrf.mxu2  ;;  %v920_v52 = vpop.f32.mrf.mxu3 }
 0x4b3   :  { %v923_v53 = vadd.f32 %v900_v37, %v124_v49  ;;  %v943_v54 = vadd.f32 %v920_v52, %v168_v50  ;;  %v3046_v37 = vld [vmem:[%s3369_s2 + $0x98] sm:$0xff]  ;;  %v3064_v52 = vld [vmem:[%s3369_s2 + $0xa8] sm:$0xff] }
 0x4b4   :  { %1618 = vmatpush.msra.mxu0 %v3064_v52 }
 0x4b5   :  { %v2253_v55 = vmul.f32 -1.442695, %v923_v53  ;;  %v2254_v0 = vmul.f32 -1.442695, %v943_v54  ;;  %v3072_v53 = vld [vmem:[%s3369_s2 + $0x88] sm:$0xff]  ;;  %v3077_v54 = vld [vmem:[%s3369_s2 + $0xa0] sm:$0xff]  ;;  %v1191_v38 = vpop.f32.mrf.mxu0 }
 0x4b6   :  { %1619 = vmatpush.msra.mxu0 %v3077_v54  ;;  %v1192_v24 = vadd.f32 %v3160_v31, %v1191_v38 }
 0x4b7   :  { %2420 = vpow2.f32 %v2253_v55 }
 0x4b8   :  { %2422 = vpow2.f32 %v2254_v0  ;;  %1754 = vmatpush.msrb.mxu0 %v2980_v26  ;;  %v3090_v0 = vld [vmem:[%s3369_s2 + $0x80] sm:$0xff] }
 0x4ba   :  { %1755 = vmatpush.msrb.mxu0 %v2992_v41 }
 0x4bc   :  { %1756 = vmatpush.msrb.mxu0 %v3003_v25 }
 0x4bd   :  { %v2421_v1 = vpop.eup %2420 }
 0x4be   :  { %v2423_v11 = vpop.eup %2422  ;;  %v927_v18 = vadd.f32 1.0, %v2421_v1  ;;  %1757 = vmatpush.msrb.mxu0 %v3015_v4 }
 0x4bf   :  { %v947_v22 = vadd.f32 1.0, %v2423_v11 }
 0x4c0   :  { %2424 = vrcp.f32 %v927_v18  ;;  %v939_v7 = vand.u32 2147483648, %v927_v18  ;;  %v937_v30 = vand.u32 2147483647, %v927_v18  ;;  %vm933_vm5 = vweird.f32 %v927_v18 }
 0x4c1   :  { %2426 = vrcp.f32 %v947_v22  ;;  %v959_v10 = vand.u32 2147483648, %v947_v22  ;;  %vm953_vm9 = vweird.f32 %v947_v22  ;;  %v957_v12 = vand.u32 2147483647, %v947_v22 }
 0x4c2   :  { %v940_v36 = vor.u32 1.1754944e-38, %v939_v7  ;;  %vm938_vm7 = vcmp.eq.f32.partialorder %v937_v30, 8.507059e+37 }
 0x4c3   :  { %v960_v20 = vor.u32 1.1754944e-38, %v959_v10  ;;  %vm958_vm11 = vcmp.eq.f32.partialorder %v957_v12, 8.507059e+37  ;;  %v2522_v10 = vld [vmem:[%s3372_s3 + $0x3] ss:$0 sm:$0xff] }
 0x4c6   :  { %v2425_v32 = vpop.eup %2424 }
 0x4c7   :  { %v2427_v35 = vpop.eup %2426  ;;  %v929_v56 = vmul.f32 %v2425_v32, %v927_v18  ;;  %vm934_vm4 = vweird.f32 %v2425_v32 }
 0x4c8   :  { %v949_v21 = vmul.f32 %v2427_v35, %v947_v22  ;;  %vm935_vm6 = vmor %vm933_vm5, %vm934_vm4  ;;  %vm954_vm8 = vweird.f32 %v2427_v35 }
 0x4c9   :  { %v930_v58 = vsub.f32 1.0, %v929_v56  ;;  %vm955_vm10 = vmor %vm953_vm9, %vm954_vm8 }
 0x4ca   :  { %v950_v62 = vsub.f32 1.0, %v949_v21 }
 0x4cb   :  { %v931_v59 = vmul.f32 %v2425_v32, %v930_v58 }
 0x4cc   :  { %v951_v6 = vmul.f32 %v2427_v35, %v950_v62 }
 0x4cd   :  { %v932_v61 = vadd.f32 %v2425_v32, %v931_v59 }
 0x4ce   :  { %v952_v9 = vadd.f32 %v2427_v35, %v951_v6 }
 0x4cf   :  { %v936_v63 = vsel %vm935_vm6, %v2425_v32, %v932_v61 }
 0x4d0   :  { %v941_v2 = vsel %vm938_vm7, %v940_v36, %v936_v63  ;;  %v956_v14 = vsel %vm955_vm10, %v2427_v35, %v952_v9  ;;  %v3166_v35 = vld [vmem:[%s3372_s3 + $0x5] ss:$0 sm:$0xff] }
 0x4d1   :  { %v983_v5 = vmul.f32 %v981_v29, %v941_v2  ;;  %v961_v42 = vsel %vm958_vm11, %v960_v20, %v956_v14 }
 0x4d3   :  { %v984_v8 = vadd.f32 %v983_v5, %v212_v3 }
 0x4d5   :  { %2428 = vtanh.f32 %v984_v8 }
 0x4db   :  { %v2429_v15 = vpop.eup %2428 }
 0x4dc   :  { %v986_v51 = vsub.f32 %v2939_v27, %v2429_v15  ;;  %v3059_v27 = vld [vmem:[%s3369_s2 + $0x90] sm:$0xff] }
 0x4de   :  { %v987_v49 = vmul.f32 %v986_v51, %v961_v42 }
 0x4e0   :  { %v3041_v50 = vadd.f32 %v2429_v15, %v987_v49  ;;  %v2523_v15 = vld [vmem:[%s3372_s3 + $0x2] ss:$0 sm:$0xff] }
 0x4e1   :  { %v215_v20 = vadd.f32 %v2523_v15, %v2867_v44  ;;  %v3179_v44 = vld [vmem:[%s3372_s3 + $0x7] ss:$0 sm:$0xff]  ;;  %v1194_v15 = vpop.f32.mrf.mxu0 }
 0x4e2   :  { %989 = vst.msk [vmem:[#allocation2 + $0x30] sm:$0xff] %vm63_vm0, %v3041_v50  ;;  %2256 = vmatmul.msk.f32.vlgmr.msra.gmra.mxu1 %vm63_vm0, %v3041_v50  ;;  %2257 = vmatmul.msk.f32.vlgmr.msra.gmra.mxu2 %vm63_vm0, %v3041_v50 }
 0x4e3   :  { %2260 = vmatmul.msk.f32.vlgmr.msrb.gmra.mxu3 %vm63_vm0, %v3041_v50  ;;  %1645 = vmatpush.msra.mxu1 %v2980_v26 }
 0x4e4   :  { %1335 = vmatpush.msrb.mxu3 %v3046_v37  ;;  %1665 = vmatpush.msra.mxu2 %v3046_v37 }
 0x4e5   :  { %1646 = vmatpush.msra.mxu1 %v2992_v41 }
 0x4e6   :  { %1336 = vmatpush.msrb.mxu3 %v3059_v27  ;;  %1666 = vmatpush.msra.mxu2 %v3059_v27 }
 0x4e7   :  { %1647 = vmatpush.msra.mxu1 %v3003_v25 }
 0x4e8   :  { %1337 = vmatpush.msrb.mxu3 %v3072_v53  ;;  %1667 = vmatpush.msra.mxu2 %v3072_v53 }
 0x4e9   :  { %v1107_v55 = vld [vmem:[#allocation2 + $0x30] sm:$0xff]  ;;  %1648 = vmatpush.msra.mxu1 %v3015_v4 }
 0x4ea   :  { %2295 = vmatmul.msk.f32.gmra.mxu0 %vm63_vm0, %v1107_v55  ;;  %2297 = vmatmul.msk.f32.vlgmr.msrb.gmra.mxu1 %vm63_vm0, %v2949_v40 }
 0x4eb   :  { %2305 = vmatmul.msk.f32.vlgmr.msrb.gmra.mxu2 %vm63_vm0, %v2949_v40  ;;  %1319 = vmatmul.f32.vlgmr.msra.gmra.mxu3 %v2526_v16 }
 0x4ec   :  { %1338 = vmatpush.msrb.mxu3 %v3090_v0  ;;  %1668 = vmatpush.msra.mxu2 %v3090_v0 }
 0x4ed   :  { %1774 = vmatpush.msrb.mxu1 %v3046_v37 }
 0x4ee   :  { %1398 = vmatpush.msra.mxu3 %v3031_v46  ;;  %1834 = vmatpush.msrb.mxu2 %v3031_v46 }
 0x4ef   :  { %1775 = vmatpush.msrb.mxu1 %v3059_v27 }
 0x4f0   :  { %1399 = vmatpush.msra.mxu3 %v3038_v23  ;;  %1835 = vmatpush.msrb.mxu2 %v3038_v23 }
 0x4f1   :  { %1776 = vmatpush.msrb.mxu1 %v3072_v53 }
 0x4f2   :  { %1400 = vmatpush.msra.mxu3 %v3064_v52  ;;  %2298 = vmatmul.msk.f32.gmra.mxu1 %vm63_vm0, %v2953_v19 }
 0x4f3   :  { %1836 = vmatpush.msrb.mxu2 %v3064_v52  ;;  %1339 = vmatmul.f32.vlgmr.msrb.gmra.mxu3 %v2526_v16 }
 0x4f4   :  { %2306 = vmatmul.msk.f32.gmra.mxu2 %vm63_vm0, %v2953_v19  ;;  %1401 = vmatpush.msra.mxu3 %v3077_v54 }
 0x4f5   :  { %1777 = vmatpush.msrb.mxu1 %v3090_v0  ;;  %1837 = vmatpush.msrb.mxu2 %v3077_v54 }
 0x4f6   :  { %1427 = vmatpush.msrb.mxu3 %v2980_v26 }
 0x4f8   :  { %1428 = vmatpush.msrb.mxu3 %v2992_v41 }
 0x4fa   :  { %1429 = vmatpush.msrb.mxu3 %v3003_v25  ;;  %2299 = vmatmul.msk.f32.gmra.mxu1 %vm63_vm0, %v2957_v33 }
 0x4fb   :  { %1402 = vmatmul.f32.vlgmr.msra.gmra.mxu3 %v2526_v16  ;;  %v2520_v16 = vld [vmem:[%s3372_s3] ss:$0 sm:$0xff] }
 0x4fc   :  { %2307 = vmatmul.msk.f32.gmra.mxu2 %vm63_vm0, %v2957_v33  ;;  %1430 = vmatpush.msrb.mxu3 %v3015_v4  ;;  %v127_v40 = vadd.f32 %v2520_v16, %v2826_v45 }
 0x4fe   :  { %1447 = vmatpush.msra.mxu3 %v3046_v37 }
 0x500   :  { %1448 = vmatpush.msra.mxu3 %v3059_v27 }
 0x502   :  { %1449 = vmatpush.msra.mxu3 %v3072_v53  ;;  %2300 = vmatmul.msk.f32.gmra.mxu1 %vm63_vm0, %v2961_v28 }
 0x504   :  { %2308 = vmatmul.msk.f32.gmra.mxu2 %vm63_vm0, %v2961_v28  ;;  %1450 = vmatpush.msra.mxu3 %v3090_v0 }
 0x50a   :  { %2301 = vmatmul.msk.f32.gmra.mxu1 %vm63_vm0, %v2965_v47 }
 0x50c   :  { %2309 = vmatmul.msk.f32.gmra.mxu2 %vm63_vm0, %v2965_v47  ;;  %v2521_v47 = vld [vmem:[%s3372_s3 + $0x1] ss:$0 sm:$0xff] }
 0x50d   :  { %v171_v1 = vadd.f32 %v2521_v47, %v2865_v43 }
 0x512   :  { %2302 = vmatmul.msk.f32.gmra.mxu1 %vm63_vm0, %v2969_v48 }
 0x514   :  { %2310 = vmatmul.msk.f32.gmra.mxu2 %vm63_vm0, %v2969_v48 }
 0x51a   :  { %2303 = vmatmul.msk.f32.gmra.mxu1 %vm63_vm0, %v1107_v55 }
 0x51c   :  { %2311 = vmatmul.msk.f32.gmra.mxu2 %vm63_vm0, %v1107_v55 }
 0x55f   :  { %v1010_v19 = vpop.f32.mrf.mxu1 }
 0x560   :  { %v1033_v33 = vadd.f32 %v1010_v19, %v127_v40 }
 0x562   :  { %v2258_v28 = vmul.f32 -1.442695, %v1033_v33 }
 0x564   :  { %2430 = vpow2.f32 %v2258_v28 }
 0x565   :  { %v1030_v48 = vpop.f32.mrf.mxu2 }
 0x566   :  { %v1053_v11 = vadd.f32 %v1030_v48, %v171_v1  ;;  %v1090_v18 = vpop.f32.mrf.mxu3 }
 0x567   :  { %v1235_v17 = vpop.f32.mrf.mxu1  ;;  %v1091_v12 = vadd.f32 %v2522_v10, %v1090_v18 }
 0x568   :  { %v2259_v22 = vmul.f32 -1.442695, %v1053_v11  ;;  %v1236_v7 = vadd.f32 %v3166_v35, %v1235_v17 }
 0x56a   :  { %v2431_v45 = vpop.eup %2430  ;;  %2432 = vpow2.f32 %v2259_v22 }
 0x56b   :  { %v1037_v13 = vadd.f32 1.0, %v2431_v45 }
 0x56d   :  { %2434 = vrcp.f32 %v1037_v13  ;;  %v1049_v30 = vand.u32 2147483648, %v1037_v13  ;;  %v1047_v36 = vand.u32 2147483647, %v1037_v13  ;;  %vm1043_vm13 = vweird.f32 %v1037_v13 }
 0x56e   :  { %v1320_v39 = vpop.f32.mrf.mxu3 }
 0x56f   :  { %v1343_v32 = vadd.f32 %v1320_v39, %v1192_v24  ;;  %v1050_v5 = vor.u32 1.1754944e-38, %v1049_v30  ;;  %vm1048_vm15 = vcmp.eq.f32.partialorder %v1047_v36, 8.507059e+37 }
 0x570   :  { %v2433_v43 = vpop.eup %2432 }
 0x571   :  { %v1057_v34 = vadd.f32 1.0, %v2433_v43  ;;  %v2313_v56 = vmul.f32 -1.442695, %v1343_v32 }
 0x573   :  { %v2435_v57 = vpop.eup %2434  ;;  %2436 = vrcp.f32 %v1057_v34  ;;  %v1067_v33 = vand.u32 2147483647, %v1057_v34  ;;  %v1069_v28 = vand.u32 2147483648, %v1057_v34  ;;  %vm1063_vm2 = vweird.f32 %v1057_v34 }
 0x574   :  { %v1039_v58 = vmul.f32 %v2435_v57, %v1037_v13  ;;  %2438 = vpow2.f32 %v2313_v56  ;;  %vm1044_vm12 = vweird.f32 %v2435_v57 }
 0x575   :  { %vm1045_vm14 = vmor %vm1043_vm13, %vm1044_vm12  ;;  %vm1068_vm4 = vcmp.eq.f32.partialorder %v1067_v33, 8.507059e+37  ;;  %v1070_v18 = vor.u32 1.1754944e-38, %v1069_v28 }
 0x576   :  { %v1040_v21 = vsub.f32 1.0, %v1039_v58  ;;  %v1340_v59 = vpop.f32.mrf.mxu3  ;;  %v1279_v58 = vpop.f32.mrf.mxu2 }
 0x577   :  { %v1363_v60 = vadd.f32 %v1340_v59, %v1236_v7 }
 0x578   :  { %v1041_v61 = vmul.f32 %v2435_v57, %v1040_v21 }
 0x579   :  { %v2437_v62 = vpop.eup %2436  ;;  %v2314_v29 = vmul.f32 -1.442695, %v1363_v60 }
 0x57a   :  { %v2439_v63 = vpop.eup %2438  ;;  %v1059_v2 = vmul.f32 %v2437_v62, %v1057_v34  ;;  %v1042_v3 = vadd.f32 %v2435_v57, %v1041_v61  ;;  %vm1064_vm1 = vweird.f32 %v2437_v62  ;;  %v3185_v34 = vld [vmem:[%s3372_s3 + $0x6] ss:$0 sm:$0xff] }
 0x57b   :  { %v1347_v6 = vadd.f32 1.0, %v2439_v63  ;;  %2440 = vpow2.f32 %v2314_v29  ;;  %vm1065_vm3 = vmor %vm1063_vm2, %vm1064_vm1  ;;  %v1280_v60 = vadd.f32 %v3185_v34, %v1279_v58 }
 0x57c   :  { %v1060_v8 = vsub.f32 1.0, %v1059_v2  ;;  %v1046_v9 = vsel %vm1045_vm14, %v2435_v57, %v1042_v3 }
 0x57d   :  { %v1051_v14 = vsel %vm1048_vm15, %v1050_v5, %v1046_v9  ;;  %2442 = vrcp.f32 %v1347_v6  ;;  %v1359_v22 = vand.u32 2147483648, %v1347_v6  ;;  %v1357_v24 = vand.u32 2147483647, %v1347_v6 }
 0x57e   :  { %v1093_v51 = vmul.f32 %v1091_v12, %v1051_v14  ;;  %v1061_v42 = vmul.f32 %v2437_v62, %v1060_v8  ;;  %v1403_v45 = vpop.f32.mrf.mxu3  ;;  %vm1353_vm6 = vweird.f32 %v1347_v6 }
 0x57f   :  { %v1404_v57 = vadd.f32 %v3179_v44, %v1403_v45  ;;  %v1360_v7 = vor.u32 1.1754944e-38, %v1359_v22  ;;  %vm1358_vm8 = vcmp.eq.f32.partialorder %v1357_v24, 8.507059e+37 }
 0x580   :  { %v1094_v49 = vadd.f32 %v1093_v51, %v215_v20  ;;  %v1062_v19 = vadd.f32 %v2437_v62, %v1061_v42  ;;  %v1195_v20 = vadd.f32 %v3160_v31, %v1194_v15 }
 0x581   :  { %v2441_v55 = vpop.eup %2440 }
 0x582   :  { %2444 = vtanh.f32 %v1094_v49  ;;  %v1367_v16 = vadd.f32 1.0, %v2441_v55  ;;  %v1066_v1 = vsel %vm1065_vm3, %v2437_v62, %v1062_v19  ;;  %v1238_v55 = vpop.f32.mrf.mxu1 }
 0x583   :  { %v2443_v40 = vpop.eup %2442  ;;  %v1071_v32 = vsel %vm1068_vm4, %v1070_v18, %v1066_v1 }
 0x584   :  { %2446 = vrcp.f32 %v1367_v16  ;;  %v1349_v47 = vmul.f32 %v2443_v40, %v1347_v6  ;;  %vm1354_vm5 = vweird.f32 %v2443_v40  ;;  %v1379_v63 = vand.u32 2147483648, %v1367_v16 }
 0x585   :  { %vm1355_vm7 = vmor %vm1353_vm6, %vm1354_vm5  ;;  %vm1373_vm10 = vweird.f32 %v1367_v16  ;;  %v1377_v2 = vand.u32 2147483647, %v1367_v16 }
 0x586   :  { %v1350_v48 = vsub.f32 1.0, %v1349_v47  ;;  %v1380_v8 = vor.u32 1.1754944e-38, %v1379_v63 }
 0x587   :  { %vm1378_vm12 = vcmp.eq.f32.partialorder %v1377_v2, 8.507059e+37 }
 0x588   :  { %v2445_v11 = vpop.eup %2444  ;;  %v1351_v13 = vmul.f32 %v2443_v40, %v1350_v48 }
 0x589   :  { %v1096_v38 = vsub.f32 %v3041_v50, %v2445_v11 }
 0x58a   :  { %v2447_v39 = vpop.eup %2446  ;;  %v1352_v17 = vadd.f32 %v2443_v40, %v1351_v13 }
 0x58b   :  { %v1097_v43 = vmul.f32 %v1096_v38, %v1071_v32  ;;  %v1369_v56 = vmul.f32 %v2447_v39, %v1367_v16  ;;  %vm1374_vm9 = vweird.f32 %v2447_v39  ;;  %v1239_v16 = vadd.f32 %v3166_v35, %v1238_v55 }
 0x58c   :  { %v1356_v59 = vsel %vm1355_vm7, %v2443_v40, %v1352_v17  ;;  %vm1375_vm11 = vmor %vm1373_vm10, %vm1374_vm9 }
 0x58d   :  { %v1098_v50 = vadd.f32 %v2445_v11, %v1097_v43  ;;  %v1370_v21 = vsub.f32 1.0, %v1369_v56  ;;  %v1361_v30 = vsel %vm1358_vm8, %v1360_v7, %v1356_v59  ;;  %v1282_v43 = vpop.f32.mrf.mxu2 }
 0x58e   :  { %v1406_v61 = vmul.f32 %v1404_v57, %v1361_v30 }
 0x58f   :  { %1099 = vst.msk [vmem:[#allocation2 + $0x38] sm:$0xff] %vm63_vm0, %v1098_v50  ;;  %v1371_v36 = vmul.f32 %v2447_v39, %v1370_v21 }
 0x590   :  { %1100 = vst.msk [vmem:[%s3373_s4] sm:$0xff] %vm63_vm0, %v1098_v50  ;;  %v1407_v62 = vadd.f32 %v1406_v61, %v1280_v60  ;;  %v1283_v50 = vadd.f32 %v3185_v34, %v1282_v43 }
 0x591   :  { %v1372_v29 = vadd.f32 %v2447_v39, %v1371_v36 }
 0x592   :  { %2448 = vtanh.f32 %v1407_v62 }
 0x593   :  { %v1376_v5 = vsel %vm1375_vm11, %v2447_v39, %v1372_v29 }
 0x594   :  { %v1381_v10 = vsel %vm1378_vm12, %v1380_v8, %v1376_v5 }
 0x596   :  { %v1108_v3 = vld [vmem:[#allocation2 + $0x38] sm:$0xff] }
 0x597   :  { %2296 = vmatmul.msk.f32.gmra.mxu0 %vm63_vm0, %v1108_v3  ;;  %2304 = vmatmul.msk.f32.gmra.mxu1 %vm63_vm0, %v1108_v3 }
 0x598   :  { %2312 = vmatmul.msk.f32.gmra.mxu2 %vm63_vm0, %v1108_v3  ;;  %v2449_v6 = vpop.eup %2448 }
 0x599   :  { %v1409_v9 = vsub.f32 0.0, %v2449_v6 }
 0x59b   :  { %v1410_v12 = vmul.f32 %v1409_v9, %v1381_v10  ;;  %v1197_v9 = vpop.f32.mrf.mxu0 }
 0x59d   :  { %v3197_v14 = vadd.f32 %v2449_v6, %v1410_v12 }
 0x59f   :  { %2315 = vmatmul.msk.f32.vlgmr.msrb.gmra.mxu3 %vm63_vm0, %v3197_v14 }
 0x5a0   :  { %1507 = vmatpush.msrb.mxu3 %v3031_v46 }
 0x5a2   :  { %1508 = vmatpush.msrb.mxu3 %v3038_v23 }
 0x5a3   :  { %v3242_v10 = vpop.f32.mrf.mxu0 }
 0x5a4   :  { %1509 = vmatpush.msrb.mxu3 %v3064_v52 }
 0x5a6   :  { %1510 = vmatpush.msrb.mxu3 %v3077_v54 }
 0x5a7   :  { %2316 = vmatmul.msk.f32.vlgmr.msra.gmra.mxu3 %vm63_vm0, %v3197_v14 }
 0x5a8   :  { %1536 = vmatpush.msra.mxu3 %v2980_v26 }
 0x5aa   :  { %1537 = vmatpush.msra.mxu3 %v2992_v41 }
 0x5ab   :  { %v3244_v12 = vpop.f32.mrf.mxu0 }
 0x5ac   :  { %1538 = vmatpush.msra.mxu3 %v3003_v25 }
 0x5ae   :  { %1539 = vmatpush.msra.mxu3 %v3015_v4 }
 0x5af   :  { %2319 = vmatmul.msk.f32.vlgmr.msrb.gmra.mxu3 %vm63_vm0, %v3197_v14 }
 0x5b0   :  { %1556 = vmatpush.msrb.mxu3 %v3046_v37 }
 0x5b2   :  { %1557 = vmatpush.msrb.mxu3 %v3059_v27 }
 0x5b4   :  { %1558 = vmatpush.msrb.mxu3 %v3072_v53 }
 0x5b6   :  { %1559 = vmatpush.msrb.mxu3 %v3090_v0 }
 0x622   :  { %v1432_v51 = vpop.f32.mrf.mxu3 }
 0x623   :  { %v1455_v42 = vadd.f32 %v1432_v51, %v1195_v20  ;;  %v3247_v51 = vpop.f32.mrf.mxu0 }
 0x625   :  { %v2317_v49 = vmul.f32 -1.442695, %v1455_v42 }
 0x627   :  { %2450 = vpow2.f32 %v2317_v49  ;;  %v1241_v49 = vpop.f32.mrf.mxu1 }
 0x628   :  { %v1242_v55 = vadd.f32 %v3166_v35, %v1241_v49 }
 0x62a   :  { %v1452_v40 = vpop.f32.mrf.mxu3 }
 0x62b   :  { %v1475_v19 = vadd.f32 %v1452_v40, %v1239_v16 }
 0x62d   :  { %v2451_v33 = vpop.eup %2450  ;;  %v2318_v28 = vmul.f32 -1.442695, %v1475_v19  ;;  %v3250_v19 = vpop.f32.mrf.mxu0 }
 0x62e   :  { %v1459_v47 = vadd.f32 1.0, %v2451_v33 }
 0x62f   :  { %2452 = vpow2.f32 %v2318_v28 }
 0x630   :  { %2454 = vrcp.f32 %v1459_v47  ;;  %v1471_v45 = vand.u32 2147483648, %v1459_v47  ;;  %v1469_v13 = vand.u32 2147483647, %v1459_v47  ;;  %vm1465_vm14 = vweird.f32 %v1459_v47 }
 0x632   :  { %v1512_v24 = vpop.f32.mrf.mxu3  ;;  %v1472_v56 = vor.u32 1.1754944e-38, %v1471_v45  ;;  %vm1470_vm1 = vcmp.eq.f32.partialorder %v1469_v13, 8.507059e+37 }
 0x633   :  { %v1513_v58 = vadd.f32 %v3179_v44, %v1512_v24 }
 0x635   :  { %v2453_v1 = vpop.eup %2452 }
 0x636   :  { %v2455_v48 = vpop.eup %2454  ;;  %v1479_v11 = vadd.f32 1.0, %v2453_v1  ;;  %v3252_v1 = vpop.f32.mrf.mxu0 }
 0x637   :  { %v1461_v18 = vmul.f32 %v2455_v48, %v1459_v47  ;;  %vm1466_vm13 = vweird.f32 %v2455_v48 }
 0x638   :  { %2456 = vrcp.f32 %v1479_v11  ;;  %vm1467_vm15 = vmor %vm1465_vm14, %vm1466_vm13  ;;  %v1491_v36 = vand.u32 2147483648, %v1479_v11  ;;  %vm1485_vm3 = vweird.f32 %v1479_v11  ;;  %v1489_v62 = vand.u32 2147483647, %v1479_v11 }
 0x639   :  { %v1462_v22 = vsub.f32 1.0, %v1461_v18 }
 0x63a   :  { %v1492_v2 = vor.u32 1.1754944e-38, %v1491_v36  ;;  %vm1490_vm5 = vcmp.eq.f32.partialorder %v1489_v62, 8.507059e+37 }
 0x63b   :  { %v1463_v38 = vmul.f32 %v2455_v48, %v1462_v22 }
 0x63d   :  { %v1464_v39 = vadd.f32 %v2455_v48, %v1463_v38 }
 0x63e   :  { %v2457_v32 = vpop.eup %2456 }
 0x63f   :  { %v1481_v17 = vmul.f32 %v2457_v32, %v1479_v11  ;;  %v1468_v57 = vsel %vm1467_vm15, %v2455_v48, %v1464_v39  ;;  %vm1486_vm2 = vweird.f32 %v2457_v32 }
 0x640   :  { %v1473_v7 = vsel %vm1470_vm1, %v1472_v56, %v1468_v57  ;;  %vm1487_vm4 = vmor %vm1485_vm3, %vm1486_vm2  ;;  %v1285_v56 = vpop.f32.mrf.mxu2 }
 0x641   :  { %v1482_v21 = vsub.f32 1.0, %v1481_v17  ;;  %v1515_v59 = vmul.f32 %v1513_v58, %v1473_v7 }
 0x643   :  { %v1483_v30 = vmul.f32 %v2457_v32, %v1482_v21  ;;  %v1516_v60 = vadd.f32 %v1515_v59, %v1283_v50  ;;  %v1286_v21 = vadd.f32 %v3185_v34, %v1285_v56 }
 0x645   :  { %2458 = vtanh.f32 %v1516_v60  ;;  %v1484_v61 = vadd.f32 %v2457_v32, %v1483_v30 }
 0x647   :  { %v1488_v29 = vsel %vm1487_vm4, %v2457_v32, %v1484_v61 }
 0x648   :  { %v1493_v5 = vsel %vm1490_vm5, %v1492_v2, %v1488_v29 }
 0x64b   :  { %v2459_v63 = vpop.eup %2458 }
 0x64c   :  { %v1518_v3 = vsub.f32 %v3197_v14, %v2459_v63  ;;  %v1198_v14 = vadd.f32 %v3160_v31, %v1197_v9 }
 0x64e   :  { %v1519_v6 = vmul.f32 %v1518_v3, %v1493_v5 }
 0x650   :  { %v3222_v8 = vadd.f32 %v2459_v63, %v1519_v6 }
 0x652   :  { %2320 = vmatmul.msk.f32.vlgmr.msra.gmra.mxu3 %vm63_vm0, %v3222_v8  ;;  %2324 = vmatmul.msk.f32.vlgmr.msra.gmra.mxu0 %vm63_vm0, %v3222_v8 }
 0x653   :  { %1725 = vmatpush.msra.mxu3 %v3031_v46  ;;  %1883 = vmatpush.msra.mxu0 %v3046_v37 }
 0x655   :  { %1726 = vmatpush.msra.mxu3 %v3038_v23  ;;  %1884 = vmatpush.msra.mxu0 %v3059_v27 }
 0x657   :  { %1727 = vmatpush.msra.mxu3 %v3064_v52  ;;  %1885 = vmatpush.msra.mxu0 %v3072_v53 }
 0x659   :  { %1728 = vmatpush.msra.mxu3 %v3077_v54  ;;  %1886 = vmatpush.msra.mxu0 %v3090_v0 }
 0x65a   :  { %2321 = vmatmul.msk.f32.vlgmr.msrb.gmra.mxu3 %vm63_vm0, %v3222_v8 }
 0x65b   :  { %1863 = vmatpush.msrb.mxu3 %v2980_v26 }
 0x65d   :  { %1864 = vmatpush.msrb.mxu3 %v2992_v41 }
 0x65f   :  { %1865 = vmatpush.msrb.mxu3 %v3003_v25 }
 0x661   :  { %1866 = vmatpush.msrb.mxu3 %v3015_v4 }
 0x6cf   :  { %v1621_v39 = vpop.f32.mrf.mxu0 }
 0x6d0   :  { %v1622_v57 = vadd.f32 %v3179_v44, %v1621_v39 }
 0x6d5   :  { %v1541_v15 = vpop.f32.mrf.mxu3 }
 0x6d6   :  { %v1564_v20 = vadd.f32 %v1541_v15, %v1198_v14  ;;  %v1288_v15 = vpop.f32.mrf.mxu2 }
 0x6d8   :  { %v2322_v42 = vmul.f32 -1.442695, %v1564_v20 }
 0x6da   :  { %2460 = vpow2.f32 %v2322_v42 }
 0x6dd   :  { %v1561_v16 = vpop.f32.mrf.mxu3 }
 0x6de   :  { %v1584_v40 = vadd.f32 %v1561_v16, %v1242_v55  ;;  %v3279_v42 = vpop.f32.mrf.mxu2 }
 0x6e0   :  { %v2461_v33 = vpop.eup %2460  ;;  %v2323_v28 = vmul.f32 -1.442695, %v1584_v40 }
 0x6e1   :  { %v1568_v47 = vadd.f32 1.0, %v2461_v33 }
 0x6e2   :  { %2462 = vpow2.f32 %v2323_v28 }
 0x6e3   :  { %2464 = vrcp.f32 %v1568_v47  ;;  %v1580_v38 = vand.u32 2147483648, %v1568_v47  ;;  %v1578_v24 = vand.u32 2147483647, %v1568_v47  ;;  %vm1574_vm7 = vweird.f32 %v1568_v47 }
 0x6e5   :  { %v1581_v17 = vor.u32 1.1754944e-38, %v1580_v38  ;;  %vm1579_vm9 = vcmp.eq.f32.partialorder %v1578_v24, 8.507059e+37 }
 0x6e6   :  { %v3283_v55 = vpop.f32.mrf.mxu2 }
 0x6e8   :  { %v2463_v48 = vpop.eup %2462 }
 0x6e9   :  { %v2465_v11 = vpop.eup %2464  ;;  %v1588_v18 = vadd.f32 1.0, %v2463_v48 }
 0x6ea   :  { %v1570_v22 = vmul.f32 %v2465_v11, %v1568_v47  ;;  %vm1575_vm6 = vweird.f32 %v2465_v11  ;;  %v1201_v47 = vadd.f32 %v3160_v31, %v3242_v10 }
 0x6eb   :  { %2466 = vrcp.f32 %v1588_v18  ;;  %vm1576_vm8 = vmor %vm1574_vm7, %vm1575_vm6  ;;  %v1600_v62 = vand.u32 2147483648, %v1588_v18  ;;  %vm1594_vm11 = vweird.f32 %v1588_v18  ;;  %v1598_v29 = vand.u32 2147483647, %v1588_v18 }
 0x6ec   :  { %v1571_v45 = vsub.f32 1.0, %v1570_v22 }
 0x6ed   :  { %v1601_v3 = vor.u32 1.1754944e-38, %v1600_v62  ;;  %vm1599_vm13 = vcmp.eq.f32.partialorder %v1598_v29, 8.507059e+37 }
 0x6ee   :  { %v1572_v13 = vmul.f32 %v2465_v11, %v1571_v45  ;;  %v3287_v40 = vpop.f32.mrf.mxu2 }
 0x6f0   :  { %v1573_v32 = vadd.f32 %v2465_v11, %v1572_v13 }
 0x6f1   :  { %v2467_v43 = vpop.eup %2466 }
 0x6f2   :  { %v1577_v58 = vsel %vm1576_vm8, %v2465_v11, %v1573_v32  ;;  %v1590_v7 = vmul.f32 %v2467_v43, %v1588_v18  ;;  %vm1595_vm10 = vweird.f32 %v2467_v43 }
 0x6f3   :  { %v1582_v50 = vsel %vm1579_vm9, %v1581_v17, %v1577_v58  ;;  %vm1596_vm12 = vmor %vm1594_vm11, %vm1595_vm10 }
 0x6f4   :  { %v1624_v59 = vmul.f32 %v1622_v57, %v1582_v50  ;;  %v1591_v30 = vsub.f32 1.0, %v1590_v7 }
 0x6f6   :  { %v1592_v60 = vmul.f32 %v2467_v43, %v1591_v30  ;;  %v1625_v61 = vadd.f32 %v1624_v59, %v1286_v21  ;;  %v3291_v28 = vpop.f32.mrf.mxu2 }
 0x6f8   :  { %2468 = vtanh.f32 %v1625_v61  ;;  %v1593_v36 = vadd.f32 %v2467_v43, %v1592_v60 }
 0x6fa   :  { %v1597_v63 = vsel %vm1596_vm12, %v2467_v43, %v1593_v36 }
 0x6fb   :  { %v1602_v6 = vsel %vm1599_vm13, %v1601_v3, %v1597_v63  ;;  %v1289_v63 = vadd.f32 %v3185_v34, %v1288_v15 }
 0x6fe   :  { %v2469_v2 = vpop.eup %2468 }
 0x6ff   :  { %v1627_v5 = vsub.f32 %v3222_v8, %v2469_v2  ;;  %v1244_v8 = vpop.f32.mrf.mxu1 }
 0x700   :  { %v1245_v22 = vadd.f32 %v3166_v35, %v1244_v8 }
 0x701   :  { %v1628_v9 = vmul.f32 %v1627_v5, %v1602_v6 }
 0x703   :  { %v3257_v14 = vadd.f32 %v2469_v2, %v1628_v9 }
 0x705   :  { %2325 = vmatmul.msk.f32.vlgmr.msra.gmra.mxu1 %vm63_vm0, %v3257_v14  ;;  %2326 = vmatmul.msk.f32.vlgmr.msra.gmra.mxu2 %vm63_vm0, %v3257_v14 }
 0x706   :  { %2329 = vmatmul.msk.f32.vlgmr.msra.gmra.mxu3 %vm63_vm0, %v3257_v14  ;;  %1943 = vmatpush.msra.mxu1 %v3031_v46 }
 0x707   :  { %1972 = vmatpush.msra.mxu2 %v2980_v26  ;;  %1992 = vmatpush.msra.mxu3 %v3046_v37  ;;  %v3277_v20 = vpop.f32.mrf.mxu1 }
 0x708   :  { %1944 = vmatpush.msra.mxu1 %v3038_v23 }
 0x709   :  { %1973 = vmatpush.msra.mxu2 %v2992_v41  ;;  %1993 = vmatpush.msra.mxu3 %v3059_v27 }
 0x70a   :  { %1945 = vmatpush.msra.mxu1 %v3064_v52 }
 0x70b   :  { %1974 = vmatpush.msra.mxu2 %v3003_v25  ;;  %1994 = vmatpush.msra.mxu3 %v3072_v53 }
 0x70c   :  { %1946 = vmatpush.msra.mxu1 %v3077_v54 }
 0x70d   :  { %1975 = vmatpush.msra.mxu2 %v3015_v4  ;;  %1995 = vmatpush.msra.mxu3 %v3090_v0 }
 0x70f   :  { %v3281_v49 = vpop.f32.mrf.mxu1 }
 0x717   :  { %v3285_v16 = vpop.f32.mrf.mxu1 }
 0x71f   :  { %v3289_v33 = vpop.f32.mrf.mxu1 }
 0x782   :  { %v1650_v48 = vpop.f32.mrf.mxu1 }
 0x783   :  { %v1673_v11 = vadd.f32 %v1650_v48, %v1201_v47 }
 0x785   :  { %v2327_v18 = vmul.f32 -1.442695, %v1673_v11 }
 0x787   :  { %2470 = vpow2.f32 %v2327_v18 }
 0x788   :  { %v1670_v45 = vpop.f32.mrf.mxu2 }
 0x789   :  { %v1693_v38 = vadd.f32 %v1670_v45, %v1245_v22  ;;  %v1730_v21 = vpop.f32.mrf.mxu3 }
 0x78a   :  { %v1731_v62 = vadd.f32 %v3179_v44, %v1730_v21 }
 0x78b   :  { %v2328_v13 = vmul.f32 -1.442695, %v1693_v38 }
 0x78d   :  { %v2471_v24 = vpop.eup %2470  ;;  %2472 = vpow2.f32 %v2328_v13 }
 0x78e   :  { %v1677_v39 = vadd.f32 1.0, %v2471_v24 }
 0x790   :  { %2474 = vrcp.f32 %v1677_v39  ;;  %v1689_v10 = vand.u32 2147483648, %v1677_v39  ;;  %v1687_v7 = vand.u32 2147483647, %v1677_v39  ;;  %vm1683_vm15 = vweird.f32 %v1677_v39 }
 0x792   :  { %v1690_v60 = vor.u32 1.1754944e-38, %v1689_v10  ;;  %vm1688_vm2 = vcmp.eq.f32.partialorder %v1687_v7, 8.507059e+37 }
 0x793   :  { %v2473_v32 = vpop.eup %2472 }
 0x794   :  { %v1697_v43 = vadd.f32 1.0, %v2473_v32 }
 0x796   :  { %v2475_v56 = vpop.eup %2474  ;;  %2476 = vrcp.f32 %v1697_v43  ;;  %v1709_v9 = vand.u32 2147483648, %v1697_v43  ;;  %vm1703_vm4 = vweird.f32 %v1697_v43  ;;  %v1707_v8 = vand.u32 2147483647, %v1697_v43 }
 0x797   :  { %v1679_v17 = vmul.f32 %v2475_v56, %v1677_v39  ;;  %vm1684_vm14 = vweird.f32 %v2475_v56 }
 0x798   :  { %vm1685_vm1 = vmor %vm1683_vm15, %vm1684_vm14  ;;  %v1710_v11 = vor.u32 1.1754944e-38, %v1709_v9  ;;  %vm1708_vm6 = vcmp.eq.f32.partialorder %v1707_v8, 8.507059e+37 }
 0x799   :  { %v1680_v57 = vsub.f32 1.0, %v1679_v17 }
 0x79b   :  { %v1681_v58 = vmul.f32 %v2475_v56, %v1680_v57 }
 0x79c   :  { %v2477_v50 = vpop.eup %2476 }
 0x79d   :  { %v1699_v59 = vmul.f32 %v2477_v50, %v1697_v43  ;;  %v1682_v30 = vadd.f32 %v2475_v56, %v1681_v58  ;;  %vm1704_vm3 = vweird.f32 %v2477_v50 }
 0x79e   :  { %vm1705_vm5 = vmor %vm1703_vm4, %vm1704_vm3 }
 0x79f   :  { %v1700_v61 = vsub.f32 1.0, %v1699_v59  ;;  %v1686_v36 = vsel %vm1685_vm1, %v2475_v56, %v1682_v30 }
 0x7a0   :  { %v1691_v29 = vsel %vm1688_vm2, %v1690_v60, %v1686_v36  ;;  %v1292_v60 = vadd.f32 %v3185_v34, %v3279_v42  ;;  %v1251_v42 = vadd.f32 %v3166_v35, %v3281_v49 }
 0x7a1   :  { %v1733_v2 = vmul.f32 %v1731_v62, %v1691_v29  ;;  %v1701_v3 = vmul.f32 %v2477_v50, %v1700_v61 }
 0x7a3   :  { %v1734_v5 = vadd.f32 %v1733_v2, %v1289_v63  ;;  %v1702_v6 = vadd.f32 %v2477_v50, %v1701_v3 }
 0x7a5   :  { %2478 = vtanh.f32 %v1734_v5  ;;  %v1706_v47 = vsel %vm1705_vm5, %v2477_v50, %v1702_v6 }
 0x7a6   :  { %v1711_v22 = vsel %vm1708_vm6, %v1710_v11, %v1706_v47 }
 0x7ab   :  { %v2479_v48 = vpop.eup %2478 }
 0x7ac   :  { %v1736_v18 = vsub.f32 %v3257_v14, %v2479_v48 }
 0x7ae   :  { %v1737_v45 = vmul.f32 %v1736_v18, %v1711_v22 }
 0x7b0   :  { %v3299_v38 = vadd.f32 %v2479_v48, %v1737_v45  ;;  %v1207_v45 = vadd.f32 %v3160_v31, %v3247_v51 }
 0x7b2   :  { %2330 = vmatmul.msk.f32.vlgmr.msrb.gmra.mxu0 %vm63_vm0, %v3299_v38  ;;  %2331 = vmatmul.msk.f32.vlgmr.msrb.gmra.mxu1 %vm63_vm0, %v3299_v38 }
 0x7b3   :  { %2334 = vmatmul.msk.f32.vlgmr.msrb.gmra.mxu2 %vm63_vm0, %v3299_v38  ;;  %2052 = vmatpush.msrb.mxu0 %v3031_v46 }
 0x7b4   :  { %2081 = vmatpush.msrb.mxu1 %v2980_v26  ;;  %2101 = vmatpush.msrb.mxu2 %v3046_v37  ;;  %v1204_v26 = vadd.f32 %v3160_v31, %v3244_v12 }
 0x7b5   :  { %2053 = vmatpush.msrb.mxu0 %v3038_v23 }
 0x7b6   :  { %2082 = vmatpush.msrb.mxu1 %v2992_v41  ;;  %2102 = vmatpush.msrb.mxu2 %v3059_v27  ;;  %v1248_v41 = vadd.f32 %v3166_v35, %v3277_v20 }
 0x7b7   :  { %2054 = vmatpush.msrb.mxu0 %v3064_v52 }
 0x7b8   :  { %2083 = vmatpush.msrb.mxu1 %v3003_v25  ;;  %2103 = vmatpush.msrb.mxu2 %v3072_v53 }
 0x7b9   :  { %2055 = vmatpush.msrb.mxu0 %v3077_v54 }
 0x7ba   :  { %2084 = vmatpush.msrb.mxu1 %v3015_v4  ;;  %2104 = vmatpush.msrb.mxu2 %v3090_v0 }
 0x82f   :  { %v1759_v37 = vpop.f32.mrf.mxu0  ;;  %v1779_v27 = vpop.f32.mrf.mxu1 }
 0x830   :  { %v1782_v14 = vadd.f32 %v1759_v37, %v1204_v26  ;;  %v1802_v15 = vadd.f32 %v1779_v27, %v1248_v41 }
 0x832   :  { %v2332_v13 = vmul.f32 -1.442695, %v1782_v14  ;;  %v2333_v25 = vmul.f32 -1.442695, %v1802_v15 }
 0x834   :  { %2480 = vpow2.f32 %v2332_v13 }
 0x835   :  { %2482 = vpow2.f32 %v2333_v25 }
 0x836   :  { %v1839_v10 = vpop.f32.mrf.mxu2 }
 0x837   :  { %v1840_v59 = vadd.f32 %v3179_v44, %v1839_v10 }
 0x83a   :  { %v2481_v53 = vpop.eup %2480 }
 0x83b   :  { %v2483_v24 = vpop.eup %2482  ;;  %v1786_v39 = vadd.f32 1.0, %v2481_v53 }
 0x83c   :  { %v1806_v4 = vadd.f32 1.0, %v2483_v24 }
 0x83d   :  { %2484 = vrcp.f32 %v1786_v39  ;;  %v1798_v20 = vand.u32 2147483648, %v1786_v39  ;;  %v1796_v57 = vand.u32 2147483647, %v1786_v39  ;;  %vm1792_vm8 = vweird.f32 %v1786_v39 }
 0x83e   :  { %2486 = vrcp.f32 %v1806_v4  ;;  %v1818_v63 = vand.u32 2147483648, %v1806_v4  ;;  %vm1812_vm12 = vweird.f32 %v1806_v4  ;;  %v1816_v2 = vand.u32 2147483647, %v1806_v4 }
 0x83f   :  { %v1799_v50 = vor.u32 1.1754944e-38, %v1798_v20  ;;  %vm1797_vm10 = vcmp.eq.f32.partialorder %v1796_v57, 8.507059e+37 }
 0x840   :  { %v1819_v6 = vor.u32 1.1754944e-38, %v1818_v63  ;;  %vm1817_vm14 = vcmp.eq.f32.partialorder %v1816_v2, 8.507059e+37 }
 0x843   :  { %v2485_v0 = vpop.eup %2484 }
 0x844   :  { %v2487_v32 = vpop.eup %2486  ;;  %v1788_v12 = vmul.f32 %v2485_v0, %v1786_v39  ;;  %vm1793_vm7 = vweird.f32 %v2485_v0 }
 0x845   :  { %v1808_v56 = vmul.f32 %v2487_v32, %v1806_v4  ;;  %vm1794_vm9 = vmor %vm1792_vm8, %vm1793_vm7  ;;  %vm1813_vm11 = vweird.f32 %v2487_v32 }
 0x846   :  { %v1789_v43 = vsub.f32 1.0, %v1788_v12  ;;  %vm1814_vm13 = vmor %vm1812_vm12, %vm1813_vm11 }
 0x847   :  { %v1809_v7 = vsub.f32 1.0, %v1808_v56 }
 0x848   :  { %v1790_v17 = vmul.f32 %v2485_v0, %v1789_v43  ;;  %v1295_v43 = vadd.f32 %v3185_v34, %v3283_v55  ;;  %v1210_v55 = vadd.f32 %v3160_v31, %v3250_v19 }
 0x849   :  { %v1810_v36 = vmul.f32 %v2487_v32, %v1809_v7 }
 0x84a   :  { %v1791_v58 = vadd.f32 %v2485_v0, %v1790_v17 }
 0x84b   :  { %v1811_v29 = vadd.f32 %v2487_v32, %v1810_v36  ;;  %v1254_v36 = vadd.f32 %v3166_v35, %v3285_v16 }
 0x84c   :  { %v1795_v21 = vsel %vm1794_vm9, %v2485_v0, %v1791_v58 }
 0x84d   :  { %v1800_v30 = vsel %vm1797_vm10, %v1799_v50, %v1795_v21  ;;  %v1815_v3 = vsel %vm1814_vm13, %v2487_v32, %v1811_v29 }
 0x84e   :  { %v1842_v61 = vmul.f32 %v1840_v59, %v1800_v30  ;;  %v1820_v8 = vsel %vm1817_vm14, %v1819_v6, %v1815_v3 }
 0x850   :  { %v1843_v62 = vadd.f32 %v1842_v61, %v1292_v60 }
 0x852   :  { %2488 = vtanh.f32 %v1843_v62 }
 0x858   :  { %v2489_v5 = vpop.eup %2488 }
 0x859   :  { %v1845_v9 = vsub.f32 %v3299_v38, %v2489_v5 }
 0x85b   :  { %v1846_v47 = vmul.f32 %v1845_v9, %v1820_v8 }
 0x85d   :  { %v1847_v48 = vadd.f32 %v2489_v5, %v1846_v47 }
 0x85f   :  { %2335 = vmatmul.msk.f32.vlgmr.msrb.gmra.mxu3 %vm63_vm0, %v1847_v48  ;;  %2336 = vmatmul.msk.f32.vlgmr.msra.gmra.mxu0 %vm63_vm0, %v1847_v48 }
 0x860   :  { %2339 = vmatmul.msk.f32.vlgmr.msra.gmra.mxu1 %vm63_vm0, %v1847_v48  ;;  %2161 = vmatpush.msrb.mxu3 %v3031_v46 }
 0x862   :  { %2162 = vmatpush.msrb.mxu3 %v3038_v23 }
 0x864   :  { %2163 = vmatpush.msrb.mxu3 %v3064_v52 }
 0x866   :  { %2164 = vmatpush.msrb.mxu3 %v3077_v54 }
 0x8dc   :  { %v1888_v11 = vpop.f32.mrf.mxu0 }
 0x8dd   :  { %v1911_v18 = vadd.f32 %v1888_v11, %v1251_v42  ;;  %v1948_v53 = vpop.f32.mrf.mxu1 }
 0x8de   :  { %v1949_v0 = vadd.f32 %v3179_v44, %v1948_v53 }
 0x8df   :  { %v2338_v22 = vmul.f32 -1.442695, %v1911_v18 }
 0x8e1   :  { %2490 = vpow2.f32 %v2338_v22 }
 0x8e2   :  { %v1868_v38 = vpop.f32.mrf.mxu3 }
 0x8e3   :  { %v1891_v26 = vadd.f32 %v1868_v38, %v1207_v45 }
 0x8e5   :  { %v2337_v41 = vmul.f32 -1.442695, %v1891_v26 }
 0x8e7   :  { %2492 = vpow2.f32 %v2337_v41  ;;  %v2491_v46 = vpop.eup %2490 }
 0x8e8   :  { %v1915_v37 = vadd.f32 1.0, %v2491_v46 }
 0x8ea   :  { %v1927_v10 = vand.u32 2147483648, %v1915_v37  ;;  %vm1921_vm5 = vweird.f32 %v1915_v37  ;;  %v1925_v58 = vand.u32 2147483647, %v1915_v37 }
 0x8ec   :  { %v1928_v21 = vor.u32 1.1754944e-38, %v1927_v10  ;;  %vm1926_vm7 = vcmp.eq.f32.partialorder %v1925_v58, 8.507059e+37 }
 0x8ed   :  { %v2493_v23 = vpop.eup %2492 }
 0x8ee   :  { %v1895_v52 = vadd.f32 1.0, %v2493_v23 }
 0x8f0   :  { %2494 = vrcp.f32 %v1895_v52  ;;  %v1907_v13 = vand.u32 2147483648, %v1895_v52  ;;  %v1905_v51 = vand.u32 2147483647, %v1895_v52  ;;  %vm1901_vm1 = vweird.f32 %v1895_v52 }
 0x8f1   :  { %2496 = vrcp.f32 %v1915_v37 }
 0x8f2   :  { %v1908_v4 = vor.u32 1.1754944e-38, %v1907_v13  ;;  %vm1906_vm3 = vcmp.eq.f32.partialorder %v1905_v51, 8.507059e+37 }
 0x8f6   :  { %v2495_v54 = vpop.eup %2494 }
 0x8f7   :  { %v2497_v27 = vpop.eup %2496  ;;  %v1897_v49 = vmul.f32 %v2495_v54, %v1895_v52  ;;  %vm1902_vm15 = vweird.f32 %v2495_v54 }
 0x8f8   :  { %v1917_v15 = vmul.f32 %v2497_v27, %v1915_v37  ;;  %vm1903_vm2 = vmor %vm1901_vm1, %vm1902_vm15  ;;  %vm1922_vm4 = vweird.f32 %v2497_v27  ;;  %v1298_v37 = vadd.f32 %v3185_v34, %v3287_v40  ;;  %v2524_v40 = vld [vmem:[%s3372_s3 + $0x4] ss:$0 sm:$0xff] }
 0x8f9   :  { %v1898_v14 = vsub.f32 1.0, %v1897_v49  ;;  %vm1923_vm6 = vmor %vm1921_vm5, %vm1922_vm4 }
 0x8fa   :  { %v1918_v39 = vsub.f32 1.0, %v1917_v15 }
 0x8fb   :  { %v1899_v25 = vmul.f32 %v2495_v54, %v1898_v14 }
 0x8fc   :  { %v1919_v20 = vmul.f32 %v2497_v27, %v1918_v39 }
 0x8fd   :  { %v1900_v24 = vadd.f32 %v2495_v54, %v1899_v25 }
 0x8fe   :  { %v1920_v57 = vadd.f32 %v2497_v27, %v1919_v20 }
 0x8ff   :  { %v1904_v32 = vsel %vm1903_vm2, %v2495_v54, %v1900_v24 }
 0x900   :  { %v1909_v12 = vsel %vm1906_vm3, %v1908_v4, %v1904_v32  ;;  %v1924_v7 = vsel %vm1923_vm6, %v2497_v27, %v1920_v57 }
 0x901   :  { %v1951_v56 = vmul.f32 %v1949_v0, %v1909_v12  ;;  %v1929_v30 = vsel %vm1926_vm7, %v1928_v21, %v1924_v7  ;;  %v1213_v0 = vadd.f32 %v2524_v40, %v3252_v1 }
 0x903   :  { %v1952_v17 = vadd.f32 %v1951_v56, %v1295_v43  ;;  %v2525_v56 = vld [vmem:[%s3372_s3 + $0x5] ss:$0 sm:$0xff] }
 0x904   :  { %v1257_v20 = vadd.f32 %v2525_v56, %v3289_v33 }
 0x905   :  { %2498 = vtanh.f32 %v1952_v17 }
 0x90b   :  { %v2499_v50 = vpop.eup %2498 }
 0x90c   :  { %v1954_v59 = vsub.f32 %v1847_v48, %v2499_v50 }
 0x90e   :  { %v1955_v60 = vmul.f32 %v1954_v59, %v1929_v30 }
 0x910   :  { %v1956_v61 = vadd.f32 %v2499_v50, %v1955_v60 }
 0x912   :  { %2340 = vmatmul.msk.f32.vlgmr.msra.gmra.mxu2 %vm63_vm0, %v1956_v61  ;;  %2341 = vmatmul.msk.f32.vlgmr.msra.gmra.mxu3 %vm63_vm0, %v1956_v61 }
 0x913   :  { %2344 = vmatmul.msk.f32.vlgmr.msrb.gmra.mxu0 %vm63_vm0, %v1956_v61 }
 0x990   :  { %v2057_v22 = vpop.f32.mrf.mxu0 }
 0x991   :  { %v2058_v41 = vadd.f32 %v3179_v44, %v2057_v22 }
 0x995   :  { %v1977_v62 = vpop.f32.mrf.mxu2  ;;  %v1997_v29 = vpop.f32.mrf.mxu3 }
 0x996   :  { %v2000_v63 = vadd.f32 %v1977_v62, %v1210_v55  ;;  %v2020_v2 = vadd.f32 %v1997_v29, %v1254_v36 }
 0x998   :  { %v2342_v3 = vmul.f32 -1.442695, %v2000_v63  ;;  %v2343_v5 = vmul.f32 -1.442695, %v2020_v2 }
 0x99a   :  { %2500 = vpow2.f32 %v2342_v3 }
 0x99b   :  { %2502 = vpow2.f32 %v2343_v5 }
 0x9a0   :  { %v2501_v6 = vpop.eup %2500 }
 0x9a1   :  { %v2503_v9 = vpop.eup %2502  ;;  %v2004_v8 = vadd.f32 1.0, %v2501_v6 }
 0x9a2   :  { %v2024_v47 = vadd.f32 1.0, %v2503_v9  ;;  %v1301_v9 = vadd.f32 %v3185_v34, %v3291_v28 }
 0x9a3   :  { %2504 = vrcp.f32 %v2004_v8  ;;  %v2016_v11 = vand.u32 2147483648, %v2004_v8  ;;  %v2014_v18 = vand.u32 2147483647, %v2004_v8  ;;  %vm2010_vm9 = vweird.f32 %v2004_v8 }
 0x9a4   :  { %2506 = vrcp.f32 %v2024_v47  ;;  %v2036_v14 = vand.u32 2147483648, %v2024_v47  ;;  %vm2030_vm13 = vweird.f32 %v2024_v47  ;;  %v2034_v15 = vand.u32 2147483647, %v2024_v47 }
 0x9a5   :  { %v2017_v38 = vor.u32 1.1754944e-38, %v2016_v11  ;;  %vm2015_vm11 = vcmp.eq.f32.partialorder %v2014_v18, 8.507059e+37 }
 0x9a6   :  { %v2037_v51 = vor.u32 1.1754944e-38, %v2036_v14  ;;  %vm2035_vm15 = vcmp.eq.f32.partialorder %v2034_v15, 8.507059e+37 }
 0x9a9   :  { %v2505_v48 = vpop.eup %2504 }
 0x9aa   :  { %v2507_v42 = vpop.eup %2506  ;;  %v2006_v31 = vmul.f32 %v2505_v48, %v2004_v8  ;;  %vm2011_vm8 = vweird.f32 %v2505_v48 }
 0x9ab   :  { %v2026_v35 = vmul.f32 %v2507_v42, %v2024_v47  ;;  %vm2012_vm10 = vmor %vm2010_vm9, %vm2011_vm8  ;;  %vm2031_vm12 = vweird.f32 %v2507_v42 }
 0x9ac   :  { %v2007_v19 = vsub.f32 1.0, %v2006_v31  ;;  %vm2032_vm14 = vmor %vm2030_vm13, %vm2031_vm12 }
 0x9ad   :  { %v2027_v26 = vsub.f32 1.0, %v2026_v35 }
 0x9ae   :  { %v2008_v16 = vmul.f32 %v2505_v48, %v2007_v19 }
 0x9af   :  { %v2028_v54 = vmul.f32 %v2507_v42, %v2027_v26 }
 0x9b0   :  { %v2009_v45 = vadd.f32 %v2505_v48, %v2008_v16 }
 0x9b1   :  { %v2029_v49 = vadd.f32 %v2507_v42, %v2028_v54 }
 0x9b2   :  { %v2013_v46 = vsel %vm2012_vm10, %v2505_v48, %v2009_v45 }
 0x9b3   :  { %v2018_v23 = vsel %vm2015_vm11, %v2017_v38, %v2013_v46  ;;  %v2033_v13 = vsel %vm2032_vm14, %v2507_v42, %v2029_v49 }
 0x9b4   :  { %v2060_v52 = vmul.f32 %v2058_v41, %v2018_v23  ;;  %v2038_v24 = vsel %vm2035_vm15, %v2037_v51, %v2033_v13 }
 0x9b6   :  { %v2061_v27 = vadd.f32 %v2060_v52, %v1298_v37 }
 0x9b8   :  { %2508 = vtanh.f32 %v2061_v27 }
 0x9be   :  { %v2509_v25 = vpop.eup %2508 }
 0x9bf   :  { %v2063_v53 = vsub.f32 %v1956_v61, %v2509_v25 }
 0x9c1   :  { %v2064_v39 = vmul.f32 %v2063_v53, %v2038_v24 }
 0x9c3   :  { %v2065_v4 = vadd.f32 %v2509_v25, %v2064_v39 }
 0x9c5   :  { %2345 = vmatmul.msk.f32.vlgmr.msrb.gmra.mxu1 %vm63_vm0, %v2065_v4  ;;  %2346 = vmatmul.msk.f32.vlgmr.msrb.gmra.mxu2 %vm63_vm0, %v2065_v4 }
 0x9c6   :  { %2349 = vmatmul.msk.f32.vlgmr.msrb.gmra.mxu3 %vm63_vm0, %v2065_v4 }
 0xa42   :  { %v2086_v32 = vpop.f32.mrf.mxu1 }
 0xa43   :  { %v2109_v12 = vadd.f32 %v2086_v32, %v1213_v0 }
 0xa45   :  { %v2347_v43 = vmul.f32 -1.442695, %v2109_v12 }
 0xa47   :  { %2510 = vpow2.f32 %v2347_v43 }
 0xa48   :  { %v2106_v17 = vpop.f32.mrf.mxu2 }
 0xa49   :  { %v2129_v57 = vadd.f32 %v2106_v17, %v1257_v20  ;;  %v2166_v33 = vpop.f32.mrf.mxu3 }
 0xa4a   :  { %v2167_v5 = vadd.f32 %v3179_v44, %v2166_v33 }
 0xa4b   :  { %v2348_v10 = vmul.f32 -1.442695, %v2129_v57 }
 0xa4d   :  { %v2511_v58 = vpop.eup %2510  ;;  %2512 = vpow2.f32 %v2348_v10 }
 0xa4e   :  { %v2113_v7 = vadd.f32 1.0, %v2511_v58 }
 0xa50   :  { %2514 = vrcp.f32 %v2113_v7  ;;  %v2125_v60 = vand.u32 2147483648, %v2113_v7  ;;  %v2123_v55 = vand.u32 2147483647, %v2113_v7  ;;  %vm2119_vm2 = vweird.f32 %v2113_v7 }
 0xa52   :  { %v2126_v63 = vor.u32 1.1754944e-38, %v2125_v60  ;;  %vm2124_vm4 = vcmp.eq.f32.partialorder %v2123_v55, 8.507059e+37 }
 0xa53   :  { %v2513_v50 = vpop.eup %2512 }
 0xa54   :  { %v2133_v21 = vadd.f32 1.0, %v2513_v50 }
 0xa56   :  { %v2515_v1 = vpop.eup %2514  ;;  %2516 = vrcp.f32 %v2133_v21  ;;  %v2145_v31 = vand.u32 2147483648, %v2133_v21  ;;  %vm2139_vm6 = vweird.f32 %v2133_v21  ;;  %v2143_v19 = vand.u32 2147483647, %v2133_v21 }
 0xa57   :  { %v2115_v59 = vmul.f32 %v2515_v1, %v2113_v7  ;;  %vm2120_vm1 = vweird.f32 %v2515_v1 }
 0xa58   :  { %vm2121_vm3 = vmor %vm2119_vm2, %vm2120_vm1  ;;  %v2146_v16 = vor.u32 1.1754944e-38, %v2145_v31  ;;  %vm2144_vm8 = vcmp.eq.f32.partialorder %v2143_v19, 8.507059e+37 }
 0xa59   :  { %v2116_v30 = vsub.f32 1.0, %v2115_v59 }
 0xa5b   :  { %v2117_v61 = vmul.f32 %v2515_v1, %v2116_v30 }
 0xa5c   :  { %v2517_v36 = vpop.eup %2516 }
 0xa5d   :  { %v2135_v62 = vmul.f32 %v2517_v36, %v2133_v21  ;;  %v2118_v29 = vadd.f32 %v2515_v1, %v2117_v61  ;;  %vm2140_vm5 = vweird.f32 %v2517_v36 }
 0xa5e   :  { %vm2141_vm7 = vmor %vm2139_vm6, %vm2140_vm5 }
 0xa5f   :  { %v2136_v2 = vsub.f32 1.0, %v2135_v62  ;;  %v2122_v3 = vsel %vm2121_vm3, %v2515_v1, %v2118_v29 }
 0xa60   :  { %v2127_v6 = vsel %vm2124_vm4, %v2126_v63, %v2122_v3 }
 0xa61   :  { %v2169_v8 = vmul.f32 %v2167_v5, %v2127_v6  ;;  %v2137_v47 = vmul.f32 %v2517_v36, %v2136_v2 }
 0xa63   :  { %v2170_v48 = vadd.f32 %v2169_v8, %v1301_v9  ;;  %v2138_v42 = vadd.f32 %v2517_v36, %v2137_v47 }
 0xa65   :  { %2518 = vtanh.f32 %v2170_v48  ;;  %v2142_v11 = vsel %vm2141_vm7, %v2517_v36, %v2138_v42 }
 0xa66   :  { %v2147_v44 = vsel %vm2144_vm8, %v2146_v16, %v2142_v11 }
 0xa6b   :  { %v2519_v35 = vpop.eup %2518 }
 0xa6c   :  { %v2172_v18 = vsub.f32 %v2065_v4, %v2519_v35 }
 0xa6e   :  { %v2173_v22 = vmul.f32 %v2172_v18, %v2147_v44 }
 0xa70   :  { %v2174_v45 = vadd.f32 %v2519_v35, %v2173_v22 }
 0xa72   :  { %2350 = vst.msk [vmem:[%s3373_s4 + $0x8] sm:$0xff] %vm63_vm0, %v2174_v45 }

// kernel: _lambda_.11
= control target key start
LH: loop header
LB: loop body
LE: loop exit
PB: predicated region body
PF: predicated region fallthrough
CT: control target
= control target key end

     0   :  { %vm44_vm0 = vcmask 261120   ;;  %vm194_vm1 = vcmask 257024   ;;  %s377_s3 = inlined_call_operand.vmem [shape: f32[32,32], index: 3, kind: input, shape index: {}]   ;;  %s378_s2 = inlined_call_operand.vmem [shape: f32[32,32], index: 2, kind: input, shape index: {}]   ;;  %s379_s1 = inlined_call_operand.vmem [shape: f32[60,32], index: 1, kind: input, shape index: {}]   ;;  %s380_s0 = inlined_call_operand.vmem [shape: f32[60,32], index: 0, kind: input, shape index: {}]   ;;  %s381_s4 = inlined_call_operand.vmem [shape: f32[1,32], index: 4, kind: input, shape index: {}]   ;;  %s382_s5 = inlined_call_operand.vmem [shape: f32[60,32], index: 5, kind: output, shape index: {}]  }
   0x1   :  { %v43_v0 = vld [vmem:[%s377_s3 + $0x18] sm:$0xff]  ;;  %v42_v2 = vld [vmem:[%s377_s3 + $0x10] sm:$0xff]  ;;  %v41_v4 = vld [vmem:[%s377_s3 + $0x8] sm:$0xff] }
   0x2   :  { %v31_v1 = vld [vmem:[%s378_s2 + $0x18] sm:$0xff]  ;;  %216 = vmatpush.msra.mxu2 %v43_v0  ;;  %v30_v3 = vld [vmem:[%s378_s2 + $0x10] sm:$0xff]  ;;  %v29_v5 = vld [vmem:[%s378_s2 + $0x8] sm:$0xff]  ;;  %81 = vmatpush.msra.mxu0 %v43_v0 }
   0x3   :  { %220 = vmatpush.msra.mxu3 %v31_v1  ;;  %146 = vmatpush.msra.mxu1 %v31_v1  ;;  %v40_v6 = vld [vmem:[%s377_s3] sm:$0xff]  ;;  %v37_v12 = vld [vmem:[%s379_s1 + $0x28] sm:$0xff]  ;;  %v38_v16 = vld [vmem:[%s379_s1 + $0x30] sm:$0xff] }
   0x4   :  { %217 = vmatpush.msra.mxu2 %v42_v2  ;;  %v28_v7 = vld [vmem:[%s378_s2] sm:$0xff]  ;;  %82 = vmatpush.msra.mxu0 %v42_v2  ;;  %v25_v13 = vld [vmem:[%s380_s0 + $0x28] sm:$0xff]  ;;  %v26_v17 = vld [vmem:[%s380_s0 + $0x30] sm:$0xff] }
   0x5   :  { %221 = vmatpush.msra.mxu3 %v30_v3  ;;  %147 = vmatpush.msra.mxu1 %v30_v3  ;;  %v36_v8 = vld [vmem:[%s379_s1 + $0x20] sm:$0xff]  ;;  %v33_v14 = vld [vmem:[%s379_s1 + $0x8] sm:$0xff]  ;;  %v34_v18 = vld [vmem:[%s379_s1 + $0x10] sm:$0xff] }
   0x6   :  { %218 = vmatpush.msra.mxu2 %v41_v4  ;;  %v24_v9 = vld [vmem:[%s380_s0 + $0x20] sm:$0xff]  ;;  %83 = vmatpush.msra.mxu0 %v41_v4  ;;  %v21_v15 = vld [vmem:[%s380_s0 + $0x8] sm:$0xff]  ;;  %v22_v19 = vld [vmem:[%s380_s0 + $0x10] sm:$0xff] }
   0x7   :  { %222 = vmatpush.msra.mxu3 %v29_v5  ;;  %148 = vmatpush.msra.mxu1 %v29_v5  ;;  %v32_v10 = vld [vmem:[%s379_s1] sm:$0xff]  ;;  %v39_v20 = vld [vmem:[%s379_s1 + $0x38] sm:$0xf] }
   0x8   :  { %219 = vmatpush.msra.mxu2 %v40_v6  ;;  %v20_v11 = vld [vmem:[%s380_s0] sm:$0xff]  ;;  %84 = vmatpush.msra.mxu0 %v40_v6  ;;  %v27_v21 = vld [vmem:[%s380_s0 + $0x38] sm:$0xf] }
   0x9   :  { %223 = vmatpush.msra.mxu3 %v28_v7  ;;  %204 = vmatmul.msk.f32.vlgmr.msra.gmra.mxu2 %vm44_vm0, %v36_v8  ;;  %v35_v22 = vld [vmem:[%s379_s1 + $0x18] sm:$0xff]  ;;  %v224_v24 = vld [vmem:[%s381_s4] ss:$0 sm:$0xff] }
   0xa   :  { %212 = vmatmul.msk.f32.vlgmr.msra.gmra.mxu3 %vm44_vm0, %v24_v9  ;;  %149 = vmatpush.msra.mxu1 %v28_v7  ;;  %v23_v23 = vld [vmem:[%s380_s0 + $0x18] sm:$0xff] }
   0xb   :  { %200 = vmatmul.msk.f32.vlgmr.msra.gmra.mxu0 %vm44_vm0, %v32_v10  ;;  %208 = vmatmul.msk.f32.vlgmr.msra.gmra.mxu1 %vm44_vm0, %v20_v11 }
  0x11   :  { %205 = vmatmul.msk.f32.gmra.mxu2 %vm44_vm0, %v37_v12 }
  0x12   :  { %213 = vmatmul.msk.f32.gmra.mxu3 %vm44_vm0, %v25_v13 }
  0x13   :  { %201 = vmatmul.msk.f32.gmra.mxu0 %vm44_vm0, %v33_v14  ;;  %209 = vmatmul.msk.f32.gmra.mxu1 %vm44_vm0, %v21_v15 }
  0x19   :  { %206 = vmatmul.msk.f32.gmra.mxu2 %vm44_vm0, %v38_v16 }
  0x1a   :  { %214 = vmatmul.msk.f32.gmra.mxu3 %vm44_vm0, %v26_v17 }
  0x1b   :  { %202 = vmatmul.msk.f32.gmra.mxu0 %vm44_vm0, %v34_v18  ;;  %210 = vmatmul.msk.f32.gmra.mxu1 %vm44_vm0, %v22_v19 }
  0x21   :  { %207 = vmatmul.msk.f32.gmra.mxu2 %vm44_vm0, %v39_v20 }
  0x22   :  { %215 = vmatmul.msk.f32.gmra.mxu3 %vm44_vm0, %v27_v21 }
  0x23   :  { %203 = vmatmul.msk.f32.gmra.mxu0 %vm44_vm0, %v35_v22  ;;  %211 = vmatmul.msk.f32.gmra.mxu1 %vm44_vm0, %v23_v23 }
  0x88   :  { %v86_v25 = vpop.f32.mrf.mxu0  ;;  %v151_v26 = vpop.f32.mrf.mxu1 }
  0x89   :  { %v152_v27 = vadd.f32 %v151_v26, %v86_v25 }
  0x8b   :  { %v179_v28 = vadd.f32 %v224_v24, %v152_v27 }
  0x8c   :  { %v98_v29 = vpop.f32.mrf.mxu2 }
  0x8d   :  { %v163_v30 = vpop.f32.mrf.mxu3  ;;  %187 = vst.msk [vmem:[%s382_s5] sm:$0xff] %vm44_vm0, %v179_v28 }
  0x8e   :  { %v164_v31 = vadd.f32 %v163_v30, %v98_v29 }
  0x90   :  { %v183_v32 = vadd.f32 %v224_v24, %v164_v31  ;;  %v89_v33 = vpop.f32.mrf.mxu0  ;;  %v154_v34 = vpop.f32.mrf.mxu1 }
  0x91   :  { %v155_v35 = vadd.f32 %v154_v34, %v89_v33 }
  0x92   :  { %191 = vst.msk [vmem:[%s382_s5 + $0x20] sm:$0xff] %vm44_vm0, %v183_v32 }
  0x93   :  { %v180_v36 = vadd.f32 %v224_v24, %v155_v35 }
  0x94   :  { %v101_v37 = vpop.f32.mrf.mxu2 }
  0x95   :  { %v166_v38 = vpop.f32.mrf.mxu3  ;;  %188 = vst.msk [vmem:[%s382_s5 + $0x8] sm:$0xff] %vm44_vm0, %v180_v36 }
  0x96   :  { %v167_v39 = vadd.f32 %v166_v38, %v101_v37 }
  0x98   :  { %v184_v40 = vadd.f32 %v224_v24, %v167_v39  ;;  %v92_v41 = vpop.f32.mrf.mxu0  ;;  %v157_v42 = vpop.f32.mrf.mxu1 }
  0x99   :  { %v158_v43 = vadd.f32 %v157_v42, %v92_v41 }
  0x9a   :  { %192 = vst.msk [vmem:[%s382_s5 + $0x28] sm:$0xff] %vm44_vm0, %v184_v40 }
  0x9b   :  { %v181_v44 = vadd.f32 %v224_v24, %v158_v43 }
  0x9c   :  { %v104_v45 = vpop.f32.mrf.mxu2 }
  0x9d   :  { %v169_v46 = vpop.f32.mrf.mxu3  ;;  %189 = vst.msk [vmem:[%s382_s5 + $0x10] sm:$0xff] %vm44_vm0, %v181_v44 }
  0x9e   :  { %v170_v47 = vadd.f32 %v169_v46, %v104_v45 }
  0xa0   :  { %v185_v48 = vadd.f32 %v224_v24, %v170_v47  ;;  %v95_v49 = vpop.f32.mrf.mxu0  ;;  %v160_v50 = vpop.f32.mrf.mxu1 }
  0xa1   :  { %v161_v51 = vadd.f32 %v160_v50, %v95_v49 }
  0xa2   :  { %193 = vst.msk [vmem:[%s382_s5 + $0x30] sm:$0xff] %vm44_vm0, %v185_v48 }
  0xa3   :  { %v182_v52 = vadd.f32 %v224_v24, %v161_v51 }
  0xa4   :  { %v107_v53 = vpop.f32.mrf.mxu2 }
  0xa5   :  { %v172_v54 = vpop.f32.mrf.mxu3  ;;  %190 = vst.msk [vmem:[%s382_s5 + $0x18] sm:$0xff] %vm44_vm0, %v182_v52 }
  0xa6   :  { %v173_v55 = vadd.f32 %v172_v54, %v107_v53 }
  0xa8   :  { %v186_v56 = vadd.f32 %v224_v24, %v173_v55 }
  0xaa   :  { %195 = vst.msk [vmem:[%s382_s5 + $0x38] sm:$0xf] %vm194_vm1, %v186_v56 }

// kernel: _lambda_.9
= control target key start
LH: loop header
LB: loop body
LE: loop exit
PB: predicated region body
PF: predicated region fallthrough
CT: control target
= control target key end

     0   :  { %vm62_vm0 = vcmask 261120   ;;  %v2243_v15 = vmov 0.0   ;;  %s3032_s2 = inlined_call_operand.vmem [shape: f32[2,3,32,32], index: 2, kind: input, shape index: {}]   ;;  %s3033_s1 = inlined_call_operand.vmem [shape: f32[2,3,32,32], index: 1, kind: input, shape index: {}]   ;;  %s3034_s0 = inlined_call_operand.vmem [shape: f32[56,32], index: 0, kind: input, shape index: {}]   ;;  %s3035_s3 = inlined_call_operand.vmem [shape: f32[2,4,1,32], index: 3, kind: input, shape index: {}]   ;;  %s3036_s4 = inlined_call_operand.vmem [shape: f32[2,8,32], index: 4, kind: output, shape index: {}]  }
   0x1   :  { %v2272_v0 = vld [vmem:[%s3032_s2 + $0x18] sm:$0xff]  ;;  %v2277_v1 = vld [vmem:[%s3032_s2 + $0x10] sm:$0xff]  ;;  %v2289_v4 = vld [vmem:[%s3032_s2 + $0x8] sm:$0xff] }
   0x2   :  { %v27_v2 = vld [vmem:[%s3033_s1 + $0x18] sm:$0xff]  ;;  %219 = vmatpush.msra.mxu3 %v2272_v0  ;;  %v26_v3 = vld [vmem:[%s3033_s1 + $0x10] sm:$0xff]  ;;  %v25_v5 = vld [vmem:[%s3033_s1 + $0x8] sm:$0xff] }
   0x3   :  { %96 = vmatpush.msra.mxu0 %v27_v2  ;;  %v1939_v6 = vld [vmem:[%s3033_s1 + $0x38] sm:$0xff]  ;;  %v2301_v7 = vld [vmem:[%s3032_s2] sm:$0xff]  ;;  %v1938_v9 = vld [vmem:[%s3033_s1 + $0x30] sm:$0xff] }
   0x4   :  { %220 = vmatpush.msra.mxu3 %v2277_v1  ;;  %v24_v8 = vld [vmem:[%s3033_s1] sm:$0xff]  ;;  %137 = vmatpush.msra.mxu1 %v1939_v6  ;;  %v2316_v11 = vld [vmem:[%s3032_s2 + $0x38] sm:$0xff]  ;;  %v1937_v12 = vld [vmem:[%s3033_s1 + $0x28] sm:$0xff] }
   0x5   :  { %97 = vmatpush.msra.mxu0 %v26_v3  ;;  %v17_v10 = vld [vmem:[%s3034_s0] sm:$0xff]  ;;  %v2325_v13 = vld [vmem:[%s3032_s2 + $0x30] sm:$0xff]  ;;  %v1943_v14 = vld [vmem:[%s3033_s1 + $0x58] sm:$0xff] }
   0x6   :  { %221 = vmatpush.msra.mxu3 %v2289_v4  ;;  %138 = vmatpush.msra.mxu1 %v1938_v9  ;;  %v2335_v16 = vld [vmem:[%s3032_s2 + $0x28] sm:$0xff]  ;;  %v1936_v17 = vld [vmem:[%s3033_s1 + $0x20] sm:$0xff]  ;;  %v1942_v18 = vld [vmem:[%s3033_s1 + $0x50] sm:$0xff] }
   0x7   :  { %98 = vmatpush.msra.mxu0 %v25_v5  ;;  %178 = vmatpush.msra.mxu2 %v1943_v14  ;;  %v1941_v19 = vld [vmem:[%s3033_s1 + $0x48] sm:$0xff]  ;;  %v2352_v20 = vld [vmem:[%s3032_s2 + $0x20] sm:$0xff]  ;;  %v2359_v21 = vld [vmem:[%s3032_s2 + $0x58] sm:$0xff] }
   0x8   :  { %222 = vmatpush.msra.mxu3 %v2301_v7  ;;  %139 = vmatpush.msra.mxu1 %v1937_v12  ;;  %v1940_v22 = vld [vmem:[%s3033_s1 + $0x40] sm:$0xff]  ;;  %v2372_v23 = vld [vmem:[%s3032_s2 + $0x50] sm:$0xff]  ;;  %v2379_v24 = vld [vmem:[%s3032_s2 + $0x48] sm:$0xff] }
   0x9   :  { %99 = vmatpush.msra.mxu0 %v24_v8  ;;  %223 = vmatmul.f32.vlgmr.msra.gmra.mxu3 %v2243_v15  ;;  %v2388_v25 = vld [vmem:[%s3032_s2 + $0x40] sm:$0xff]  ;;  %v18_v40 = vld [vmem:[%s3034_s0 + $0x8] sm:$0xff] }
   0xa   :  { %1955 = vmatmul.msk.f32.vlgmr.msra.gmra.mxu0 %vm62_vm0, %v17_v10  ;;  %239 = vmatpush.msrb.mxu3 %v2316_v11  ;;  %v2421_v26 = vld [vmem:[%s3035_s3] ss:$0 sm:$0xff]  ;;  %v2427_v31 = vld [vmem:[%s3035_s3 + $0x1] ss:$0 sm:$0xff]  ;;  %v2439_v46 = vld [vmem:[%s3035_s3 + $0x3] ss:$0 sm:$0xff] }
   0xb   :  { %462 = vmatpush.msrb.mxu0 %v2316_v11  ;;  %140 = vmatpush.msra.mxu1 %v1936_v17  ;;  %v2444_v51 = vld [vmem:[%s3035_s3 + $0x2] ss:$0 sm:$0xff] }
   0xc   :  { %240 = vmatpush.msrb.mxu3 %v2325_v13  ;;  %1962 = vmatmul.msk.f32.vlgmr.msra.gmra.mxu1 %vm62_vm0, %v17_v10 }
   0xd   :  { %179 = vmatpush.msra.mxu2 %v1942_v18  ;;  %463 = vmatpush.msrb.mxu0 %v2325_v13 }
   0xe   :  { %241 = vmatpush.msrb.mxu3 %v2335_v16  ;;  %522 = vmatpush.msrb.mxu1 %v2359_v21 }
   0xf   :  { %180 = vmatpush.msra.mxu2 %v1941_v19  ;;  %464 = vmatpush.msrb.mxu0 %v2335_v16  ;;  %v19_v19 = vld [vmem:[%s3034_s0 + $0x10] sm:$0xff] }
  0x10   :  { %242 = vmatpush.msrb.mxu3 %v2352_v20  ;;  %523 = vmatpush.msrb.mxu1 %v2372_v23 }
  0x11   :  { %243 = vmatmul.f32.vlgmr.msrb.gmra.mxu3 %v2243_v15  ;;  %181 = vmatpush.msra.mxu2 %v1940_v22  ;;  %v20_v22 = vld [vmem:[%s3034_s0 + $0x18] sm:$0xff] }
  0x12   :  { %302 = vmatpush.msra.mxu3 %v2359_v21  ;;  %1969 = vmatmul.msk.f32.vlgmr.msra.gmra.mxu2 %vm62_vm0, %v17_v10 }
  0x13   :  { %465 = vmatpush.msrb.mxu0 %v2352_v20  ;;  %552 = vmatpush.msrb.mxu2 %v2272_v0 }
  0x14   :  { %303 = vmatpush.msra.mxu3 %v2372_v23  ;;  %524 = vmatpush.msrb.mxu1 %v2379_v24 }
  0x15   :  { %632 = vmatpush.msra.mxu0 %v2359_v21  ;;  %553 = vmatpush.msrb.mxu2 %v2277_v1 }
  0x16   :  { %304 = vmatpush.msra.mxu3 %v2379_v24  ;;  %525 = vmatpush.msrb.mxu1 %v2388_v25 }
  0x17   :  { %633 = vmatpush.msra.mxu0 %v2372_v23  ;;  %554 = vmatpush.msrb.mxu2 %v2289_v4 }
  0x18   :  { %305 = vmatpush.msra.mxu3 %v2388_v25  ;;  %662 = vmatpush.msra.mxu1 %v2272_v0 }
  0x19   :  { %306 = vmatmul.f32.vlgmr.msra.gmra.mxu3 %v2243_v15  ;;  %634 = vmatpush.msra.mxu0 %v2379_v24 }
  0x1a   :  { %332 = vmatpush.msrb.mxu3 %v2272_v0  ;;  %555 = vmatpush.msrb.mxu2 %v2301_v7 }
  0x1b   :  { %635 = vmatpush.msra.mxu0 %v2388_v25  ;;  %663 = vmatpush.msra.mxu1 %v2277_v1 }
  0x1c   :  { %333 = vmatpush.msrb.mxu3 %v2277_v1  ;;  %682 = vmatpush.msra.mxu2 %v2316_v11 }
  0x1d   :  { %664 = vmatpush.msra.mxu1 %v2289_v4  ;;  %1956 = vmatmul.msk.f32.gmra.mxu0 %vm62_vm0, %v18_v40 }
  0x1e   :  { %334 = vmatpush.msrb.mxu3 %v2289_v4  ;;  %683 = vmatpush.msra.mxu2 %v2325_v13 }
  0x1f   :  { %665 = vmatpush.msra.mxu1 %v2301_v7  ;;  %1970 = vmatmul.msk.f32.gmra.mxu2 %vm62_vm0, %v18_v40 }
  0x20   :  { %335 = vmatpush.msrb.mxu3 %v2301_v7  ;;  %684 = vmatpush.msra.mxu2 %v2335_v16 }
  0x21   :  { %1963 = vmatmul.msk.f32.gmra.mxu1 %vm62_vm0, %v18_v40 }
  0x22   :  { %352 = vmatpush.msra.mxu3 %v2316_v11  ;;  %685 = vmatpush.msra.mxu2 %v2352_v20 }
  0x24   :  { %353 = vmatpush.msra.mxu3 %v2325_v13 }
  0x25   :  { %1957 = vmatmul.msk.f32.gmra.mxu0 %vm62_vm0, %v19_v19 }
  0x26   :  { %354 = vmatpush.msra.mxu3 %v2335_v16 }
  0x27   :  { %1971 = vmatmul.msk.f32.gmra.mxu2 %vm62_vm0, %v19_v19 }
  0x28   :  { %355 = vmatpush.msra.mxu3 %v2352_v20 }
  0x29   :  { %1964 = vmatmul.msk.f32.gmra.mxu1 %vm62_vm0, %v19_v19 }
  0x2d   :  { %1958 = vmatmul.msk.f32.gmra.mxu0 %vm62_vm0, %v20_v22 }
  0x2f   :  { %1972 = vmatmul.msk.f32.gmra.mxu2 %vm62_vm0, %v20_v22 }
  0x31   :  { %1965 = vmatmul.msk.f32.gmra.mxu1 %vm62_vm0, %v20_v22 }
  0x87   :  { %v101_v27 = vpop.f32.mrf.mxu0 }
  0x88   :  { %v102_v28 = vadd.f32 %v2421_v26, %v101_v27  ;;  %v21_v27 = vld [vmem:[%s3034_s0 + $0x20] sm:$0xff] }
  0x89   :  { %v142_v32 = vpop.f32.mrf.mxu1  ;;  %1959 = vmatmul.msk.f32.gmra.mxu0 %vm62_vm0, %v21_v27  ;;  %1966 = vmatmul.msk.f32.gmra.mxu1 %vm62_vm0, %v21_v27 }
  0x8a   :  { %v143_v34 = vadd.f32 %v2427_v31, %v142_v32  ;;  %1973 = vmatmul.msk.f32.gmra.mxu2 %vm62_vm0, %v21_v27 }
  0x8c   :  { %v224_v29 = vpop.f32.mrf.mxu3 }
  0x8d   :  { %v247_v30 = vadd.f32 %v224_v29, %v102_v28 }
  0x8f   :  { %v1976_v33 = vmul.f32 -1.442695, %v247_v30  ;;  %v22_v30 = vld [vmem:[%s3034_s0 + $0x28] sm:$0xff] }
  0x91   :  { %2099 = vpow2.f32 %v1976_v33  ;;  %1960 = vmatmul.msk.f32.gmra.mxu0 %vm62_vm0, %v22_v30  ;;  %1967 = vmatmul.msk.f32.gmra.mxu1 %vm62_vm0, %v22_v30 }
  0x92   :  { %1974 = vmatmul.msk.f32.gmra.mxu2 %vm62_vm0, %v22_v30 }
  0x94   :  { %v244_v35 = vpop.f32.mrf.mxu3 }
  0x95   :  { %v267_v36 = vadd.f32 %v244_v35, %v143_v34  ;;  %v183_v52 = vpop.f32.mrf.mxu2 }
  0x96   :  { %v184_v59 = vadd.f32 %v2444_v51, %v183_v52 }
  0x97   :  { %v2100_v37 = vpop.eup %2099  ;;  %v1977_v38 = vmul.f32 -1.442695, %v267_v36 }
  0x98   :  { %v251_v39 = vadd.f32 1.0, %v2100_v37  ;;  %v23_v37 = vld [vmem:[%s3034_s0 + $0x30] sm:$0xff] }
  0x99   :  { %2101 = vpow2.f32 %v1977_v38  ;;  %1961 = vmatmul.msk.f32.gmra.mxu0 %vm62_vm0, %v23_v37  ;;  %1968 = vmatmul.msk.f32.gmra.mxu1 %vm62_vm0, %v23_v37 }
  0x9a   :  { %2103 = vrcp.f32 %v251_v39  ;;  %v263_v47 = vand.u32 2147483648, %v251_v39  ;;  %v261_v50 = vand.u32 2147483647, %v251_v39  ;;  %vm257_vm2 = vweird.f32 %v251_v39  ;;  %v104_v28 = vpop.f32.mrf.mxu0  ;;  %1975 = vmatmul.msk.f32.gmra.mxu2 %vm62_vm0, %v23_v37 }
  0x9b   :  { %v105_v29 = vadd.f32 %v2421_v26, %v104_v28 }
  0x9c   :  { %v307_v48 = vpop.f32.mrf.mxu3  ;;  %v264_v56 = vor.u32 1.1754944e-38, %v263_v47  ;;  %vm262_vm4 = vcmp.eq.f32.partialorder %v261_v50, 8.507059e+37 }
  0x9d   :  { %v308_v54 = vadd.f32 %v2439_v46, %v307_v48 }
  0x9e   :  { %v145_v34 = vpop.f32.mrf.mxu1 }
  0x9f   :  { %v2102_v41 = vpop.eup %2101  ;;  %v146_v36 = vadd.f32 %v2427_v31, %v145_v34 }
  0xa0   :  { %v2104_v42 = vpop.eup %2103  ;;  %v271_v43 = vadd.f32 1.0, %v2102_v41 }
  0xa1   :  { %v253_v44 = vmul.f32 %v2104_v42, %v251_v39  ;;  %vm258_vm1 = vweird.f32 %v2104_v42 }
  0xa2   :  { %2105 = vrcp.f32 %v271_v43  ;;  %vm259_vm3 = vmor %vm257_vm2, %vm258_vm1  ;;  %v283_v5 = vand.u32 2147483648, %v271_v43  ;;  %vm277_vm6 = vweird.f32 %v271_v43  ;;  %v281_v6 = vand.u32 2147483647, %v271_v43 }
  0xa3   :  { %v254_v45 = vsub.f32 1.0, %v253_v44 }
  0xa4   :  { %v284_v10 = vor.u32 1.1754944e-38, %v283_v5  ;;  %vm282_vm8 = vcmp.eq.f32.partialorder %v281_v6, 8.507059e+37 }
  0xa5   :  { %v255_v49 = vmul.f32 %v2104_v42, %v254_v45 }
  0xa7   :  { %v256_v53 = vadd.f32 %v2104_v42, %v255_v49 }
  0xa8   :  { %v2106_v55 = vpop.eup %2105 }
  0xa9   :  { %v273_v57 = vmul.f32 %v2106_v55, %v271_v43  ;;  %v260_v58 = vsel %vm259_vm3, %v2104_v42, %v256_v53  ;;  %vm278_vm5 = vweird.f32 %v2106_v55  ;;  %v186_v53 = vpop.f32.mrf.mxu2 }
  0xaa   :  { %v265_v60 = vsel %vm262_vm4, %v264_v56, %v260_v58  ;;  %vm279_vm7 = vmor %vm277_vm6, %vm278_vm5  ;;  %v187_v58 = vadd.f32 %v2444_v51, %v186_v53 }
  0xab   :  { %v274_v61 = vsub.f32 1.0, %v273_v57  ;;  %v310_v62 = vmul.f32 %v308_v54, %v265_v60 }
  0xad   :  { %v275_v63 = vmul.f32 %v2106_v55, %v274_v61  ;;  %v311_v2 = vadd.f32 %v310_v62, %v184_v59 }
  0xaf   :  { %2107 = vtanh.f32 %v311_v2  ;;  %v276_v3 = vadd.f32 %v2106_v55, %v275_v63 }
  0xb1   :  { %v280_v8 = vsel %vm279_vm7, %v2106_v55, %v276_v3 }
  0xb2   :  { %v285_v14 = vsel %vm282_vm8, %v284_v10, %v280_v8 }
  0xb5   :  { %v2108_v9 = vpop.eup %2107 }
  0xb6   :  { %v313_v12 = vsub.f32 0.0, %v2108_v9 }
  0xb8   :  { %v314_v17 = vmul.f32 %v313_v12, %v285_v14 }
  0xba   :  { %v2448_v18 = vadd.f32 %v2108_v9, %v314_v17 }
  0xbc   :  { %316 = vst.msk [vmem:[#allocation2] sm:$0xff] %vm62_vm0, %v2448_v18  ;;  %1978 = vmatmul.msk.f32.vlgmr.msrb.gmra.mxu3 %vm62_vm0, %v2448_v18 }
  0xbd   :  { %412 = vmatpush.msrb.mxu3 %v2359_v21 }
  0xbf   :  { %413 = vmatpush.msrb.mxu3 %v2372_v23 }
  0xc1   :  { %414 = vmatpush.msrb.mxu3 %v2379_v24 }
  0xc3   :  { %415 = vmatpush.msrb.mxu3 %v2388_v25 }
  0xc4   :  { %1979 = vmatmul.msk.f32.vlgmr.msra.gmra.mxu3 %vm62_vm0, %v2448_v18 }
  0xc5   :  { %442 = vmatpush.msra.mxu3 %v2272_v0 }
  0xc7   :  { %443 = vmatpush.msra.mxu3 %v2277_v1 }
  0xc9   :  { %444 = vmatpush.msra.mxu3 %v2289_v4 }
  0xcb   :  { %445 = vmatpush.msra.mxu3 %v2301_v7 }
  0xcc   :  { %1982 = vmatmul.msk.f32.vlgmr.msrb.gmra.mxu3 %vm62_vm0, %v2448_v18 }
  0xcd   :  { %572 = vmatpush.msrb.mxu3 %v2316_v11 }
  0xcf   :  { %573 = vmatpush.msrb.mxu3 %v2325_v13 }
  0xd1   :  { %574 = vmatpush.msrb.mxu3 %v2335_v16 }
  0xd3   :  { %575 = vmatpush.msrb.mxu3 %v2352_v20 }
 0x13f   :  { %v337_v32 = vpop.f32.mrf.mxu3 }
 0x140   :  { %v360_v33 = vadd.f32 %v337_v32, %v105_v29  ;;  %v148_v32 = vpop.f32.mrf.mxu1 }
 0x142   :  { %v1980_v35 = vmul.f32 -1.442695, %v360_v33 }
 0x144   :  { %2109 = vpow2.f32 %v1980_v35  ;;  %v149_v35 = vadd.f32 %v2427_v31, %v148_v32 }
 0x147   :  { %v357_v38 = vpop.f32.mrf.mxu3 }
 0x148   :  { %v380_v39 = vadd.f32 %v357_v38, %v146_v36  ;;  %v2535_v34 = vpop.f32.mrf.mxu1 }
 0x14a   :  { %v2110_v40 = vpop.eup %2109  ;;  %v1981_v41 = vmul.f32 -1.442695, %v380_v39 }
 0x14b   :  { %v364_v42 = vadd.f32 1.0, %v2110_v40 }
 0x14c   :  { %2111 = vpow2.f32 %v1981_v41 }
 0x14d   :  { %2113 = vrcp.f32 %v364_v42  ;;  %v376_v49 = vand.u32 2147483648, %v364_v42  ;;  %v374_v52 = vand.u32 2147483647, %v364_v42  ;;  %vm370_vm10 = vweird.f32 %v364_v42 }
 0x14f   :  { %v417_v54 = vpop.f32.mrf.mxu3  ;;  %v377_v57 = vor.u32 1.1754944e-38, %v376_v49  ;;  %vm375_vm12 = vcmp.eq.f32.partialorder %v374_v52, 8.507059e+37 }
 0x150   :  { %v418_v61 = vadd.f32 %v2439_v46, %v417_v54  ;;  %v2538_v38 = vpop.f32.mrf.mxu1 }
 0x152   :  { %v2112_v43 = vpop.eup %2111 }
 0x153   :  { %v2114_v44 = vpop.eup %2113  ;;  %v384_v45 = vadd.f32 1.0, %v2112_v43 }
 0x154   :  { %v366_v47 = vmul.f32 %v2114_v44, %v364_v42  ;;  %vm371_vm9 = vweird.f32 %v2114_v44 }
 0x155   :  { %2115 = vrcp.f32 %v384_v45  ;;  %vm372_vm11 = vmor %vm370_vm10, %vm371_vm9  ;;  %v396_v8 = vand.u32 2147483648, %v384_v45  ;;  %vm390_vm14 = vweird.f32 %v384_v45  ;;  %v394_v9 = vand.u32 2147483647, %v384_v45 }
 0x156   :  { %v367_v48 = vsub.f32 1.0, %v366_v47 }
 0x157   :  { %v397_v14 = vor.u32 1.1754944e-38, %v396_v8  ;;  %vm395_vm1 = vcmp.eq.f32.partialorder %v394_v9, 8.507059e+37 }
 0x158   :  { %v368_v50 = vmul.f32 %v2114_v44, %v367_v48 }
 0x15a   :  { %v369_v55 = vadd.f32 %v2114_v44, %v368_v50 }
 0x15b   :  { %v2116_v56 = vpop.eup %2115 }
 0x15c   :  { %v386_v59 = vmul.f32 %v2116_v56, %v384_v45  ;;  %v373_v60 = vsel %vm372_vm11, %v2114_v44, %v369_v55  ;;  %vm391_vm13 = vweird.f32 %v2116_v56  ;;  %v2541_v44 = vpop.f32.mrf.mxu1 }
 0x15d   :  { %v378_v62 = vsel %vm375_vm12, %v377_v57, %v373_v60  ;;  %vm392_vm15 = vmor %vm390_vm14, %vm391_vm13 }
 0x15e   :  { %v387_v63 = vsub.f32 1.0, %v386_v59  ;;  %v420_v2 = vmul.f32 %v418_v61, %v378_v62  ;;  %v189_v61 = vpop.f32.mrf.mxu2 }
 0x160   :  { %v388_v3 = vmul.f32 %v2116_v56, %v387_v63  ;;  %v421_v5 = vadd.f32 %v420_v2, %v187_v58 }
 0x162   :  { %2117 = vtanh.f32 %v421_v5  ;;  %v389_v6 = vadd.f32 %v2116_v56, %v388_v3  ;;  %v190_v5 = vadd.f32 %v2444_v51, %v189_v61 }
 0x164   :  { %v393_v10 = vsel %vm392_vm15, %v2116_v56, %v389_v6  ;;  %v2543_v50 = vpop.f32.mrf.mxu1 }
 0x165   :  { %v398_v19 = vsel %vm395_vm1, %v397_v14, %v393_v10 }
 0x168   :  { %v2118_v12 = vpop.eup %2117 }
 0x169   :  { %v423_v17 = vsub.f32 %v2448_v18, %v2118_v12  ;;  %v107_v18 = vpop.f32.mrf.mxu0 }
 0x16a   :  { %v108_v40 = vadd.f32 %v2421_v26, %v107_v18 }
 0x16b   :  { %v424_v22 = vmul.f32 %v423_v17, %v398_v19 }
 0x16d   :  { %v2505_v27 = vadd.f32 %v2118_v12, %v424_v22 }
 0x16f   :  { %426 = vst.msk [vmem:[#allocation2 + $0x8] sm:$0xff] %vm62_vm0, %v2505_v27  ;;  %1983 = vmatmul.msk.f32.vlgmr.msra.gmra.mxu3 %vm62_vm0, %v2505_v27  ;;  %1984 = vmatmul.msk.f32.vlgmr.msrb.gmra.mxu0 %vm62_vm0, %v2505_v27 }
 0x170   :  { %1987 = vmatmul.msk.f32.vlgmr.msrb.gmra.mxu1 %vm62_vm0, %v2505_v27  ;;  %742 = vmatpush.msra.mxu3 %v2359_v21 }
 0x171   :  { %772 = vmatpush.msrb.mxu0 %v2272_v0  ;;  %792 = vmatpush.msrb.mxu1 %v2316_v11  ;;  %v2527_v28 = vpop.f32.mrf.mxu0 }
 0x172   :  { %743 = vmatpush.msra.mxu3 %v2372_v23 }
 0x173   :  { %773 = vmatpush.msrb.mxu0 %v2277_v1  ;;  %793 = vmatpush.msrb.mxu1 %v2325_v13 }
 0x174   :  { %744 = vmatpush.msra.mxu3 %v2379_v24 }
 0x175   :  { %774 = vmatpush.msrb.mxu0 %v2289_v4  ;;  %794 = vmatpush.msrb.mxu1 %v2335_v16 }
 0x176   :  { %745 = vmatpush.msra.mxu3 %v2388_v25 }
 0x177   :  { %775 = vmatpush.msrb.mxu0 %v2301_v7  ;;  %795 = vmatpush.msrb.mxu1 %v2352_v20 }
 0x179   :  { %v2529_v29 = vpop.f32.mrf.mxu0 }
 0x181   :  { %v2531_v30 = vpop.f32.mrf.mxu0 }
 0x189   :  { %v2533_v33 = vpop.f32.mrf.mxu0 }
 0x1ec   :  { %v467_v36 = vpop.f32.mrf.mxu0 }
 0x1ed   :  { %v490_v37 = vadd.f32 %v467_v36, %v149_v35  ;;  %v527_v60 = vpop.f32.mrf.mxu1 }
 0x1ee   :  { %v528_v3 = vadd.f32 %v2439_v46, %v527_v60 }
 0x1ef   :  { %v1986_v39 = vmul.f32 -1.442695, %v490_v37 }
 0x1f1   :  { %2119 = vpow2.f32 %v1986_v39 }
 0x1f2   :  { %v447_v41 = vpop.f32.mrf.mxu3 }
 0x1f3   :  { %v470_v42 = vadd.f32 %v447_v41, %v108_v40 }
 0x1f5   :  { %v1985_v43 = vmul.f32 -1.442695, %v470_v42 }
 0x1f7   :  { %2121 = vpow2.f32 %v1985_v43  ;;  %v2120_v45 = vpop.eup %2119 }
 0x1f8   :  { %v494_v48 = vadd.f32 1.0, %v2120_v45 }
 0x1fa   :  { %v506_v17 = vand.u32 2147483648, %v494_v48  ;;  %vm500_vm7 = vweird.f32 %v494_v48  ;;  %v504_v19 = vand.u32 2147483647, %v494_v48 }
 0x1fc   :  { %v507_v32 = vor.u32 1.1754944e-38, %v506_v17  ;;  %vm505_vm9 = vcmp.eq.f32.partialorder %v504_v19, 8.507059e+37 }
 0x1fd   :  { %v2122_v47 = vpop.eup %2121 }
 0x1fe   :  { %v474_v49 = vadd.f32 1.0, %v2122_v47 }
 0x200   :  { %2123 = vrcp.f32 %v474_v49  ;;  %v486_v57 = vand.u32 2147483648, %v474_v49  ;;  %v484_v59 = vand.u32 2147483647, %v474_v49  ;;  %vm480_vm3 = vweird.f32 %v474_v49 }
 0x201   :  { %2125 = vrcp.f32 %v494_v48 }
 0x202   :  { %v487_v2 = vor.u32 1.1754944e-38, %v486_v57  ;;  %vm485_vm5 = vcmp.eq.f32.partialorder %v484_v59, 8.507059e+37 }
 0x206   :  { %v2124_v52 = vpop.eup %2123 }
 0x207   :  { %v2126_v53 = vpop.eup %2125  ;;  %v476_v54 = vmul.f32 %v2124_v52, %v474_v49  ;;  %vm481_vm2 = vweird.f32 %v2124_v52 }
 0x208   :  { %v496_v56 = vmul.f32 %v2126_v53, %v494_v48  ;;  %vm482_vm4 = vmor %vm480_vm3, %vm481_vm2  ;;  %vm501_vm6 = vweird.f32 %v2126_v53 }
 0x209   :  { %v477_v55 = vsub.f32 1.0, %v476_v54  ;;  %vm502_vm8 = vmor %vm500_vm7, %vm501_vm6 }
 0x20a   :  { %v497_v63 = vsub.f32 1.0, %v496_v56 }
 0x20b   :  { %v478_v58 = vmul.f32 %v2124_v52, %v477_v55 }
 0x20c   :  { %v498_v10 = vmul.f32 %v2126_v53, %v497_v63 }
 0x20d   :  { %v479_v62 = vadd.f32 %v2124_v52, %v478_v58 }
 0x20e   :  { %v499_v14 = vadd.f32 %v2126_v53, %v498_v10 }
 0x20f   :  { %v483_v6 = vsel %vm482_vm4, %v2124_v52, %v479_v62 }
 0x210   :  { %v488_v8 = vsel %vm485_vm5, %v487_v2, %v483_v6  ;;  %v503_v22 = vsel %vm502_vm8, %v2126_v53, %v499_v14 }
 0x211   :  { %v530_v9 = vmul.f32 %v528_v3, %v488_v8  ;;  %v508_v36 = vsel %vm505_vm9, %v507_v32, %v503_v22 }
 0x213   :  { %v531_v12 = vadd.f32 %v530_v9, %v190_v5 }
 0x215   :  { %2127 = vtanh.f32 %v531_v12 }
 0x21b   :  { %v2128_v18 = vpop.eup %2127 }
 0x21c   :  { %v533_v35 = vsub.f32 %v2505_v27, %v2128_v18 }
 0x21e   :  { %v534_v37 = vmul.f32 %v533_v35, %v508_v36  ;;  %v114_v35 = vadd.f32 %v2421_v26, %v2529_v29  ;;  %v2010_v29 = vld [vmem:[%s3033_s1 + $0x70] sm:$0xff] }
 0x220   :  { %v2548_v39 = vadd.f32 %v2128_v18, %v534_v37 }
 0x222   :  { %536 = vst.msk [vmem:[#allocation2 + $0x10] sm:$0xff] %vm62_vm0, %v2548_v39  ;;  %1988 = vmatmul.msk.f32.vlgmr.msrb.gmra.mxu2 %vm62_vm0, %v2548_v39  ;;  %1989 = vmatmul.msk.f32.vlgmr.msrb.gmra.mxu3 %vm62_vm0, %v2548_v39 }
 0x223   :  { %1992 = vmatmul.msk.f32.vlgmr.msra.gmra.mxu0 %vm62_vm0, %v2548_v39  ;;  %852 = vmatpush.msrb.mxu2 %v2359_v21 }
 0x224   :  { %882 = vmatpush.msrb.mxu3 %v2272_v0  ;;  %902 = vmatpush.msra.mxu0 %v2316_v11  ;;  %v192_v0 = vpop.f32.mrf.mxu2 }
 0x225   :  { %853 = vmatpush.msrb.mxu2 %v2372_v23  ;;  %v193_v2 = vadd.f32 %v2444_v51, %v192_v0  ;;  %v155_v0 = vadd.f32 %v2427_v31, %v2538_v38  ;;  %v2009_v38 = vld [vmem:[%s3033_s1 + $0x68] sm:$0xff] }
 0x226   :  { %883 = vmatpush.msrb.mxu3 %v2277_v1  ;;  %903 = vmatpush.msra.mxu0 %v2325_v13  ;;  %v111_v13 = vadd.f32 %v2421_v26, %v2527_v28 }
 0x227   :  { %854 = vmatpush.msrb.mxu2 %v2379_v24 }
 0x228   :  { %884 = vmatpush.msrb.mxu3 %v2289_v4  ;;  %904 = vmatpush.msra.mxu0 %v2335_v16  ;;  %v152_v4 = vadd.f32 %v2427_v31, %v2535_v34 }
 0x229   :  { %855 = vmatpush.msrb.mxu2 %v2388_v25 }
 0x22a   :  { %885 = vmatpush.msrb.mxu3 %v2301_v7  ;;  %905 = vmatpush.msra.mxu0 %v2352_v20 }
 0x22c   :  { %v2570_v11 = vpop.f32.mrf.mxu2 }
 0x234   :  { %v2572_v27 = vpop.f32.mrf.mxu2 }
 0x23c   :  { %v2574_v1 = vpop.f32.mrf.mxu2 }
 0x2a0   :  { %v637_v57 = vpop.f32.mrf.mxu0 }
 0x2a1   :  { %v638_v61 = vadd.f32 %v2439_v46, %v637_v57  ;;  %v196_v57 = vadd.f32 %v2444_v51, %v2570_v11  ;;  %v2627_v11 = vld [vmem:[#allocation2] sm:$0xff] }
 0x2a5   :  { %v557_v16 = vpop.f32.mrf.mxu2  ;;  %v577_v40 = vpop.f32.mrf.mxu3 }
 0x2a6   :  { %v580_v41 = vadd.f32 %v557_v16, %v111_v13  ;;  %v600_v42 = vadd.f32 %v577_v40, %v152_v4 }
 0x2a8   :  { %v1990_v7 = vmul.f32 -1.442695, %v580_v41  ;;  %v1991_v43 = vmul.f32 -1.442695, %v600_v42 }
 0x2aa   :  { %2129 = vpow2.f32 %v1990_v7  ;;  %v2008_v7 = vld [vmem:[%s3033_s1 + $0x60] sm:$0xff] }
 0x2ab   :  { %2131 = vpow2.f32 %v1991_v43 }
 0x2b0   :  { %v2130_v20 = vpop.eup %2129 }
 0x2b1   :  { %v2132_v45 = vpop.eup %2131  ;;  %v584_v47 = vadd.f32 1.0, %v2130_v20 }
 0x2b2   :  { %v604_v48 = vadd.f32 1.0, %v2132_v45 }
 0x2b3   :  { %2133 = vrcp.f32 %v584_v47  ;;  %v596_v54 = vand.u32 2147483648, %v584_v47  ;;  %v594_v56 = vand.u32 2147483647, %v584_v47  ;;  %vm590_vm11 = vweird.f32 %v584_v47 }
 0x2b4   :  { %2135 = vrcp.f32 %v604_v48  ;;  %v616_v9 = vand.u32 2147483648, %v604_v48  ;;  %vm610_vm15 = vweird.f32 %v604_v48  ;;  %v614_v10 = vand.u32 2147483647, %v604_v48 }
 0x2b5   :  { %v597_v59 = vor.u32 1.1754944e-38, %v596_v54  ;;  %vm595_vm13 = vcmp.eq.f32.partialorder %v594_v56, 8.507059e+37 }
 0x2b6   :  { %v617_v17 = vor.u32 1.1754944e-38, %v616_v9  ;;  %vm615_vm2 = vcmp.eq.f32.partialorder %v614_v10, 8.507059e+37 }
 0x2b9   :  { %v2134_v49 = vpop.eup %2133 }
 0x2ba   :  { %v2136_v52 = vpop.eup %2135  ;;  %v586_v28 = vmul.f32 %v2134_v49, %v584_v47  ;;  %vm591_vm10 = vweird.f32 %v2134_v49 }
 0x2bb   :  { %v606_v34 = vmul.f32 %v2136_v52, %v604_v48  ;;  %vm592_vm12 = vmor %vm590_vm11, %vm591_vm10  ;;  %vm611_vm14 = vweird.f32 %v2136_v52 }
 0x2bc   :  { %v587_v53 = vsub.f32 1.0, %v586_v28  ;;  %vm612_vm1 = vmor %vm610_vm15, %vm611_vm14 }
 0x2bd   :  { %v607_v60 = vsub.f32 1.0, %v606_v34 }
 0x2be   :  { %v588_v55 = vmul.f32 %v2134_v49, %v587_v53 }
 0x2bf   :  { %v608_v5 = vmul.f32 %v2136_v52, %v607_v60 }
 0x2c0   :  { %v589_v58 = vadd.f32 %v2134_v49, %v588_v55 }
 0x2c1   :  { %v609_v8 = vadd.f32 %v2136_v52, %v608_v5 }
 0x2c2   :  { %v593_v62 = vsel %vm592_vm12, %v2134_v49, %v589_v58 }
 0x2c3   :  { %v598_v63 = vsel %vm595_vm13, %v597_v59, %v593_v62  ;;  %v613_v12 = vsel %vm612_vm1, %v2136_v52, %v609_v8 }
 0x2c4   :  { %v640_v3 = vmul.f32 %v638_v61, %v598_v63  ;;  %v618_v22 = vsel %vm615_vm2, %v617_v17, %v613_v12  ;;  %v2631_v12 = vld [vmem:[#allocation2 + $0x8] sm:$0xff] }
 0x2c6   :  { %v641_v6 = vadd.f32 %v640_v3, %v193_v2 }
 0x2c8   :  { %2137 = vtanh.f32 %v641_v6 }
 0x2ce   :  { %v2138_v14 = vpop.eup %2137 }
 0x2cf   :  { %v643_v19 = vsub.f32 %v2548_v39, %v2138_v14 }
 0x2d1   :  { %v644_v18 = vmul.f32 %v643_v19, %v618_v22  ;;  %v117_v22 = vadd.f32 %v2421_v26, %v2531_v30  ;;  %v2657_v26 = vld [vmem:[%s3032_s2 + $0x78] sm:$0xff] }
 0x2d2   :  { %v2019_v30 = vld [vmem:[%s3033_s1 + $0xb8] sm:$0xff] }
 0x2d3   :  { %v2583_v32 = vadd.f32 %v2138_v14, %v644_v18  ;;  %v2635_v14 = vld [vmem:[#allocation2 + $0x10] sm:$0xff]  ;;  %v158_v18 = vadd.f32 %v2427_v31, %v2541_v44  ;;  %v2015_v31 = vld [vmem:[%s3033_s1 + $0x98] sm:$0xff] }
 0x2d4   :  { %v2669_v44 = vld [vmem:[%s3032_s2 + $0x70] sm:$0xff] }
 0x2d5   :  { %646 = vst.msk [vmem:[#allocation2 + $0x18] sm:$0xff] %vm62_vm0, %v2583_v32  ;;  %1993 = vmatmul.msk.f32.vlgmr.msra.gmra.mxu1 %vm62_vm0, %v2583_v32  ;;  %1994 = vmatmul.msk.f32.vlgmr.msra.gmra.mxu2 %vm62_vm0, %v2583_v32 }
 0x2d6   :  { %1997 = vmatmul.msk.f32.vlgmr.msra.gmra.mxu3 %vm62_vm0, %v2583_v32  ;;  %962 = vmatpush.msra.mxu1 %v2359_v21 }
 0x2d7   :  { %1100 = vmatpush.msra.mxu3 %v2015_v31 }
 0x2d8   :  { %963 = vmatpush.msra.mxu1 %v2372_v23 }
 0x2da   :  { %964 = vmatpush.msra.mxu1 %v2379_v24 }
 0x2dc   :  { %965 = vmatpush.msra.mxu1 %v2388_v25  ;;  %v2011_v25 = vld [vmem:[%s3033_s1 + $0x78] sm:$0xff] }
 0x2dd   :  { %1059 = vmatpush.msra.mxu2 %v2011_v25  ;;  %v2639_v17 = vld [vmem:[#allocation2 + $0x18] sm:$0xff]  ;;  %v2680_v25 = vld [vmem:[%s3032_s2 + $0x68] sm:$0xff] }
 0x2df   :  { %1060 = vmatpush.msra.mxu2 %v2010_v29  ;;  %v2013_v29 = vld [vmem:[%s3033_s1 + $0x88] sm:$0xff] }
 0x2e1   :  { %1061 = vmatpush.msra.mxu2 %v2009_v38  ;;  %v2017_v38 = vld [vmem:[%s3033_s1 + $0xa8] sm:$0xff] }
 0x2e3   :  { %1062 = vmatpush.msra.mxu2 %v2008_v7  ;;  %v2692_v7 = vld [vmem:[%s3032_s2 + $0x60] sm:$0xff] }
 0x352   :  { %v667_v36 = vpop.f32.mrf.mxu1 }
 0x353   :  { %v690_v37 = vadd.f32 %v667_v36, %v114_v35 }
 0x355   :  { %v1995_v39 = vmul.f32 -1.442695, %v690_v37 }
 0x357   :  { %2139 = vpow2.f32 %v1995_v39 }
 0x358   :  { %v687_v13 = vpop.f32.mrf.mxu2 }
 0x359   :  { %v710_v4 = vadd.f32 %v687_v13, %v155_v0  ;;  %v747_v49 = vpop.f32.mrf.mxu3 }
 0x35a   :  { %v748_v55 = vadd.f32 %v2439_v46, %v747_v49 }
 0x35b   :  { %v1996_v16 = vmul.f32 -1.442695, %v710_v4 }
 0x35d   :  { %v2140_v21 = vpop.eup %2139  ;;  %2141 = vpow2.f32 %v1996_v16 }
 0x35e   :  { %v694_v23 = vadd.f32 1.0, %v2140_v21 }
 0x360   :  { %2143 = vrcp.f32 %v694_v23  ;;  %v706_v20 = vand.u32 2147483648, %v694_v23  ;;  %v704_v47 = vand.u32 2147483647, %v694_v23  ;;  %vm700_vm4 = vweird.f32 %v694_v23 }
 0x362   :  { %v707_v53 = vor.u32 1.1754944e-38, %v706_v20  ;;  %vm705_vm6 = vcmp.eq.f32.partialorder %v704_v47, 8.507059e+37  ;;  %v2016_v20 = vld [vmem:[%s3033_s1 + $0xa0] sm:$0xff] }
 0x363   :  { %v2142_v24 = vpop.eup %2141 }
 0x364   :  { %v714_v40 = vadd.f32 1.0, %v2142_v24  ;;  %v2018_v24 = vld [vmem:[%s3033_s1 + $0xb0] sm:$0xff] }
 0x366   :  { %v2144_v41 = vpop.eup %2143  ;;  %2145 = vrcp.f32 %v714_v40  ;;  %v726_v62 = vand.u32 2147483648, %v714_v40  ;;  %vm720_vm8 = vweird.f32 %v714_v40  ;;  %v724_v63 = vand.u32 2147483647, %v714_v40 }
 0x367   :  { %v696_v42 = vmul.f32 %v2144_v41, %v694_v23  ;;  %vm701_vm3 = vweird.f32 %v2144_v41  ;;  %v2014_v23 = vld [vmem:[%s3033_s1 + $0x90] sm:$0xff] }
 0x368   :  { %vm702_vm5 = vmor %vm700_vm4, %vm701_vm3  ;;  %v727_v5 = vor.u32 1.1754944e-38, %v726_v62  ;;  %vm725_vm10 = vcmp.eq.f32.partialorder %v724_v63, 8.507059e+37  ;;  %1101 = vmatpush.msra.mxu3 %v2014_v23  ;;  %v2727_v63 = vld [vmem:[%s3032_s2 + $0x80] sm:$0xff] }
 0x369   :  { %v697_v43 = vsub.f32 1.0, %v696_v42 }
 0x36a   :  { %1102 = vmatpush.msra.mxu3 %v2013_v29  ;;  %v2843_v29 = vld [vmem:[%s3035_s3 + $0x5] ss:$0 sm:$0xff] }
 0x36b   :  { %v698_v45 = vmul.f32 %v2144_v41, %v697_v43  ;;  %v2012_v43 = vld [vmem:[%s3033_s1 + $0x80] sm:$0xff] }
 0x36c   :  { %v2146_v48 = vpop.eup %2145  ;;  %1103 = vmatpush.msra.mxu3 %v2012_v43 }
 0x36d   :  { %v716_v52 = vmul.f32 %v2146_v48, %v714_v40  ;;  %v699_v28 = vadd.f32 %v2144_v41, %v698_v45  ;;  %vm721_vm7 = vweird.f32 %v2146_v48 }
 0x36e   :  { %vm722_vm9 = vmor %vm720_vm8, %vm721_vm7 }
 0x36f   :  { %v717_v54 = vsub.f32 1.0, %v716_v52  ;;  %v703_v34 = vsel %vm702_vm5, %v2144_v41, %v699_v28  ;;  %v2706_v28 = vld [vmem:[%s3032_s2 + $0x98] sm:$0xff] }
 0x370   :  { %v708_v56 = vsel %vm705_vm6, %v707_v53, %v703_v34  ;;  %v2712_v34 = vld [vmem:[%s3032_s2 + $0x90] sm:$0xff] }
 0x371   :  { %v750_v58 = vmul.f32 %v748_v55, %v708_v56  ;;  %v718_v59 = vmul.f32 %v2146_v48, %v717_v54 }
 0x373   :  { %v751_v60 = vadd.f32 %v750_v58, %v196_v57  ;;  %v719_v61 = vadd.f32 %v2146_v48, %v718_v59  ;;  %v2719_v59 = vld [vmem:[%s3032_s2 + $0x88] sm:$0xff] }
 0x375   :  { %2147 = vtanh.f32 %v751_v60  ;;  %v723_v2 = vsel %vm722_vm9, %v2146_v48, %v719_v61  ;;  %v199_v61 = vadd.f32 %v2444_v51, %v2572_v27 }
 0x376   :  { %v728_v8 = vsel %vm725_vm10, %v727_v5, %v723_v2 }
 0x37b   :  { %v2148_v3 = vpop.eup %2147 }
 0x37c   :  { %v753_v6 = vsub.f32 %v2583_v32, %v2148_v3 }
 0x37e   :  { %v754_v9 = vmul.f32 %v753_v6, %v728_v8 }
 0x380   :  { %v2617_v10 = vadd.f32 %v2148_v3, %v754_v9  ;;  %v2736_v9 = vld [vmem:[%s3032_s2 + $0xb8] sm:$0xff] }
 0x382   :  { %756 = vst.msk [vmem:[#allocation2 + $0x20] sm:$0xff] %vm62_vm0, %v2617_v10  ;;  %1998 = vmatmul.msk.f32.vlgmr.msrb.gmra.mxu0 %vm62_vm0, %v2617_v10  ;;  %1999 = vmatmul.msk.f32.vlgmr.msrb.gmra.mxu1 %vm62_vm0, %v2617_v10 }
 0x383   :  { %2002 = vmatmul.msk.f32.vlgmr.msrb.gmra.mxu2 %vm62_vm0, %v2617_v10  ;;  %1179 = vmatpush.msrb.mxu1 %v2657_v26 }
 0x384   :  { %1141 = vmatpush.msrb.mxu0 %v2019_v30  ;;  %1420 = vmatpush.msrb.mxu2 %v2706_v28 }
 0x385   :  { %1180 = vmatpush.msrb.mxu1 %v2669_v44 }
 0x386   :  { %1142 = vmatpush.msrb.mxu0 %v2018_v24  ;;  %1421 = vmatpush.msrb.mxu2 %v2712_v34 }
 0x387   :  { %1181 = vmatpush.msrb.mxu1 %v2680_v25 }
 0x388   :  { %1143 = vmatpush.msrb.mxu0 %v2017_v38  ;;  %1422 = vmatpush.msrb.mxu2 %v2719_v59 }
 0x389   :  { %v2643_v19 = vld [vmem:[#allocation2 + $0x20] sm:$0xff]  ;;  %1182 = vmatpush.msrb.mxu1 %v2692_v7 }
 0x38a   :  { %1144 = vmatpush.msrb.mxu0 %v2016_v20  ;;  %1423 = vmatpush.msrb.mxu2 %v2727_v63 }
 0x38b   :  { %2036 = vmatmul.msk.f32.vlgmr.msra.gmra.mxu2 %vm62_vm0, %v2627_v11 }
 0x38c   :  { %1589 = vmatpush.msra.mxu2 %v2736_v9 }
 0x393   :  { %2037 = vmatmul.msk.f32.gmra.mxu2 %vm62_vm0, %v2631_v12 }
 0x39b   :  { %2038 = vmatmul.msk.f32.gmra.mxu2 %vm62_vm0, %v2635_v14 }
 0x3a3   :  { %2039 = vmatmul.msk.f32.gmra.mxu2 %vm62_vm0, %v2639_v17 }
 0x3ab   :  { %2040 = vmatmul.msk.f32.gmra.mxu2 %vm62_vm0, %v2643_v19 }
 0x3ff   :  { %v777_v32 = vpop.f32.mrf.mxu0  ;;  %v797_v35 = vpop.f32.mrf.mxu1 }
 0x400   :  { %v800_v36 = vadd.f32 %v777_v32, %v117_v22  ;;  %v820_v37 = vadd.f32 %v797_v35, %v158_v18  ;;  %v2743_v32 = vld [vmem:[%s3032_s2 + $0xb0] sm:$0xff] }
 0x401   :  { %1590 = vmatpush.msra.mxu2 %v2743_v32 }
 0x402   :  { %v2000_v39 = vmul.f32 -1.442695, %v800_v36  ;;  %v2001_v0 = vmul.f32 -1.442695, %v820_v37  ;;  %v2770_v37 = vld [vmem:[%s3032_s2 + $0xa0] sm:$0xff] }
 0x404   :  { %2149 = vpow2.f32 %v2000_v39 }
 0x405   :  { %2151 = vpow2.f32 %v2001_v0  ;;  %v2833_v0 = vld [vmem:[%s3035_s3 + $0x4] ss:$0 sm:$0xff] }
 0x406   :  { %v857_v53 = vpop.f32.mrf.mxu2 }
 0x407   :  { %v858_v58 = vadd.f32 %v2439_v46, %v857_v53 }
 0x40a   :  { %v2150_v13 = vpop.eup %2149 }
 0x40b   :  { %v2152_v4 = vpop.eup %2151  ;;  %v804_v16 = vadd.f32 1.0, %v2150_v13 }
 0x40c   :  { %v2651_v21 = vadd.f32 1.0, %v2152_v4 }
 0x40d   :  { %2153 = vrcp.f32 %v804_v16  ;;  %v816_v48 = vand.u32 2147483648, %v804_v16  ;;  %v814_v52 = vand.u32 2147483647, %v804_v16  ;;  %vm810_vm12 = vweird.f32 %v804_v16 }
 0x40e   :  { %2155 = vrcp.f32 %v2651_v21  ;;  %v836_v5 = vand.u32 2147483648, %v2651_v21  ;;  %vm830_vm1 = vweird.f32 %v2651_v21  ;;  %v834_v6 = vand.u32 2147483647, %v2651_v21 }
 0x40f   :  { %v817_v56 = vor.u32 1.1754944e-38, %v816_v48  ;;  %vm815_vm14 = vcmp.eq.f32.partialorder %v814_v52, 8.507059e+37 }
 0x410   :  { %v837_v8 = vor.u32 1.1754944e-38, %v836_v5  ;;  %vm835_vm3 = vcmp.eq.f32.partialorder %v834_v6, 8.507059e+37  ;;  %v2241_v5 = vld [vmem:[%s3035_s3 + $0x3] ss:$0 sm:$0xff] }
 0x413   :  { %v2154_v40 = vpop.eup %2153 }
 0x414   :  { %v2156_v41 = vpop.eup %2155  ;;  %v806_v42 = vmul.f32 %v2154_v40, %v804_v16  ;;  %vm811_vm11 = vweird.f32 %v2154_v40  ;;  %v1064_v16 = vpop.f32.mrf.mxu2 }
 0x415   :  { %v826_v47 = vmul.f32 %v2156_v41, %v2651_v21  ;;  %vm812_vm13 = vmor %vm810_vm12, %vm811_vm11  ;;  %vm831_vm15 = vweird.f32 %v2156_v41 }
 0x416   :  { %v807_v45 = vsub.f32 1.0, %v806_v42  ;;  %vm832_vm2 = vmor %vm830_vm1, %vm831_vm15 }
 0x417   :  { %v827_v55 = vsub.f32 1.0, %v826_v47 }
 0x418   :  { %v808_v49 = vmul.f32 %v2154_v40, %v807_v45 }
 0x419   :  { %v828_v2 = vmul.f32 %v2156_v41, %v827_v55 }
 0x41a   :  { %v809_v54 = vadd.f32 %v2154_v40, %v808_v49 }
 0x41b   :  { %v829_v3 = vadd.f32 %v2156_v41, %v828_v2 }
 0x41c   :  { %v813_v57 = vsel %vm812_vm13, %v2154_v40, %v809_v54 }
 0x41d   :  { %v818_v60 = vsel %vm815_vm14, %v817_v56, %v813_v57  ;;  %v833_v51 = vsel %vm832_vm2, %v2156_v41, %v829_v3 }
 0x41e   :  { %v860_v62 = vmul.f32 %v858_v58, %v818_v60  ;;  %v838_v18 = vsel %vm835_vm3, %v837_v8, %v833_v51  ;;  %v2862_v8 = vld [vmem:[%s3035_s3 + $0x7] ss:$0 sm:$0xff] }
 0x420   :  { %v861_v46 = vadd.f32 %v860_v62, %v199_v61 }
 0x422   :  { %2157 = vtanh.f32 %v861_v46 }
 0x428   :  { %v2158_v27 = vpop.eup %2157 }
 0x429   :  { %v863_v22 = vsub.f32 %v2617_v10, %v2158_v27  ;;  %v2761_v10 = vld [vmem:[%s3032_s2 + $0xa8] sm:$0xff] }
 0x42a   :  { %1591 = vmatpush.msra.mxu2 %v2761_v10 }
 0x42b   :  { %v864_v35 = vmul.f32 %v863_v22, %v838_v18 }
 0x42c   :  { %1592 = vmatpush.msra.mxu2 %v2770_v37 }
 0x42d   :  { %v2746_v36 = vadd.f32 %v2158_v27, %v864_v35 }
 0x42f   :  { %866 = vst.msk [vmem:[#allocation2 + $0x28] sm:$0xff] %vm62_vm0, %v2746_v36  ;;  %2003 = vmatmul.msk.f32.vlgmr.msrb.gmra.mxu3 %vm62_vm0, %v2746_v36  ;;  %2004 = vmatmul.msk.f32.vlgmr.msra.gmra.mxu0 %vm62_vm0, %v2746_v36 }
 0x430   :  { %2007 = vmatmul.msk.f32.vlgmr.msra.gmra.mxu1 %vm62_vm0, %v2746_v36  ;;  %1480 = vmatpush.msrb.mxu3 %v2736_v9 }
 0x431   :  { %1199 = vmatpush.msra.mxu1 %v2706_v28  ;;  %1509 = vmatpush.msra.mxu0 %v2657_v26 }
 0x432   :  { %1481 = vmatpush.msrb.mxu3 %v2743_v32 }
 0x433   :  { %1200 = vmatpush.msra.mxu1 %v2712_v34  ;;  %1510 = vmatpush.msra.mxu0 %v2669_v44 }
 0x434   :  { %1482 = vmatpush.msrb.mxu3 %v2761_v10 }
 0x435   :  { %1201 = vmatpush.msra.mxu1 %v2719_v59  ;;  %1511 = vmatpush.msra.mxu0 %v2680_v25 }
 0x436   :  { %v983_v39 = vld [vmem:[#allocation2 + $0x28] sm:$0xff]  ;;  %1483 = vmatpush.msrb.mxu3 %v2770_v37 }
 0x437   :  { %2041 = vmatmul.msk.f32.gmra.mxu2 %vm62_vm0, %v983_v39  ;;  %2043 = vmatmul.msk.f32.vlgmr.msra.gmra.mxu3 %vm62_vm0, %v2627_v11 }
 0x438   :  { %2050 = vmatmul.msk.f32.vlgmr.msrb.gmra.mxu0 %vm62_vm0, %v2627_v11  ;;  %1183 = vmatmul.f32.vlgmr.msrb.gmra.mxu1 %v2243_v15 }
 0x439   :  { %1202 = vmatpush.msra.mxu1 %v2727_v63  ;;  %1512 = vmatpush.msra.mxu0 %v2692_v7 }
 0x43a   :  { %1618 = vmatpush.msra.mxu3 %v2657_v26 }
 0x43b   :  { %1262 = vmatpush.msrb.mxu1 %v2736_v9  ;;  %1638 = vmatpush.msrb.mxu0 %v2706_v28 }
 0x43c   :  { %1619 = vmatpush.msra.mxu3 %v2669_v44 }
 0x43d   :  { %1263 = vmatpush.msrb.mxu1 %v2743_v32  ;;  %1639 = vmatpush.msrb.mxu0 %v2712_v34 }
 0x43e   :  { %1620 = vmatpush.msra.mxu3 %v2680_v25 }
 0x43f   :  { %1264 = vmatpush.msrb.mxu1 %v2761_v10  ;;  %2044 = vmatmul.msk.f32.gmra.mxu3 %vm62_vm0, %v2631_v12 }
 0x440   :  { %1640 = vmatpush.msrb.mxu0 %v2719_v59  ;;  %1203 = vmatmul.f32.vlgmr.msra.gmra.mxu1 %v2243_v15 }
 0x441   :  { %2051 = vmatmul.msk.f32.gmra.mxu0 %vm62_vm0, %v2631_v12  ;;  %1265 = vmatpush.msrb.mxu1 %v2770_v37 }
 0x442   :  { %1621 = vmatpush.msra.mxu3 %v2692_v7  ;;  %1641 = vmatpush.msrb.mxu0 %v2727_v63 }
 0x443   :  { %1291 = vmatpush.msra.mxu1 %v2657_v26 }
 0x445   :  { %1292 = vmatpush.msra.mxu1 %v2669_v44 }
 0x447   :  { %1293 = vmatpush.msra.mxu1 %v2680_v25  ;;  %2045 = vmatmul.msk.f32.gmra.mxu3 %vm62_vm0, %v2635_v14 }
 0x448   :  { %1266 = vmatmul.f32.vlgmr.msrb.gmra.mxu1 %v2243_v15  ;;  %v2239_v15 = vld [vmem:[%s3035_s3 + $0x1] ss:$0 sm:$0xff] }
 0x449   :  { %2052 = vmatmul.msk.f32.gmra.mxu0 %vm62_vm0, %v2635_v14  ;;  %1294 = vmatpush.msra.mxu1 %v2692_v7  ;;  %v161_v11 = vadd.f32 %v2239_v15, %v2543_v50  ;;  %v1065_v50 = vadd.f32 %v2833_v0, %v1064_v16 }
 0x44b   :  { %1311 = vmatpush.msrb.mxu1 %v2706_v28 }
 0x44d   :  { %1312 = vmatpush.msrb.mxu1 %v2712_v34 }
 0x44f   :  { %1313 = vmatpush.msrb.mxu1 %v2719_v59  ;;  %2046 = vmatmul.msk.f32.gmra.mxu3 %vm62_vm0, %v2639_v17 }
 0x451   :  { %2053 = vmatmul.msk.f32.gmra.mxu0 %vm62_vm0, %v2639_v17  ;;  %1314 = vmatpush.msrb.mxu1 %v2727_v63 }
 0x457   :  { %2047 = vmatmul.msk.f32.gmra.mxu3 %vm62_vm0, %v2643_v19 }
 0x459   :  { %2054 = vmatmul.msk.f32.gmra.mxu0 %vm62_vm0, %v2643_v19  ;;  %v2240_v19 = vld [vmem:[%s3035_s3] ss:$0 sm:$0xff] }
 0x45a   :  { %v120_v4 = vadd.f32 %v2240_v19, %v2533_v33 }
 0x45f   :  { %2048 = vmatmul.msk.f32.gmra.mxu3 %vm62_vm0, %v983_v39 }
 0x461   :  { %2055 = vmatmul.msk.f32.gmra.mxu0 %vm62_vm0, %v983_v39 }
 0x4ac   :  { %v907_v12 = vpop.f32.mrf.mxu0 }
 0x4ad   :  { %v930_v14 = vadd.f32 %v907_v12, %v161_v11  ;;  %v967_v17 = vpop.f32.mrf.mxu1 }
 0x4ae   :  { %v968_v6 = vadd.f32 %v2241_v5, %v967_v17 }
 0x4af   :  { %v2006_v13 = vmul.f32 -1.442695, %v930_v14  ;;  %v2242_v14 = vld [vmem:[%s3035_s3 + $0x2] ss:$0 sm:$0xff] }
 0x4b0   :  { %v202_v17 = vadd.f32 %v2242_v14, %v2574_v1 }
 0x4b1   :  { %2159 = vpow2.f32 %v2006_v13 }
 0x4b2   :  { %v887_v21 = vpop.f32.mrf.mxu3 }
 0x4b3   :  { %v910_v31 = vadd.f32 %v887_v21, %v120_v4  ;;  %v2871_v4 = vld [vmem:[%s3035_s3 + $0x6] ss:$0 sm:$0xff] }
 0x4b5   :  { %v2005_v30 = vmul.f32 -1.442695, %v910_v31  ;;  %v1184_v23 = vpop.f32.mrf.mxu1 }
 0x4b6   :  { %v1207_v24 = vadd.f32 %v1184_v23, %v1065_v50 }
 0x4b7   :  { %2161 = vpow2.f32 %v2005_v30  ;;  %v2160_v38 = vpop.eup %2159  ;;  %v1146_v30 = vpop.f32.mrf.mxu0 }
 0x4b8   :  { %v2057_v40 = vmul.f32 -1.442695, %v1207_v24  ;;  %v2846_v43 = vadd.f32 1.0, %v2160_v38 }
 0x4ba   :  { %v1105_v41 = vpop.f32.mrf.mxu3  ;;  %2163 = vpow2.f32 %v2057_v40  ;;  %vm940_vm13 = vweird.f32 %v2846_v43 }
 0x4bb   :  { %v1106_v33 = vadd.f32 %v2843_v29, %v1105_v41  ;;  %v1147_v41 = vadd.f32 %v2871_v4, %v1146_v30 }
 0x4bd   :  { %v2162_v42 = vpop.eup %2161  ;;  %v1204_v20 = vpop.f32.mrf.mxu1 }
 0x4be   :  { %v914_v45 = vadd.f32 1.0, %v2162_v42  ;;  %v1227_v47 = vadd.f32 %v1204_v20, %v1106_v33 }
 0x4c0   :  { %2165 = vrcp.f32 %v914_v45  ;;  %v2164_v48 = vpop.eup %2163  ;;  %v2058_v49 = vmul.f32 -1.442695, %v1227_v47  ;;  %v924_v61 = vand.u32 2147483647, %v914_v45  ;;  %v926_v62 = vand.u32 2147483648, %v914_v45 }
 0x4c1   :  { %2167 = vrcp.f32 %v2846_v43  ;;  %v1211_v52 = vadd.f32 1.0, %v2164_v48  ;;  %vm920_vm5 = vweird.f32 %v914_v45 }
 0x4c2   :  { %2169 = vpow2.f32 %v2058_v49  ;;  %vm925_vm7 = vcmp.eq.f32.partialorder %v924_v61, 8.507059e+37  ;;  %v927_v18 = vor.u32 1.1754944e-38, %v926_v62  ;;  %v944_v49 = vand.u32 2147483647, %v2846_v43 }
 0x4c3   :  { %2171 = vrcp.f32 %v1211_v52  ;;  %v1223_v35 = vand.u32 2147483648, %v1211_v52  ;;  %v1221_v12 = vand.u32 2147483647, %v1211_v52  ;;  %vm1217_vm9 = vweird.f32 %v1211_v52 }
 0x4c4   :  { %vm945_vm1 = vcmp.eq.f32.partialorder %v944_v49, 8.507059e+37 }
 0x4c5   :  { %v1267_v39 = vpop.f32.mrf.mxu1  ;;  %v1224_v23 = vor.u32 1.1754944e-38, %v1223_v35  ;;  %vm1222_vm11 = vcmp.eq.f32.partialorder %v1221_v12, 8.507059e+37 }
 0x4c6   :  { %v2166_v53 = vpop.eup %2165  ;;  %v1268_v21 = vadd.f32 %v2862_v8, %v1267_v39 }
 0x4c7   :  { %v2849_v54 = vpop.eup %2167  ;;  %v916_v55 = vmul.f32 %v2166_v53, %v914_v45  ;;  %vm921_vm4 = vweird.f32 %v2166_v53  ;;  %v946_v45 = vand.u32 2147483648, %v2846_v43 }
 0x4c8   :  { %v2170_v56 = vpop.eup %2169  ;;  %v936_v60 = vmul.f32 %v2849_v54, %v2846_v43  ;;  %vm922_vm6 = vmor %vm920_vm5, %vm921_vm4  ;;  %vm941_vm12 = vweird.f32 %v2849_v54 }
 0x4c9   :  { %v917_v57 = vsub.f32 1.0, %v916_v55  ;;  %v2172_v58 = vpop.eup %2171  ;;  %v2853_v2 = vadd.f32 1.0, %v2170_v56  ;;  %vm942_vm14 = vmor %vm940_vm13, %vm941_vm12  ;;  %v947_v56 = vor.u32 1.1754944e-38, %v946_v45 }
 0x4ca   :  { %v1213_v3 = vmul.f32 %v2172_v58, %v1211_v52  ;;  %v937_v22 = vsub.f32 1.0, %v936_v60  ;;  %vm1218_vm8 = vweird.f32 %v2172_v58 }
 0x4cb   :  { %v918_v46 = vmul.f32 %v2166_v53, %v917_v57  ;;  %2173 = vrcp.f32 %v2853_v2  ;;  %vm1219_vm10 = vmor %vm1217_vm9, %vm1218_vm8  ;;  %v1243_v57 = vand.u32 2147483648, %v2853_v2  ;;  %vm1237_vm2 = vweird.f32 %v2853_v2 }
 0x4cc   :  { %v1214_v27 = vsub.f32 1.0, %v1213_v3  ;;  %v938_v50 = vmul.f32 %v2849_v54, %v937_v22  ;;  %v1241_v60 = vand.u32 2147483647, %v2853_v2 }
 0x4cd   :  { %v919_v51 = vadd.f32 %v2166_v53, %v918_v46  ;;  %v1244_v3 = vor.u32 1.1754944e-38, %v1243_v57 }
 0x4ce   :  { %v1215_v11 = vmul.f32 %v2172_v58, %v1214_v27  ;;  %v939_v20 = vadd.f32 %v2849_v54, %v938_v50  ;;  %vm1242_vm4 = vcmp.eq.f32.partialorder %v1241_v60, 8.507059e+37  ;;  %v1067_v27 = vpop.f32.mrf.mxu2 }
 0x4cf   :  { %v923_v15 = vsel %vm922_vm6, %v2166_v53, %v919_v51  ;;  %v1068_v22 = vadd.f32 %v2833_v0, %v1067_v27 }
 0x4d0   :  { %v928_v13 = vsel %vm925_vm7, %v927_v18, %v923_v15  ;;  %v1216_v16 = vadd.f32 %v2172_v58, %v1215_v11  ;;  %v943_v52 = vsel %vm942_vm14, %v2849_v54, %v939_v20  ;;  %v1108_v15 = vpop.f32.mrf.mxu3 }
 0x4d1   :  { %v970_v19 = vmul.f32 %v968_v6, %v928_v13  ;;  %v2174_v31 = vpop.eup %2173  ;;  %v948_v61 = vsel %vm945_vm1, %v947_v56, %v943_v52  ;;  %v1109_v11 = vadd.f32 %v2843_v29, %v1108_v15 }
 0x4d2   :  { %v1233_v1 = vmul.f32 %v2174_v31, %v2853_v2  ;;  %v1220_v40 = vsel %vm1219_vm10, %v2172_v58, %v1216_v16  ;;  %vm1238_vm15 = vweird.f32 %v2174_v31 }
 0x4d3   :  { %v971_v24 = vadd.f32 %v970_v19, %v202_v17  ;;  %v1225_v38 = vsel %vm1222_vm11, %v1224_v23, %v1220_v40  ;;  %vm1239_vm3 = vmor %vm1237_vm2, %vm1238_vm15 }
 0x4d4   :  { %v1234_v33 = vsub.f32 1.0, %v1233_v1  ;;  %v1270_v42 = vmul.f32 %v1268_v21, %v1225_v38 }
 0x4d5   :  { %2175 = vtanh.f32 %v971_v24 }
 0x4d6   :  { %v1235_v47 = vmul.f32 %v2174_v31, %v1234_v33  ;;  %v1271_v48 = vadd.f32 %v1270_v42, %v1147_v41  ;;  %v1149_v33 = vpop.f32.mrf.mxu0 }
 0x4d7   :  { %v1150_v49 = vadd.f32 %v2871_v4, %v1149_v33 }
 0x4d8   :  { %2177 = vtanh.f32 %v1271_v48  ;;  %v1236_v53 = vadd.f32 %v2174_v31, %v1235_v47 }
 0x4da   :  { %v1240_v62 = vsel %vm1239_vm3, %v2174_v31, %v1236_v53 }
 0x4db   :  { %v2176_v55 = vpop.eup %2175  ;;  %v1245_v6 = vsel %vm1242_vm4, %v1244_v3, %v1240_v62 }
 0x4dc   :  { %v973_v58 = vsub.f32 %v2746_v36, %v2176_v55 }
 0x4de   :  { %v974_v43 = vmul.f32 %v973_v58, %v948_v61  ;;  %v2178_v46 = vpop.eup %2177 }
 0x4df   :  { %v1273_v5 = vsub.f32 0.0, %v2178_v46 }
 0x4e0   :  { %v975_v54 = vadd.f32 %v2176_v55, %v974_v43 }
 0x4e1   :  { %v1274_v51 = vmul.f32 %v1273_v5, %v1245_v6  ;;  %v1070_v6 = vpop.f32.mrf.mxu2 }
 0x4e2   :  { %976 = vst.msk [vmem:[#allocation2 + $0x30] sm:$0xff] %vm62_vm0, %v975_v54 }
 0x4e3   :  { %977 = vst.msk [vmem:[%s3036_s4] sm:$0xff] %vm62_vm0, %v975_v54  ;;  %v2892_v36 = vadd.f32 %v2178_v46, %v1274_v51 }
 0x4e5   :  { %2059 = vmatmul.msk.f32.vlgmr.msra.gmra.mxu1 %vm62_vm0, %v2892_v36 }
 0x4e6   :  { %1371 = vmatpush.msra.mxu1 %v2736_v9 }
 0x4e8   :  { %1372 = vmatpush.msra.mxu1 %v2743_v32 }
 0x4e9   :  { %v984_v2 = vld [vmem:[#allocation2 + $0x30] sm:$0xff]  ;;  %v2940_v51 = vpop.f32.mrf.mxu2 }
 0x4ea   :  { %2042 = vmatmul.msk.f32.gmra.mxu2 %vm62_vm0, %v984_v2  ;;  %2049 = vmatmul.msk.f32.gmra.mxu3 %vm62_vm0, %v984_v2 }
 0x4eb   :  { %2056 = vmatmul.msk.f32.gmra.mxu0 %vm62_vm0, %v984_v2  ;;  %1373 = vmatpush.msra.mxu1 %v2761_v10 }
 0x4ed   :  { %1374 = vmatpush.msra.mxu1 %v2770_v37 }
 0x4ee   :  { %2060 = vmatmul.msk.f32.vlgmr.msrb.gmra.mxu1 %vm62_vm0, %v2892_v36 }
 0x4ef   :  { %1400 = vmatpush.msrb.mxu1 %v2657_v26 }
 0x4f1   :  { %1401 = vmatpush.msrb.mxu1 %v2669_v44  ;;  %v2942_v2 = vpop.f32.mrf.mxu2 }
 0x4f3   :  { %1402 = vmatpush.msrb.mxu1 %v2680_v25 }
 0x4f5   :  { %1403 = vmatpush.msrb.mxu1 %v2692_v7 }
 0x4f6   :  { %2063 = vmatmul.msk.f32.vlgmr.msra.gmra.mxu1 %vm62_vm0, %v2892_v36 }
 0x4f7   :  { %1529 = vmatpush.msra.mxu1 %v2706_v28 }
 0x4f9   :  { %1530 = vmatpush.msra.mxu1 %v2712_v34  ;;  %v2944_v27 = vpop.f32.mrf.mxu2 }
 0x4fb   :  { %1531 = vmatpush.msra.mxu1 %v2719_v59 }
 0x4fd   :  { %1532 = vmatpush.msra.mxu1 %v2727_v63 }
 0x562   :  { %v1296_v18 = vpop.f32.mrf.mxu1 }
 0x563   :  { %v1319_v35 = vadd.f32 %v1296_v18, %v1068_v22 }
 0x565   :  { %v2061_v39 = vmul.f32 -1.442695, %v1319_v35  ;;  %v1071_v35 = vadd.f32 %v2833_v0, %v1070_v6 }
 0x567   :  { %2179 = vpow2.f32 %v2061_v39 }
 0x56b   :  { %v1316_v12 = vpop.f32.mrf.mxu1 }
 0x56c   :  { %v1339_v14 = vadd.f32 %v1316_v12, %v1109_v11 }
 0x56d   :  { %v2180_v17 = vpop.eup %2179  ;;  %v2948_v18 = vpop.f32.mrf.mxu2 }
 0x56e   :  { %v2062_v13 = vmul.f32 -1.442695, %v1339_v14  ;;  %v1323_v19 = vadd.f32 1.0, %v2180_v17 }
 0x570   :  { %2181 = vpow2.f32 %v2062_v13  ;;  %v1335_v23 = vand.u32 2147483648, %v1323_v19  ;;  %v1333_v1 = vand.u32 2147483647, %v1323_v19  ;;  %vm1329_vm6 = vweird.f32 %v1323_v19 }
 0x571   :  { %2183 = vrcp.f32 %v1323_v19 }
 0x572   :  { %v1336_v42 = vor.u32 1.1754944e-38, %v1335_v23  ;;  %vm1334_vm8 = vcmp.eq.f32.partialorder %v1333_v1, 8.507059e+37 }
 0x573   :  { %v1376_v40 = vpop.f32.mrf.mxu1 }
 0x574   :  { %v1377_v47 = vadd.f32 %v2862_v8, %v1376_v40 }
 0x576   :  { %v2182_v16 = vpop.eup %2181 }
 0x577   :  { %v2184_v21 = vpop.eup %2183  ;;  %v1343_v31 = vadd.f32 1.0, %v2182_v16 }
 0x578   :  { %v1325_v50 = vmul.f32 %v2184_v21, %v1323_v19  ;;  %vm1330_vm5 = vweird.f32 %v2184_v21 }
 0x579   :  { %2185 = vrcp.f32 %v1343_v31  ;;  %vm1331_vm7 = vmor %vm1329_vm6, %vm1330_vm5  ;;  %v1355_v58 = vand.u32 2147483648, %v1343_v31  ;;  %vm1349_vm10 = vweird.f32 %v1343_v31  ;;  %v1353_v60 = vand.u32 2147483647, %v1343_v31 }
 0x57a   :  { %v1326_v30 = vsub.f32 1.0, %v1325_v50 }
 0x57b   :  { %v1356_v62 = vor.u32 1.1754944e-38, %v1355_v58  ;;  %vm1354_vm12 = vcmp.eq.f32.partialorder %v1353_v60, 8.507059e+37 }
 0x57c   :  { %v1327_v24 = vmul.f32 %v2184_v21, %v1326_v30 }
 0x57e   :  { %v1328_v38 = vadd.f32 %v2184_v21, %v1327_v24 }
 0x57f   :  { %v2186_v41 = vpop.eup %2185 }
 0x580   :  { %v1345_v20 = vmul.f32 %v2186_v41, %v1343_v31  ;;  %v1332_v45 = vsel %vm1331_vm7, %v2184_v21, %v1328_v38  ;;  %vm1350_vm9 = vweird.f32 %v2186_v41 }
 0x581   :  { %v1337_v48 = vsel %vm1334_vm8, %v1336_v42, %v1332_v45  ;;  %vm1351_vm11 = vmor %vm1349_vm10, %vm1350_vm9 }
 0x582   :  { %v1346_v52 = vsub.f32 1.0, %v1345_v20  ;;  %v1379_v53 = vmul.f32 %v1377_v47, %v1337_v48  ;;  %v1152_v48 = vpop.f32.mrf.mxu0 }
 0x584   :  { %v1347_v55 = vmul.f32 %v2186_v41, %v1346_v52  ;;  %v1380_v56 = vadd.f32 %v1379_v53, %v1150_v49 }
 0x586   :  { %2187 = vtanh.f32 %v1380_v56  ;;  %v1348_v57 = vadd.f32 %v2186_v41, %v1347_v55 }
 0x588   :  { %v1352_v61 = vsel %vm1351_vm11, %v2186_v41, %v1348_v57  ;;  %v1153_v57 = vadd.f32 %v2871_v4, %v1152_v48 }
 0x589   :  { %v1357_v3 = vsel %vm1354_vm12, %v1356_v62, %v1352_v61 }
 0x58c   :  { %v2188_v43 = vpop.eup %2187 }
 0x58d   :  { %v1382_v46 = vsub.f32 %v2892_v36, %v2188_v43  ;;  %v1111_v36 = vpop.f32.mrf.mxu3 }
 0x58e   :  { %v1112_v14 = vadd.f32 %v2843_v29, %v1111_v36 }
 0x58f   :  { %v1383_v54 = vmul.f32 %v1382_v46, %v1357_v3 }
 0x591   :  { %v2920_v5 = vadd.f32 %v2188_v43, %v1383_v54 }
 0x593   :  { %2064 = vmatmul.msk.f32.vlgmr.msrb.gmra.mxu1 %vm62_vm0, %v2920_v5  ;;  %2065 = vmatmul.msk.f32.vlgmr.msrb.gmra.mxu2 %vm62_vm0, %v2920_v5 }
 0x594   :  { %2068 = vmatmul.msk.f32.vlgmr.msrb.gmra.mxu3 %vm62_vm0, %v2920_v5  ;;  %1698 = vmatpush.msrb.mxu1 %v2736_v9 }
 0x595   :  { %1727 = vmatpush.msrb.mxu2 %v2657_v26  ;;  %1747 = vmatpush.msrb.mxu3 %v2706_v28  ;;  %v2946_v22 = vpop.f32.mrf.mxu3 }
 0x596   :  { %1699 = vmatpush.msrb.mxu1 %v2743_v32 }
 0x597   :  { %1728 = vmatpush.msrb.mxu2 %v2669_v44  ;;  %1748 = vmatpush.msrb.mxu3 %v2712_v34 }
 0x598   :  { %1700 = vmatpush.msrb.mxu1 %v2761_v10 }
 0x599   :  { %1729 = vmatpush.msrb.mxu2 %v2680_v25  ;;  %1749 = vmatpush.msrb.mxu3 %v2719_v59 }
 0x59a   :  { %1701 = vmatpush.msrb.mxu1 %v2770_v37 }
 0x59b   :  { %1730 = vmatpush.msrb.mxu2 %v2692_v7  ;;  %1750 = vmatpush.msrb.mxu3 %v2727_v63 }
 0x59d   :  { %v2951_v39 = vpop.f32.mrf.mxu3 }
 0x5a5   :  { %v2954_v16 = vpop.f32.mrf.mxu3 }
 0x5ad   :  { %v2956_v30 = vpop.f32.mrf.mxu3 }
 0x610   :  { %v1405_v15 = vpop.f32.mrf.mxu1 }
 0x611   :  { %v1428_v11 = vadd.f32 %v1405_v15, %v1071_v35 }
 0x613   :  { %v2066_v12 = vmul.f32 -1.442695, %v1428_v11 }
 0x615   :  { %2189 = vpow2.f32 %v2066_v12 }
 0x616   :  { %v1425_v17 = vpop.f32.mrf.mxu2 }
 0x617   :  { %v1448_v13 = vadd.f32 %v1425_v17, %v1112_v14  ;;  %v1485_v20 = vpop.f32.mrf.mxu3 }
 0x618   :  { %v1486_v55 = vadd.f32 %v2862_v8, %v1485_v20 }
 0x619   :  { %v2067_v19 = vmul.f32 -1.442695, %v1448_v13 }
 0x61b   :  { %v2190_v21 = vpop.eup %2189  ;;  %2191 = vpow2.f32 %v2067_v19 }
 0x61c   :  { %v1432_v31 = vadd.f32 1.0, %v2190_v21 }
 0x61e   :  { %2193 = vrcp.f32 %v1432_v31  ;;  %v1444_v38 = vand.u32 2147483648, %v1432_v31  ;;  %v1442_v33 = vand.u32 2147483647, %v1432_v31  ;;  %vm1438_vm14 = vweird.f32 %v1432_v31 }
 0x620   :  { %v1445_v49 = vor.u32 1.1754944e-38, %v1444_v38  ;;  %vm1443_vm1 = vcmp.eq.f32.partialorder %v1442_v33, 8.507059e+37 }
 0x621   :  { %v2192_v50 = vpop.eup %2191 }
 0x622   :  { %v1452_v23 = vadd.f32 1.0, %v2192_v50 }
 0x624   :  { %v2194_v24 = vpop.eup %2193  ;;  %2195 = vrcp.f32 %v1452_v23  ;;  %v1464_v62 = vand.u32 2147483648, %v1452_v23  ;;  %vm1458_vm3 = vweird.f32 %v1452_v23  ;;  %v1462_v46 = vand.u32 2147483647, %v1452_v23 }
 0x625   :  { %v1434_v1 = vmul.f32 %v2194_v24, %v1432_v31  ;;  %vm1439_vm13 = vweird.f32 %v2194_v24 }
 0x626   :  { %vm1440_vm15 = vmor %vm1438_vm14, %vm1439_vm13  ;;  %v1465_v6 = vor.u32 1.1754944e-38, %v1464_v62  ;;  %vm1463_vm5 = vcmp.eq.f32.partialorder %v1462_v46, 8.507059e+37 }
 0x627   :  { %v1435_v40 = vsub.f32 1.0, %v1434_v1 }
 0x629   :  { %v1436_v41 = vmul.f32 %v2194_v24, %v1435_v40 }
 0x62a   :  { %v2196_v42 = vpop.eup %2195 }
 0x62b   :  { %v1454_v45 = vmul.f32 %v2196_v42, %v1452_v23  ;;  %v1437_v47 = vadd.f32 %v2194_v24, %v1436_v41  ;;  %vm1459_vm2 = vweird.f32 %v2196_v42 }
 0x62c   :  { %vm1460_vm4 = vmor %vm1458_vm3, %vm1459_vm2 }
 0x62d   :  { %v1455_v52 = vsub.f32 1.0, %v1454_v45  ;;  %v1441_v53 = vsel %vm1440_vm15, %v2194_v24, %v1437_v47 }
 0x62e   :  { %v1446_v56 = vsel %vm1443_vm1, %v1445_v49, %v1441_v53 }
 0x62f   :  { %v1488_v58 = vmul.f32 %v1486_v55, %v1446_v56  ;;  %v1456_v60 = vmul.f32 %v2196_v42, %v1455_v52 }
 0x631   :  { %v1489_v61 = vadd.f32 %v1488_v58, %v1153_v57  ;;  %v1457_v43 = vadd.f32 %v2196_v42, %v1456_v60 }
 0x633   :  { %2197 = vtanh.f32 %v1489_v61  ;;  %v1461_v3 = vsel %vm1460_vm4, %v2196_v42, %v1457_v43 }
 0x634   :  { %v1466_v35 = vsel %vm1463_vm5, %v1465_v6, %v1461_v3  ;;  %v1118_v6 = vadd.f32 %v2843_v29, %v2951_v39 }
 0x639   :  { %v2198_v54 = vpop.eup %2197 }
 0x63a   :  { %v1491_v36 = vsub.f32 %v2920_v5, %v2198_v54 }
 0x63c   :  { %v1492_v15 = vmul.f32 %v1491_v36, %v1466_v35 }
 0x63e   :  { %v2961_v11 = vadd.f32 %v2198_v54, %v1492_v15 }
 0x640   :  { %2069 = vmatmul.msk.f32.vlgmr.msra.gmra.mxu0 %vm62_vm0, %v2961_v11  ;;  %2070 = vmatmul.msk.f32.vlgmr.msra.gmra.mxu1 %vm62_vm0, %v2961_v11 }
 0x641   :  { %2073 = vmatmul.msk.f32.vlgmr.msra.gmra.mxu2 %vm62_vm0, %v2961_v11  ;;  %1807 = vmatpush.msra.mxu0 %v2736_v9 }
 0x642   :  { %1836 = vmatpush.msra.mxu1 %v2657_v26  ;;  %1856 = vmatpush.msra.mxu2 %v2706_v28  ;;  %v1155_v26 = vpop.f32.mrf.mxu0 }
 0x643   :  { %1808 = vmatpush.msra.mxu0 %v2743_v32  ;;  %v1156_v49 = vadd.f32 %v2871_v4, %v1155_v26 }
 0x644   :  { %1837 = vmatpush.msra.mxu1 %v2669_v44  ;;  %1857 = vmatpush.msra.mxu2 %v2712_v34  ;;  %v1074_v34 = vadd.f32 %v2833_v0, %v2940_v51 }
 0x645   :  { %1809 = vmatpush.msra.mxu0 %v2761_v10 }
 0x646   :  { %1838 = vmatpush.msra.mxu1 %v2680_v25  ;;  %1858 = vmatpush.msra.mxu2 %v2719_v59  ;;  %v1115_v25 = vadd.f32 %v2843_v29, %v2946_v22 }
 0x647   :  { %1810 = vmatpush.msra.mxu0 %v2770_v37 }
 0x648   :  { %1839 = vmatpush.msra.mxu1 %v2692_v7  ;;  %1859 = vmatpush.msra.mxu2 %v2727_v63 }
 0x64a   :  { %v2981_v28 = vpop.f32.mrf.mxu0 }
 0x652   :  { %v2983_v5 = vpop.f32.mrf.mxu0 }
 0x65a   :  { %v2985_v44 = vpop.f32.mrf.mxu0 }
 0x6bd   :  { %v1514_v59 = vpop.f32.mrf.mxu0  ;;  %v1534_v12 = vpop.f32.mrf.mxu1 }
 0x6be   :  { %v1537_v14 = vadd.f32 %v1514_v59, %v1074_v34  ;;  %v1557_v17 = vadd.f32 %v1534_v12, %v1115_v25 }
 0x6c0   :  { %v2071_v7 = vmul.f32 -1.442695, %v1537_v14  ;;  %v2072_v13 = vmul.f32 -1.442695, %v1557_v17 }
 0x6c2   :  { %2199 = vpow2.f32 %v2071_v7 }
 0x6c3   :  { %2201 = vpow2.f32 %v2072_v13 }
 0x6c4   :  { %v1594_v41 = vpop.f32.mrf.mxu2 }
 0x6c5   :  { %v1595_v47 = vadd.f32 %v2862_v8, %v1594_v41 }
 0x6c8   :  { %v2200_v63 = vpop.eup %2199 }
 0x6c9   :  { %v2202_v19 = vpop.eup %2201  ;;  %v1541_v21 = vadd.f32 1.0, %v2200_v63 }
 0x6ca   :  { %v1561_v31 = vadd.f32 1.0, %v2202_v19 }
 0x6cb   :  { %2203 = vrcp.f32 %v1541_v21  ;;  %v1553_v22 = vand.u32 2147483648, %v1541_v21  ;;  %v1551_v38 = vand.u32 2147483647, %v1541_v21  ;;  %vm1547_vm7 = vweird.f32 %v1541_v21 }
 0x6cc   :  { %2205 = vrcp.f32 %v1561_v31  ;;  %v1573_v57 = vand.u32 2147483648, %v1561_v31  ;;  %vm1567_vm11 = vweird.f32 %v1561_v31  ;;  %v1571_v58 = vand.u32 2147483647, %v1561_v31 }
 0x6cd   :  { %v1554_v20 = vor.u32 1.1754944e-38, %v1553_v22  ;;  %vm1552_vm9 = vcmp.eq.f32.partialorder %v1551_v38, 8.507059e+37 }
 0x6ce   :  { %v1574_v43 = vor.u32 1.1754944e-38, %v1573_v57  ;;  %vm1572_vm13 = vcmp.eq.f32.partialorder %v1571_v58, 8.507059e+37 }
 0x6d1   :  { %v2204_v50 = vpop.eup %2203 }
 0x6d2   :  { %v2206_v23 = vpop.eup %2205  ;;  %v1543_v51 = vmul.f32 %v2204_v50, %v1541_v21  ;;  %vm1548_vm6 = vweird.f32 %v2204_v50 }
 0x6d3   :  { %v1563_v1 = vmul.f32 %v2206_v23, %v1561_v31  ;;  %vm1549_vm8 = vmor %vm1547_vm7, %vm1548_vm6  ;;  %vm1568_vm10 = vweird.f32 %v2206_v23 }
 0x6d4   :  { %v1544_v24 = vsub.f32 1.0, %v1543_v51  ;;  %vm1569_vm12 = vmor %vm1567_vm11, %vm1568_vm10 }
 0x6d5   :  { %v1564_v42 = vsub.f32 1.0, %v1563_v1 }
 0x6d6   :  { %v1545_v40 = vmul.f32 %v2204_v50, %v1544_v24  ;;  %v1159_v24 = vadd.f32 %v2871_v4, %v2981_v28  ;;  %v1080_v28 = vadd.f32 %v2833_v0, %v2944_v27 }
 0x6d7   :  { %v1565_v53 = vmul.f32 %v2206_v23, %v1564_v42 }
 0x6d8   :  { %v1546_v33 = vadd.f32 %v2204_v50, %v1545_v40 }
 0x6d9   :  { %v1566_v56 = vadd.f32 %v2206_v23, %v1565_v53  ;;  %v1121_v53 = vadd.f32 %v2843_v29, %v2954_v16 }
 0x6da   :  { %v1550_v45 = vsel %vm1549_vm8, %v2204_v50, %v1546_v33 }
 0x6db   :  { %v1555_v48 = vsel %vm1552_vm9, %v1554_v20, %v1550_v45  ;;  %v1570_v60 = vsel %vm1569_vm12, %v2206_v23, %v1566_v56 }
 0x6dc   :  { %v1597_v52 = vmul.f32 %v1595_v47, %v1555_v48  ;;  %v1575_v46 = vsel %vm1572_vm13, %v1574_v43, %v1570_v60 }
 0x6de   :  { %v1598_v55 = vadd.f32 %v1597_v52, %v1156_v49 }
 0x6e0   :  { %2207 = vtanh.f32 %v1598_v55 }
 0x6e6   :  { %v2208_v61 = vpop.eup %2207 }
 0x6e7   :  { %v1600_v62 = vsub.f32 %v2961_v11, %v2208_v61  ;;  %v1077_v11 = vadd.f32 %v2833_v0, %v2942_v2 }
 0x6e9   :  { %v1601_v3 = vmul.f32 %v1600_v62, %v1575_v46 }
 0x6eb   :  { %v1602_v54 = vadd.f32 %v2208_v61, %v1601_v3 }
 0x6ed   :  { %2074 = vmatmul.msk.f32.vlgmr.msra.gmra.mxu3 %vm62_vm0, %v1602_v54  ;;  %2075 = vmatmul.msk.f32.vlgmr.msrb.gmra.mxu0 %vm62_vm0, %v1602_v54 }
 0x6ee   :  { %2078 = vmatmul.msk.f32.vlgmr.msrb.gmra.mxu1 %vm62_vm0, %v1602_v54  ;;  %1916 = vmatpush.msra.mxu3 %v2736_v9 }
 0x6f0   :  { %1917 = vmatpush.msra.mxu3 %v2743_v32 }
 0x6f2   :  { %1918 = vmatpush.msra.mxu3 %v2761_v10 }
 0x6f4   :  { %1919 = vmatpush.msra.mxu3 %v2770_v37 }
 0x76a   :  { %v1643_v36 = vpop.f32.mrf.mxu0 }
 0x76b   :  { %v1666_v35 = vadd.f32 %v1643_v36, %v1118_v6  ;;  %v1703_v63 = vpop.f32.mrf.mxu1 }
 0x76c   :  { %v1704_v50 = vadd.f32 %v2862_v8, %v1703_v63 }
 0x76d   :  { %v2077_v15 = vmul.f32 -1.442695, %v1666_v35 }
 0x76f   :  { %2209 = vpow2.f32 %v2077_v15 }
 0x770   :  { %v1623_v26 = vpop.f32.mrf.mxu3 }
 0x771   :  { %v1646_v34 = vadd.f32 %v1623_v26, %v1077_v11 }
 0x773   :  { %v2076_v25 = vmul.f32 -1.442695, %v1646_v34 }
 0x775   :  { %2211 = vpow2.f32 %v2076_v25  ;;  %v2210_v9 = vpop.eup %2209 }
 0x776   :  { %v1670_v59 = vadd.f32 1.0, %v2210_v9 }
 0x778   :  { %v1682_v41 = vand.u32 2147483648, %v1670_v59  ;;  %vm1676_vm4 = vweird.f32 %v1670_v59  ;;  %v1680_v33 = vand.u32 2147483647, %v1670_v59 }
 0x77a   :  { %v1683_v45 = vor.u32 1.1754944e-38, %v1682_v41  ;;  %vm1681_vm6 = vcmp.eq.f32.partialorder %v1680_v33, 8.507059e+37 }
 0x77b   :  { %v2212_v32 = vpop.eup %2211 }
 0x77c   :  { %v1650_v10 = vadd.f32 1.0, %v2212_v32 }
 0x77e   :  { %2213 = vrcp.f32 %v1650_v10  ;;  %v1662_v7 = vand.u32 2147483648, %v1650_v10  ;;  %v1660_v2 = vand.u32 2147483647, %v1650_v10  ;;  %vm1656_vm15 = vweird.f32 %v1650_v10 }
 0x77f   :  { %2215 = vrcp.f32 %v1670_v59 }
 0x780   :  { %v1663_v31 = vor.u32 1.1754944e-38, %v1662_v7  ;;  %vm1661_vm2 = vcmp.eq.f32.partialorder %v1660_v2, 8.507059e+37 }
 0x784   :  { %v2214_v37 = vpop.eup %2213 }
 0x785   :  { %v2216_v12 = vpop.eup %2215  ;;  %v1652_v39 = vmul.f32 %v2214_v37, %v1650_v10  ;;  %vm1657_vm14 = vweird.f32 %v2214_v37 }
 0x786   :  { %v1672_v17 = vmul.f32 %v2216_v12, %v1670_v59  ;;  %vm1658_vm1 = vmor %vm1656_vm15, %vm1657_vm14  ;;  %vm1677_vm3 = vweird.f32 %v2216_v12 }
 0x787   :  { %v1653_v14 = vsub.f32 1.0, %v1652_v39  ;;  %vm1678_vm5 = vmor %vm1676_vm4, %vm1677_vm3 }
 0x788   :  { %v1673_v21 = vsub.f32 1.0, %v1672_v17 }
 0x789   :  { %v1654_v13 = vmul.f32 %v2214_v37, %v1653_v14 }
 0x78a   :  { %v1674_v22 = vmul.f32 %v2216_v12, %v1673_v21 }
 0x78b   :  { %v1655_v19 = vadd.f32 %v2214_v37, %v1654_v13 }
 0x78c   :  { %v1675_v38 = vadd.f32 %v2216_v12, %v1674_v22  ;;  %v1124_v22 = vadd.f32 %v2843_v29, %v2956_v30 }
 0x78d   :  { %v1659_v23 = vsel %vm1658_vm1, %v2214_v37, %v1655_v19  ;;  %v1162_v37 = vadd.f32 %v2871_v4, %v2983_v5  ;;  %v1083_v5 = vadd.f32 %v2833_v0, %v2948_v18 }
 0x78e   :  { %v1664_v51 = vsel %vm1661_vm2, %v1663_v31, %v1659_v23  ;;  %v1679_v42 = vsel %vm1678_vm5, %v2216_v12, %v1675_v38 }
 0x78f   :  { %v1706_v1 = vmul.f32 %v1704_v50, %v1664_v51  ;;  %v1684_v48 = vsel %vm1681_vm6, %v1683_v45, %v1679_v42 }
 0x791   :  { %v1707_v40 = vadd.f32 %v1706_v1, %v1159_v24 }
 0x793   :  { %2217 = vtanh.f32 %v1707_v40 }
 0x799   :  { %v2218_v20 = vpop.eup %2217 }
 0x79a   :  { %v1709_v47 = vsub.f32 %v1602_v54, %v2218_v20 }
 0x79c   :  { %v1710_v49 = vmul.f32 %v1709_v47, %v1684_v48 }
 0x79e   :  { %v1711_v52 = vadd.f32 %v2218_v20, %v1710_v49 }
 0x7a0   :  { %2079 = vmatmul.msk.f32.vlgmr.msrb.gmra.mxu2 %vm62_vm0, %v1711_v52  ;;  %2080 = vmatmul.msk.f32.vlgmr.msrb.gmra.mxu3 %vm62_vm0, %v1711_v52 }
 0x7a1   :  { %2083 = vmatmul.msk.f32.vlgmr.msra.gmra.mxu0 %vm62_vm0, %v1711_v52 }
 0x81e   :  { %v1812_v26 = vpop.f32.mrf.mxu0 }
 0x81f   :  { %v1813_v32 = vadd.f32 %v2862_v8, %v1812_v26 }
 0x823   :  { %v1732_v55 = vpop.f32.mrf.mxu2  ;;  %v1752_v56 = vpop.f32.mrf.mxu3 }
 0x824   :  { %v1755_v57 = vadd.f32 %v1732_v55, %v1080_v28  ;;  %v1775_v58 = vadd.f32 %v1752_v56, %v1121_v53 }
 0x826   :  { %v2081_v60 = vmul.f32 -1.442695, %v1755_v57  ;;  %v2082_v61 = vmul.f32 -1.442695, %v1775_v58 }
 0x828   :  { %2219 = vpow2.f32 %v2081_v60 }
 0x829   :  { %2221 = vpow2.f32 %v2082_v61  ;;  %v1165_v61 = vadd.f32 %v2871_v4, %v2985_v44 }
 0x82e   :  { %v2220_v43 = vpop.eup %2219 }
 0x82f   :  { %v2222_v62 = vpop.eup %2221  ;;  %v1759_v46 = vadd.f32 1.0, %v2220_v43 }
 0x830   :  { %v1779_v3 = vadd.f32 1.0, %v2222_v62 }
 0x831   :  { %2223 = vrcp.f32 %v1759_v46  ;;  %v1771_v35 = vand.u32 2147483648, %v1759_v46  ;;  %v1769_v11 = vand.u32 2147483647, %v1759_v46  ;;  %vm1765_vm8 = vweird.f32 %v1759_v46 }
 0x832   :  { %2225 = vrcp.f32 %v1779_v3  ;;  %v1791_v7 = vand.u32 2147483648, %v1779_v3  ;;  %vm1785_vm12 = vweird.f32 %v1779_v3  ;;  %v1789_v13 = vand.u32 2147483647, %v1779_v3 }
 0x833   :  { %v1772_v25 = vor.u32 1.1754944e-38, %v1771_v35  ;;  %vm1770_vm10 = vcmp.eq.f32.partialorder %v1769_v11, 8.507059e+37 }
 0x834   :  { %v1792_v19 = vor.u32 1.1754944e-38, %v1791_v7  ;;  %vm1790_vm14 = vcmp.eq.f32.partialorder %v1789_v13, 8.507059e+37 }
 0x837   :  { %v2224_v54 = vpop.eup %2223 }
 0x838   :  { %v2226_v6 = vpop.eup %2225  ;;  %v1761_v27 = vmul.f32 %v2224_v54, %v1759_v46  ;;  %vm1766_vm7 = vweird.f32 %v2224_v54 }
 0x839   :  { %v1781_v16 = vmul.f32 %v2226_v6, %v1779_v3  ;;  %vm1767_vm9 = vmor %vm1765_vm8, %vm1766_vm7  ;;  %vm1786_vm11 = vweird.f32 %v2226_v6 }
 0x83a   :  { %v1762_v36 = vsub.f32 1.0, %v1761_v27  ;;  %vm1787_vm13 = vmor %vm1785_vm12, %vm1786_vm11 }
 0x83b   :  { %v1782_v9 = vsub.f32 1.0, %v1781_v16 }
 0x83c   :  { %v1763_v15 = vmul.f32 %v2224_v54, %v1762_v36 }
 0x83d   :  { %v1783_v39 = vmul.f32 %v2226_v6, %v1782_v9 }
 0x83e   :  { %v1764_v34 = vadd.f32 %v2224_v54, %v1763_v15 }
 0x83f   :  { %v1784_v17 = vadd.f32 %v2226_v6, %v1783_v39 }
 0x840   :  { %v1768_v59 = vsel %vm1767_vm9, %v2224_v54, %v1764_v34 }
 0x841   :  { %v1773_v10 = vsel %vm1770_vm10, %v1772_v25, %v1768_v59  ;;  %v1788_v2 = vsel %vm1787_vm13, %v2226_v6, %v1784_v17 }
 0x842   :  { %v1815_v12 = vmul.f32 %v1813_v32, %v1773_v10  ;;  %v1793_v31 = vsel %vm1790_vm14, %v1792_v19, %v1788_v2 }
 0x844   :  { %v1816_v14 = vadd.f32 %v1815_v12, %v1162_v37 }
 0x846   :  { %2227 = vtanh.f32 %v1816_v14 }
 0x84c   :  { %v2228_v63 = vpop.eup %2227 }
 0x84d   :  { %v1818_v21 = vsub.f32 %v1711_v52, %v2228_v63 }
 0x84f   :  { %v1819_v50 = vmul.f32 %v1818_v21, %v1793_v31 }
 0x851   :  { %v1820_v23 = vadd.f32 %v2228_v63, %v1819_v50 }
 0x853   :  { %2084 = vmatmul.msk.f32.vlgmr.msra.gmra.mxu1 %vm62_vm0, %v1820_v23  ;;  %2085 = vmatmul.msk.f32.vlgmr.msra.gmra.mxu2 %vm62_vm0, %v1820_v23 }
 0x854   :  { %2088 = vmatmul.msk.f32.vlgmr.msra.gmra.mxu3 %vm62_vm0, %v1820_v23 }
 0x8d0   :  { %v1841_v51 = vpop.f32.mrf.mxu1 }
 0x8d1   :  { %v1864_v24 = vadd.f32 %v1841_v51, %v1083_v5 }
 0x8d3   :  { %v2086_v1 = vmul.f32 -1.442695, %v1864_v24 }
 0x8d5   :  { %2229 = vpow2.f32 %v2086_v1 }
 0x8d6   :  { %v1861_v40 = vpop.f32.mrf.mxu2 }
 0x8d7   :  { %v1884_v38 = vadd.f32 %v1861_v40, %v1124_v22  ;;  %v1921_v29 = vpop.f32.mrf.mxu3 }
 0x8d8   :  { %v1922_v58 = vadd.f32 %v2862_v8, %v1921_v29 }
 0x8d9   :  { %v2087_v41 = vmul.f32 -1.442695, %v1884_v38 }
 0x8db   :  { %v2230_v33 = vpop.eup %2229  ;;  %2231 = vpow2.f32 %v2087_v41 }
 0x8dc   :  { %v1868_v42 = vadd.f32 1.0, %v2230_v33 }
 0x8de   :  { %2233 = vrcp.f32 %v1868_v42  ;;  %v1880_v18 = vand.u32 2147483648, %v1868_v42  ;;  %v1878_v52 = vand.u32 2147483647, %v1868_v42  ;;  %vm1874_vm1 = vweird.f32 %v1868_v42 }
 0x8e0   :  { %v1881_v55 = vor.u32 1.1754944e-38, %v1880_v18  ;;  %vm1879_vm3 = vcmp.eq.f32.partialorder %v1878_v52, 8.507059e+37 }
 0x8e1   :  { %v2232_v20 = vpop.eup %2231 }
 0x8e2   :  { %v1888_v45 = vadd.f32 1.0, %v2232_v20 }
 0x8e4   :  { %v2234_v47 = vpop.eup %2233  ;;  %2235 = vrcp.f32 %v1888_v45  ;;  %v1900_v54 = vand.u32 2147483648, %v1888_v45  ;;  %vm1894_vm5 = vweird.f32 %v1888_v45  ;;  %v1898_v6 = vand.u32 2147483647, %v1888_v45 }
 0x8e5   :  { %v1870_v48 = vmul.f32 %v2234_v47, %v1868_v42  ;;  %vm1875_vm15 = vweird.f32 %v2234_v47 }
 0x8e6   :  { %vm1876_vm2 = vmor %vm1874_vm1, %vm1875_vm15  ;;  %v1901_v35 = vor.u32 1.1754944e-38, %v1900_v54  ;;  %vm1899_vm7 = vcmp.eq.f32.partialorder %v1898_v6, 8.507059e+37 }
 0x8e7   :  { %v1871_v0 = vsub.f32 1.0, %v1870_v48 }
 0x8e9   :  { %v1872_v49 = vmul.f32 %v2234_v47, %v1871_v0 }
 0x8ea   :  { %v2236_v28 = vpop.eup %2235 }
 0x8eb   :  { %v1890_v30 = vmul.f32 %v2236_v28, %v1888_v45  ;;  %v1873_v53 = vadd.f32 %v2234_v47, %v1872_v49  ;;  %vm1895_vm4 = vweird.f32 %v2236_v28 }
 0x8ec   :  { %vm1896_vm6 = vmor %vm1894_vm5, %vm1895_vm4 }
 0x8ed   :  { %v1891_v56 = vsub.f32 1.0, %v1890_v30  ;;  %v1877_v57 = vsel %vm1876_vm2, %v2234_v47, %v1873_v53 }
 0x8ee   :  { %v1882_v60 = vsel %vm1879_vm3, %v1881_v55, %v1877_v57 }
 0x8ef   :  { %v1924_v43 = vmul.f32 %v1922_v58, %v1882_v60  ;;  %v1892_v62 = vmul.f32 %v2236_v28, %v1891_v56 }
 0x8f1   :  { %v1925_v46 = vadd.f32 %v1924_v43, %v1165_v61  ;;  %v1893_v3 = vadd.f32 %v2236_v28, %v1892_v62 }
 0x8f3   :  { %2237 = vtanh.f32 %v1925_v46  ;;  %v1897_v27 = vsel %vm1896_vm6, %v2236_v28, %v1893_v3 }
 0x8f4   :  { %v1902_v8 = vsel %vm1899_vm7, %v1901_v35, %v1897_v27 }
 0x8f9   :  { %v2238_v36 = vpop.eup %2237 }
 0x8fa   :  { %v1927_v16 = vsub.f32 %v1820_v23, %v2238_v36 }
 0x8fc   :  { %v1928_v15 = vmul.f32 %v1927_v16, %v1902_v8 }
 0x8fe   :  { %v1929_v11 = vadd.f32 %v2238_v36, %v1928_v15 }
 0x900   :  { %2089 = vst.msk [vmem:[%s3036_s4 + $0x8] sm:$0xff] %vm62_vm0, %v1929_v11 }

</bundles_post_ra>
